<compile_context>
chip_gen: v7x
topology: tpu7x:2x2x1
jax: 0.10.0
libtpu: 0.0.40
codegen_flags: <defaults>
</compile_context>

<pallas_src>
import jax
import jax.numpy as jnp
from jax import lax
from jax.experimental import pallas as pl
from jax.experimental.pallas import tpu as pltpu


_GROUP = 8  # sublane count of one f32 vreg: gather/add/store 8 rows at a time


# --------------------------------------------------------------------------- #
# Kernel 1: embedding table resident in VMEM (small/medium vocab)
# --------------------------------------------------------------------------- #
def _embedding_kernel_vmem(ids_ref, table_ref, pos_ref, out_ref):
    """One (seq-tile j, batch bi) grid step.

    ids_ref:   (B, S)       int32, SMEM (scalar prefetch) -- full id matrix.
    table_ref: (V, D)       f32,   VMEM -- whole table, resident across all steps.
    pos_ref:   (tile_s, D)  f32,   VMEM -- positional rows for this sequence tile.
    out_ref:   (tile_s, D)  VMEM  -- output tile (leading batch dim squeezed).
    """
    j = pl.program_id(0)
    bi = pl.program_id(1)
    tile_s = out_ref.shape[0]
    col0 = j * tile_s
    n_groups = tile_s // _GROUP
    rem = tile_s - n_groups * _GROUP

    def gather_group(base):
        # base: element offset of this 8-row group inside the tile (multiple of 8).
        rows = [table_ref[pl.ds(ids_ref[bi, col0 + base + r], 1), :]
                for r in range(_GROUP)]
        block = jnp.concatenate(rows, axis=0)                      # (8, D)
        off = base if isinstance(base, int) else pl.multiple_of(base, _GROUP)
        out_ref[pl.ds(off, _GROUP), :] = (
            block + pos_ref[pl.ds(off, _GROUP), :]).astype(out_ref.dtype)

    if n_groups > 0:
        if n_groups <= 64:
            # Static unroll: full-width adds + unmasked, aligned 8-row stores,
            # visible to the LLO scheduler for co-issue.
            for g in range(n_groups):
                gather_group(g * _GROUP)
        else:
            def body(g, carry):
                gather_group(g * _GROUP)
                return carry
            lax.fori_loop(0, n_groups, body, 0)

    # Remainder rows (< 8): only taken when tile_s == full seq extent and the
    # sequence length is not a multiple of 8 (e.g. the docstring's seq_len=3).
    for r in range(rem):
        row = n_groups * _GROUP + r
        tok = ids_ref[bi, col0 + row]
        out_ref[pl.ds(row, 1), :] = (
            table_ref[pl.ds(tok, 1), :] + pos_ref[pl.ds(row, 1), :]
        ).astype(out_ref.dtype)

    # TODO(synk): training-mode dropout (pltpu.prng_seed + prng_random_bits + mask/scale);
    # nn.Dropout in eval mode is the identity, which is what this forward implements.


# --------------------------------------------------------------------------- #
# Kernel 2: embedding table resident in HBM (large vocab / v7x 64 MiB VMEM)
# --------------------------------------------------------------------------- #
def _embedding_kernel_hbm(ids_ref, table_hbm, pos_ref, out_ref, stage, sems):
    """Same tiling, but the table stays in HBM and rows are DMA-gathered into a
    double-buffered (2, 8, D) staging buffer; the next group's DMAs are issued
    while the current group is added/stored."""
    j = pl.program_id(0)
    bi = pl.program_id(1)
    tile_s = out_ref.shape[0]
    col0 = j * tile_s
    n_groups = tile_s // _GROUP
    rem = tile_s - n_groups * _GROUP

    def issue_group(g, slot):
        base = col0 + g * _GROUP
        cps = []
        for r in range(_GROUP):
            tok = ids_ref[bi, base + r]
            cp = pltpu.make_async_copy(
                table_hbm.at[pl.ds(tok, 1), :],
                stage.at[slot, pl.ds(r, 1), :],
                sems.at[slot, r],
            )
            cp.start()
            cps.append(cp)
        return cps

    pending = [None, None]
    if n_groups > 0:
        pending[0] = issue_group(0, 0)

    for g in range(n_groups):
        slot = g & 1
        if g + 1 < n_groups:
            pending[1 - slot] = issue_group(g + 1, 1 - slot)   # prefetch next group
        for cp in pending[slot]:
            cp.wait()
        base = g * _GROUP
        out_ref[pl.ds(base, _GROUP), :] = (
            stage[slot] + pos_ref[pl.ds(base, _GROUP), :]).astype(out_ref.dtype)

    if rem > 0:
        base = n_groups * _GROUP
        cps = []
        for r in range(rem):
            tok = ids_ref[bi, col0 + base + r]
            cp = pltpu.make_async_copy(
                table_hbm.at[pl.ds(tok, 1), :],
                stage.at[0, pl.ds(r, 1), :],
                sems.at[0, r],
            )
            cp.start()
            cps.append(cp)
        for cp in cps:
            cp.wait()
        out_ref[pl.ds(base, rem), :] = (
            stage[0, pl.ds(0, rem), :] + pos_ref[pl.ds(base, rem), :]
        ).astype(out_ref.dtype)

    # TODO(synk): training-mode dropout (same as the VMEM-path kernel).


# --------------------------------------------------------------------------- #
# Wrapper
# --------------------------------------------------------------------------- #
def _pick_seq_tile(s):
    for t in (512, 256, 128, 64, 32, 16, 8):
        if s % t == 0:
            return t
    # Full-extent block (always legal even if not a multiple of 8); the kernels'
    # remainder path handles the last (s % 8) rows.
    return s


def _vmem_capacity_bytes():
    """Per-TensorCore VMEM capacity (v5e/v6e: 128 MiB, v7x: 64 MiB)."""
    try:
        info = pltpu.get_tpu_info()
        for attr in ("vmem_capacity_bytes", "vmem_size_bytes"):
            cap = getattr(info, attr, None)
            if cap:
                return int(cap)
    except Exception:
        pass
    return 64 << 20  # conservative default = smallest current generation (v7x)


def transformer_embedding(ids, embed_table, pos_encoding, *, tile_s=None,
                          out_dtype=jnp.float32, force_hbm_table=False):
    """
    ids:          (B, S) integer token ids
    embed_table:  (V, D) float, pad_idx row already zeroed
    pos_encoding: (max_length, D) float sinusoidal table, max_length >= S
    returns:      (B, S, D) out_dtype  (eval-mode dropout == identity)
    """
    b, s = ids.shape
    v, d = embed_table.shape
    assert pos_encoding.shape[0] >= s and pos_encoding.shape[1] == d

    if tile_s is None:
        tile_s = _pick_seq_tile(s)
    assert s % tile_s == 0, "tile_s must divide seq_len"
    assert tile_s == s or tile_s % _GROUP == 0, "partial tiles must be multiples of 8"

    # OOB guard hoisted out of the kernel: one clip on the tiny (B, S) id matrix
    # instead of 2 scalar-slot ops per row inside the kernel.
    # NOTE: PyTorch nn.Embedding would raise on out-of-range ids; here they clamp.
    ids = jnp.clip(ids.astype(jnp.int32), 0, v - 1)
    table = embed_table.astype(jnp.float32)
    pos_s = pos_encoding[:s].astype(jnp.float32)      # (S, D): no (B,S,D) broadcast slab

    vmem_cap = _vmem_capacity_bytes()
    table_bytes = 4 * v * d
    tile_bytes = 4 * tile_s * d
    headroom = 4 << 20
    # Conservative resident-path need: table possibly double-buffered (if
    # pl.Buffered(1) is unavailable) + double-buffered pos and out tiles.
    resident_need = 2 * table_bytes + 4 * tile_bytes + headroom
    use_hbm = force_hbm_table or resident_need > vmem_cap

    grid = (s // tile_s, b)                            # seq tile outer, batch inner
    out_shape = jax.ShapeDtypeStruct((b, s, d), out_dtype)
    pos_spec = pl.BlockSpec((tile_s, d), lambda j, bi, ids_sref: (j, 0))
    out_spec = pl.BlockSpec((None, tile_s, d), lambda j, bi, ids_sref: (bi, j, 0))
    dim_sem = ("parallel", "parallel")                 # v7x: 2 TCs split the grid

    if use_hbm:
        vmem_limit = int(min(vmem_cap, max(4 * tile_bytes + (8 << 20), 32 << 20)))
        return pl.pallas_call(
            _embedding_kernel_hbm,
            out_shape=out_shape,
            grid_spec=pltpu.PrefetchScalarGridSpec(
                num_scalar_prefetch=1,                 # ids -> SMEM, drive the gather
                grid=grid,
                in_specs=[
                    pl.BlockSpec(memory_space=pl.ANY),  # table stays in HBM
                    pos_spec,
                ],
                out_specs=out_spec,
                scratch_shapes=[
                    pltpu.VMEM((2, _GROUP, d), jnp.float32),   # double-buffered stage
                    pltpu.SemaphoreType.DMA((2, _GROUP)),
                ],
            ),
            compiler_params=pltpu.CompilerParams(
                dimension_semantics=dim_sem, vmem_limit_bytes=vmem_limit),
        )(ids, table, pos_s)

    # VMEM-resident table path.
    vmem_limit = int(min(vmem_cap,
                         max(2 * table_bytes + 4 * tile_bytes + headroom, 32 << 20)))

    def call(single_buffer_table):
        kwargs = {}
        if single_buffer_table:
            # Constant block index -> fetched exactly once; single-buffer it so only
            # one (V, D) copy of the table sits in VMEM (matters most on v7x).
            kwargs["pipeline_mode"] = pl.Buffered(1)
        table_spec = pl.BlockSpec((v, d), lambda j, bi, ids_sref: (0, 0), **kwargs)
        return pl.pallas_call(
            _embedding_kernel_vmem,
            out_shape=out_shape,
            grid_spec=pltpu.PrefetchScalarGridSpec(
                num_scalar_prefetch=1,
                grid=grid,
                in_specs=[table_spec, pos_spec],
                out_specs=out_spec,
            ),
            compiler_params=pltpu.CompilerParams(
                dimension_semantics=dim_sem, vmem_limit_bytes=vmem_limit),
        )(ids, table, pos_s)

    if hasattr(pl, "Buffered"):
        try:
            return call(single_buffer_table=True)
        except Exception:
            pass  # Buffered(1)/pipeline_mode unsupported in this jax: use default buffering
    return call(single_buffer_table=False)


def make_sinusoidal_encoding(max_length, d_model):
    pos = jnp.arange(max_length, dtype=jnp.float32)[:, None]           # (L, 1)
    two_i = jnp.arange(0, d_model, 2, dtype=jnp.float32)[None, :]      # (1, D/2)
    angle = pos / jnp.power(10000.0, two_i / d_model)                  # (L, D/2)
    pe = jnp.zeros((max_length, d_model), dtype=jnp.float32)
    pe = pe.at[:, 0::2].set(jnp.sin(angle))
    pe = pe.at[:, 1::2].set(jnp.cos(angle))
    return pe


if __name__ == "__main__":
    # Small, deterministic config consistent with the module's forward.
    vocab_size = 1000
    d_model = 128            # lane-dense output (multiple of 128)
    max_length = 512
    pad_idx = 0
    batch, seq_len = 2, 384
    dropout_p = 0.1          # eval mode -> identity

    key = jax.random.PRNGKey(0)
    k_emb, k_ids = jax.random.split(key)

    # nn.Embedding(vocab_size, d_model, padding_idx=pad_idx): N(0,1) init, pad row zeroed.
    embed_table = jax.random.normal(k_emb, (vocab_size, d_model), dtype=jnp.float32)
    embed_table = embed_table.at[pad_idx].set(0.0)

    pos_encoding = make_sinusoidal_encoding(max_length, d_model)

    ids = jax.random.randint(k_ids, (batch, seq_len), 0, vocab_size, dtype=jnp.int32)

    # Reference in plain JAX (eval-mode dropout == identity, no sqrt(d_model) scale).
    ref_full = embed_table[ids] + pos_encoding[:seq_len][None, :, :]

    # 1) VMEM-resident table path: default tile_s=128 -> grid (3, 2), grouped
    #    8-row gathers with full-vreg adds and aligned stores.
    out = jax.block_until_ready(transformer_embedding(ids, embed_table, pos_encoding))
    assert out.shape == (batch, seq_len, d_model)
    assert jnp.allclose(out, ref_full, atol=1e-5), "VMEM-path mismatch vs reference"

    # 2) HBM-resident table path (large-vocab / v7x fallback), forced here on a
    #    small slice: grid (2, 2), double-buffered per-row DMA gather.
    s2 = 64
    out2 = jax.block_until_ready(
        transformer_embedding(ids[:, :s2], embed_table, pos_encoding,
                              tile_s=32, force_hbm_table=True))
    assert jnp.allclose(out2, ref_full[:, :s2], atol=1e-5), "HBM-path mismatch vs reference"

    # 3) Ragged / docstring-style shape (B, 3): full-extent seq block + remainder rows.
    out3 = jax.block_until_ready(
        transformer_embedding(ids[:, :3], embed_table, pos_encoding))
    assert jnp.allclose(out3, ref_full[:, :3], atol=1e-5), "remainder-path mismatch"

    print("KERNEL_OK")
</pallas_src>

<mosaic_0001>
module attributes {stable_mosaic.version = 11 : i64} {
  func.func @_embedding_kernel_vmem(%arg0: i32, %arg1: i32, %arg2: memref<2x384xi32, #tpu.memory_space<smem>>, %arg3: memref<1000x128xf32, #tpu.memory_space<vmem>>, %arg4: memref<128x128xf32, #tpu.memory_space<vmem>>, %arg5: memref<1x128x128xf32, #tpu.memory_space<vmem>>) attributes {dimension_semantics = [#tpu.dimension_semantics<parallel>, #tpu.dimension_semantics<parallel>], iteration_bounds = array<i64: 3, 2>, scalar_prefetch = 1 : i64, scratch_operands = 0 : i64, tpu.core_type = #tpu.core_type<tc>, window_params = [{pipeline_mode = #tpu.pipeline_mode<synchronous>, transform_indices = @transform_0, window_bounds = array<i64: 1000, 128>}, {transform_indices = @transform_1, window_bounds = array<i64: 128, 128>}, {transform_indices = @transform_2, window_bounds = array<i64: 1, 128, 128>}]} {
    %c128_i32 = arith.constant 128 : i32
    %0 = arith.muli %arg0, %c128_i32 : i32
    %c0_i32 = arith.constant 0 : i32
    %1 = arith.addi %0, %c0_i32 : i32
    %c0_i32_0 = arith.constant 0 : i32
    %2 = arith.addi %1, %c0_i32_0 : i32
    %3 = arith.index_cast %arg1 : i32 to index
    %4 = arith.index_cast %2 : i32 to index
    %5 = memref.load %arg2[%3, %4] : memref<2x384xi32, #tpu.memory_space<smem>>
    %6 = arith.index_cast %5 : i32 to index
    %c0 = arith.constant 0 : index
    %7 = vector.load %arg3[%6, %c0] : memref<1000x128xf32, #tpu.memory_space<vmem>>, vector<1x128xf32>
    %c0_i32_1 = arith.constant 0 : i32
    %8 = arith.addi %0, %c0_i32_1 : i32
    %c1_i32 = arith.constant 1 : i32
    %9 = arith.addi %8, %c1_i32 : i32
    %10 = arith.index_cast %arg1 : i32 to index
    %11 = arith.index_cast %9 : i32 to index
    %12 = memref.load %arg2[%10, %11] : memref<2x384xi32, #tpu.memory_space<smem>>
    %13 = arith.index_cast %12 : i32 to index
    %c0_2 = arith.constant 0 : index
    %14 = vector.load %arg3[%13, %c0_2] : memref<1000x128xf32, #tpu.memory_space<vmem>>, vector<1x128xf32>
    %c0_i32_3 = arith.constant 0 : i32
    %15 = arith.addi %0, %c0_i32_3 : i32
    %c2_i32 = arith.constant 2 : i32
    %16 = arith.addi %15, %c2_i32 : i32
    %17 = arith.index_cast %arg1 : i32 to index
    %18 = arith.index_cast %16 : i32 to index
    %19 = memref.load %arg2[%17, %18] : memref<2x384xi32, #tpu.memory_space<smem>>
    %20 = arith.index_cast %19 : i32 to index
    %c0_4 = arith.constant 0 : index
    %21 = vector.load %arg3[%20, %c0_4] : memref<1000x128xf32, #tpu.memory_space<vmem>>, vector<1x128xf32>
    %c0_i32_5 = arith.constant 0 : i32
    %22 = arith.addi %0, %c0_i32_5 : i32
    %c3_i32 = arith.constant 3 : i32
    %23 = arith.addi %22, %c3_i32 : i32
    %24 = arith.index_cast %arg1 : i32 to index
    %25 = arith.index_cast %23 : i32 to index
    %26 = memref.load %arg2[%24, %25] : memref<2x384xi32, #tpu.memory_space<smem>>
    %27 = arith.index_cast %26 : i32 to index
    %c0_6 = arith.constant 0 : index
    %28 = vector.load %arg3[%27, %c0_6] : memref<1000x128xf32, #tpu.memory_space<vmem>>, vector<1x128xf32>
    %c0_i32_7 = arith.constant 0 : i32
    %29 = arith.addi %0, %c0_i32_7 : i32
    %c4_i32 = arith.constant 4 : i32
    %30 = arith.addi %29, %c4_i32 : i32
    %31 = arith.index_cast %arg1 : i32 to index
    %32 = arith.index_cast %30 : i32 to index
    %33 = memref.load %arg2[%31, %32] : memref<2x384xi32, #tpu.memory_space<smem>>
    %34 = arith.index_cast %33 : i32 to index
    %c0_8 = arith.constant 0 : index
    %35 = vector.load %arg3[%34, %c0_8] : memref<1000x128xf32, #tpu.memory_space<vmem>>, vector<1x128xf32>
    %c0_i32_9 = arith.constant 0 : i32
    %36 = arith.addi %0, %c0_i32_9 : i32
    %c5_i32 = arith.constant 5 : i32
    %37 = arith.addi %36, %c5_i32 : i32
    %38 = arith.index_cast %arg1 : i32 to index
    %39 = arith.index_cast %37 : i32 to index
    %40 = memref.load %arg2[%38, %39] : memref<2x384xi32, #tpu.memory_space<smem>>
    %41 = arith.index_cast %40 : i32 to index
    %c0_10 = arith.constant 0 : index
    %42 = vector.load %arg3[%41, %c0_10] : memref<1000x128xf32, #tpu.memory_space<vmem>>, vector<1x128xf32>
    %c0_i32_11 = arith.constant 0 : i32
    %43 = arith.addi %0, %c0_i32_11 : i32
    %c6_i32 = arith.constant 6 : i32
    %44 = arith.addi %43, %c6_i32 : i32
    %45 = arith.index_cast %arg1 : i32 to index
    %46 = arith.index_cast %44 : i32 to index
    %47 = memref.load %arg2[%45, %46] : memref<2x384xi32, #tpu.memory_space<smem>>
    %48 = arith.index_cast %47 : i32 to index
    %c0_12 = arith.constant 0 : index
    %49 = vector.load %arg3[%48, %c0_12] : memref<1000x128xf32, #tpu.memory_space<vmem>>, vector<1x128xf32>
    %c0_i32_13 = arith.constant 0 : i32
    %50 = arith.addi %0, %c0_i32_13 : i32
    %c7_i32 = arith.constant 7 : i32
    %51 = arith.addi %50, %c7_i32 : i32
    %52 = arith.index_cast %arg1 : i32 to index
    %53 = arith.index_cast %51 : i32 to index
    %54 = memref.load %arg2[%52, %53] : memref<2x384xi32, #tpu.memory_space<smem>>
    %55 = arith.index_cast %54 : i32 to index
    %c0_14 = arith.constant 0 : index
    %56 = vector.load %arg3[%55, %c0_14] : memref<1000x128xf32, #tpu.memory_space<vmem>>, vector<1x128xf32>
    %57 = tpu.concatenate %7, %14, %21, %28, %35, %42, %49, %56 in 0 : vector<1x128xf32>, vector<1x128xf32>, vector<1x128xf32>, vector<1x128xf32>, vector<1x128xf32>, vector<1x128xf32>, vector<1x128xf32>, vector<1x128xf32> -> vector<8x128xf32>
    %c0_15 = arith.constant 0 : index
    %c0_16 = arith.constant 0 : index
    %58 = vector.load %arg4[%c0_15, %c0_16] : memref<128x128xf32, #tpu.memory_space<vmem>>, vector<8x128xf32>
    %59 = arith.addf %57, %58 : vector<8x128xf32>
    %c0_17 = arith.constant 0 : index
    %c0_18 = arith.constant 0 : index
    %c0_19 = arith.constant 0 : index
    %60 = vector.load %arg5[%c0_17, %c0_18, %c0_19] : memref<1x128x128xf32, #tpu.memory_space<vmem>>, vector<1x8x128xf32>
    %61 = vector.shape_cast %60 : vector<1x8x128xf32> to vector<8x128xf32>
    %62 = vector.shape_cast %59 : vector<8x128xf32> to vector<1x8x128xf32>
    tpu.vector_store %arg5[%c0_17, %c0_18, %c0_19], %62 {strides = array<i32>} : memref<1x128x128xf32, #tpu.memory_space<vmem>>, vector<1x8x128xf32>,
    %c8_i32 = arith.constant 8 : i32
    %63 = arith.addi %0, %c8_i32 : i32
    %c0_i32_20 = arith.constant 0 : i32
    %64 = arith.addi %63, %c0_i32_20 : i32
    %65 = arith.index_cast %arg1 : i32 to index
    %66 = arith.index_cast %64 : i32 to index
    %67 = memref.load %arg2[%65, %66] : memref<2x384xi32, #tpu.memory_space<smem>>
    %68 = arith.index_cast %67 : i32 to index
    %c0_21 = arith.constant 0 : index
    %69 = vector.load %arg3[%68, %c0_21] : memref<1000x128xf32, #tpu.memory_space<vmem>>, vector<1x128xf32>
    %c8_i32_22 = arith.constant 8 : i32
    %70 = arith.addi %0, %c8_i32_22 : i32
    %c1_i32_23 = arith.constant 1 : i32
    %71 = arith.addi %70, %c1_i32_23 : i32
    %72 = arith.index_cast %arg1 : i32 to index
    %73 = arith.index_cast %71 : i32 to index
    %74 = memref.load %arg2[%72, %73] : memref<2x384xi32, #tpu.memory_space<smem>>
    %75 = arith.index_cast %74 : i32 to index
    %c0_24 = arith.constant 0 : index
    %76 = vector.load %arg3[%75, %c0_24] : memref<1000x128xf32, #tpu.memory_space<vmem>>, vector<1x128xf32>
    %c8_i32_25 = arith.constant 8 : i32
    %77 = arith.addi %0, %c8_i32_25 : i32
    %c2_i32_26 = arith.constant 2 : i32
    %78 = arith.addi %77, %c2_i32_26 : i32
    %79 = arith.index_cast %arg1 : i32 to index
    %80 = arith.index_cast %78 : i32 to index
    %81 = memref.load %arg2[%79, %80] : memref<2x384xi32, #tpu.memory_space<smem>>
    %82 = arith.index_cast %81 : i32 to index
    %c0_27 = arith.constant 0 : index
    %83 = vector.load %arg3[%82, %c0_27] : memref<1000x128xf32, #tpu.memory_space<vmem>>, vector<1x128xf32>
    %c8_i32_28 = arith.constant 8 : i32
    %84 = arith.addi %0, %c8_i32_28 : i32
    %c3_i32_29 = arith.constant 3 : i32
    %85 = arith.addi %84, %c3_i32_29 : i32
    %86 = arith.index_cast %arg1 : i32 to index
    %87 = arith.index_cast %85 : i32 to index
    %88 = memref.load %arg2[%86, %87] : memref<2x384xi32, #tpu.memory_space<smem>>
    %89 = arith.index_cast %88 : i32 to index
    %c0_30 = arith.constant 0 : index
    %90 = vector.load %arg3[%89, %c0_30] : memref<1000x128xf32, #tpu.memory_space<vmem>>, vector<1x128xf32>
    %c8_i32_31 = arith.constant 8 : i32
    %91 = arith.addi %0, %c8_i32_31 : i32
    %c4_i32_32 = arith.constant 4 : i32
    %92 = arith.addi %91, %c4_i32_32 : i32
    %93 = arith.index_cast %arg1 : i32 to index
    %94 = arith.index_cast %92 : i32 to index
    %95 = memref.load %arg2[%93, %94] : memref<2x384xi32, #tpu.memory_space<smem>>
    %96 = arith.index_cast %95 : i32 to index
    %c0_33 = arith.constant 0 : index
    %97 = vector.load %arg3[%96, %c0_33] : memref<1000x128xf32, #tpu.memory_space<vmem>>, vector<1x128xf32>
    %c8_i32_34 = arith.constant 8 : i32
    %98 = arith.addi %0, %c8_i32_34 : i32
    %c5_i32_35 = arith.constant 5 : i32
    %99 = arith.addi %98, %c5_i32_35 : i32
    %100 = arith.index_cast %arg1 : i32 to index
    %101 = arith.index_cast %99 : i32 to index
    %102 = memref.load %arg2[%100, %101] : memref<2x384xi32, #tpu.memory_space<smem>>
    %103 = arith.index_cast %102 : i32 to index
    %c0_36 = arith.constant 0 : index
    %104 = vector.load %arg3[%103, %c0_36] : memref<1000x128xf32, #tpu.memory_space<vmem>>, vector<1x128xf32>
    %c8_i32_37 = arith.constant 8 : i32
    %105 = arith.addi %0, %c8_i32_37 : i32
    %c6_i32_38 = arith.constant 6 : i32
    %106 = arith.addi %105, %c6_i32_38 : i32
    %107 = arith.index_cast %arg1 : i32 to index
    %108 = arith.index_cast %106 : i32 to index
    %109 = memref.load %arg2[%107, %108] : memref<2x384xi32, #tpu.memory_space<smem>>
    %110 = arith.index_cast %109 : i32 to index
    %c0_39 = arith.constant 0 : index
    %111 = vector.load %arg3[%110, %c0_39] : memref<1000x128xf32, #tpu.memory_space<vmem>>, vector<1x128xf32>
    %c8_i32_40 = arith.constant 8 : i32
    %112 = arith.addi %0, %c8_i32_40 : i32
    %c7_i32_41 = arith.constant 7 : i32
    %113 = arith.addi %112, %c7_i32_41 : i32
    %114 = arith.index_cast %arg1 : i32 to index
    %115 = arith.index_cast %113 : i32 to index
    %116 = memref.load %arg2[%114, %115] : memref<2x384xi32, #tpu.memory_space<smem>>
    %117 = arith.index_cast %116 : i32 to index
    %c0_42 = arith.constant 0 : index
    %118 = vector.load %arg3[%117, %c0_42] : memref<1000x128xf32, #tpu.memory_space<vmem>>, vector<1x128xf32>
    %119 = tpu.concatenate %69, %76, %83, %90, %97, %104, %111, %118 in 0 : vector<1x128xf32>, vector<1x128xf32>, vector<1x128xf32>, vector<1x128xf32>, vector<1x128xf32>, vector<1x128xf32>, vector<1x128xf32>, vector<1x128xf32> -> vector<8x128xf32>
    %c8 = arith.constant 8 : index
    %c0_43 = arith.constant 0 : index
    %120 = vector.load %arg4[%c8, %c0_43] : memref<128x128xf32, #tpu.memory_space<vmem>>, vector<8x128xf32>
    %121 = arith.addf %119, %120 : vector<8x128xf32>
    %c0_44 = arith.constant 0 : index
    %c8_45 = arith.constant 8 : index
    %c0_46 = arith.constant 0 : index
    %122 = vector.load %arg5[%c0_44, %c8_45, %c0_46] : memref<1x128x128xf32, #tpu.memory_space<vmem>>, vector<1x8x128xf32>
    %123 = vector.shape_cast %122 : vector<1x8x128xf32> to vector<8x128xf32>
    %124 = vector.shape_cast %121 : vector<8x128xf32> to vector<1x8x128xf32>
    tpu.vector_store %arg5[%c0_44, %c8_45, %c0_46], %124 {strides = array<i32>} : memref<1x128x128xf32, #tpu.memory_space<vmem>>, vector<1x8x128xf32>,
    %c16_i32 = arith.constant 16 : i32
    %125 = arith.addi %0, %c16_i32 : i32
    %c0_i32_47 = arith.constant 0 : i32
    %126 = arith.addi %125, %c0_i32_47 : i32
    %127 = arith.index_cast %arg1 : i32 to index
    %128 = arith.index_cast %126 : i32 to index
    %129 = memref.load %arg2[%127, %128] : memref<2x384xi32, #tpu.memory_space<smem>>
    %130 = arith.index_cast %129 : i32 to index
    %c0_48 = arith.constant 0 : index
    %131 = vector.load %arg3[%130, %c0_48] : memref<1000x128xf32, #tpu.memory_space<vmem>>, vector<1x128xf32>
    %c16_i32_49 = arith.constant 16 : i32
    %132 = arith.addi %0, %c16_i32_49 : i32
    %c1_i32_50 = arith.constant 1 : i32
    %133 = arith.addi %132, %c1_i32_50 : i32
    %134 = arith.index_cast %arg1 : i32 to index
    %135 = arith.index_cast %133 : i32 to index
    %136 = memref.load %arg2[%134, %135] : memref<2x384xi32, #tpu.memory_space<smem>>
    %137 = arith.index_cast %136 : i32 to index
    %c0_51 = arith.constant 0 : index
    %138 = vector.load %arg3[%137, %c0_51] : memref<1000x128xf32, #tpu.memory_space<vmem>>, vector<1x128xf32>
    %c16_i32_52 = arith.constant 16 : i32
    %139 = arith.addi %0, %c16_i32_52 : i32
    %c2_i32_53 = arith.constant 2 : i32
    %140 = arith.addi %139, %c2_i32_53 : i32
    %141 = arith.index_cast %arg1 : i32 to index
    %142 = arith.index_cast %140 : i32 to index
    %143 = memref.load %arg2[%141, %142] : memref<2x384xi32, #tpu.memory_space<smem>>
    %144 = arith.index_cast %143 : i32 to index
    %c0_54 = arith.constant 0 : index
    %145 = vector.load %arg3[%144, %c0_54] : memref<1000x128xf32, #tpu.memory_space<vmem>>, vector<1x128xf32>
    %c16_i32_55 = arith.constant 16 : i32
    %146 = arith.addi %0, %c16_i32_55 : i32
    %c3_i32_56 = arith.constant 3 : i32
    %147 = arith.addi %146, %c3_i32_56 : i32
    %148 = arith.index_cast %arg1 : i32 to index
    %149 = arith.index_cast %147 : i32 to index
    %150 = memref.load %arg2[%148, %149] : memref<2x384xi32, #tpu.memory_space<smem>>
    %151 = arith.index_cast %150 : i32 to index
    %c0_57 = arith.constant 0 : index
    %152 = vector.load %arg3[%151, %c0_57] : memref<1000x128xf32, #tpu.memory_space<vmem>>, vector<1x128xf32>
    %c16_i32_58 = arith.constant 16 : i32
    %153 = arith.addi %0, %c16_i32_58 : i32
    %c4_i32_59 = arith.constant 4 : i32
    %154 = arith.addi %153, %c4_i32_59 : i32
    %155 = arith.index_cast %arg1 : i32 to index
    %156 = arith.index_cast %154 : i32 to index
    %157 = memref.load %arg2[%155, %156] : memref<2x384xi32, #tpu.memory_space<smem>>
    %158 = arith.index_cast %157 : i32 to index
    %c0_60 = arith.constant 0 : index
    %159 = vector.load %arg3[%158, %c0_60] : memref<1000x128xf32, #tpu.memory_space<vmem>>, vector<1x128xf32>
    %c16_i32_61 = arith.constant 16 : i32
    %160 = arith.addi %0, %c16_i32_61 : i32
    %c5_i32_62 = arith.constant 5 : i32
    %161 = arith.addi %160, %c5_i32_62 : i32
    %162 = arith.index_cast %arg1 : i32 to index
    %163 = arith.index_cast %161 : i32 to index
    %164 = memref.load %arg2[%162, %163] : memref<2x384xi32, #tpu.memory_space<smem>>
    %165 = arith.index_cast %164 : i32 to index
    %c0_63 = arith.constant 0 : index
    %166 = vector.load %arg3[%165, %c0_63] : memref<1000x128xf32, #tpu.memory_space<vmem>>, vector<1x128xf32>
    %c16_i32_64 = arith.constant 16 : i32
    %167 = arith.addi %0, %c16_i32_64 : i32
    %c6_i32_65 = arith.constant 6 : i32
    %168 = arith.addi %167, %c6_i32_65 : i32
    %169 = arith.index_cast %arg1 : i32 to index
    %170 = arith.index_cast %168 : i32 to index
    %171 = memref.load %arg2[%169, %170] : memref<2x384xi32, #tpu.memory_space<smem>>
    %172 = arith.index_cast %171 : i32 to index
    %c0_66 = arith.constant 0 : index
    %173 = vector.load %arg3[%172, %c0_66] : memref<1000x128xf32, #tpu.memory_space<vmem>>, vector<1x128xf32>
    %c16_i32_67 = arith.constant 16 : i32
    %174 = arith.addi %0, %c16_i32_67 : i32
    %c7_i32_68 = arith.constant 7 : i32
    %175 = arith.addi %174, %c7_i32_68 : i32
    %176 = arith.index_cast %arg1 : i32 to index
    %177 = arith.index_cast %175 : i32 to index
    %178 = memref.load %arg2[%176, %177] : memref<2x384xi32, #tpu.memory_space<smem>>
    %179 = arith.index_cast %178 : i32 to index
    %c0_69 = arith.constant 0 : index
    %180 = vector.load %arg3[%179, %c0_69] : memref<1000x128xf32, #tpu.memory_space<vmem>>, vector<1x128xf32>
    %181 = tpu.concatenate %131, %138, %145, %152, %159, %166, %173, %180 in 0 : vector<1x128xf32>, vector<1x128xf32>, vector<1x128xf32>, vector<1x128xf32>, vector<1x128xf32>, vector<1x128xf32>, vector<1x128xf32>, vector<1x128xf32> -> vector<8x128xf32>
    %c16 = arith.constant 16 : index
    %c0_70 = arith.constant 0 : index
    %182 = vector.load %arg4[%c16, %c0_70] : memref<128x128xf32, #tpu.memory_space<vmem>>, vector<8x128xf32>
    %183 = arith.addf %181, %182 : vector<8x128xf32>
    %c0_71 = arith.constant 0 : index
    %c16_72 = arith.constant 16 : index
    %c0_73 = arith.constant 0 : index
    %184 = vector.load %arg5[%c0_71, %c16_72, %c0_73] : memref<1x128x128xf32, #tpu.memory_space<vmem>>, vector<1x8x128xf32>
    %185 = vector.shape_cast %184 : vector<1x8x128xf32> to vector<8x128xf32>
    %186 = vector.shape_cast %183 : vector<8x128xf32> to vector<1x8x128xf32>
    tpu.vector_store %arg5[%c0_71, %c16_72, %c0_73], %186 {strides = array<i32>} : memref<1x128x128xf32, #tpu.memory_space<vmem>>, vector<1x8x128xf32>,
    %c24_i32 = arith.constant 24 : i32
    %187 = arith.addi %0, %c24_i32 : i32
    %c0_i32_74 = arith.constant 0 : i32
    %188 = arith.addi %187, %c0_i32_74 : i32
    %189 = arith.index_cast %arg1 : i32 to index
    %190 = arith.index_cast %188 : i32 to index
    %191 = memref.load %arg2[%189, %190] : memref<2x384xi32, #tpu.memory_space<smem>>
    %192 = arith.index_cast %191 : i32 to index
    %c0_75 = arith.constant 0 : index
    %193 = vector.load %arg3[%192, %c0_75] : memref<1000x128xf32, #tpu.memory_space<vmem>>, vector<1x128xf32>
    %c24_i32_76 = arith.constant 24 : i32
    %194 = arith.addi %0, %c24_i32_76 : i32
    %c1_i32_77 = arith.constant 1 : i32
    %195 = arith.addi %194, %c1_i32_77 : i32
    %196 = arith.index_cast %arg1 : i32 to index
    %197 = arith.index_cast %195 : i32 to index
    %198 = memref.load %arg2[%196, %197] : memref<2x384xi32, #tpu.memory_space<smem>>
    %199 = arith.index_cast %198 : i32 to index
    %c0_78 = arith.constant 0 : index
    %200 = vector.load %arg3[%199, %c0_78] : memref<1000x128xf32, #tpu.memory_space<vmem>>, vector<1x128xf32>
    %c24_i32_79 = arith.constant 24 : i32
    %201 = arith.addi %0, %c24_i32_79 : i32
    %c2_i32_80 = arith.constant 2 : i32
    %202 = arith.addi %201, %c2_i32_80 : i32
    %203 = arith.index_cast %arg1 : i32 to index
    %204 = arith.index_cast %202 : i32 to index
    %205 = memref.load %arg2[%203, %204] : memref<2x384xi32, #tpu.memory_space<smem>>
    %206 = arith.index_cast %205 : i32 to index
    %c0_81 = arith.constant 0 : index
    %207 = vector.load %arg3[%206, %c0_81] : memref<1000x128xf32, #tpu.memory_space<vmem>>, vector<1x128xf32>
    %c24_i32_82 = arith.constant 24 : i32
    %208 = arith.addi %0, %c24_i32_82 : i32
    %c3_i32_83 = arith.constant 3 : i32
    %209 = arith.addi %208, %c3_i32_83 : i32
    %210 = arith.index_cast %arg1 : i32 to index
    %211 = arith.index_cast %209 : i32 to index
    %212 = memref.load %arg2[%210, %211] : memref<2x384xi32, #tpu.memory_space<smem>>
    %213 = arith.index_cast %212 : i32 to index
    %c0_84 = arith.constant 0 : index
    %214 = vector.load %arg3[%213, %c0_84] : memref<1000x128xf32, #tpu.memory_space<vmem>>, vector<1x128xf32>
    %c24_i32_85 = arith.constant 24 : i32
    %215 = arith.addi %0, %c24_i32_85 : i32
    %c4_i32_86 = arith.constant 4 : i32
    %216 = arith.addi %215, %c4_i32_86 : i32
    %217 = arith.index_cast %arg1 : i32 to index
    %218 = arith.index_cast %216 : i32 to index
    %219 = memref.load %arg2[%217, %218] : memref<2x384xi32, #tpu.memory_space<smem>>
    %220 = arith.index_cast %219 : i32 to index
    %c0_87 = arith.constant 0 : index
    %221 = vector.load %arg3[%220, %c0_87] : memref<1000x128xf32, #tpu.memory_space<vmem>>, vector<1x128xf32>
    %c24_i32_88 = arith.constant 24 : i32
    %222 = arith.addi %0, %c24_i32_88 : i32
    %c5_i32_89 = arith.constant 5 : i32
    %223 = arith.addi %222, %c5_i32_89 : i32
    %224 = arith.index_cast %arg1 : i32 to index
    %225 = arith.index_cast %223 : i32 to index
    %226 = memref.load %arg2[%224, %225] : memref<2x384xi32, #tpu.memory_space<smem>>
    %227 = arith.index_cast %226 : i32 to index
    %c0_90 = arith.constant 0 : index
    %228 = vector.load %arg3[%227, %c0_90] : memref<1000x128xf32, #tpu.memory_space<vmem>>, vector<1x128xf32>
    %c24_i32_91 = arith.constant 24 : i32
    %229 = arith.addi %0, %c24_i32_91 : i32
    %c6_i32_92 = arith.constant 6 : i32
    %230 = arith.addi %229, %c6_i32_92 : i32
    %231 = arith.index_cast %arg1 : i32 to index
    %232 = arith.index_cast %230 : i32 to index
    %233 = memref.load %arg2[%231, %232] : memref<2x384xi32, #tpu.memory_space<smem>>
    %234 = arith.index_cast %233 : i32 to index
    %c0_93 = arith.constant 0 : index
    %235 = vector.load %arg3[%234, %c0_93] : memref<1000x128xf32, #tpu.memory_space<vmem>>, vector<1x128xf32>
    %c24_i32_94 = arith.constant 24 : i32
    %236 = arith.addi %0, %c24_i32_94 : i32
    %c7_i32_95 = arith.constant 7 : i32
    %237 = arith.addi %236, %c7_i32_95 : i32
    %238 = arith.index_cast %arg1 : i32 to index
    %239 = arith.index_cast %237 : i32 to index
    %240 = memref.load %arg2[%238, %239] : memref<2x384xi32, #tpu.memory_space<smem>>
    %241 = arith.index_cast %240 : i32 to index
    %c0_96 = arith.constant 0 : index
    %242 = vector.load %arg3[%241, %c0_96] : memref<1000x128xf32, #tpu.memory_space<vmem>>, vector<1x128xf32>
    %243 = tpu.concatenate %193, %200, %207, %214, %221, %228, %235, %242 in 0 : vector<1x128xf32>, vector<1x128xf32>, vector<1x128xf32>, vector<1x128xf32>, vector<1x128xf32>, vector<1x128xf32>, vector<1x128xf32>, vector<1x128xf32> -> vector<8x128xf32>
    %c24 = arith.constant 24 : index
    %c0_97 = arith.constant 0 : index
    %244 = vector.load %arg4[%c24, %c0_97] : memref<128x128xf32, #tpu.memory_space<vmem>>, vector<8x128xf32>
    %245 = arith.addf %243, %244 : vector<8x128xf32>
    %c0_98 = arith.constant 0 : index
    %c24_99 = arith.constant 24 : index
    %c0_100 = arith.constant 0 : index
    %246 = vector.load %arg5[%c0_98, %c24_99, %c0_100] : memref<1x128x128xf32, #tpu.memory_space<vmem>>, vector<1x8x128xf32>
    %247 = vector.shape_cast %246 : vector<1x8x128xf32> to vector<8x128xf32>
    %248 = vector.shape_cast %245 : vector<8x128xf32> to vector<1x8x128xf32>
    tpu.vector_store %arg5[%c0_98, %c24_99, %c0_100], %248 {strides = array<i32>} : memref<1x128x128xf32, #tpu.memory_space<vmem>>, vector<1x8x128xf32>,
    %c32_i32 = arith.constant 32 : i32
    %249 = arith.addi %0, %c32_i32 : i32
    %c0_i32_101 = arith.constant 0 : i32
    %250 = arith.addi %249, %c0_i32_101 : i32
    %251 = arith.index_cast %arg1 : i32 to index
    %252 = arith.index_cast %250 : i32 to index
    %253 = memref.load %arg2[%251, %252] : memref<2x384xi32, #tpu.memory_space<smem>>
    %254 = arith.index_cast %253 : i32 to index
    %c0_102 = arith.constant 0 : index
    %255 = vector.load %arg3[%254, %c0_102] : memref<1000x128xf32, #tpu.memory_space<vmem>>, vector<1x128xf32>
    %c32_i32_103 = arith.constant 32 : i32
    %256 = arith.addi %0, %c32_i32_103 : i32
    %c1_i32_104 = arith.constant 1 : i32
    %257 = arith.addi %256, %c1_i32_104 : i32
    %258 = arith.index_cast %arg1 : i32 to index
    %259 = arith.index_cast %257 : i32 to index
    %260 = memref.load %arg2[%258, %259] : memref<2x384xi32, #tpu.memory_space<smem>>
    %261 = arith.index_cast %260 : i32 to index
    %c0_105 = arith.constant 0 : index
    %262 = vector.load %arg3[%261, %c0_105] : memref<1000x128xf32, #tpu.memory_space<vmem>>, vector<1x128xf32>
    %c32_i32_106 = arith.constant 32 : i32
    %263 = arith.addi %0, %c32_i32_106 : i32
    %c2_i32_107 = arith.constant 2 : i32
    %264 = arith.addi %263, %c2_i32_107 : i32
    %265 = arith.index_cast %arg1 : i32 to index
    %266 = arith.index_cast %264 : i32 to index
    %267 = memref.load %arg2[%265, %266] : memref<2x384xi32, #tpu.memory_space<smem>>
    %268 = arith.index_cast %267 : i32 to index
    %c0_108 = arith.constant 0 : index
    %269 = vector.load %arg3[%268, %c0_108] : memref<1000x128xf32, #tpu.memory_space<vmem>>, vector<1x128xf32>
    %c32_i32_109 = arith.constant 32 : i32
    %270 = arith.addi %0, %c32_i32_109 : i32
    %c3_i32_110 = arith.constant 3 : i32
    %271 = arith.addi %270, %c3_i32_110 : i32
    %272 = arith.index_cast %arg1 : i32 to index
    %273 = arith.index_cast %271 : i32 to index
    %274 = memref.load %arg2[%272, %273] : memref<2x384xi32, #tpu.memory_space<smem>>
    %275 = arith.index_cast %274 : i32 to index
    %c0_111 = arith.constant 0 : index
    %276 = vector.load %arg3[%275, %c0_111] : memref<1000x128xf32, #tpu.memory_space<vmem>>, vector<1x128xf32>
    %c32_i32_112 = arith.constant 32 : i32
    %277 = arith.addi %0, %c32_i32_112 : i32
    %c4_i32_113 = arith.constant 4 : i32
    %278 = arith.addi %277, %c4_i32_113 : i32
    %279 = arith.index_cast %arg1 : i32 to index
    %280 = arith.index_cast %278 : i32 to index
    %281 = memref.load %arg2[%279, %280] : memref<2x384xi32, #tpu.memory_space<smem>>
    %282 = arith.index_cast %281 : i32 to index
    %c0_114 = arith.constant 0 : index
    %283 = vector.load %arg3[%282, %c0_114] : memref<1000x128xf32, #tpu.memory_space<vmem>>, vector<1x128xf32>
    %c32_i32_115 = arith.constant 32 : i32
    %284 = arith.addi %0, %c32_i32_115 : i32
    %c5_i32_116 = arith.constant 5 : i32
    %285 = arith.addi %284, %c5_i32_116 : i32
    %286 = arith.index_cast %arg1 : i32 to index
    %287 = arith.index_cast %285 : i32 to index
    %288 = memref.load %arg2[%286, %287] : memref<2x384xi32, #tpu.memory_space<smem>>
    %289 = arith.index_cast %288 : i32 to index
    %c0_117 = arith.constant 0 : index
    %290 = vector.load %arg3[%289, %c0_117] : memref<1000x128xf32, #tpu.memory_space<vmem>>, vector<1x128xf32>
    %c32_i32_118 = arith.constant 32 : i32
    %291 = arith.addi %0, %c32_i32_118 : i32
    %c6_i32_119 = arith.constant 6 : i32
    %292 = arith.addi %291, %c6_i32_119 : i32
    %293 = arith.index_cast %arg1 : i32 to index
    %294 = arith.index_cast %292 : i32 to index
    %295 = memref.load %arg2[%293, %294] : memref<2x384xi32, #tpu.memory_space<smem>>
    %296 = arith.index_cast %295 : i32 to index
    %c0_120 = arith.constant 0 : index
    %297 = vector.load %arg3[%296, %c0_120] : memref<1000x128xf32, #tpu.memory_space<vmem>>, vector<1x128xf32>
    %c32_i32_121 = arith.constant 32 : i32
    %298 = arith.addi %0, %c32_i32_121 : i32
    %c7_i32_122 = arith.constant 7 : i32
    %299 = arith.addi %298, %c7_i32_122 : i32
    %300 = arith.index_cast %arg1 : i32 to index
    %301 = arith.index_cast %299 : i32 to index
    %302 = memref.load %arg2[%300, %301] : memref<2x384xi32, #tpu.memory_space<smem>>
    %303 = arith.index_cast %302 : i32 to index
    %c0_123 = arith.constant 0 : index
    %304 = vector.load %arg3[%303, %c0_123] : memref<1000x128xf32, #tpu.memory_space<vmem>>, vector<1x128xf32>
    %305 = tpu.concatenate %255, %262, %269, %276, %283, %290, %297, %304 in 0 : vector<1x128xf32>, vector<1x128xf32>, vector<1x128xf32>, vector<1x128xf32>, vector<1x128xf32>, vector<1x128xf32>, vector<1x128xf32>, vector<1x128xf32> -> vector<8x128xf32>
    %c32 = arith.constant 32 : index
    %c0_124 = arith.constant 0 : index
    %306 = vector.load %arg4[%c32, %c0_124] : memref<128x128xf32, #tpu.memory_space<vmem>>, vector<8x128xf32>
    %307 = arith.addf %305, %306 : vector<8x128xf32>
    %c0_125 = arith.constant 0 : index
    %c32_126 = arith.constant 32 : index
    %c0_127 = arith.constant 0 : index
    %308 = vector.load %arg5[%c0_125, %c32_126, %c0_127] : memref<1x128x128xf32, #tpu.memory_space<vmem>>, vector<1x8x128xf32>
    %309 = vector.shape_cast %308 : vector<1x8x128xf32> to vector<8x128xf32>
    %310 = vector.shape_cast %307 : vector<8x128xf32> to vector<1x8x128xf32>
    tpu.vector_store %arg5[%c0_125, %c32_126, %c0_127], %310 {strides = array<i32>} : memref<1x128x128xf32, #tpu.memory_space<vmem>>, vector<1x8x128xf32>,
    %c40_i32 = arith.constant 40 : i32
    %311 = arith.addi %0, %c40_i32 : i32
    %c0_i32_128 = arith.constant 0 : i32
    %312 = arith.addi %311, %c0_i32_128 : i32
    %313 = arith.index_cast %arg1 : i32 to index
    %314 = arith.index_cast %312 : i32 to index
    %315 = memref.load %arg2[%313, %314] : memref<2x384xi32, #tpu.memory_space<smem>>
    %316 = arith.index_cast %315 : i32 to index
    %c0_129 = arith.constant 0 : index
    %317 = vector.load %arg3[%316, %c0_129] : memref<1000x128xf32, #tpu.memory_space<vmem>>, vector<1x128xf32>
    %c40_i32_130 = arith.constant 40 : i32
    %318 = arith.addi %0, %c40_i32_130 : i32
    %c1_i32_131 = arith.constant 1 : i32
    %319 = arith.addi %318, %c1_i32_131 : i32
    %320 = arith.index_cast %arg1 : i32 to index
    %321 = arith.index_cast %319 : i32 to index
    %322 = memref.load %arg2[%320, %321] : memref<2x384xi32, #tpu.memory_space<smem>>
    %323 = arith.index_cast %322 : i32 to index
    %c0_132 = arith.constant 0 : index
    %324 = vector.load %arg3[%323, %c0_132] : memref<1000x128xf32, #tpu.memory_space<vmem>>, vector<1x128xf32>
    %c40_i32_133 = arith.constant 40 : i32
    %325 = arith.addi %0, %c40_i32_133 : i32
    %c2_i32_134 = arith.constant 2 : i32
    %326 = arith.addi %325, %c2_i32_134 : i32
    %327 = arith.index_cast %arg1 : i32 to index
    %328 = arith.index_cast %326 : i32 to index
    %329 = memref.load %arg2[%327, %328] : memref<2x384xi32, #tpu.memory_space<smem>>
    %330 = arith.index_cast %329 : i32 to index
    %c0_135 = arith.constant 0 : index
    %331 = vector.load %arg3[%330, %c0_135] : memref<1000x128xf32, #tpu.memory_space<vmem>>, vector<1x128xf32>
    %c40_i32_136 = arith.constant 40 : i32
    %332 = arith.addi %0, %c40_i32_136 : i32
    %c3_i32_137 = arith.constant 3 : i32
    %333 = arith.addi %332, %c3_i32_137 : i32
    %334 = arith.index_cast %arg1 : i32 to index
    %335 = arith.index_cast %333 : i32 to index
    %336 = memref.load %arg2[%334, %335] : memref<2x384xi32, #tpu.memory_space<smem>>
    %337 = arith.index_cast %336 : i32 to index
    %c0_138 = arith.constant 0 : index
    %338 = vector.load %arg3[%337, %c0_138] : memref<1000x128xf32, #tpu.memory_space<vmem>>, vector<1x128xf32>
    %c40_i32_139 = arith.constant 40 : i32
    %339 = arith.addi %0, %c40_i32_139 : i32
    %c4_i32_140 = arith.constant 4 : i32
    %340 = arith.addi %339, %c4_i32_140 : i32
    %341 = arith.index_cast %arg1 : i32 to index
    %342 = arith.index_cast %340 : i32 to index
    %343 = memref.load %arg2[%341, %342] : memref<2x384xi32, #tpu.memory_space<smem>>
    %344 = arith.index_cast %343 : i32 to index
    %c0_141 = arith.constant 0 : index
    %345 = vector.load %arg3[%344, %c0_141] : memref<1000x128xf32, #tpu.memory_space<vmem>>, vector<1x128xf32>
    %c40_i32_142 = arith.constant 40 : i32
    %346 = arith.addi %0, %c40_i32_142 : i32
    %c5_i32_143 = arith.constant 5 : i32
    %347 = arith.addi %346, %c5_i32_143 : i32
    %348 = arith.index_cast %arg1 : i32 to index
    %349 = arith.index_cast %347 : i32 to index
    %350 = memref.load %arg2[%348, %349] : memref<2x384xi32, #tpu.memory_space<smem>>
    %351 = arith.index_cast %350 : i32 to index
    %c0_144 = arith.constant 0 : index
    %352 = vector.load %arg3[%351, %c0_144] : memref<1000x128xf32, #tpu.memory_space<vmem>>, vector<1x128xf32>
    %c40_i32_145 = arith.constant 40 : i32
    %353 = arith.addi %0, %c40_i32_145 : i32
    %c6_i32_146 = arith.constant 6 : i32
    %354 = arith.addi %353, %c6_i32_146 : i32
    %355 = arith.index_cast %arg1 : i32 to index
    %356 = arith.index_cast %354 : i32 to index
    %357 = memref.load %arg2[%355, %356] : memref<2x384xi32, #tpu.memory_space<smem>>
    %358 = arith.index_cast %357 : i32 to index
    %c0_147 = arith.constant 0 : index
    %359 = vector.load %arg3[%358, %c0_147] : memref<1000x128xf32, #tpu.memory_space<vmem>>, vector<1x128xf32>
    %c40_i32_148 = arith.constant 40 : i32
    %360 = arith.addi %0, %c40_i32_148 : i32
    %c7_i32_149 = arith.constant 7 : i32
    %361 = arith.addi %360, %c7_i32_149 : i32
    %362 = arith.index_cast %arg1 : i32 to index
    %363 = arith.index_cast %361 : i32 to index
    %364 = memref.load %arg2[%362, %363] : memref<2x384xi32, #tpu.memory_space<smem>>
    %365 = arith.index_cast %364 : i32 to index
    %c0_150 = arith.constant 0 : index
    %366 = vector.load %arg3[%365, %c0_150] : memref<1000x128xf32, #tpu.memory_space<vmem>>, vector<1x128xf32>
    %367 = tpu.concatenate %317, %324, %331, %338, %345, %352, %359, %366 in 0 : vector<1x128xf32>, vector<1x128xf32>, vector<1x128xf32>, vector<1x128xf32>, vector<1x128xf32>, vector<1x128xf32>, vector<1x128xf32>, vector<1x128xf32> -> vector<8x128xf32>
    %c40 = arith.constant 40 : index
    %c0_151 = arith.constant 0 : index
    %368 = vector.load %arg4[%c40, %c0_151] : memref<128x128xf32, #tpu.memory_space<vmem>>, vector<8x128xf32>
    %369 = arith.addf %367, %368 : vector<8x128xf32>
    %c0_152 = arith.constant 0 : index
    %c40_153 = arith.constant 40 : index
    %c0_154 = arith.constant 0 : index
    %370 = vector.load %arg5[%c0_152, %c40_153, %c0_154] : memref<1x128x128xf32, #tpu.memory_space<vmem>>, vector<1x8x128xf32>
    %371 = vector.shape_cast %370 : vector<1x8x128xf32> to vector<8x128xf32>
    %372 = vector.shape_cast %369 : vector<8x128xf32> to vector<1x8x128xf32>
    tpu.vector_store %arg5[%c0_152, %c40_153, %c0_154], %372 {strides = array<i32>} : memref<1x128x128xf32, #tpu.memory_space<vmem>>, vector<1x8x128xf32>,
    %c48_i32 = arith.constant 48 : i32
    %373 = arith.addi %0, %c48_i32 : i32
    %c0_i32_155 = arith.constant 0 : i32
    %374 = arith.addi %373, %c0_i32_155 : i32
    %375 = arith.index_cast %arg1 : i32 to index
    %376 = arith.index_cast %374 : i32 to index
    %377 = memref.load %arg2[%375, %376] : memref<2x384xi32, #tpu.memory_space<smem>>
    %378 = arith.index_cast %377 : i32 to index
    %c0_156 = arith.constant 0 : index
    %379 = vector.load %arg3[%378, %c0_156] : memref<1000x128xf32, #tpu.memory_space<vmem>>, vector<1x128xf32>
    %c48_i32_157 = arith.constant 48 : i32
    %380 = arith.addi %0, %c48_i32_157 : i32
    %c1_i32_158 = arith.constant 1 : i32
    %381 = arith.addi %380, %c1_i32_158 : i32
    %382 = arith.index_cast %arg1 : i32 to index
    %383 = arith.index_cast %381 : i32 to index
    %384 = memref.load %arg2[%382, %383] : memref<2x384xi32, #tpu.memory_space<smem>>
    %385 = arith.index_cast %384 : i32 to index
    %c0_159 = arith.constant 0 : index
    %386 = vector.load %arg3[%385, %c0_159] : memref<1000x128xf32, #tpu.memory_space<vmem>>, vector<1x128xf32>
    %c48_i32_160 = arith.constant 48 : i32
    %387 = arith.addi %0, %c48_i32_160 : i32
    %c2_i32_161 = arith.constant 2 : i32
    %388 = arith.addi %387, %c2_i32_161 : i32
    %389 = arith.index_cast %arg1 : i32 to index
    %390 = arith.index_cast %388 : i32 to index
    %391 = memref.load %arg2[%389, %390] : memref<2x384xi32, #tpu.memory_space<smem>>
    %392 = arith.index_cast %391 : i32 to index
    %c0_162 = arith.constant 0 : index
    %393 = vector.load %arg3[%392, %c0_162] : memref<1000x128xf32, #tpu.memory_space<vmem>>, vector<1x128xf32>
    %c48_i32_163 = arith.constant 48 : i32
    %394 = arith.addi %0, %c48_i32_163 : i32
    %c3_i32_164 = arith.constant 3 : i32
    %395 = arith.addi %394, %c3_i32_164 : i32
    %396 = arith.index_cast %arg1 : i32 to index
    %397 = arith.index_cast %395 : i32 to index
    %398 = memref.load %arg2[%396, %397] : memref<2x384xi32, #tpu.memory_space<smem>>
    %399 = arith.index_cast %398 : i32 to index
    %c0_165 = arith.constant 0 : index
    %400 = vector.load %arg3[%399, %c0_165] : memref<1000x128xf32, #tpu.memory_space<vmem>>, vector<1x128xf32>
    %c48_i32_166 = arith.constant 48 : i32
    %401 = arith.addi %0, %c48_i32_166 : i32
    %c4_i32_167 = arith.constant 4 : i32
    %402 = arith.addi %401, %c4_i32_167 : i32
    %403 = arith.index_cast %arg1 : i32 to index
    %404 = arith.index_cast %402 : i32 to index
    %405 = memref.load %arg2[%403, %404] : memref<2x384xi32, #tpu.memory_space<smem>>
    %406 = arith.index_cast %405 : i32 to index
    %c0_168 = arith.constant 0 : index
    %407 = vector.load %arg3[%406, %c0_168] : memref<1000x128xf32, #tpu.memory_space<vmem>>, vector<1x128xf32>
    %c48_i32_169 = arith.constant 48 : i32
    %408 = arith.addi %0, %c48_i32_169 : i32
    %c5_i32_170 = arith.constant 5 : i32
    %409 = arith.addi %408, %c5_i32_170 : i32
    %410 = arith.index_cast %arg1 : i32 to index
    %411 = arith.index_cast %409 : i32 to index
    %412 = memref.load %arg2[%410, %411] : memref<2x384xi32, #tpu.memory_space<smem>>
    %413 = arith.index_cast %412 : i32 to index
    %c0_171 = arith.constant 0 : index
    %414 = vector.load %arg3[%413, %c0_171] : memref<1000x128xf32, #tpu.memory_space<vmem>>, vector<1x128xf32>
    %c48_i32_172 = arith.constant 48 : i32
    %415 = arith.addi %0, %c48_i32_172 : i32
    %c6_i32_173 = arith.constant 6 : i32
    %416 = arith.addi %415, %c6_i32_173 : i32
    %417 = arith.index_cast %arg1 : i32 to index
    %418 = arith.index_cast %416 : i32 to index
    %419 = memref.load %arg2[%417, %418] : memref<2x384xi32, #tpu.memory_space<smem>>
    %420 = arith.index_cast %419 : i32 to index
    %c0_174 = arith.constant 0 : index
    %421 = vector.load %arg3[%420, %c0_174] : memref<1000x128xf32, #tpu.memory_space<vmem>>, vector<1x128xf32>
    %c48_i32_175 = arith.constant 48 : i32
    %422 = arith.addi %0, %c48_i32_175 : i32
    %c7_i32_176 = arith.constant 7 : i32
    %423 = arith.addi %422, %c7_i32_176 : i32
    %424 = arith.index_cast %arg1 : i32 to index
    %425 = arith.index_cast %423 : i32 to index
    %426 = memref.load %arg2[%424, %425] : memref<2x384xi32, #tpu.memory_space<smem>>
    %427 = arith.index_cast %426 : i32 to index
    %c0_177 = arith.constant 0 : index
    %428 = vector.load %arg3[%427, %c0_177] : memref<1000x128xf32, #tpu.memory_space<vmem>>, vector<1x128xf32>
    %429 = tpu.concatenate %379, %386, %393, %400, %407, %414, %421, %428 in 0 : vector<1x128xf32>, vector<1x128xf32>, vector<1x128xf32>, vector<1x128xf32>, vector<1x128xf32>, vector<1x128xf32>, vector<1x128xf32>, vector<1x128xf32> -> vector<8x128xf32>
    %c48 = arith.constant 48 : index
    %c0_178 = arith.constant 0 : index
    %430 = vector.load %arg4[%c48, %c0_178] : memref<128x128xf32, #tpu.memory_space<vmem>>, vector<8x128xf32>
    %431 = arith.addf %429, %430 : vector<8x128xf32>
    %c0_179 = arith.constant 0 : index
    %c48_180 = arith.constant 48 : index
    %c0_181 = arith.constant 0 : index
    %432 = vector.load %arg5[%c0_179, %c48_180, %c0_181] : memref<1x128x128xf32, #tpu.memory_space<vmem>>, vector<1x8x128xf32>
    %433 = vector.shape_cast %432 : vector<1x8x128xf32> to vector<8x128xf32>
    %434 = vector.shape_cast %431 : vector<8x128xf32> to vector<1x8x128xf32>
    tpu.vector_store %arg5[%c0_179, %c48_180, %c0_181], %434 {strides = array<i32>} : memref<1x128x128xf32, #tpu.memory_space<vmem>>, vector<1x8x128xf32>,
    %c56_i32 = arith.constant 56 : i32
    %435 = arith.addi %0, %c56_i32 : i32
    %c0_i32_182 = arith.constant 0 : i32
    %436 = arith.addi %435, %c0_i32_182 : i32
    %437 = arith.index_cast %arg1 : i32 to index
    %438 = arith.index_cast %436 : i32 to index
    %439 = memref.load %arg2[%437, %438] : memref<2x384xi32, #tpu.memory_space<smem>>
    %440 = arith.index_cast %439 : i32 to index
    %c0_183 = arith.constant 0 : index
    %441 = vector.load %arg3[%440, %c0_183] : memref<1000x128xf32, #tpu.memory_space<vmem>>, vector<1x128xf32>
    %c56_i32_184 = arith.constant 56 : i32
    %442 = arith.addi %0, %c56_i32_184 : i32
    %c1_i32_185 = arith.constant 1 : i32
    %443 = arith.addi %442, %c1_i32_185 : i32
    %444 = arith.index_cast %arg1 : i32 to index
    %445 = arith.index_cast %443 : i32 to index
    %446 = memref.load %arg2[%444, %445] : memref<2x384xi32, #tpu.memory_space<smem>>
    %447 = arith.index_cast %446 : i32 to index
    %c0_186 = arith.constant 0 : index
    %448 = vector.load %arg3[%447, %c0_186] : memref<1000x128xf32, #tpu.memory_space<vmem>>, vector<1x128xf32>
    %c56_i32_187 = arith.constant 56 : i32
    %449 = arith.addi %0, %c56_i32_187 : i32
    %c2_i32_188 = arith.constant 2 : i32
    %450 = arith.addi %449, %c2_i32_188 : i32
    %451 = arith.index_cast %arg1 : i32 to index
    %452 = arith.index_cast %450 : i32 to index
    %453 = memref.load %arg2[%451, %452] : memref<2x384xi32, #tpu.memory_space<smem>>
    %454 = arith.index_cast %453 : i32 to index
    %c0_189 = arith.constant 0 : index
    %455 = vector.load %arg3[%454, %c0_189] : memref<1000x128xf32, #tpu.memory_space<vmem>>, vector<1x128xf32>
    %c56_i32_190 = arith.constant 56 : i32
    %456 = arith.addi %0, %c56_i32_190 : i32
    %c3_i32_191 = arith.constant 3 : i32
    %457 = arith.addi %456, %c3_i32_191 : i32
    %458 = arith.index_cast %arg1 : i32 to index
    %459 = arith.index_cast %457 : i32 to index
    %460 = memref.load %arg2[%458, %459] : memref<2x384xi32, #tpu.memory_space<smem>>
    %461 = arith.index_cast %460 : i32 to index
    %c0_192 = arith.constant 0 : index
    %462 = vector.load %arg3[%461, %c0_192] : memref<1000x128xf32, #tpu.memory_space<vmem>>, vector<1x128xf32>
    %c56_i32_193 = arith.constant 56 : i32
    %463 = arith.addi %0, %c56_i32_193 : i32
    %c4_i32_194 = arith.constant 4 : i32
    %464 = arith.addi %463, %c4_i32_194 : i32
    %465 = arith.index_cast %arg1 : i32 to index
    %466 = arith.index_cast %464 : i32 to index
    %467 = memref.load %arg2[%465, %466] : memref<2x384xi32, #tpu.memory_space<smem>>
    %468 = arith.index_cast %467 : i32 to index
    %c0_195 = arith.constant 0 : index
    %469 = vector.load %arg3[%468, %c0_195] : memref<1000x128xf32, #tpu.memory_space<vmem>>, vector<1x128xf32>
    %c56_i32_196 = arith.constant 56 : i32
    %470 = arith.addi %0, %c56_i32_196 : i32
    %c5_i32_197 = arith.constant 5 : i32
    %471 = arith.addi %470, %c5_i32_197 : i32
    %472 = arith.index_cast %arg1 : i32 to index
    %473 = arith.index_cast %471 : i32 to index
    %474 = memref.load %arg2[%472, %473] : memref<2x384xi32, #tpu.memory_space<smem>>
    %475 = arith.index_cast %474 : i32 to index
    %c0_198 = arith.constant 0 : index
    %476 = vector.load %arg3[%475, %c0_198] : memref<1000x128xf32, #tpu.memory_space<vmem>>, vector<1x128xf32>
    %c56_i32_199 = arith.constant 56 : i32
    %477 = arith.addi %0, %c56_i32_199 : i32
    %c6_i32_200 = arith.constant 6 : i32
    %478 = arith.addi %477, %c6_i32_200 : i32
    %479 = arith.index_cast %arg1 : i32 to index
    %480 = arith.index_cast %478 : i32 to index
    %481 = memref.load %arg2[%479, %480] : memref<2x384xi32, #tpu.memory_space<smem>>
    %482 = arith.index_cast %481 : i32 to index
    %c0_201 = arith.constant 0 : index
    %483 = vector.load %arg3[%482, %c0_201] : memref<1000x128xf32, #tpu.memory_space<vmem>>, vector<1x128xf32>
    %c56_i32_202 = arith.constant 56 : i32
    %484 = arith.addi %0, %c56_i32_202 : i32
    %c7_i32_203 = arith.constant 7 : i32
    %485 = arith.addi %484, %c7_i32_203 : i32
    %486 = arith.index_cast %arg1 : i32 to index
    %487 = arith.index_cast %485 : i32 to index
    %488 = memref.load %arg2[%486, %487] : memref<2x384xi32, #tpu.memory_space<smem>>
    %489 = arith.index_cast %488 : i32 to index
    %c0_204 = arith.constant 0 : index
    %490 = vector.load %arg3[%489, %c0_204] : memref<1000x128xf32, #tpu.memory_space<vmem>>, vector<1x128xf32>
    %491 = tpu.concatenate %441, %448, %455, %462, %469, %476, %483, %490 in 0 : vector<1x128xf32>, vector<1x128xf32>, vector<1x128xf32>, vector<1x128xf32>, vector<1x128xf32>, vector<1x128xf32>, vector<1x128xf32>, vector<1x128xf32> -> vector<8x128xf32>
    %c56 = arith.constant 56 : index
    %c0_205 = arith.constant 0 : index
    %492 = vector.load %arg4[%c56, %c0_205] : memref<128x128xf32, #tpu.memory_space<vmem>>, vector<8x128xf32>
    %493 = arith.addf %491, %492 : vector<8x128xf32>
    %c0_206 = arith.constant 0 : index
    %c56_207 = arith.constant 56 : index
    %c0_208 = arith.constant 0 : index
    %494 = vector.load %arg5[%c0_206, %c56_207, %c0_208] : memref<1x128x128xf32, #tpu.memory_space<vmem>>, vector<1x8x128xf32>
    %495 = vector.shape_cast %494 : vector<1x8x128xf32> to vector<8x128xf32>
    %496 = vector.shape_cast %493 : vector<8x128xf32> to vector<1x8x128xf32>
    tpu.vector_store %arg5[%c0_206, %c56_207, %c0_208], %496 {strides = array<i32>} : memref<1x128x128xf32, #tpu.memory_space<vmem>>, vector<1x8x128xf32>,
    %c64_i32 = arith.constant 64 : i32
    %497 = arith.addi %0, %c64_i32 : i32
    %c0_i32_209 = arith.constant 0 : i32
    %498 = arith.addi %497, %c0_i32_209 : i32
    %499 = arith.index_cast %arg1 : i32 to index
    %500 = arith.index_cast %498 : i32 to index
    %501 = memref.load %arg2[%499, %500] : memref<2x384xi32, #tpu.memory_space<smem>>
    %502 = arith.index_cast %501 : i32 to index
    %c0_210 = arith.constant 0 : index
    %503 = vector.load %arg3[%502, %c0_210] : memref<1000x128xf32, #tpu.memory_space<vmem>>, vector<1x128xf32>
    %c64_i32_211 = arith.constant 64 : i32
    %504 = arith.addi %0, %c64_i32_211 : i32
    %c1_i32_212 = arith.constant 1 : i32
    %505 = arith.addi %504, %c1_i32_212 : i32
    %506 = arith.index_cast %arg1 : i32 to index
    %507 = arith.index_cast %505 : i32 to index
    %508 = memref.load %arg2[%506, %507] : memref<2x384xi32, #tpu.memory_space<smem>>
    %509 = arith.index_cast %508 : i32 to index
    %c0_213 = arith.constant 0 : index
    %510 = vector.load %arg3[%509, %c0_213] : memref<1000x128xf32, #tpu.memory_space<vmem>>, vector<1x128xf32>
    %c64_i32_214 = arith.constant 64 : i32
    %511 = arith.addi %0, %c64_i32_214 : i32
    %c2_i32_215 = arith.constant 2 : i32
    %512 = arith.addi %511, %c2_i32_215 : i32
    %513 = arith.index_cast %arg1 : i32 to index
    %514 = arith.index_cast %512 : i32 to index
    %515 = memref.load %arg2[%513, %514] : memref<2x384xi32, #tpu.memory_space<smem>>
    %516 = arith.index_cast %515 : i32 to index
    %c0_216 = arith.constant 0 : index
    %517 = vector.load %arg3[%516, %c0_216] : memref<1000x128xf32, #tpu.memory_space<vmem>>, vector<1x128xf32>
    %c64_i32_217 = arith.constant 64 : i32
    %518 = arith.addi %0, %c64_i32_217 : i32
    %c3_i32_218 = arith.constant 3 : i32
    %519 = arith.addi %518, %c3_i32_218 : i32
    %520 = arith.index_cast %arg1 : i32 to index
    %521 = arith.index_cast %519 : i32 to index
    %522 = memref.load %arg2[%520, %521] : memref<2x384xi32, #tpu.memory_space<smem>>
    %523 = arith.index_cast %522 : i32 to index
    %c0_219 = arith.constant 0 : index
    %524 = vector.load %arg3[%523, %c0_219] : memref<1000x128xf32, #tpu.memory_space<vmem>>, vector<1x128xf32>
    %c64_i32_220 = arith.constant 64 : i32
    %525 = arith.addi %0, %c64_i32_220 : i32
    %c4_i32_221 = arith.constant 4 : i32
    %526 = arith.addi %525, %c4_i32_221 : i32
    %527 = arith.index_cast %arg1 : i32 to index
    %528 = arith.index_cast %526 : i32 to index
    %529 = memref.load %arg2[%527, %528] : memref<2x384xi32, #tpu.memory_space<smem>>
    %530 = arith.index_cast %529 : i32 to index
    %c0_222 = arith.constant 0 : index
    %531 = vector.load %arg3[%530, %c0_222] : memref<1000x128xf32, #tpu.memory_space<vmem>>, vector<1x128xf32>
    %c64_i32_223 = arith.constant 64 : i32
    %532 = arith.addi %0, %c64_i32_223 : i32
    %c5_i32_224 = arith.constant 5 : i32
    %533 = arith.addi %532, %c5_i32_224 : i32
    %534 = arith.index_cast %arg1 : i32 to index
    %535 = arith.index_cast %533 : i32 to index
    %536 = memref.load %arg2[%534, %535] : memref<2x384xi32, #tpu.memory_space<smem>>
    %537 = arith.index_cast %536 : i32 to index
    %c0_225 = arith.constant 0 : index
    %538 = vector.load %arg3[%537, %c0_225] : memref<1000x128xf32, #tpu.memory_space<vmem>>, vector<1x128xf32>
    %c64_i32_226 = arith.constant 64 : i32
    %539 = arith.addi %0, %c64_i32_226 : i32
    %c6_i32_227 = arith.constant 6 : i32
    %540 = arith.addi %539, %c6_i32_227 : i32
    %541 = arith.index_cast %arg1 : i32 to index
    %542 = arith.index_cast %540 : i32 to index
    %543 = memref.load %arg2[%541, %542] : memref<2x384xi32, #tpu.memory_space<smem>>
    %544 = arith.index_cast %543 : i32 to index
    %c0_228 = arith.constant 0 : index
    %545 = vector.load %arg3[%544, %c0_228] : memref<1000x128xf32, #tpu.memory_space<vmem>>, vector<1x128xf32>
    %c64_i32_229 = arith.constant 64 : i32
    %546 = arith.addi %0, %c64_i32_229 : i32
    %c7_i32_230 = arith.constant 7 : i32
    %547 = arith.addi %546, %c7_i32_230 : i32
    %548 = arith.index_cast %arg1 : i32 to index
    %549 = arith.index_cast %547 : i32 to index
    %550 = memref.load %arg2[%548, %549] : memref<2x384xi32, #tpu.memory_space<smem>>
    %551 = arith.index_cast %550 : i32 to index
    %c0_231 = arith.constant 0 : index
    %552 = vector.load %arg3[%551, %c0_231] : memref<1000x128xf32, #tpu.memory_space<vmem>>, vector<1x128xf32>
    %553 = tpu.concatenate %503, %510, %517, %524, %531, %538, %545, %552 in 0 : vector<1x128xf32>, vector<1x128xf32>, vector<1x128xf32>, vector<1x128xf32>, vector<1x128xf32>, vector<1x128xf32>, vector<1x128xf32>, vector<1x128xf32> -> vector<8x128xf32>
    %c64 = arith.constant 64 : index
    %c0_232 = arith.constant 0 : index
    %554 = vector.load %arg4[%c64, %c0_232] : memref<128x128xf32, #tpu.memory_space<vmem>>, vector<8x128xf32>
    %555 = arith.addf %553, %554 : vector<8x128xf32>
    %c0_233 = arith.constant 0 : index
    %c64_234 = arith.constant 64 : index
    %c0_235 = arith.constant 0 : index
    %556 = vector.load %arg5[%c0_233, %c64_234, %c0_235] : memref<1x128x128xf32, #tpu.memory_space<vmem>>, vector<1x8x128xf32>
    %557 = vector.shape_cast %556 : vector<1x8x128xf32> to vector<8x128xf32>
    %558 = vector.shape_cast %555 : vector<8x128xf32> to vector<1x8x128xf32>
    tpu.vector_store %arg5[%c0_233, %c64_234, %c0_235], %558 {strides = array<i32>} : memref<1x128x128xf32, #tpu.memory_space<vmem>>, vector<1x8x128xf32>,
    %c72_i32 = arith.constant 72 : i32
    %559 = arith.addi %0, %c72_i32 : i32
    %c0_i32_236 = arith.constant 0 : i32
    %560 = arith.addi %559, %c0_i32_236 : i32
    %561 = arith.index_cast %arg1 : i32 to index
    %562 = arith.index_cast %560 : i32 to index
    %563 = memref.load %arg2[%561, %562] : memref<2x384xi32, #tpu.memory_space<smem>>
    %564 = arith.index_cast %563 : i32 to index
    %c0_237 = arith.constant 0 : index
    %565 = vector.load %arg3[%564, %c0_237] : memref<1000x128xf32, #tpu.memory_space<vmem>>, vector<1x128xf32>
    %c72_i32_238 = arith.constant 72 : i32
    %566 = arith.addi %0, %c72_i32_238 : i32
    %c1_i32_239 = arith.constant 1 : i32
    %567 = arith.addi %566, %c1_i32_239 : i32
    %568 = arith.index_cast %arg1 : i32 to index
    %569 = arith.index_cast %567 : i32 to index
    %570 = memref.load %arg2[%568, %569] : memref<2x384xi32, #tpu.memory_space<smem>>
    %571 = arith.index_cast %570 : i32 to index
    %c0_240 = arith.constant 0 : index
    %572 = vector.load %arg3[%571, %c0_240] : memref<1000x128xf32, #tpu.memory_space<vmem>>, vector<1x128xf32>
    %c72_i32_241 = arith.constant 72 : i32
    %573 = arith.addi %0, %c72_i32_241 : i32
    %c2_i32_242 = arith.constant 2 : i32
    %574 = arith.addi %573, %c2_i32_242 : i32
    %575 = arith.index_cast %arg1 : i32 to index
    %576 = arith.index_cast %574 : i32 to index
    %577 = memref.load %arg2[%575, %576] : memref<2x384xi32, #tpu.memory_space<smem>>
    %578 = arith.index_cast %577 : i32 to index
    %c0_243 = arith.constant 0 : index
    %579 = vector.load %arg3[%578, %c0_243] : memref<1000x128xf32, #tpu.memory_space<vmem>>, vector<1x128xf32>
    %c72_i32_244 = arith.constant 72 : i32
    %580 = arith.addi %0, %c72_i32_244 : i32
    %c3_i32_245 = arith.constant 3 : i32
    %581 = arith.addi %580, %c3_i32_245 : i32
    %582 = arith.index_cast %arg1 : i32 to index
    %583 = arith.index_cast %581 : i32 to index
    %584 = memref.load %arg2[%582, %583] : memref<2x384xi32, #tpu.memory_space<smem>>
    %585 = arith.index_cast %584 : i32 to index
    %c0_246 = arith.constant 0 : index
    %586 = vector.load %arg3[%585, %c0_246] : memref<1000x128xf32, #tpu.memory_space<vmem>>, vector<1x128xf32>
    %c72_i32_247 = arith.constant 72 : i32
    %587 = arith.addi %0, %c72_i32_247 : i32
    %c4_i32_248 = arith.constant 4 : i32
    %588 = arith.addi %587, %c4_i32_248 : i32
    %589 = arith.index_cast %arg1 : i32 to index
    %590 = arith.index_cast %588 : i32 to index
    %591 = memref.load %arg2[%589, %590] : memref<2x384xi32, #tpu.memory_space<smem>>
    %592 = arith.index_cast %591 : i32 to index
    %c0_249 = arith.constant 0 : index
    %593 = vector.load %arg3[%592, %c0_249] : memref<1000x128xf32, #tpu.memory_space<vmem>>, vector<1x128xf32>
    %c72_i32_250 = arith.constant 72 : i32
    %594 = arith.addi %0, %c72_i32_250 : i32
    %c5_i32_251 = arith.constant 5 : i32
    %595 = arith.addi %594, %c5_i32_251 : i32
    %596 = arith.index_cast %arg1 : i32 to index
    %597 = arith.index_cast %595 : i32 to index
    %598 = memref.load %arg2[%596, %597] : memref<2x384xi32, #tpu.memory_space<smem>>
    %599 = arith.index_cast %598 : i32 to index
    %c0_252 = arith.constant 0 : index
    %600 = vector.load %arg3[%599, %c0_252] : memref<1000x128xf32, #tpu.memory_space<vmem>>, vector<1x128xf32>
    %c72_i32_253 = arith.constant 72 : i32
    %601 = arith.addi %0, %c72_i32_253 : i32
    %c6_i32_254 = arith.constant 6 : i32
    %602 = arith.addi %601, %c6_i32_254 : i32
    %603 = arith.index_cast %arg1 : i32 to index
    %604 = arith.index_cast %602 : i32 to index
    %605 = memref.load %arg2[%603, %604] : memref<2x384xi32, #tpu.memory_space<smem>>
    %606 = arith.index_cast %605 : i32 to index
    %c0_255 = arith.constant 0 : index
    %607 = vector.load %arg3[%606, %c0_255] : memref<1000x128xf32, #tpu.memory_space<vmem>>, vector<1x128xf32>
    %c72_i32_256 = arith.constant 72 : i32
    %608 = arith.addi %0, %c72_i32_256 : i32
    %c7_i32_257 = arith.constant 7 : i32
    %609 = arith.addi %608, %c7_i32_257 : i32
    %610 = arith.index_cast %arg1 : i32 to index
    %611 = arith.index_cast %609 : i32 to index
    %612 = memref.load %arg2[%610, %611] : memref<2x384xi32, #tpu.memory_space<smem>>
    %613 = arith.index_cast %612 : i32 to index
    %c0_258 = arith.constant 0 : index
    %614 = vector.load %arg3[%613, %c0_258] : memref<1000x128xf32, #tpu.memory_space<vmem>>, vector<1x128xf32>
    %615 = tpu.concatenate %565, %572, %579, %586, %593, %600, %607, %614 in 0 : vector<1x128xf32>, vector<1x128xf32>, vector<1x128xf32>, vector<1x128xf32>, vector<1x128xf32>, vector<1x128xf32>, vector<1x128xf32>, vector<1x128xf32> -> vector<8x128xf32>
    %c72 = arith.constant 72 : index
    %c0_259 = arith.constant 0 : index
    %616 = vector.load %arg4[%c72, %c0_259] : memref<128x128xf32, #tpu.memory_space<vmem>>, vector<8x128xf32>
    %617 = arith.addf %615, %616 : vector<8x128xf32>
    %c0_260 = arith.constant 0 : index
    %c72_261 = arith.constant 72 : index
    %c0_262 = arith.constant 0 : index
    %618 = vector.load %arg5[%c0_260, %c72_261, %c0_262] : memref<1x128x128xf32, #tpu.memory_space<vmem>>, vector<1x8x128xf32>
    %619 = vector.shape_cast %618 : vector<1x8x128xf32> to vector<8x128xf32>
    %620 = vector.shape_cast %617 : vector<8x128xf32> to vector<1x8x128xf32>
    tpu.vector_store %arg5[%c0_260, %c72_261, %c0_262], %620 {strides = array<i32>} : memref<1x128x128xf32, #tpu.memory_space<vmem>>, vector<1x8x128xf32>,
    %c80_i32 = arith.constant 80 : i32
    %621 = arith.addi %0, %c80_i32 : i32
    %c0_i32_263 = arith.constant 0 : i32
    %622 = arith.addi %621, %c0_i32_263 : i32
    %623 = arith.index_cast %arg1 : i32 to index
    %624 = arith.index_cast %622 : i32 to index
    %625 = memref.load %arg2[%623, %624] : memref<2x384xi32, #tpu.memory_space<smem>>
    %626 = arith.index_cast %625 : i32 to index
    %c0_264 = arith.constant 0 : index
    %627 = vector.load %arg3[%626, %c0_264] : memref<1000x128xf32, #tpu.memory_space<vmem>>, vector<1x128xf32>
    %c80_i32_265 = arith.constant 80 : i32
    %628 = arith.addi %0, %c80_i32_265 : i32
    %c1_i32_266 = arith.constant 1 : i32
    %629 = arith.addi %628, %c1_i32_266 : i32
    %630 = arith.index_cast %arg1 : i32 to index
    %631 = arith.index_cast %629 : i32 to index
    %632 = memref.load %arg2[%630, %631] : memref<2x384xi32, #tpu.memory_space<smem>>
    %633 = arith.index_cast %632 : i32 to index
    %c0_267 = arith.constant 0 : index
    %634 = vector.load %arg3[%633, %c0_267] : memref<1000x128xf32, #tpu.memory_space<vmem>>, vector<1x128xf32>
    %c80_i32_268 = arith.constant 80 : i32
    %635 = arith.addi %0, %c80_i32_268 : i32
    %c2_i32_269 = arith.constant 2 : i32
    %636 = arith.addi %635, %c2_i32_269 : i32
    %637 = arith.index_cast %arg1 : i32 to index
    %638 = arith.index_cast %636 : i32 to index
    %639 = memref.load %arg2[%637, %638] : memref<2x384xi32, #tpu.memory_space<smem>>
    %640 = arith.index_cast %639 : i32 to index
    %c0_270 = arith.constant 0 : index
    %641 = vector.load %arg3[%640, %c0_270] : memref<1000x128xf32, #tpu.memory_space<vmem>>, vector<1x128xf32>
    %c80_i32_271 = arith.constant 80 : i32
    %642 = arith.addi %0, %c80_i32_271 : i32
    %c3_i32_272 = arith.constant 3 : i32
    %643 = arith.addi %642, %c3_i32_272 : i32
    %644 = arith.index_cast %arg1 : i32 to index
    %645 = arith.index_cast %643 : i32 to index
    %646 = memref.load %arg2[%644, %645] : memref<2x384xi32, #tpu.memory_space<smem>>
    %647 = arith.index_cast %646 : i32 to index
    %c0_273 = arith.constant 0 : index
    %648 = vector.load %arg3[%647, %c0_273] : memref<1000x128xf32, #tpu.memory_space<vmem>>, vector<1x128xf32>
    %c80_i32_274 = arith.constant 80 : i32
    %649 = arith.addi %0, %c80_i32_274 : i32
    %c4_i32_275 = arith.constant 4 : i32
    %650 = arith.addi %649, %c4_i32_275 : i32
    %651 = arith.index_cast %arg1 : i32 to index
    %652 = arith.index_cast %650 : i32 to index
    %653 = memref.load %arg2[%651, %652] : memref<2x384xi32, #tpu.memory_space<smem>>
    %654 = arith.index_cast %653 : i32 to index
    %c0_276 = arith.constant 0 : index
    %655 = vector.load %arg3[%654, %c0_276] : memref<1000x128xf32, #tpu.memory_space<vmem>>, vector<1x128xf32>
    %c80_i32_277 = arith.constant 80 : i32
    %656 = arith.addi %0, %c80_i32_277 : i32
    %c5_i32_278 = arith.constant 5 : i32
    %657 = arith.addi %656, %c5_i32_278 : i32
    %658 = arith.index_cast %arg1 : i32 to index
    %659 = arith.index_cast %657 : i32 to index
    %660 = memref.load %arg2[%658, %659] : memref<2x384xi32, #tpu.memory_space<smem>>
    %661 = arith.index_cast %660 : i32 to index
    %c0_279 = arith.constant 0 : index
    %662 = vector.load %arg3[%661, %c0_279] : memref<1000x128xf32, #tpu.memory_space<vmem>>, vector<1x128xf32>
    %c80_i32_280 = arith.constant 80 : i32
    %663 = arith.addi %0, %c80_i32_280 : i32
    %c6_i32_281 = arith.constant 6 : i32
    %664 = arith.addi %663, %c6_i32_281 : i32
    %665 = arith.index_cast %arg1 : i32 to index
    %666 = arith.index_cast %664 : i32 to index
    %667 = memref.load %arg2[%665, %666] : memref<2x384xi32, #tpu.memory_space<smem>>
    %668 = arith.index_cast %667 : i32 to index
    %c0_282 = arith.constant 0 : index
    %669 = vector.load %arg3[%668, %c0_282] : memref<1000x128xf32, #tpu.memory_space<vmem>>, vector<1x128xf32>
    %c80_i32_283 = arith.constant 80 : i32
    %670 = arith.addi %0, %c80_i32_283 : i32
    %c7_i32_284 = arith.constant 7 : i32
    %671 = arith.addi %670, %c7_i32_284 : i32
    %672 = arith.index_cast %arg1 : i32 to index
    %673 = arith.index_cast %671 : i32 to index
    %674 = memref.load %arg2[%672, %673] : memref<2x384xi32, #tpu.memory_space<smem>>
    %675 = arith.index_cast %674 : i32 to index
    %c0_285 = arith.constant 0 : index
    %676 = vector.load %arg3[%675, %c0_285] : memref<1000x128xf32, #tpu.memory_space<vmem>>, vector<1x128xf32>
    %677 = tpu.concatenate %627, %634, %641, %648, %655, %662, %669, %676 in 0 : vector<1x128xf32>, vector<1x128xf32>, vector<1x128xf32>, vector<1x128xf32>, vector<1x128xf32>, vector<1x128xf32>, vector<1x128xf32>, vector<1x128xf32> -> vector<8x128xf32>
    %c80 = arith.constant 80 : index
    %c0_286 = arith.constant 0 : index
    %678 = vector.load %arg4[%c80, %c0_286] : memref<128x128xf32, #tpu.memory_space<vmem>>, vector<8x128xf32>
    %679 = arith.addf %677, %678 : vector<8x128xf32>
    %c0_287 = arith.constant 0 : index
    %c80_288 = arith.constant 80 : index
    %c0_289 = arith.constant 0 : index
    %680 = vector.load %arg5[%c0_287, %c80_288, %c0_289] : memref<1x128x128xf32, #tpu.memory_space<vmem>>, vector<1x8x128xf32>
    %681 = vector.shape_cast %680 : vector<1x8x128xf32> to vector<8x128xf32>
    %682 = vector.shape_cast %679 : vector<8x128xf32> to vector<1x8x128xf32>
    tpu.vector_store %arg5[%c0_287, %c80_288, %c0_289], %682 {strides = array<i32>} : memref<1x128x128xf32, #tpu.memory_space<vmem>>, vector<1x8x128xf32>,
    %c88_i32 = arith.constant 88 : i32
    %683 = arith.addi %0, %c88_i32 : i32
    %c0_i32_290 = arith.constant 0 : i32
    %684 = arith.addi %683, %c0_i32_290 : i32
    %685 = arith.index_cast %arg1 : i32 to index
    %686 = arith.index_cast %684 : i32 to index
    %687 = memref.load %arg2[%685, %686] : memref<2x384xi32, #tpu.memory_space<smem>>
    %688 = arith.index_cast %687 : i32 to index
    %c0_291 = arith.constant 0 : index
    %689 = vector.load %arg3[%688, %c0_291] : memref<1000x128xf32, #tpu.memory_space<vmem>>, vector<1x128xf32>
    %c88_i32_292 = arith.constant 88 : i32
    %690 = arith.addi %0, %c88_i32_292 : i32
    %c1_i32_293 = arith.constant 1 : i32
    %691 = arith.addi %690, %c1_i32_293 : i32
    %692 = arith.index_cast %arg1 : i32 to index
    %693 = arith.index_cast %691 : i32 to index
    %694 = memref.load %arg2[%692, %693] : memref<2x384xi32, #tpu.memory_space<smem>>
    %695 = arith.index_cast %694 : i32 to index
    %c0_294 = arith.constant 0 : index
    %696 = vector.load %arg3[%695, %c0_294] : memref<1000x128xf32, #tpu.memory_space<vmem>>, vector<1x128xf32>
    %c88_i32_295 = arith.constant 88 : i32
    %697 = arith.addi %0, %c88_i32_295 : i32
    %c2_i32_296 = arith.constant 2 : i32
    %698 = arith.addi %697, %c2_i32_296 : i32
    %699 = arith.index_cast %arg1 : i32 to index
    %700 = arith.index_cast %698 : i32 to index
    %701 = memref.load %arg2[%699, %700] : memref<2x384xi32, #tpu.memory_space<smem>>
    %702 = arith.index_cast %701 : i32 to index
    %c0_297 = arith.constant 0 : index
    %703 = vector.load %arg3[%702, %c0_297] : memref<1000x128xf32, #tpu.memory_space<vmem>>, vector<1x128xf32>
    %c88_i32_298 = arith.constant 88 : i32
    %704 = arith.addi %0, %c88_i32_298 : i32
    %c3_i32_299 = arith.constant 3 : i32
    %705 = arith.addi %704, %c3_i32_299 : i32
    %706 = arith.index_cast %arg1 : i32 to index
    %707 = arith.index_cast %705 : i32 to index
    %708 = memref.load %arg2[%706, %707] : memref<2x384xi32, #tpu.memory_space<smem>>
    %709 = arith.index_cast %708 : i32 to index
    %c0_300 = arith.constant 0 : index
    %710 = vector.load %arg3[%709, %c0_300] : memref<1000x128xf32, #tpu.memory_space<vmem>>, vector<1x128xf32>
    %c88_i32_301 = arith.constant 88 : i32
    %711 = arith.addi %0, %c88_i32_301 : i32
    %c4_i32_302 = arith.constant 4 : i32
    %712 = arith.addi %711, %c4_i32_302 : i32
    %713 = arith.index_cast %arg1 : i32 to index
    %714 = arith.index_cast %712 : i32 to index
    %715 = memref.load %arg2[%713, %714] : memref<2x384xi32, #tpu.memory_space<smem>>
    %716 = arith.index_cast %715 : i32 to index
    %c0_303 = arith.constant 0 : index
    %717 = vector.load %arg3[%716, %c0_303] : memref<1000x128xf32, #tpu.memory_space<vmem>>, vector<1x128xf32>
    %c88_i32_304 = arith.constant 88 : i32
    %718 = arith.addi %0, %c88_i32_304 : i32
    %c5_i32_305 = arith.constant 5 : i32
    %719 = arith.addi %718, %c5_i32_305 : i32
    %720 = arith.index_cast %arg1 : i32 to index
    %721 = arith.index_cast %719 : i32 to index
    %722 = memref.load %arg2[%720, %721] : memref<2x384xi32, #tpu.memory_space<smem>>
    %723 = arith.index_cast %722 : i32 to index
    %c0_306 = arith.constant 0 : index
    %724 = vector.load %arg3[%723, %c0_306] : memref<1000x128xf32, #tpu.memory_space<vmem>>, vector<1x128xf32>
    %c88_i32_307 = arith.constant 88 : i32
    %725 = arith.addi %0, %c88_i32_307 : i32
    %c6_i32_308 = arith.constant 6 : i32
    %726 = arith.addi %725, %c6_i32_308 : i32
    %727 = arith.index_cast %arg1 : i32 to index
    %728 = arith.index_cast %726 : i32 to index
    %729 = memref.load %arg2[%727, %728] : memref<2x384xi32, #tpu.memory_space<smem>>
    %730 = arith.index_cast %729 : i32 to index
    %c0_309 = arith.constant 0 : index
    %731 = vector.load %arg3[%730, %c0_309] : memref<1000x128xf32, #tpu.memory_space<vmem>>, vector<1x128xf32>
    %c88_i32_310 = arith.constant 88 : i32
    %732 = arith.addi %0, %c88_i32_310 : i32
    %c7_i32_311 = arith.constant 7 : i32
    %733 = arith.addi %732, %c7_i32_311 : i32
    %734 = arith.index_cast %arg1 : i32 to index
    %735 = arith.index_cast %733 : i32 to index
    %736 = memref.load %arg2[%734, %735] : memref<2x384xi32, #tpu.memory_space<smem>>
    %737 = arith.index_cast %736 : i32 to index
    %c0_312 = arith.constant 0 : index
    %738 = vector.load %arg3[%737, %c0_312] : memref<1000x128xf32, #tpu.memory_space<vmem>>, vector<1x128xf32>
    %739 = tpu.concatenate %689, %696, %703, %710, %717, %724, %731, %738 in 0 : vector<1x128xf32>, vector<1x128xf32>, vector<1x128xf32>, vector<1x128xf32>, vector<1x128xf32>, vector<1x128xf32>, vector<1x128xf32>, vector<1x128xf32> -> vector<8x128xf32>
    %c88 = arith.constant 88 : index
    %c0_313 = arith.constant 0 : index
    %740 = vector.load %arg4[%c88, %c0_313] : memref<128x128xf32, #tpu.memory_space<vmem>>, vector<8x128xf32>
    %741 = arith.addf %739, %740 : vector<8x128xf32>
    %c0_314 = arith.constant 0 : index
    %c88_315 = arith.constant 88 : index
    %c0_316 = arith.constant 0 : index
    %742 = vector.load %arg5[%c0_314, %c88_315, %c0_316] : memref<1x128x128xf32, #tpu.memory_space<vmem>>, vector<1x8x128xf32>
    %743 = vector.shape_cast %742 : vector<1x8x128xf32> to vector<8x128xf32>
    %744 = vector.shape_cast %741 : vector<8x128xf32> to vector<1x8x128xf32>
    tpu.vector_store %arg5[%c0_314, %c88_315, %c0_316], %744 {strides = array<i32>} : memref<1x128x128xf32, #tpu.memory_space<vmem>>, vector<1x8x128xf32>,
    %c96_i32 = arith.constant 96 : i32
    %745 = arith.addi %0, %c96_i32 : i32
    %c0_i32_317 = arith.constant 0 : i32
    %746 = arith.addi %745, %c0_i32_317 : i32
    %747 = arith.index_cast %arg1 : i32 to index
    %748 = arith.index_cast %746 : i32 to index
    %749 = memref.load %arg2[%747, %748] : memref<2x384xi32, #tpu.memory_space<smem>>
    %750 = arith.index_cast %749 : i32 to index
    %c0_318 = arith.constant 0 : index
    %751 = vector.load %arg3[%750, %c0_318] : memref<1000x128xf32, #tpu.memory_space<vmem>>, vector<1x128xf32>
    %c96_i32_319 = arith.constant 96 : i32
    %752 = arith.addi %0, %c96_i32_319 : i32
    %c1_i32_320 = arith.constant 1 : i32
    %753 = arith.addi %752, %c1_i32_320 : i32
    %754 = arith.index_cast %arg1 : i32 to index
    %755 = arith.index_cast %753 : i32 to index
    %756 = memref.load %arg2[%754, %755] : memref<2x384xi32, #tpu.memory_space<smem>>
    %757 = arith.index_cast %756 : i32 to index
    %c0_321 = arith.constant 0 : index
    %758 = vector.load %arg3[%757, %c0_321] : memref<1000x128xf32, #tpu.memory_space<vmem>>, vector<1x128xf32>
    %c96_i32_322 = arith.constant 96 : i32
    %759 = arith.addi %0, %c96_i32_322 : i32
    %c2_i32_323 = arith.constant 2 : i32
    %760 = arith.addi %759, %c2_i32_323 : i32
    %761 = arith.index_cast %arg1 : i32 to index
    %762 = arith.index_cast %760 : i32 to index
    %763 = memref.load %arg2[%761, %762] : memref<2x384xi32, #tpu.memory_space<smem>>
    %764 = arith.index_cast %763 : i32 to index
    %c0_324 = arith.constant 0 : index
    %765 = vector.load %arg3[%764, %c0_324] : memref<1000x128xf32, #tpu.memory_space<vmem>>, vector<1x128xf32>
    %c96_i32_325 = arith.constant 96 : i32
    %766 = arith.addi %0, %c96_i32_325 : i32
    %c3_i32_326 = arith.constant 3 : i32
    %767 = arith.addi %766, %c3_i32_326 : i32
    %768 = arith.index_cast %arg1 : i32 to index
    %769 = arith.index_cast %767 : i32 to index
    %770 = memref.load %arg2[%768, %769] : memref<2x384xi32, #tpu.memory_space<smem>>
    %771 = arith.index_cast %770 : i32 to index
    %c0_327 = arith.constant 0 : index
    %772 = vector.load %arg3[%771, %c0_327] : memref<1000x128xf32, #tpu.memory_space<vmem>>, vector<1x128xf32>
    %c96_i32_328 = arith.constant 96 : i32
    %773 = arith.addi %0, %c96_i32_328 : i32
    %c4_i32_329 = arith.constant 4 : i32
    %774 = arith.addi %773, %c4_i32_329 : i32
    %775 = arith.index_cast %arg1 : i32 to index
    %776 = arith.index_cast %774 : i32 to index
    %777 = memref.load %arg2[%775, %776] : memref<2x384xi32, #tpu.memory_space<smem>>
    %778 = arith.index_cast %777 : i32 to index
    %c0_330 = arith.constant 0 : index
    %779 = vector.load %arg3[%778, %c0_330] : memref<1000x128xf32, #tpu.memory_space<vmem>>, vector<1x128xf32>
    %c96_i32_331 = arith.constant 96 : i32
    %780 = arith.addi %0, %c96_i32_331 : i32
    %c5_i32_332 = arith.constant 5 : i32
    %781 = arith.addi %780, %c5_i32_332 : i32
    %782 = arith.index_cast %arg1 : i32 to index
    %783 = arith.index_cast %781 : i32 to index
    %784 = memref.load %arg2[%782, %783] : memref<2x384xi32, #tpu.memory_space<smem>>
    %785 = arith.index_cast %784 : i32 to index
    %c0_333 = arith.constant 0 : index
    %786 = vector.load %arg3[%785, %c0_333] : memref<1000x128xf32, #tpu.memory_space<vmem>>, vector<1x128xf32>
    %c96_i32_334 = arith.constant 96 : i32
    %787 = arith.addi %0, %c96_i32_334 : i32
    %c6_i32_335 = arith.constant 6 : i32
    %788 = arith.addi %787, %c6_i32_335 : i32
    %789 = arith.index_cast %arg1 : i32 to index
    %790 = arith.index_cast %788 : i32 to index
    %791 = memref.load %arg2[%789, %790] : memref<2x384xi32, #tpu.memory_space<smem>>
    %792 = arith.index_cast %791 : i32 to index
    %c0_336 = arith.constant 0 : index
    %793 = vector.load %arg3[%792, %c0_336] : memref<1000x128xf32, #tpu.memory_space<vmem>>, vector<1x128xf32>
    %c96_i32_337 = arith.constant 96 : i32
    %794 = arith.addi %0, %c96_i32_337 : i32
    %c7_i32_338 = arith.constant 7 : i32
    %795 = arith.addi %794, %c7_i32_338 : i32
    %796 = arith.index_cast %arg1 : i32 to index
    %797 = arith.index_cast %795 : i32 to index
    %798 = memref.load %arg2[%796, %797] : memref<2x384xi32, #tpu.memory_space<smem>>
    %799 = arith.index_cast %798 : i32 to index
    %c0_339 = arith.constant 0 : index
    %800 = vector.load %arg3[%799, %c0_339] : memref<1000x128xf32, #tpu.memory_space<vmem>>, vector<1x128xf32>
    %801 = tpu.concatenate %751, %758, %765, %772, %779, %786, %793, %800 in 0 : vector<1x128xf32>, vector<1x128xf32>, vector<1x128xf32>, vector<1x128xf32>, vector<1x128xf32>, vector<1x128xf32>, vector<1x128xf32>, vector<1x128xf32> -> vector<8x128xf32>
    %c96 = arith.constant 96 : index
    %c0_340 = arith.constant 0 : index
    %802 = vector.load %arg4[%c96, %c0_340] : memref<128x128xf32, #tpu.memory_space<vmem>>, vector<8x128xf32>
    %803 = arith.addf %801, %802 : vector<8x128xf32>
    %c0_341 = arith.constant 0 : index
    %c96_342 = arith.constant 96 : index
    %c0_343 = arith.constant 0 : index
    %804 = vector.load %arg5[%c0_341, %c96_342, %c0_343] : memref<1x128x128xf32, #tpu.memory_space<vmem>>, vector<1x8x128xf32>
    %805 = vector.shape_cast %804 : vector<1x8x128xf32> to vector<8x128xf32>
    %806 = vector.shape_cast %803 : vector<8x128xf32> to vector<1x8x128xf32>
    tpu.vector_store %arg5[%c0_341, %c96_342, %c0_343], %806 {strides = array<i32>} : memref<1x128x128xf32, #tpu.memory_space<vmem>>, vector<1x8x128xf32>,
    %c104_i32 = arith.constant 104 : i32
    %807 = arith.addi %0, %c104_i32 : i32
    %c0_i32_344 = arith.constant 0 : i32
    %808 = arith.addi %807, %c0_i32_344 : i32
    %809 = arith.index_cast %arg1 : i32 to index
    %810 = arith.index_cast %808 : i32 to index
    %811 = memref.load %arg2[%809, %810] : memref<2x384xi32, #tpu.memory_space<smem>>
    %812 = arith.index_cast %811 : i32 to index
    %c0_345 = arith.constant 0 : index
    %813 = vector.load %arg3[%812, %c0_345] : memref<1000x128xf32, #tpu.memory_space<vmem>>, vector<1x128xf32>
    %c104_i32_346 = arith.constant 104 : i32
    %814 = arith.addi %0, %c104_i32_346 : i32
    %c1_i32_347 = arith.constant 1 : i32
    %815 = arith.addi %814, %c1_i32_347 : i32
    %816 = arith.index_cast %arg1 : i32 to index
    %817 = arith.index_cast %815 : i32 to index
    %818 = memref.load %arg2[%816, %817] : memref<2x384xi32, #tpu.memory_space<smem>>
    %819 = arith.index_cast %818 : i32 to index
    %c0_348 = arith.constant 0 : index
    %820 = vector.load %arg3[%819, %c0_348] : memref<1000x128xf32, #tpu.memory_space<vmem>>, vector<1x128xf32>
    %c104_i32_349 = arith.constant 104 : i32
    %821 = arith.addi %0, %c104_i32_349 : i32
    %c2_i32_350 = arith.constant 2 : i32
    %822 = arith.addi %821, %c2_i32_350 : i32
    %823 = arith.index_cast %arg1 : i32 to index
    %824 = arith.index_cast %822 : i32 to index
    %825 = memref.load %arg2[%823, %824] : memref<2x384xi32, #tpu.memory_space<smem>>
    %826 = arith.index_cast %825 : i32 to index
    %c0_351 = arith.constant 0 : index
    %827 = vector.load %arg3[%826, %c0_351] : memref<1000x128xf32, #tpu.memory_space<vmem>>, vector<1x128xf32>
    %c104_i32_352 = arith.constant 104 : i32
    %828 = arith.addi %0, %c104_i32_352 : i32
    %c3_i32_353 = arith.constant 3 : i32
    %829 = arith.addi %828, %c3_i32_353 : i32
    %830 = arith.index_cast %arg1 : i32 to index
    %831 = arith.index_cast %829 : i32 to index
    %832 = memref.load %arg2[%830, %831] : memref<2x384xi32, #tpu.memory_space<smem>>
    %833 = arith.index_cast %832 : i32 to index
    %c0_354 = arith.constant 0 : index
    %834 = vector.load %arg3[%833, %c0_354] : memref<1000x128xf32, #tpu.memory_space<vmem>>, vector<1x128xf32>
    %c104_i32_355 = arith.constant 104 : i32
    %835 = arith.addi %0, %c104_i32_355 : i32
    %c4_i32_356 = arith.constant 4 : i32
    %836 = arith.addi %835, %c4_i32_356 : i32
    %837 = arith.index_cast %arg1 : i32 to index
    %838 = arith.index_cast %836 : i32 to index
    %839 = memref.load %arg2[%837, %838] : memref<2x384xi32, #tpu.memory_space<smem>>
    %840 = arith.index_cast %839 : i32 to index
    %c0_357 = arith.constant 0 : index
    %841 = vector.load %arg3[%840, %c0_357] : memref<1000x128xf32, #tpu.memory_space<vmem>>, vector<1x128xf32>
    %c104_i32_358 = arith.constant 104 : i32
    %842 = arith.addi %0, %c104_i32_358 : i32
    %c5_i32_359 = arith.constant 5 : i32
    %843 = arith.addi %842, %c5_i32_359 : i32
    %844 = arith.index_cast %arg1 : i32 to index
    %845 = arith.index_cast %843 : i32 to index
    %846 = memref.load %arg2[%844, %845] : memref<2x384xi32, #tpu.memory_space<smem>>
    %847 = arith.index_cast %846 : i32 to index
    %c0_360 = arith.constant 0 : index
    %848 = vector.load %arg3[%847, %c0_360] : memref<1000x128xf32, #tpu.memory_space<vmem>>, vector<1x128xf32>
    %c104_i32_361 = arith.constant 104 : i32
    %849 = arith.addi %0, %c104_i32_361 : i32
    %c6_i32_362 = arith.constant 6 : i32
    %850 = arith.addi %849, %c6_i32_362 : i32
    %851 = arith.index_cast %arg1 : i32 to index
    %852 = arith.index_cast %850 : i32 to index
    %853 = memref.load %arg2[%851, %852] : memref<2x384xi32, #tpu.memory_space<smem>>
    %854 = arith.index_cast %853 : i32 to index
    %c0_363 = arith.constant 0 : index
    %855 = vector.load %arg3[%854, %c0_363] : memref<1000x128xf32, #tpu.memory_space<vmem>>, vector<1x128xf32>
    %c104_i32_364 = arith.constant 104 : i32
    %856 = arith.addi %0, %c104_i32_364 : i32
    %c7_i32_365 = arith.constant 7 : i32
    %857 = arith.addi %856, %c7_i32_365 : i32
    %858 = arith.index_cast %arg1 : i32 to index
    %859 = arith.index_cast %857 : i32 to index
    %860 = memref.load %arg2[%858, %859] : memref<2x384xi32, #tpu.memory_space<smem>>
    %861 = arith.index_cast %860 : i32 to index
    %c0_366 = arith.constant 0 : index
    %862 = vector.load %arg3[%861, %c0_366] : memref<1000x128xf32, #tpu.memory_space<vmem>>, vector<1x128xf32>
    %863 = tpu.concatenate %813, %820, %827, %834, %841, %848, %855, %862 in 0 : vector<1x128xf32>, vector<1x128xf32>, vector<1x128xf32>, vector<1x128xf32>, vector<1x128xf32>, vector<1x128xf32>, vector<1x128xf32>, vector<1x128xf32> -> vector<8x128xf32>
    %c104 = arith.constant 104 : index
    %c0_367 = arith.constant 0 : index
    %864 = vector.load %arg4[%c104, %c0_367] : memref<128x128xf32, #tpu.memory_space<vmem>>, vector<8x128xf32>
    %865 = arith.addf %863, %864 : vector<8x128xf32>
    %c0_368 = arith.constant 0 : index
    %c104_369 = arith.constant 104 : index
    %c0_370 = arith.constant 0 : index
    %866 = vector.load %arg5[%c0_368, %c104_369, %c0_370] : memref<1x128x128xf32, #tpu.memory_space<vmem>>, vector<1x8x128xf32>
    %867 = vector.shape_cast %866 : vector<1x8x128xf32> to vector<8x128xf32>
    %868 = vector.shape_cast %865 : vector<8x128xf32> to vector<1x8x128xf32>
    tpu.vector_store %arg5[%c0_368, %c104_369, %c0_370], %868 {strides = array<i32>} : memref<1x128x128xf32, #tpu.memory_space<vmem>>, vector<1x8x128xf32>,
    %c112_i32 = arith.constant 112 : i32
    %869 = arith.addi %0, %c112_i32 : i32
    %c0_i32_371 = arith.constant 0 : i32
    %870 = arith.addi %869, %c0_i32_371 : i32
    %871 = arith.index_cast %arg1 : i32 to index
    %872 = arith.index_cast %870 : i32 to index
    %873 = memref.load %arg2[%871, %872] : memref<2x384xi32, #tpu.memory_space<smem>>
    %874 = arith.index_cast %873 : i32 to index
    %c0_372 = arith.constant 0 : index
    %875 = vector.load %arg3[%874, %c0_372] : memref<1000x128xf32, #tpu.memory_space<vmem>>, vector<1x128xf32>
    %c112_i32_373 = arith.constant 112 : i32
    %876 = arith.addi %0, %c112_i32_373 : i32
    %c1_i32_374 = arith.constant 1 : i32
    %877 = arith.addi %876, %c1_i32_374 : i32
    %878 = arith.index_cast %arg1 : i32 to index
    %879 = arith.index_cast %877 : i32 to index
    %880 = memref.load %arg2[%878, %879] : memref<2x384xi32, #tpu.memory_space<smem>>
    %881 = arith.index_cast %880 : i32 to index
    %c0_375 = arith.constant 0 : index
    %882 = vector.load %arg3[%881, %c0_375] : memref<1000x128xf32, #tpu.memory_space<vmem>>, vector<1x128xf32>
    %c112_i32_376 = arith.constant 112 : i32
    %883 = arith.addi %0, %c112_i32_376 : i32
    %c2_i32_377 = arith.constant 2 : i32
    %884 = arith.addi %883, %c2_i32_377 : i32
    %885 = arith.index_cast %arg1 : i32 to index
    %886 = arith.index_cast %884 : i32 to index
    %887 = memref.load %arg2[%885, %886] : memref<2x384xi32, #tpu.memory_space<smem>>
    %888 = arith.index_cast %887 : i32 to index
    %c0_378 = arith.constant 0 : index
    %889 = vector.load %arg3[%888, %c0_378] : memref<1000x128xf32, #tpu.memory_space<vmem>>, vector<1x128xf32>
    %c112_i32_379 = arith.constant 112 : i32
    %890 = arith.addi %0, %c112_i32_379 : i32
    %c3_i32_380 = arith.constant 3 : i32
    %891 = arith.addi %890, %c3_i32_380 : i32
    %892 = arith.index_cast %arg1 : i32 to index
    %893 = arith.index_cast %891 : i32 to index
    %894 = memref.load %arg2[%892, %893] : memref<2x384xi32, #tpu.memory_space<smem>>
    %895 = arith.index_cast %894 : i32 to index
    %c0_381 = arith.constant 0 : index
    %896 = vector.load %arg3[%895, %c0_381] : memref<1000x128xf32, #tpu.memory_space<vmem>>, vector<1x128xf32>
    %c112_i32_382 = arith.constant 112 : i32
    %897 = arith.addi %0, %c112_i32_382 : i32
    %c4_i32_383 = arith.constant 4 : i32
    %898 = arith.addi %897, %c4_i32_383 : i32
    %899 = arith.index_cast %arg1 : i32 to index
    %900 = arith.index_cast %898 : i32 to index
    %901 = memref.load %arg2[%899, %900] : memref<2x384xi32, #tpu.memory_space<smem>>
    %902 = arith.index_cast %901 : i32 to index
    %c0_384 = arith.constant 0 : index
    %903 = vector.load %arg3[%902, %c0_384] : memref<1000x128xf32, #tpu.memory_space<vmem>>, vector<1x128xf32>
    %c112_i32_385 = arith.constant 112 : i32
    %904 = arith.addi %0, %c112_i32_385 : i32
    %c5_i32_386 = arith.constant 5 : i32
    %905 = arith.addi %904, %c5_i32_386 : i32
    %906 = arith.index_cast %arg1 : i32 to index
    %907 = arith.index_cast %905 : i32 to index
    %908 = memref.load %arg2[%906, %907] : memref<2x384xi32, #tpu.memory_space<smem>>
    %909 = arith.index_cast %908 : i32 to index
    %c0_387 = arith.constant 0 : index
    %910 = vector.load %arg3[%909, %c0_387] : memref<1000x128xf32, #tpu.memory_space<vmem>>, vector<1x128xf32>
    %c112_i32_388 = arith.constant 112 : i32
    %911 = arith.addi %0, %c112_i32_388 : i32
    %c6_i32_389 = arith.constant 6 : i32
    %912 = arith.addi %911, %c6_i32_389 : i32
    %913 = arith.index_cast %arg1 : i32 to index
    %914 = arith.index_cast %912 : i32 to index
    %915 = memref.load %arg2[%913, %914] : memref<2x384xi32, #tpu.memory_space<smem>>
    %916 = arith.index_cast %915 : i32 to index
    %c0_390 = arith.constant 0 : index
    %917 = vector.load %arg3[%916, %c0_390] : memref<1000x128xf32, #tpu.memory_space<vmem>>, vector<1x128xf32>
    %c112_i32_391 = arith.constant 112 : i32
    %918 = arith.addi %0, %c112_i32_391 : i32
    %c7_i32_392 = arith.constant 7 : i32
    %919 = arith.addi %918, %c7_i32_392 : i32
    %920 = arith.index_cast %arg1 : i32 to index
    %921 = arith.index_cast %919 : i32 to index
    %922 = memref.load %arg2[%920, %921] : memref<2x384xi32, #tpu.memory_space<smem>>
    %923 = arith.index_cast %922 : i32 to index
    %c0_393 = arith.constant 0 : index
    %924 = vector.load %arg3[%923, %c0_393] : memref<1000x128xf32, #tpu.memory_space<vmem>>, vector<1x128xf32>
    %925 = tpu.concatenate %875, %882, %889, %896, %903, %910, %917, %924 in 0 : vector<1x128xf32>, vector<1x128xf32>, vector<1x128xf32>, vector<1x128xf32>, vector<1x128xf32>, vector<1x128xf32>, vector<1x128xf32>, vector<1x128xf32> -> vector<8x128xf32>
    %c112 = arith.constant 112 : index
    %c0_394 = arith.constant 0 : index
    %926 = vector.load %arg4[%c112, %c0_394] : memref<128x128xf32, #tpu.memory_space<vmem>>, vector<8x128xf32>
    %927 = arith.addf %925, %926 : vector<8x128xf32>
    %c0_395 = arith.constant 0 : index
    %c112_396 = arith.constant 112 : index
    %c0_397 = arith.constant 0 : index
    %928 = vector.load %arg5[%c0_395, %c112_396, %c0_397] : memref<1x128x128xf32, #tpu.memory_space<vmem>>, vector<1x8x128xf32>
    %929 = vector.shape_cast %928 : vector<1x8x128xf32> to vector<8x128xf32>
    %930 = vector.shape_cast %927 : vector<8x128xf32> to vector<1x8x128xf32>
    tpu.vector_store %arg5[%c0_395, %c112_396, %c0_397], %930 {strides = array<i32>} : memref<1x128x128xf32, #tpu.memory_space<vmem>>, vector<1x8x128xf32>,
    %c120_i32 = arith.constant 120 : i32
    %931 = arith.addi %0, %c120_i32 : i32
    %c0_i32_398 = arith.constant 0 : i32
    %932 = arith.addi %931, %c0_i32_398 : i32
    %933 = arith.index_cast %arg1 : i32 to index
    %934 = arith.index_cast %932 : i32 to index
    %935 = memref.load %arg2[%933, %934] : memref<2x384xi32, #tpu.memory_space<smem>>
    %936 = arith.index_cast %935 : i32 to index
    %c0_399 = arith.constant 0 : index
    %937 = vector.load %arg3[%936, %c0_399] : memref<1000x128xf32, #tpu.memory_space<vmem>>, vector<1x128xf32>
    %c120_i32_400 = arith.constant 120 : i32
    %938 = arith.addi %0, %c120_i32_400 : i32
    %c1_i32_401 = arith.constant 1 : i32
    %939 = arith.addi %938, %c1_i32_401 : i32
    %940 = arith.index_cast %arg1 : i32 to index
    %941 = arith.index_cast %939 : i32 to index
    %942 = memref.load %arg2[%940, %941] : memref<2x384xi32, #tpu.memory_space<smem>>
    %943 = arith.index_cast %942 : i32 to index
    %c0_402 = arith.constant 0 : index
    %944 = vector.load %arg3[%943, %c0_402] : memref<1000x128xf32, #tpu.memory_space<vmem>>, vector<1x128xf32>
    %c120_i32_403 = arith.constant 120 : i32
    %945 = arith.addi %0, %c120_i32_403 : i32
    %c2_i32_404 = arith.constant 2 : i32
    %946 = arith.addi %945, %c2_i32_404 : i32
    %947 = arith.index_cast %arg1 : i32 to index
    %948 = arith.index_cast %946 : i32 to index
    %949 = memref.load %arg2[%947, %948] : memref<2x384xi32, #tpu.memory_space<smem>>
    %950 = arith.index_cast %949 : i32 to index
    %c0_405 = arith.constant 0 : index
    %951 = vector.load %arg3[%950, %c0_405] : memref<1000x128xf32, #tpu.memory_space<vmem>>, vector<1x128xf32>
    %c120_i32_406 = arith.constant 120 : i32
    %952 = arith.addi %0, %c120_i32_406 : i32
    %c3_i32_407 = arith.constant 3 : i32
    %953 = arith.addi %952, %c3_i32_407 : i32
    %954 = arith.index_cast %arg1 : i32 to index
    %955 = arith.index_cast %953 : i32 to index
    %956 = memref.load %arg2[%954, %955] : memref<2x384xi32, #tpu.memory_space<smem>>
    %957 = arith.index_cast %956 : i32 to index
    %c0_408 = arith.constant 0 : index
    %958 = vector.load %arg3[%957, %c0_408] : memref<1000x128xf32, #tpu.memory_space<vmem>>, vector<1x128xf32>
    %c120_i32_409 = arith.constant 120 : i32
    %959 = arith.addi %0, %c120_i32_409 : i32
    %c4_i32_410 = arith.constant 4 : i32
    %960 = arith.addi %959, %c4_i32_410 : i32
    %961 = arith.index_cast %arg1 : i32 to index
    %962 = arith.index_cast %960 : i32 to index
    %963 = memref.load %arg2[%961, %962] : memref<2x384xi32, #tpu.memory_space<smem>>
    %964 = arith.index_cast %963 : i32 to index
    %c0_411 = arith.constant 0 : index
    %965 = vector.load %arg3[%964, %c0_411] : memref<1000x128xf32, #tpu.memory_space<vmem>>, vector<1x128xf32>
    %c120_i32_412 = arith.constant 120 : i32
    %966 = arith.addi %0, %c120_i32_412 : i32
    %c5_i32_413 = arith.constant 5 : i32
    %967 = arith.addi %966, %c5_i32_413 : i32
    %968 = arith.index_cast %arg1 : i32 to index
    %969 = arith.index_cast %967 : i32 to index
    %970 = memref.load %arg2[%968, %969] : memref<2x384xi32, #tpu.memory_space<smem>>
    %971 = arith.index_cast %970 : i32 to index
    %c0_414 = arith.constant 0 : index
    %972 = vector.load %arg3[%971, %c0_414] : memref<1000x128xf32, #tpu.memory_space<vmem>>, vector<1x128xf32>
    %c120_i32_415 = arith.constant 120 : i32
    %973 = arith.addi %0, %c120_i32_415 : i32
    %c6_i32_416 = arith.constant 6 : i32
    %974 = arith.addi %973, %c6_i32_416 : i32
    %975 = arith.index_cast %arg1 : i32 to index
    %976 = arith.index_cast %974 : i32 to index
    %977 = memref.load %arg2[%975, %976] : memref<2x384xi32, #tpu.memory_space<smem>>
    %978 = arith.index_cast %977 : i32 to index
    %c0_417 = arith.constant 0 : index
    %979 = vector.load %arg3[%978, %c0_417] : memref<1000x128xf32, #tpu.memory_space<vmem>>, vector<1x128xf32>
    %c120_i32_418 = arith.constant 120 : i32
    %980 = arith.addi %0, %c120_i32_418 : i32
    %c7_i32_419 = arith.constant 7 : i32
    %981 = arith.addi %980, %c7_i32_419 : i32
    %982 = arith.index_cast %arg1 : i32 to index
    %983 = arith.index_cast %981 : i32 to index
    %984 = memref.load %arg2[%982, %983] : memref<2x384xi32, #tpu.memory_space<smem>>
    %985 = arith.index_cast %984 : i32 to index
    %c0_420 = arith.constant 0 : index
    %986 = vector.load %arg3[%985, %c0_420] : memref<1000x128xf32, #tpu.memory_space<vmem>>, vector<1x128xf32>
    %987 = tpu.concatenate %937, %944, %951, %958, %965, %972, %979, %986 in 0 : vector<1x128xf32>, vector<1x128xf32>, vector<1x128xf32>, vector<1x128xf32>, vector<1x128xf32>, vector<1x128xf32>, vector<1x128xf32>, vector<1x128xf32> -> vector<8x128xf32>
    %c120 = arith.constant 120 : index
    %c0_421 = arith.constant 0 : index
    %988 = vector.load %arg4[%c120, %c0_421] : memref<128x128xf32, #tpu.memory_space<vmem>>, vector<8x128xf32>
    %989 = arith.addf %987, %988 : vector<8x128xf32>
    %c0_422 = arith.constant 0 : index
    %c120_423 = arith.constant 120 : index
    %c0_424 = arith.constant 0 : index
    %990 = vector.load %arg5[%c0_422, %c120_423, %c0_424] : memref<1x128x128xf32, #tpu.memory_space<vmem>>, vector<1x8x128xf32>
    %991 = vector.shape_cast %990 : vector<1x8x128xf32> to vector<8x128xf32>
    %992 = vector.shape_cast %989 : vector<8x128xf32> to vector<1x8x128xf32>
    tpu.vector_store %arg5[%c0_422, %c120_423, %c0_424], %992 {strides = array<i32>} : memref<1x128x128xf32, #tpu.memory_space<vmem>>, vector<1x8x128xf32>,
    return
  }
  func.func @transform_0(%arg0: i32, %arg1: i32, %arg2: memref<2x384xi32, #tpu.memory_space<smem>>) -> (i32, i32) {
    %c0_i32 = arith.constant 0 : i32
    %c0_i32_0 = arith.constant 0 : i32
    %c0_i32_1 = arith.constant 0 : i32
    return %c0_i32, %c0_i32_0 : i32, i32
  }
  func.func @transform_1(%arg0: i32, %arg1: i32, %arg2: memref<2x384xi32, #tpu.memory_space<smem>>) -> (i32, i32) {
    %c0_i32 = arith.constant 0 : i32
    %c0_i32_0 = arith.constant 0 : i32
    return %arg0, %c0_i32 : i32, i32
  }
  func.func @transform_2(%arg0: i32, %arg1: i32, %arg2: memref<2x384xi32, #tpu.memory_space<smem>>) -> (i32, i32, i32) {
    %c0_i32 = arith.constant 0 : i32
    %c0_i32_0 = arith.constant 0 : i32
    return %arg1, %arg0, %c0_i32 : i32, i32, i32
  }
}

module attributes {stable_mosaic.version = 11 : i64} {
  func.func @_embedding_kernel_vmem(%arg0: i32, %arg1: i32, %arg2: memref<2x384xi32, #tpu.memory_space<smem>>, %arg3: memref<1000x128xf32, #tpu.memory_space<vmem>>, %arg4: memref<128x128xf32, #tpu.memory_space<vmem>>, %arg5: memref<1x128x128xf32, #tpu.memory_space<vmem>>) attributes {dimension_semantics = [#tpu.dimension_semantics<parallel>, #tpu.dimension_semantics<parallel>], iteration_bounds = array<i64: 3, 2>, scalar_prefetch = 1 : i64, scratch_operands = 0 : i64, tpu.core_type = #tpu.core_type<tc>, window_params = [{pipeline_mode = #tpu.pipeline_mode<synchronous>, transform_indices = @transform_0, window_bounds = array<i64: 1000, 128>}, {transform_indices = @transform_1, window_bounds = array<i64: 128, 128>}, {transform_indices = @transform_2, window_bounds = array<i64: 1, 128, 128>}]} {
    %c128_i32 = arith.constant 128 : i32
    %0 = arith.muli %arg0, %c128_i32 : i32
    %c0_i32 = arith.constant 0 : i32
    %1 = arith.addi %0, %c0_i32 : i32
    %c0_i32_0 = arith.constant 0 : i32
    %2 = arith.addi %1, %c0_i32_0 : i32
    %3 = arith.index_cast %arg1 : i32 to index
    %4 = arith.index_cast %2 : i32 to index
    %5 = memref.load %arg2[%3, %4] : memref<2x384xi32, #tpu.memory_space<smem>>
    %6 = arith.index_cast %5 : i32 to index
    %c0 = arith.constant 0 : index
    %7 = vector.load %arg3[%6, %c0] : memref<1000x128xf32, #tpu.memory_space<vmem>>, vector<1x128xf32>
    %c0_i32_1 = arith.constant 0 : i32
    %8 = arith.addi %0, %c0_i32_1 : i32
    %c1_i32 = arith.constant 1 : i32
    %9 = arith.addi %8, %c1_i32 : i32
    %10 = arith.index_cast %arg1 : i32 to index
    %11 = arith.index_cast %9 : i32 to index
    %12 = memref.load %arg2[%10, %11] : memref<2x384xi32, #tpu.memory_space<smem>>
    %13 = arith.index_cast %12 : i32 to index
    %c0_2 = arith.constant 0 : index
    %14 = vector.load %arg3[%13, %c0_2] : memref<1000x128xf32, #tpu.memory_space<vmem>>, vector<1x128xf32>
    %c0_i32_3 = arith.constant 0 : i32
    %15 = arith.addi %0, %c0_i32_3 : i32
    %c2_i32 = arith.constant 2 : i32
    %16 = arith.addi %15, %c2_i32 : i32
    %17 = arith.index_cast %arg1 : i32 to index
    %18 = arith.index_cast %16 : i32 to index
    %19 = memref.load %arg2[%17, %18] : memref<2x384xi32, #tpu.memory_space<smem>>
    %20 = arith.index_cast %19 : i32 to index
    %c0_4 = arith.constant 0 : index
    %21 = vector.load %arg3[%20, %c0_4] : memref<1000x128xf32, #tpu.memory_space<vmem>>, vector<1x128xf32>
    %c0_i32_5 = arith.constant 0 : i32
    %22 = arith.addi %0, %c0_i32_5 : i32
    %c3_i32 = arith.constant 3 : i32
    %23 = arith.addi %22, %c3_i32 : i32
    %24 = arith.index_cast %arg1 : i32 to index
    %25 = arith.index_cast %23 : i32 to index
    %26 = memref.load %arg2[%24, %25] : memref<2x384xi32, #tpu.memory_space<smem>>
    %27 = arith.index_cast %26 : i32 to index
    %c0_6 = arith.constant 0 : index
    %28 = vector.load %arg3[%27, %c0_6] : memref<1000x128xf32, #tpu.memory_space<vmem>>, vector<1x128xf32>
    %c0_i32_7 = arith.constant 0 : i32
    %29 = arith.addi %0, %c0_i32_7 : i32
    %c4_i32 = arith.constant 4 : i32
    %30 = arith.addi %29, %c4_i32 : i32
    %31 = arith.index_cast %arg1 : i32 to index
    %32 = arith.index_cast %30 : i32 to index
    %33 = memref.load %arg2[%31, %32] : memref<2x384xi32, #tpu.memory_space<smem>>
    %34 = arith.index_cast %33 : i32 to index
    %c0_8 = arith.constant 0 : index
    %35 = vector.load %arg3[%34, %c0_8] : memref<1000x128xf32, #tpu.memory_space<vmem>>, vector<1x128xf32>
    %c0_i32_9 = arith.constant 0 : i32
    %36 = arith.addi %0, %c0_i32_9 : i32
    %c5_i32 = arith.constant 5 : i32
    %37 = arith.addi %36, %c5_i32 : i32
    %38 = arith.index_cast %arg1 : i32 to index
    %39 = arith.index_cast %37 : i32 to index
    %40 = memref.load %arg2[%38, %39] : memref<2x384xi32, #tpu.memory_space<smem>>
    %41 = arith.index_cast %40 : i32 to index
    %c0_10 = arith.constant 0 : index
    %42 = vector.load %arg3[%41, %c0_10] : memref<1000x128xf32, #tpu.memory_space<vmem>>, vector<1x128xf32>
    %c0_i32_11 = arith.constant 0 : i32
    %43 = arith.addi %0, %c0_i32_11 : i32
    %c6_i32 = arith.constant 6 : i32
    %44 = arith.addi %43, %c6_i32 : i32
    %45 = arith.index_cast %arg1 : i32 to index
    %46 = arith.index_cast %44 : i32 to index
    %47 = memref.load %arg2[%45, %46] : memref<2x384xi32, #tpu.memory_space<smem>>
    %48 = arith.index_cast %47 : i32 to index
    %c0_12 = arith.constant 0 : index
    %49 = vector.load %arg3[%48, %c0_12] : memref<1000x128xf32, #tpu.memory_space<vmem>>, vector<1x128xf32>
    %c0_i32_13 = arith.constant 0 : i32
    %50 = arith.addi %0, %c0_i32_13 : i32
    %c7_i32 = arith.constant 7 : i32
    %51 = arith.addi %50, %c7_i32 : i32
    %52 = arith.index_cast %arg1 : i32 to index
    %53 = arith.index_cast %51 : i32 to index
    %54 = memref.load %arg2[%52, %53] : memref<2x384xi32, #tpu.memory_space<smem>>
    %55 = arith.index_cast %54 : i32 to index
    %c0_14 = arith.constant 0 : index
    %56 = vector.load %arg3[%55, %c0_14] : memref<1000x128xf32, #tpu.memory_space<vmem>>, vector<1x128xf32>
    %57 = tpu.concatenate %7, %14, %21, %28, %35, %42, %49, %56 in 0 : vector<1x128xf32>, vector<1x128xf32>, vector<1x128xf32>, vector<1x128xf32>, vector<1x128xf32>, vector<1x128xf32>, vector<1x128xf32>, vector<1x128xf32> -> vector<8x128xf32>
    %c0_15 = arith.constant 0 : index
    %c0_16 = arith.constant 0 : index
    %58 = vector.load %arg4[%c0_15, %c0_16] : memref<128x128xf32, #tpu.memory_space<vmem>>, vector<8x128xf32>
    %59 = arith.addf %57, %58 : vector<8x128xf32>
    %c0_17 = arith.constant 0 : index
    %c0_18 = arith.constant 0 : index
    %c0_19 = arith.constant 0 : index
    %60 = vector.load %arg5[%c0_17, %c0_18, %c0_19] : memref<1x128x128xf32, #tpu.memory_space<vmem>>, vector<1x8x128xf32>
    %61 = vector.shape_cast %60 : vector<1x8x128xf32> to vector<8x128xf32>
    %62 = vector.shape_cast %59 : vector<8x128xf32> to vector<1x8x128xf32>
    tpu.vector_store %arg5[%c0_17, %c0_18, %c0_19], %62 {strides = array<i32>} : memref<1x128x128xf32, #tpu.memory_space<vmem>>, vector<1x8x128xf32>,
    %c8_i32 = arith.constant 8 : i32
    %63 = arith.addi %0, %c8_i32 : i32
    %c0_i32_20 = arith.constant 0 : i32
    %64 = arith.addi %63, %c0_i32_20 : i32
    %65 = arith.index_cast %arg1 : i32 to index
    %66 = arith.index_cast %64 : i32 to index
    %67 = memref.load %arg2[%65, %66] : memref<2x384xi32, #tpu.memory_space<smem>>
    %68 = arith.index_cast %67 : i32 to index
    %c0_21 = arith.constant 0 : index
    %69 = vector.load %arg3[%68, %c0_21] : memref<1000x128xf32, #tpu.memory_space<vmem>>, vector<1x128xf32>
    %c8_i32_22 = arith.constant 8 : i32
    %70 = arith.addi %0, %c8_i32_22 : i32
    %c1_i32_23 = arith.constant 1 : i32
    %71 = arith.addi %70, %c1_i32_23 : i32
    %72 = arith.index_cast %arg1 : i32 to index
    %73 = arith.index_cast %71 : i32 to index
    %74 = memref.load %arg2[%72, %73] : memref<2x384xi32, #tpu.memory_space<smem>>
    %75 = arith.index_cast %74 : i32 to index
    %c0_24 = arith.constant 0 : index
    %76 = vector.load %arg3[%75, %c0_24] : memref<1000x128xf32, #tpu.memory_space<vmem>>, vector<1x128xf32>
    %c8_i32_25 = arith.constant 8 : i32
    %77 = arith.addi %0, %c8_i32_25 : i32
    %c2_i32_26 = arith.constant 2 : i32
    %78 = arith.addi %77, %c2_i32_26 : i32
    %79 = arith.index_cast %arg1 : i32 to index
    %80 = arith.index_cast %78 : i32 to index
    %81 = memref.load %arg2[%79, %80] : memref<2x384xi32, #tpu.memory_space<smem>>
    %82 = arith.index_cast %81 : i32 to index
    %c0_27 = arith.constant 0 : index
    %83 = vector.load %arg3[%82, %c0_27] : memref<1000x128xf32, #tpu.memory_space<vmem>>, vector<1x128xf32>
    %c8_i32_28 = arith.constant 8 : i32
    %84 = arith.addi %0, %c8_i32_28 : i32
    %c3_i32_29 = arith.constant 3 : i32
    %85 = arith.addi %84, %c3_i32_29 : i32
    %86 = arith.index_cast %arg1 : i32 to index
    %87 = arith.index_cast %85 : i32 to index
    %88 = memref.load %arg2[%86, %87] : memref<2x384xi32, #tpu.memory_space<smem>>
    %89 = arith.index_cast %88 : i32 to index
    %c0_30 = arith.constant 0 : index
    %90 = vector.load %arg3[%89, %c0_30] : memref<1000x128xf32, #tpu.memory_space<vmem>>, vector<1x128xf32>
    %c8_i32_31 = arith.constant 8 : i32
    %91 = arith.addi %0, %c8_i32_31 : i32
    %c4_i32_32 = arith.constant 4 : i32
    %92 = arith.addi %91, %c4_i32_32 : i32
    %93 = arith.index_cast %arg1 : i32 to index
    %94 = arith.index_cast %92 : i32 to index
    %95 = memref.load %arg2[%93, %94] : memref<2x384xi32, #tpu.memory_space<smem>>
    %96 = arith.index_cast %95 : i32 to index
    %c0_33 = arith.constant 0 : index
    %97 = vector.load %arg3[%96, %c0_33] : memref<1000x128xf32, #tpu.memory_space<vmem>>, vector<1x128xf32>
    %c8_i32_34 = arith.constant 8 : i32
    %98 = arith.addi %0, %c8_i32_34 : i32
    %c5_i32_35 = arith.constant 5 : i32
    %99 = arith.addi %98, %c5_i32_35 : i32
    %100 = arith.index_cast %arg1 : i32 to index
    %101 = arith.index_cast %99 : i32 to index
    %102 = memref.load %arg2[%100, %101] : memref<2x384xi32, #tpu.memory_space<smem>>
    %103 = arith.index_cast %102 : i32 to index
    %c0_36 = arith.constant 0 : index
    %104 = vector.load %arg3[%103, %c0_36] : memref<1000x128xf32, #tpu.memory_space<vmem>>, vector<1x128xf32>
    %c8_i32_37 = arith.constant 8 : i32
    %105 = arith.addi %0, %c8_i32_37 : i32
    %c6_i32_38 = arith.constant 6 : i32
    %106 = arith.addi %105, %c6_i32_38 : i32
    %107 = arith.index_cast %arg1 : i32 to index
    %108 = arith.index_cast %106 : i32 to index
    %109 = memref.load %arg2[%107, %108] : memref<2x384xi32, #tpu.memory_space<smem>>
    %110 = arith.index_cast %109 : i32 to index
    %c0_39 = arith.constant 0 : index
    %111 = vector.load %arg3[%110, %c0_39] : memref<1000x128xf32, #tpu.memory_space<vmem>>, vector<1x128xf32>
    %c8_i32_40 = arith.constant 8 : i32
    %112 = arith.addi %0, %c8_i32_40 : i32
    %c7_i32_41 = arith.constant 7 : i32
    %113 = arith.addi %112, %c7_i32_41 : i32
    %114 = arith.index_cast %arg1 : i32 to index
    %115 = arith.index_cast %113 : i32 to index
    %116 = memref.load %arg2[%114, %115] : memref<2x384xi32, #tpu.memory_space<smem>>
    %117 = arith.index_cast %116 : i32 to index
    %c0_42 = arith.constant 0 : index
    %118 = vector.load %arg3[%117, %c0_42] : memref<1000x128xf32, #tpu.memory_space<vmem>>, vector<1x128xf32>
    %119 = tpu.concatenate %69, %76, %83, %90, %97, %104, %111, %118 in 0 : vector<1x128xf32>, vector<1x128xf32>, vector<1x128xf32>, vector<1x128xf32>, vector<1x128xf32>, vector<1x128xf32>, vector<1x128xf32>, vector<1x128xf32> -> vector<8x128xf32>
    %c8 = arith.constant 8 : index
    %c0_43 = arith.constant 0 : index
    %120 = vector.load %arg4[%c8, %c0_43] : memref<128x128xf32, #tpu.memory_space<vmem>>, vector<8x128xf32>
    %121 = arith.addf %119, %120 : vector<8x128xf32>
    %c0_44 = arith.constant 0 : index
    %c8_45 = arith.constant 8 : index
    %c0_46 = arith.constant 0 : index
    %122 = vector.load %arg5[%c0_44, %c8_45, %c0_46] : memref<1x128x128xf32, #tpu.memory_space<vmem>>, vector<1x8x128xf32>
    %123 = vector.shape_cast %122 : vector<1x8x128xf32> to vector<8x128xf32>
    %124 = vector.shape_cast %121 : vector<8x128xf32> to vector<1x8x128xf32>
    tpu.vector_store %arg5[%c0_44, %c8_45, %c0_46], %124 {strides = array<i32>} : memref<1x128x128xf32, #tpu.memory_space<vmem>>, vector<1x8x128xf32>,
    %c16_i32 = arith.constant 16 : i32
    %125 = arith.addi %0, %c16_i32 : i32
    %c0_i32_47 = arith.constant 0 : i32
    %126 = arith.addi %125, %c0_i32_47 : i32
    %127 = arith.index_cast %arg1 : i32 to index
    %128 = arith.index_cast %126 : i32 to index
    %129 = memref.load %arg2[%127, %128] : memref<2x384xi32, #tpu.memory_space<smem>>
    %130 = arith.index_cast %129 : i32 to index
    %c0_48 = arith.constant 0 : index
    %131 = vector.load %arg3[%130, %c0_48] : memref<1000x128xf32, #tpu.memory_space<vmem>>, vector<1x128xf32>
    %c16_i32_49 = arith.constant 16 : i32
    %132 = arith.addi %0, %c16_i32_49 : i32
    %c1_i32_50 = arith.constant 1 : i32
    %133 = arith.addi %132, %c1_i32_50 : i32
    %134 = arith.index_cast %arg1 : i32 to index
    %135 = arith.index_cast %133 : i32 to index
    %136 = memref.load %arg2[%134, %135] : memref<2x384xi32, #tpu.memory_space<smem>>
    %137 = arith.index_cast %136 : i32 to index
    %c0_51 = arith.constant 0 : index
    %138 = vector.load %arg3[%137, %c0_51] : memref<1000x128xf32, #tpu.memory_space<vmem>>, vector<1x128xf32>
    %c16_i32_52 = arith.constant 16 : i32
    %139 = arith.addi %0, %c16_i32_52 : i32
    %c2_i32_53 = arith.constant 2 : i32
    %140 = arith.addi %139, %c2_i32_53 : i32
    %141 = arith.index_cast %arg1 : i32 to index
    %142 = arith.index_cast %140 : i32 to index
    %143 = memref.load %arg2[%141, %142] : memref<2x384xi32, #tpu.memory_space<smem>>
    %144 = arith.index_cast %143 : i32 to index
    %c0_54 = arith.constant 0 : index
    %145 = vector.load %arg3[%144, %c0_54] : memref<1000x128xf32, #tpu.memory_space<vmem>>, vector<1x128xf32>
    %c16_i32_55 = arith.constant 16 : i32
    %146 = arith.addi %0, %c16_i32_55 : i32
    %c3_i32_56 = arith.constant 3 : i32
    %147 = arith.addi %146, %c3_i32_56 : i32
    %148 = arith.index_cast %arg1 : i32 to index
    %149 = arith.index_cast %147 : i32 to index
    %150 = memref.load %arg2[%148, %149] : memref<2x384xi32, #tpu.memory_space<smem>>
    %151 = arith.index_cast %150 : i32 to index
    %c0_57 = arith.constant 0 : index
    %152 = vector.load %arg3[%151, %c0_57] : memref<1000x128xf32, #tpu.memory_space<vmem>>, vector<1x128xf32>
    %c16_i32_58 = arith.constant 16 : i32
    %153 = arith.addi %0, %c16_i32_58 : i32
    %c4_i32_59 = arith.constant 4 : i32
    %154 = arith.addi %153, %c4_i32_59 : i32
    %155 = arith.index_cast %arg1 : i32 to index
    %156 = arith.index_cast %154 : i32 to index
    %157 = memref.load %arg2[%155, %156] : memref<2x384xi32, #tpu.memory_space<smem>>
    %158 = arith.index_cast %157 : i32 to index
    %c0_60 = arith.constant 0 : index
    %159 = vector.load %arg3[%158, %c0_60] : memref<1000x128xf32, #tpu.memory_space<vmem>>, vector<1x128xf32>
    %c16_i32_61 = arith.constant 16 : i32
    %160 = arith.addi %0, %c16_i32_61 : i32
    %c5_i32_62 = arith.constant 5 : i32
    %161 = arith.addi %160, %c5_i32_62 : i32
    %162 = arith.index_cast %arg1 : i32 to index
    %163 = arith.index_cast %161 : i32 to index
    %164 = memref.load %arg2[%162, %163] : memref<2x384xi32, #tpu.memory_space<smem>>
    %165 = arith.index_cast %164 : i32 to index
    %c0_63 = arith.constant 0 : index
    %166 = vector.load %arg3[%165, %c0_63] : memref<1000x128xf32, #tpu.memory_space<vmem>>, vector<1x128xf32>
    %c16_i32_64 = arith.constant 16 : i32
    %167 = arith.addi %0, %c16_i32_64 : i32
    %c6_i32_65 = arith.constant 6 : i32
    %168 = arith.addi %167, %c6_i32_65 : i32
    %169 = arith.index_cast %arg1 : i32 to index
    %170 = arith.index_cast %168 : i32 to index
    %171 = memref.load %arg2[%169, %170] : memref<2x384xi32, #tpu.memory_space<smem>>
    %172 = arith.index_cast %171 : i32 to index
    %c0_66 = arith.constant 0 : index
    %173 = vector.load %arg3[%172, %c0_66] : memref<1000x128xf32, #tpu.memory_space<vmem>>, vector<1x128xf32>
    %c16_i32_67 = arith.constant 16 : i32
    %174 = arith.addi %0, %c16_i32_67 : i32
    %c7_i32_68 = arith.constant 7 : i32
    %175 = arith.addi %174, %c7_i32_68 : i32
    %176 = arith.index_cast %arg1 : i32 to index
    %177 = arith.index_cast %175 : i32 to index
    %178 = memref.load %arg2[%176, %177] : memref<2x384xi32, #tpu.memory_space<smem>>
    %179 = arith.index_cast %178 : i32 to index
    %c0_69 = arith.constant 0 : index
    %180 = vector.load %arg3[%179, %c0_69] : memref<1000x128xf32, #tpu.memory_space<vmem>>, vector<1x128xf32>
    %181 = tpu.concatenate %131, %138, %145, %152, %159, %166, %173, %180 in 0 : vector<1x128xf32>, vector<1x128xf32>, vector<1x128xf32>, vector<1x128xf32>, vector<1x128xf32>, vector<1x128xf32>, vector<1x128xf32>, vector<1x128xf32> -> vector<8x128xf32>
    %c16 = arith.constant 16 : index
    %c0_70 = arith.constant 0 : index
    %182 = vector.load %arg4[%c16, %c0_70] : memref<128x128xf32, #tpu.memory_space<vmem>>, vector<8x128xf32>
    %183 = arith.addf %181, %182 : vector<8x128xf32>
    %c0_71 = arith.constant 0 : index
    %c16_72 = arith.constant 16 : index
    %c0_73 = arith.constant 0 : index
    %184 = vector.load %arg5[%c0_71, %c16_72, %c0_73] : memref<1x128x128xf32, #tpu.memory_space<vmem>>, vector<1x8x128xf32>
    %185 = vector.shape_cast %184 : vector<1x8x128xf32> to vector<8x128xf32>
    %186 = vector.shape_cast %183 : vector<8x128xf32> to vector<1x8x128xf32>
    tpu.vector_store %arg5[%c0_71, %c16_72, %c0_73], %186 {strides = array<i32>} : memref<1x128x128xf32, #tpu.memory_space<vmem>>, vector<1x8x128xf32>,
    %c24_i32 = arith.constant 24 : i32
    %187 = arith.addi %0, %c24_i32 : i32
    %c0_i32_74 = arith.constant 0 : i32
    %188 = arith.addi %187, %c0_i32_74 : i32
    %189 = arith.index_cast %arg1 : i32 to index
    %190 = arith.index_cast %188 : i32 to index
    %191 = memref.load %arg2[%189, %190] : memref<2x384xi32, #tpu.memory_space<smem>>
    %192 = arith.index_cast %191 : i32 to index
    %c0_75 = arith.constant 0 : index
    %193 = vector.load %arg3[%192, %c0_75] : memref<1000x128xf32, #tpu.memory_space<vmem>>, vector<1x128xf32>
    %c24_i32_76 = arith.constant 24 : i32
    %194 = arith.addi %0, %c24_i32_76 : i32
    %c1_i32_77 = arith.constant 1 : i32
    %195 = arith.addi %194, %c1_i32_77 : i32
    %196 = arith.index_cast %arg1 : i32 to index
    %197 = arith.index_cast %195 : i32 to index
    %198 = memref.load %arg2[%196, %197] : memref<2x384xi32, #tpu.memory_space<smem>>
    %199 = arith.index_cast %198 : i32 to index
    %c0_78 = arith.constant 0 : index
    %200 = vector.load %arg3[%199, %c0_78] : memref<1000x128xf32, #tpu.memory_space<vmem>>, vector<1x128xf32>
    %c24_i32_79 = arith.constant 24 : i32
    %201 = arith.addi %0, %c24_i32_79 : i32
    %c2_i32_80 = arith.constant 2 : i32
    %202 = arith.addi %201, %c2_i32_80 : i32
    %203 = arith.index_cast %arg1 : i32 to index
    %204 = arith.index_cast %202 : i32 to index
    %205 = memref.load %arg2[%203, %204] : memref<2x384xi32, #tpu.memory_space<smem>>
    %206 = arith.index_cast %205 : i32 to index
    %c0_81 = arith.constant 0 : index
    %207 = vector.load %arg3[%206, %c0_81] : memref<1000x128xf32, #tpu.memory_space<vmem>>, vector<1x128xf32>
    %c24_i32_82 = arith.constant 24 : i32
    %208 = arith.addi %0, %c24_i32_82 : i32
    %c3_i32_83 = arith.constant 3 : i32
    %209 = arith.addi %208, %c3_i32_83 : i32
    %210 = arith.index_cast %arg1 : i32 to index
    %211 = arith.index_cast %209 : i32 to index
    %212 = memref.load %arg2[%210, %211] : memref<2x384xi32, #tpu.memory_space<smem>>
    %213 = arith.index_cast %212 : i32 to index
    %c0_84 = arith.constant 0 : index
    %214 = vector.load %arg3[%213, %c0_84] : memref<1000x128xf32, #tpu.memory_space<vmem>>, vector<1x128xf32>
    %c24_i32_85 = arith.constant 24 : i32
    %215 = arith.addi %0, %c24_i32_85 : i32
    %c4_i32_86 = arith.constant 4 : i32
    %216 = arith.addi %215, %c4_i32_86 : i32
    %217 = arith.index_cast %arg1 : i32 to index
    %218 = arith.index_cast %216 : i32 to index
    %219 = memref.load %arg2[%217, %218] : memref<2x384xi32, #tpu.memory_space<smem>>
    %220 = arith.index_cast %219 : i32 to index
    %c0_87 = arith.constant 0 : index
    %221 = vector.load %arg3[%220, %c0_87] : memref<1000x128xf32, #tpu.memory_space<vmem>>, vector<1x128xf32>
    %c24_i32_88 = arith.constant 24 : i32
    %222 = arith.addi %0, %c24_i32_88 : i32
    %c5_i32_89 = arith.constant 5 : i32
    %223 = arith.addi %222, %c5_i32_89 : i32
    %224 = arith.index_cast %arg1 : i32 to index
    %225 = arith.index_cast %223 : i32 to index
    %226 = memref.load %arg2[%224, %225] : memref<2x384xi32, #tpu.memory_space<smem>>
    %227 = arith.index_cast %226 : i32 to index
    %c0_90 = arith.constant 0 : index
    %228 = vector.load %arg3[%227, %c0_90] : memref<1000x128xf32, #tpu.memory_space<vmem>>, vector<1x128xf32>
    %c24_i32_91 = arith.constant 24 : i32
    %229 = arith.addi %0, %c24_i32_91 : i32
    %c6_i32_92 = arith.constant 6 : i32
    %230 = arith.addi %229, %c6_i32_92 : i32
    %231 = arith.index_cast %arg1 : i32 to index
    %232 = arith.index_cast %230 : i32 to index
    %233 = memref.load %arg2[%231, %232] : memref<2x384xi32, #tpu.memory_space<smem>>
    %234 = arith.index_cast %233 : i32 to index
    %c0_93 = arith.constant 0 : index
    %235 = vector.load %arg3[%234, %c0_93] : memref<1000x128xf32, #tpu.memory_space<vmem>>, vector<1x128xf32>
    %c24_i32_94 = arith.constant 24 : i32
    %236 = arith.addi %0, %c24_i32_94 : i32
    %c7_i32_95 = arith.constant 7 : i32
    %237 = arith.addi %236, %c7_i32_95 : i32
    %238 = arith.index_cast %arg1 : i32 to index
    %239 = arith.index_cast %237 : i32 to index
    %240 = memref.load %arg2[%238, %239] : memref<2x384xi32, #tpu.memory_space<smem>>
    %241 = arith.index_cast %240 : i32 to index
    %c0_96 = arith.constant 0 : index
    %242 = vector.load %arg3[%241, %c0_96] : memref<1000x128xf32, #tpu.memory_space<vmem>>, vector<1x128xf32>
    %243 = tpu.concatenate %193, %200, %207, %214, %221, %228, %235, %242 in 0 : vector<1x128xf32>, vector<1x128xf32>, vector<1x128xf32>, vector<1x128xf32>, vector<1x128xf32>, vector<1x128xf32>, vector<1x128xf32>, vector<1x128xf32> -> vector<8x128xf32>
    %c24 = arith.constant 24 : index
    %c0_97 = arith.constant 0 : index
    %244 = vector.load %arg4[%c24, %c0_97] : memref<128x128xf32, #tpu.memory_space<vmem>>, vector<8x128xf32>
    %245 = arith.addf %243, %244 : vector<8x128xf32>
    %c0_98 = arith.constant 0 : index
    %c24_99 = arith.constant 24 : index
    %c0_100 = arith.constant 0 : index
    %246 = vector.load %arg5[%c0_98, %c24_99, %c0_100] : memref<1x128x128xf32, #tpu.memory_space<vmem>>, vector<1x8x128xf32>
    %247 = vector.shape_cast %246 : vector<1x8x128xf32> to vector<8x128xf32>
    %248 = vector.shape_cast %245 : vector<8x128xf32> to vector<1x8x128xf32>
    tpu.vector_store %arg5[%c0_98, %c24_99, %c0_100], %248 {strides = array<i32>} : memref<1x128x128xf32, #tpu.memory_space<vmem>>, vector<1x8x128xf32>,
    %c32_i32 = arith.constant 32 : i32
    %249 = arith.addi %0, %c32_i32 : i32
    %c0_i32_101 = arith.constant 0 : i32
    %250 = arith.addi %249, %c0_i32_101 : i32
    %251 = arith.index_cast %arg1 : i32 to index
    %252 = arith.index_cast %250 : i32 to index
    %253 = memref.load %arg2[%251, %252] : memref<2x384xi32, #tpu.memory_space<smem>>
    %254 = arith.index_cast %253 : i32 to index
    %c0_102 = arith.constant 0 : index
    %255 = vector.load %arg3[%254, %c0_102] : memref<1000x128xf32, #tpu.memory_space<vmem>>, vector<1x128xf32>
    %c32_i32_103 = arith.constant 32 : i32
    %256 = arith.addi %0, %c32_i32_103 : i32
    %c1_i32_104 = arith.constant 1 : i32
    %257 = arith.addi %256, %c1_i32_104 : i32
    %258 = arith.index_cast %arg1 : i32 to index
    %259 = arith.index_cast %257 : i32 to index
    %260 = memref.load %arg2[%258, %259] : memref<2x384xi32, #tpu.memory_space<smem>>
    %261 = arith.index_cast %260 : i32 to index
    %c0_105 = arith.constant 0 : index
    %262 = vector.load %arg3[%261, %c0_105] : memref<1000x128xf32, #tpu.memory_space<vmem>>, vector<1x128xf32>
    %c32_i32_106 = arith.constant 32 : i32
    %263 = arith.addi %0, %c32_i32_106 : i32
    %c2_i32_107 = arith.constant 2 : i32
    %264 = arith.addi %263, %c2_i32_107 : i32
    %265 = arith.index_cast %arg1 : i32 to index
    %266 = arith.index_cast %264 : i32 to index
    %267 = memref.load %arg2[%265, %266] : memref<2x384xi32, #tpu.memory_space<smem>>
    %268 = arith.index_cast %267 : i32 to index
    %c0_108 = arith.constant 0 : index
    %269 = vector.load %arg3[%268, %c0_108] : memref<1000x128xf32, #tpu.memory_space<vmem>>, vector<1x128xf32>
    %c32_i32_109 = arith.constant 32 : i32
    %270 = arith.addi %0, %c32_i32_109 : i32
    %c3_i32_110 = arith.constant 3 : i32
    %271 = arith.addi %270, %c3_i32_110 : i32
    %272 = arith.index_cast %arg1 : i32 to index
    %273 = arith.index_cast %271 : i32 to index
    %274 = memref.load %arg2[%272, %273] : memref<2x384xi32, #tpu.memory_space<smem>>
    %275 = arith.index_cast %274 : i32 to index
    %c0_111 = arith.constant 0 : index
    %276 = vector.load %arg3[%275, %c0_111] : memref<1000x128xf32, #tpu.memory_space<vmem>>, vector<1x128xf32>
    %c32_i32_112 = arith.constant 32 : i32
    %277 = arith.addi %0, %c32_i32_112 : i32
    %c4_i32_113 = arith.constant 4 : i32
    %278 = arith.addi %277, %c4_i32_113 : i32
    %279 = arith.index_cast %arg1 : i32 to index
    %280 = arith.index_cast %278 : i32 to index
    %281 = memref.load %arg2[%279, %280] : memref<2x384xi32, #tpu.memory_space<smem>>
    %282 = arith.index_cast %281 : i32 to index
    %c0_114 = arith.constant 0 : index
    %283 = vector.load %arg3[%282, %c0_114] : memref<1000x128xf32, #tpu.memory_space<vmem>>, vector<1x128xf32>
    %c32_i32_115 = arith.constant 32 : i32
    %284 = arith.addi %0, %c32_i32_115 : i32
    %c5_i32_116 = arith.constant 5 : i32
    %285 = arith.addi %284, %c5_i32_116 : i32
    %286 = arith.index_cast %arg1 : i32 to index
    %287 = arith.index_cast %285 : i32 to index
    %288 = memref.load %arg2[%286, %287] : memref<2x384xi32, #tpu.memory_space<smem>>
    %289 = arith.index_cast %288 : i32 to index
    %c0_117 = arith.constant 0 : index
    %290 = vector.load %arg3[%289, %c0_117] : memref<1000x128xf32, #tpu.memory_space<vmem>>, vector<1x128xf32>
    %c32_i32_118 = arith.constant 32 : i32
    %291 = arith.addi %0, %c32_i32_118 : i32
    %c6_i32_119 = arith.constant 6 : i32
    %292 = arith.addi %291, %c6_i32_119 : i32
    %293 = arith.index_cast %arg1 : i32 to index
    %294 = arith.index_cast %292 : i32 to index
    %295 = memref.load %arg2[%293, %294] : memref<2x384xi32, #tpu.memory_space<smem>>
    %296 = arith.index_cast %295 : i32 to index
    %c0_120 = arith.constant 0 : index
    %297 = vector.load %arg3[%296, %c0_120] : memref<1000x128xf32, #tpu.memory_space<vmem>>, vector<1x128xf32>
    %c32_i32_121 = arith.constant 32 : i32
    %298 = arith.addi %0, %c32_i32_121 : i32
    %c7_i32_122 = arith.constant 7 : i32
    %299 = arith.addi %298, %c7_i32_122 : i32
    %300 = arith.index_cast %arg1 : i32 to index
    %301 = arith.index_cast %299 : i32 to index
    %302 = memref.load %arg2[%300, %301] : memref<2x384xi32, #tpu.memory_space<smem>>
    %303 = arith.index_cast %302 : i32 to index
    %c0_123 = arith.constant 0 : index
    %304 = vector.load %arg3[%303, %c0_123] : memref<1000x128xf32, #tpu.memory_space<vmem>>, vector<1x128xf32>
    %305 = tpu.concatenate %255, %262, %269, %276, %283, %290, %297, %304 in 0 : vector<1x128xf32>, vector<1x128xf32>, vector<1x128xf32>, vector<1x128xf32>, vector<1x128xf32>, vector<1x128xf32>, vector<1x128xf32>, vector<1x128xf32> -> vector<8x128xf32>
    %c32 = arith.constant 32 : index
    %c0_124 = arith.constant 0 : index
    %306 = vector.load %arg4[%c32, %c0_124] : memref<128x128xf32, #tpu.memory_space<vmem>>, vector<8x128xf32>
    %307 = arith.addf %305, %306 : vector<8x128xf32>
    %c0_125 = arith.constant 0 : index
    %c32_126 = arith.constant 32 : index
    %c0_127 = arith.constant 0 : index
    %308 = vector.load %arg5[%c0_125, %c32_126, %c0_127] : memref<1x128x128xf32, #tpu.memory_space<vmem>>, vector<1x8x128xf32>
    %309 = vector.shape_cast %308 : vector<1x8x128xf32> to vector<8x128xf32>
    %310 = vector.shape_cast %307 : vector<8x128xf32> to vector<1x8x128xf32>
    tpu.vector_store %arg5[%c0_125, %c32_126, %c0_127], %310 {strides = array<i32>} : memref<1x128x128xf32, #tpu.memory_space<vmem>>, vector<1x8x128xf32>,
    %c40_i32 = arith.constant 40 : i32
    %311 = arith.addi %0, %c40_i32 : i32
    %c0_i32_128 = arith.constant 0 : i32
    %312 = arith.addi %311, %c0_i32_128 : i32
    %313 = arith.index_cast %arg1 : i32 to index
    %314 = arith.index_cast %312 : i32 to index
    %315 = memref.load %arg2[%313, %314] : memref<2x384xi32, #tpu.memory_space<smem>>
    %316 = arith.index_cast %315 : i32 to index
    %c0_129 = arith.constant 0 : index
    %317 = vector.load %arg3[%316, %c0_129] : memref<1000x128xf32, #tpu.memory_space<vmem>>, vector<1x128xf32>
    %c40_i32_130 = arith.constant 40 : i32
    %318 = arith.addi %0, %c40_i32_130 : i32
    %c1_i32_131 = arith.constant 1 : i32
    %319 = arith.addi %318, %c1_i32_131 : i32
    %320 = arith.index_cast %arg1 : i32 to index
    %321 = arith.index_cast %319 : i32 to index
    %322 = memref.load %arg2[%320, %321] : memref<2x384xi32, #tpu.memory_space<smem>>
    %323 = arith.index_cast %322 : i32 to index
    %c0_132 = arith.constant 0 : index
    %324 = vector.load %arg3[%323, %c0_132] : memref<1000x128xf32, #tpu.memory_space<vmem>>, vector<1x128xf32>
    %c40_i32_133 = arith.constant 40 : i32
    %325 = arith.addi %0, %c40_i32_133 : i32
    %c2_i32_134 = arith.constant 2 : i32
    %326 = arith.addi %325, %c2_i32_134 : i32
    %327 = arith.index_cast %arg1 : i32 to index
    %328 = arith.index_cast %326 : i32 to index
    %329 = memref.load %arg2[%327, %328] : memref<2x384xi32, #tpu.memory_space<smem>>
    %330 = arith.index_cast %329 : i32 to index
    %c0_135 = arith.constant 0 : index
    %331 = vector.load %arg3[%330, %c0_135] : memref<1000x128xf32, #tpu.memory_space<vmem>>, vector<1x128xf32>
    %c40_i32_136 = arith.constant 40 : i32
    %332 = arith.addi %0, %c40_i32_136 : i32
    %c3_i32_137 = arith.constant 3 : i32
    %333 = arith.addi %332, %c3_i32_137 : i32
    %334 = arith.index_cast %arg1 : i32 to index
    %335 = arith.index_cast %333 : i32 to index
    %336 = memref.load %arg2[%334, %335] : memref<2x384xi32, #tpu.memory_space<smem>>
    %337 = arith.index_cast %336 : i32 to index
    %c0_138 = arith.constant 0 : index
    %338 = vector.load %arg3[%337, %c0_138] : memref<1000x128xf32, #tpu.memory_space<vmem>>, vector<1x128xf32>
    %c40_i32_139 = arith.constant 40 : i32
    %339 = arith.addi %0, %c40_i32_139 : i32
    %c4_i32_140 = arith.constant 4 : i32
    %340 = arith.addi %339, %c4_i32_140 : i32
    %341 = arith.index_cast %arg1 : i32 to index
    %342 = arith.index_cast %340 : i32 to index
    %343 = memref.load %arg2[%341, %342] : memref<2x384xi32, #tpu.memory_space<smem>>
    %344 = arith.index_cast %343 : i32 to index
    %c0_141 = arith.constant 0 : index
    %345 = vector.load %arg3[%344, %c0_141] : memref<1000x128xf32, #tpu.memory_space<vmem>>, vector<1x128xf32>
    %c40_i32_142 = arith.constant 40 : i32
    %346 = arith.addi %0, %c40_i32_142 : i32
    %c5_i32_143 = arith.constant 5 : i32
    %347 = arith.addi %346, %c5_i32_143 : i32
    %348 = arith.index_cast %arg1 : i32 to index
    %349 = arith.index_cast %347 : i32 to index
    %350 = memref.load %arg2[%348, %349] : memref<2x384xi32, #tpu.memory_space<smem>>
    %351 = arith.index_cast %350 : i32 to index
    %c0_144 = arith.constant 0 : index
    %352 = vector.load %arg3[%351, %c0_144] : memref<1000x128xf32, #tpu.memory_space<vmem>>, vector<1x128xf32>
    %c40_i32_145 = arith.constant 40 : i32
    %353 = arith.addi %0, %c40_i32_145 : i32
    %c6_i32_146 = arith.constant 6 : i32
    %354 = arith.addi %353, %c6_i32_146 : i32
    %355 = arith.index_cast %arg1 : i32 to index
    %356 = arith.index_cast %354 : i32 to index
    %357 = memref.load %arg2[%355, %356] : memref<2x384xi32, #tpu.memory_space<smem>>
    %358 = arith.index_cast %357 : i32 to index
    %c0_147 = arith.constant 0 : index
    %359 = vector.load %arg3[%358, %c0_147] : memref<1000x128xf32, #tpu.memory_space<vmem>>, vector<1x128xf32>
    %c40_i32_148 = arith.constant 40 : i32
    %360 = arith.addi %0, %c40_i32_148 : i32
    %c7_i32_149 = arith.constant 7 : i32
    %361 = arith.addi %360, %c7_i32_149 : i32
    %362 = arith.index_cast %arg1 : i32 to index
    %363 = arith.index_cast %361 : i32 to index
    %364 = memref.load %arg2[%362, %363] : memref<2x384xi32, #tpu.memory_space<smem>>
    %365 = arith.index_cast %364 : i32 to index
    %c0_150 = arith.constant 0 : index
    %366 = vector.load %arg3[%365, %c0_150] : memref<1000x128xf32, #tpu.memory_space<vmem>>, vector<1x128xf32>
    %367 = tpu.concatenate %317, %324, %331, %338, %345, %352, %359, %366 in 0 : vector<1x128xf32>, vector<1x128xf32>, vector<1x128xf32>, vector<1x128xf32>, vector<1x128xf32>, vector<1x128xf32>, vector<1x128xf32>, vector<1x128xf32> -> vector<8x128xf32>
    %c40 = arith.constant 40 : index
    %c0_151 = arith.constant 0 : index
    %368 = vector.load %arg4[%c40, %c0_151] : memref<128x128xf32, #tpu.memory_space<vmem>>, vector<8x128xf32>
    %369 = arith.addf %367, %368 : vector<8x128xf32>
    %c0_152 = arith.constant 0 : index
    %c40_153 = arith.constant 40 : index
    %c0_154 = arith.constant 0 : index
    %370 = vector.load %arg5[%c0_152, %c40_153, %c0_154] : memref<1x128x128xf32, #tpu.memory_space<vmem>>, vector<1x8x128xf32>
    %371 = vector.shape_cast %370 : vector<1x8x128xf32> to vector<8x128xf32>
    %372 = vector.shape_cast %369 : vector<8x128xf32> to vector<1x8x128xf32>
    tpu.vector_store %arg5[%c0_152, %c40_153, %c0_154], %372 {strides = array<i32>} : memref<1x128x128xf32, #tpu.memory_space<vmem>>, vector<1x8x128xf32>,
    %c48_i32 = arith.constant 48 : i32
    %373 = arith.addi %0, %c48_i32 : i32
    %c0_i32_155 = arith.constant 0 : i32
    %374 = arith.addi %373, %c0_i32_155 : i32
    %375 = arith.index_cast %arg1 : i32 to index
    %376 = arith.index_cast %374 : i32 to index
    %377 = memref.load %arg2[%375, %376] : memref<2x384xi32, #tpu.memory_space<smem>>
    %378 = arith.index_cast %377 : i32 to index
    %c0_156 = arith.constant 0 : index
    %379 = vector.load %arg3[%378, %c0_156] : memref<1000x128xf32, #tpu.memory_space<vmem>>, vector<1x128xf32>
    %c48_i32_157 = arith.constant 48 : i32
    %380 = arith.addi %0, %c48_i32_157 : i32
    %c1_i32_158 = arith.constant 1 : i32
    %381 = arith.addi %380, %c1_i32_158 : i32
    %382 = arith.index_cast %arg1 : i32 to index
    %383 = arith.index_cast %381 : i32 to index
    %384 = memref.load %arg2[%382, %383] : memref<2x384xi32, #tpu.memory_space<smem>>
    %385 = arith.index_cast %384 : i32 to index
    %c0_159 = arith.constant 0 : index
    %386 = vector.load %arg3[%385, %c0_159] : memref<1000x128xf32, #tpu.memory_space<vmem>>, vector<1x128xf32>
    %c48_i32_160 = arith.constant 48 : i32
    %387 = arith.addi %0, %c48_i32_160 : i32
    %c2_i32_161 = arith.constant 2 : i32
    %388 = arith.addi %387, %c2_i32_161 : i32
    %389 = arith.index_cast %arg1 : i32 to index
    %390 = arith.index_cast %388 : i32 to index
    %391 = memref.load %arg2[%389, %390] : memref<2x384xi32, #tpu.memory_space<smem>>
    %392 = arith.index_cast %391 : i32 to index
    %c0_162 = arith.constant 0 : index
    %393 = vector.load %arg3[%392, %c0_162] : memref<1000x128xf32, #tpu.memory_space<vmem>>, vector<1x128xf32>
    %c48_i32_163 = arith.constant 48 : i32
    %394 = arith.addi %0, %c48_i32_163 : i32
    %c3_i32_164 = arith.constant 3 : i32
    %395 = arith.addi %394, %c3_i32_164 : i32
    %396 = arith.index_cast %arg1 : i32 to index
    %397 = arith.index_cast %395 : i32 to index
    %398 = memref.load %arg2[%396, %397] : memref<2x384xi32, #tpu.memory_space<smem>>
    %399 = arith.index_cast %398 : i32 to index
    %c0_165 = arith.constant 0 : index
    %400 = vector.load %arg3[%399, %c0_165] : memref<1000x128xf32, #tpu.memory_space<vmem>>, vector<1x128xf32>
    %c48_i32_166 = arith.constant 48 : i32
    %401 = arith.addi %0, %c48_i32_166 : i32
    %c4_i32_167 = arith.constant 4 : i32
    %402 = arith.addi %401, %c4_i32_167 : i32
    %403 = arith.index_cast %arg1 : i32 to index
    %404 = arith.index_cast %402 : i32 to index
    %405 = memref.load %arg2[%403, %404] : memref<2x384xi32, #tpu.memory_space<smem>>
    %406 = arith.index_cast %405 : i32 to index
    %c0_168 = arith.constant 0 : index
    %407 = vector.load %arg3[%406, %c0_168] : memref<1000x128xf32, #tpu.memory_space<vmem>>, vector<1x128xf32>
    %c48_i32_169 = arith.constant 48 : i32
    %408 = arith.addi %0, %c48_i32_169 : i32
    %c5_i32_170 = arith.constant 5 : i32
    %409 = arith.addi %408, %c5_i32_170 : i32
    %410 = arith.index_cast %arg1 : i32 to index
    %411 = arith.index_cast %409 : i32 to index
    %412 = memref.load %arg2[%410, %411] : memref<2x384xi32, #tpu.memory_space<smem>>
    %413 = arith.index_cast %412 : i32 to index
    %c0_171 = arith.constant 0 : index
    %414 = vector.load %arg3[%413, %c0_171] : memref<1000x128xf32, #tpu.memory_space<vmem>>, vector<1x128xf32>
    %c48_i32_172 = arith.constant 48 : i32
    %415 = arith.addi %0, %c48_i32_172 : i32
    %c6_i32_173 = arith.constant 6 : i32
    %416 = arith.addi %415, %c6_i32_173 : i32
    %417 = arith.index_cast %arg1 : i32 to index
    %418 = arith.index_cast %416 : i32 to index
    %419 = memref.load %arg2[%417, %418] : memref<2x384xi32, #tpu.memory_space<smem>>
    %420 = arith.index_cast %419 : i32 to index
    %c0_174 = arith.constant 0 : index
    %421 = vector.load %arg3[%420, %c0_174] : memref<1000x128xf32, #tpu.memory_space<vmem>>, vector<1x128xf32>
    %c48_i32_175 = arith.constant 48 : i32
    %422 = arith.addi %0, %c48_i32_175 : i32
    %c7_i32_176 = arith.constant 7 : i32
    %423 = arith.addi %422, %c7_i32_176 : i32
    %424 = arith.index_cast %arg1 : i32 to index
    %425 = arith.index_cast %423 : i32 to index
    %426 = memref.load %arg2[%424, %425] : memref<2x384xi32, #tpu.memory_space<smem>>
    %427 = arith.index_cast %426 : i32 to index
    %c0_177 = arith.constant 0 : index
    %428 = vector.load %arg3[%427, %c0_177] : memref<1000x128xf32, #tpu.memory_space<vmem>>, vector<1x128xf32>
    %429 = tpu.concatenate %379, %386, %393, %400, %407, %414, %421, %428 in 0 : vector<1x128xf32>, vector<1x128xf32>, vector<1x128xf32>, vector<1x128xf32>, vector<1x128xf32>, vector<1x128xf32>, vector<1x128xf32>, vector<1x128xf32> -> vector<8x128xf32>
    %c48 = arith.constant 48 : index
    %c0_178 = arith.constant 0 : index
    %430 = vector.load %arg4[%c48, %c0_178] : memref<128x128xf32, #tpu.memory_space<vmem>>, vector<8x128xf32>
    %431 = arith.addf %429, %430 : vector<8x128xf32>
    %c0_179 = arith.constant 0 : index
    %c48_180 = arith.constant 48 : index
    %c0_181 = arith.constant 0 : index
    %432 = vector.load %arg5[%c0_179, %c48_180, %c0_181] : memref<1x128x128xf32, #tpu.memory_space<vmem>>, vector<1x8x128xf32>
    %433 = vector.shape_cast %432 : vector<1x8x128xf32> to vector<8x128xf32>
    %434 = vector.shape_cast %431 : vector<8x128xf32> to vector<1x8x128xf32>
    tpu.vector_store %arg5[%c0_179, %c48_180, %c0_181], %434 {strides = array<i32>} : memref<1x128x128xf32, #tpu.memory_space<vmem>>, vector<1x8x128xf32>,
    %c56_i32 = arith.constant 56 : i32
    %435 = arith.addi %0, %c56_i32 : i32
    %c0_i32_182 = arith.constant 0 : i32
    %436 = arith.addi %435, %c0_i32_182 : i32
    %437 = arith.index_cast %arg1 : i32 to index
    %438 = arith.index_cast %436 : i32 to index
    %439 = memref.load %arg2[%437, %438] : memref<2x384xi32, #tpu.memory_space<smem>>
    %440 = arith.index_cast %439 : i32 to index
    %c0_183 = arith.constant 0 : index
    %441 = vector.load %arg3[%440, %c0_183] : memref<1000x128xf32, #tpu.memory_space<vmem>>, vector<1x128xf32>
    %c56_i32_184 = arith.constant 56 : i32
    %442 = arith.addi %0, %c56_i32_184 : i32
    %c1_i32_185 = arith.constant 1 : i32
    %443 = arith.addi %442, %c1_i32_185 : i32
    %444 = arith.index_cast %arg1 : i32 to index
    %445 = arith.index_cast %443 : i32 to index
    %446 = memref.load %arg2[%444, %445] : memref<2x384xi32, #tpu.memory_space<smem>>
    %447 = arith.index_cast %446 : i32 to index
    %c0_186 = arith.constant 0 : index
    %448 = vector.load %arg3[%447, %c0_186] : memref<1000x128xf32, #tpu.memory_space<vmem>>, vector<1x128xf32>
    %c56_i32_187 = arith.constant 56 : i32
    %449 = arith.addi %0, %c56_i32_187 : i32
    %c2_i32_188 = arith.constant 2 : i32
    %450 = arith.addi %449, %c2_i32_188 : i32
    %451 = arith.index_cast %arg1 : i32 to index
    %452 = arith.index_cast %450 : i32 to index
    %453 = memref.load %arg2[%451, %452] : memref<2x384xi32, #tpu.memory_space<smem>>
    %454 = arith.index_cast %453 : i32 to index
    %c0_189 = arith.constant 0 : index
    %455 = vector.load %arg3[%454, %c0_189] : memref<1000x128xf32, #tpu.memory_space<vmem>>, vector<1x128xf32>
    %c56_i32_190 = arith.constant 56 : i32
    %456 = arith.addi %0, %c56_i32_190 : i32
    %c3_i32_191 = arith.constant 3 : i32
    %457 = arith.addi %456, %c3_i32_191 : i32
    %458 = arith.index_cast %arg1 : i32 to index
    %459 = arith.index_cast %457 : i32 to index
    %460 = memref.load %arg2[%458, %459] : memref<2x384xi32, #tpu.memory_space<smem>>
    %461 = arith.index_cast %460 : i32 to index
    %c0_192 = arith.constant 0 : index
    %462 = vector.load %arg3[%461, %c0_192] : memref<1000x128xf32, #tpu.memory_space<vmem>>, vector<1x128xf32>
    %c56_i32_193 = arith.constant 56 : i32
    %463 = arith.addi %0, %c56_i32_193 : i32
    %c4_i32_194 = arith.constant 4 : i32
    %464 = arith.addi %463, %c4_i32_194 : i32
    %465 = arith.index_cast %arg1 : i32 to index
    %466 = arith.index_cast %464 : i32 to index
    %467 = memref.load %arg2[%465, %466] : memref<2x384xi32, #tpu.memory_space<smem>>
    %468 = arith.index_cast %467 : i32 to index
    %c0_195 = arith.constant 0 : index
    %469 = vector.load %arg3[%468, %c0_195] : memref<1000x128xf32, #tpu.memory_space<vmem>>, vector<1x128xf32>
    %c56_i32_196 = arith.constant 56 : i32
    %470 = arith.addi %0, %c56_i32_196 : i32
    %c5_i32_197 = arith.constant 5 : i32
    %471 = arith.addi %470, %c5_i32_197 : i32
    %472 = arith.index_cast %arg1 : i32 to index
    %473 = arith.index_cast %471 : i32 to index
    %474 = memref.load %arg2[%472, %473] : memref<2x384xi32, #tpu.memory_space<smem>>
    %475 = arith.index_cast %474 : i32 to index
    %c0_198 = arith.constant 0 : index
    %476 = vector.load %arg3[%475, %c0_198] : memref<1000x128xf32, #tpu.memory_space<vmem>>, vector<1x128xf32>
    %c56_i32_199 = arith.constant 56 : i32
    %477 = arith.addi %0, %c56_i32_199 : i32
    %c6_i32_200 = arith.constant 6 : i32
    %478 = arith.addi %477, %c6_i32_200 : i32
    %479 = arith.index_cast %arg1 : i32 to index
    %480 = arith.index_cast %478 : i32 to index
    %481 = memref.load %arg2[%479, %480] : memref<2x384xi32, #tpu.memory_space<smem>>
    %482 = arith.index_cast %481 : i32 to index
    %c0_201 = arith.constant 0 : index
    %483 = vector.load %arg3[%482, %c0_201] : memref<1000x128xf32, #tpu.memory_space<vmem>>, vector<1x128xf32>
    %c56_i32_202 = arith.constant 56 : i32
    %484 = arith.addi %0, %c56_i32_202 : i32
    %c7_i32_203 = arith.constant 7 : i32
    %485 = arith.addi %484, %c7_i32_203 : i32
    %486 = arith.index_cast %arg1 : i32 to index
    %487 = arith.index_cast %485 : i32 to index
    %488 = memref.load %arg2[%486, %487] : memref<2x384xi32, #tpu.memory_space<smem>>
    %489 = arith.index_cast %488 : i32 to index
    %c0_204 = arith.constant 0 : index
    %490 = vector.load %arg3[%489, %c0_204] : memref<1000x128xf32, #tpu.memory_space<vmem>>, vector<1x128xf32>
    %491 = tpu.concatenate %441, %448, %455, %462, %469, %476, %483, %490 in 0 : vector<1x128xf32>, vector<1x128xf32>, vector<1x128xf32>, vector<1x128xf32>, vector<1x128xf32>, vector<1x128xf32>, vector<1x128xf32>, vector<1x128xf32> -> vector<8x128xf32>
    %c56 = arith.constant 56 : index
    %c0_205 = arith.constant 0 : index
    %492 = vector.load %arg4[%c56, %c0_205] : memref<128x128xf32, #tpu.memory_space<vmem>>, vector<8x128xf32>
    %493 = arith.addf %491, %492 : vector<8x128xf32>
    %c0_206 = arith.constant 0 : index
    %c56_207 = arith.constant 56 : index
    %c0_208 = arith.constant 0 : index
    %494 = vector.load %arg5[%c0_206, %c56_207, %c0_208] : memref<1x128x128xf32, #tpu.memory_space<vmem>>, vector<1x8x128xf32>
    %495 = vector.shape_cast %494 : vector<1x8x128xf32> to vector<8x128xf32>
    %496 = vector.shape_cast %493 : vector<8x128xf32> to vector<1x8x128xf32>
    tpu.vector_store %arg5[%c0_206, %c56_207, %c0_208], %496 {strides = array<i32>} : memref<1x128x128xf32, #tpu.memory_space<vmem>>, vector<1x8x128xf32>,
    %c64_i32 = arith.constant 64 : i32
    %497 = arith.addi %0, %c64_i32 : i32
    %c0_i32_209 = arith.constant 0 : i32
    %498 = arith.addi %497, %c0_i32_209 : i32
    %499 = arith.index_cast %arg1 : i32 to index
    %500 = arith.index_cast %498 : i32 to index
    %501 = memref.load %arg2[%499, %500] : memref<2x384xi32, #tpu.memory_space<smem>>
    %502 = arith.index_cast %501 : i32 to index
    %c0_210 = arith.constant 0 : index
    %503 = vector.load %arg3[%502, %c0_210] : memref<1000x128xf32, #tpu.memory_space<vmem>>, vector<1x128xf32>
    %c64_i32_211 = arith.constant 64 : i32
    %504 = arith.addi %0, %c64_i32_211 : i32
    %c1_i32_212 = arith.constant 1 : i32
    %505 = arith.addi %504, %c1_i32_212 : i32
    %506 = arith.index_cast %arg1 : i32 to index
    %507 = arith.index_cast %505 : i32 to index
    %508 = memref.load %arg2[%506, %507] : memref<2x384xi32, #tpu.memory_space<smem>>
    %509 = arith.index_cast %508 : i32 to index
    %c0_213 = arith.constant 0 : index
    %510 = vector.load %arg3[%509, %c0_213] : memref<1000x128xf32, #tpu.memory_space<vmem>>, vector<1x128xf32>
    %c64_i32_214 = arith.constant 64 : i32
    %511 = arith.addi %0, %c64_i32_214 : i32
    %c2_i32_215 = arith.constant 2 : i32
    %512 = arith.addi %511, %c2_i32_215 : i32
    %513 = arith.index_cast %arg1 : i32 to index
    %514 = arith.index_cast %512 : i32 to index
    %515 = memref.load %arg2[%513, %514] : memref<2x384xi32, #tpu.memory_space<smem>>
    %516 = arith.index_cast %515 : i32 to index
    %c0_216 = arith.constant 0 : index
    %517 = vector.load %arg3[%516, %c0_216] : memref<1000x128xf32, #tpu.memory_space<vmem>>, vector<1x128xf32>
    %c64_i32_217 = arith.constant 64 : i32
    %518 = arith.addi %0, %c64_i32_217 : i32
    %c3_i32_218 = arith.constant 3 : i32
    %519 = arith.addi %518, %c3_i32_218 : i32
    %520 = arith.index_cast %arg1 : i32 to index
    %521 = arith.index_cast %519 : i32 to index
    %522 = memref.load %arg2[%520, %521] : memref<2x384xi32, #tpu.memory_space<smem>>
    %523 = arith.index_cast %522 : i32 to index
    %c0_219 = arith.constant 0 : index
    %524 = vector.load %arg3[%523, %c0_219] : memref<1000x128xf32, #tpu.memory_space<vmem>>, vector<1x128xf32>
    %c64_i32_220 = arith.constant 64 : i32
    %525 = arith.addi %0, %c64_i32_220 : i32
    %c4_i32_221 = arith.constant 4 : i32
    %526 = arith.addi %525, %c4_i32_221 : i32
    %527 = arith.index_cast %arg1 : i32 to index
    %528 = arith.index_cast %526 : i32 to index
    %529 = memref.load %arg2[%527, %528] : memref<2x384xi32, #tpu.memory_space<smem>>
    %530 = arith.index_cast %529 : i32 to index
    %c0_222 = arith.constant 0 : index
    %531 = vector.load %arg3[%530, %c0_222] : memref<1000x128xf32, #tpu.memory_space<vmem>>, vector<1x128xf32>
    %c64_i32_223 = arith.constant 64 : i32
    %532 = arith.addi %0, %c64_i32_223 : i32
    %c5_i32_224 = arith.constant 5 : i32
    %533 = arith.addi %532, %c5_i32_224 : i32
    %534 = arith.index_cast %arg1 : i32 to index
    %535 = arith.index_cast %533 : i32 to index
    %536 = memref.load %arg2[%534, %535] : memref<2x384xi32, #tpu.memory_space<smem>>
    %537 = arith.index_cast %536 : i32 to index
    %c0_225 = arith.constant 0 : index
    %538 = vector.load %arg3[%537, %c0_225] : memref<1000x128xf32, #tpu.memory_space<vmem>>, vector<1x128xf32>
    %c64_i32_226 = arith.constant 64 : i32
    %539 = arith.addi %0, %c64_i32_226 : i32
    %c6_i32_227 = arith.constant 6 : i32
    %540 = arith.addi %539, %c6_i32_227 : i32
    %541 = arith.index_cast %arg1 : i32 to index
    %542 = arith.index_cast %540 : i32 to index
    %543 = memref.load %arg2[%541, %542] : memref<2x384xi32, #tpu.memory_space<smem>>
    %544 = arith.index_cast %543 : i32 to index
    %c0_228 = arith.constant 0 : index
    %545 = vector.load %arg3[%544, %c0_228] : memref<1000x128xf32, #tpu.memory_space<vmem>>, vector<1x128xf32>
    %c64_i32_229 = arith.constant 64 : i32
    %546 = arith.addi %0, %c64_i32_229 : i32
    %c7_i32_230 = arith.constant 7 : i32
    %547 = arith.addi %546, %c7_i32_230 : i32
    %548 = arith.index_cast %arg1 : i32 to index
    %549 = arith.index_cast %547 : i32 to index
    %550 = memref.load %arg2[%548, %549] : memref<2x384xi32, #tpu.memory_space<smem>>
    %551 = arith.index_cast %550 : i32 to index
    %c0_231 = arith.constant 0 : index
    %552 = vector.load %arg3[%551, %c0_231] : memref<1000x128xf32, #tpu.memory_space<vmem>>, vector<1x128xf32>
    %553 = tpu.concatenate %503, %510, %517, %524, %531, %538, %545, %552 in 0 : vector<1x128xf32>, vector<1x128xf32>, vector<1x128xf32>, vector<1x128xf32>, vector<1x128xf32>, vector<1x128xf32>, vector<1x128xf32>, vector<1x128xf32> -> vector<8x128xf32>
    %c64 = arith.constant 64 : index
    %c0_232 = arith.constant 0 : index
    %554 = vector.load %arg4[%c64, %c0_232] : memref<128x128xf32, #tpu.memory_space<vmem>>, vector<8x128xf32>
    %555 = arith.addf %553, %554 : vector<8x128xf32>
    %c0_233 = arith.constant 0 : index
    %c64_234 = arith.constant 64 : index
    %c0_235 = arith.constant 0 : index
    %556 = vector.load %arg5[%c0_233, %c64_234, %c0_235] : memref<1x128x128xf32, #tpu.memory_space<vmem>>, vector<1x8x128xf32>
    %557 = vector.shape_cast %556 : vector<1x8x128xf32> to vector<8x128xf32>
    %558 = vector.shape_cast %555 : vector<8x128xf32> to vector<1x8x128xf32>
    tpu.vector_store %arg5[%c0_233, %c64_234, %c0_235], %558 {strides = array<i32>} : memref<1x128x128xf32, #tpu.memory_space<vmem>>, vector<1x8x128xf32>,
    %c72_i32 = arith.constant 72 : i32
    %559 = arith.addi %0, %c72_i32 : i32
    %c0_i32_236 = arith.constant 0 : i32
    %560 = arith.addi %559, %c0_i32_236 : i32
    %561 = arith.index_cast %arg1 : i32 to index
    %562 = arith.index_cast %560 : i32 to index
    %563 = memref.load %arg2[%561, %562] : memref<2x384xi32, #tpu.memory_space<smem>>
    %564 = arith.index_cast %563 : i32 to index
    %c0_237 = arith.constant 0 : index
    %565 = vector.load %arg3[%564, %c0_237] : memref<1000x128xf32, #tpu.memory_space<vmem>>, vector<1x128xf32>
    %c72_i32_238 = arith.constant 72 : i32
    %566 = arith.addi %0, %c72_i32_238 : i32
    %c1_i32_239 = arith.constant 1 : i32
    %567 = arith.addi %566, %c1_i32_239 : i32
    %568 = arith.index_cast %arg1 : i32 to index
    %569 = arith.index_cast %567 : i32 to index
    %570 = memref.load %arg2[%568, %569] : memref<2x384xi32, #tpu.memory_space<smem>>
    %571 = arith.index_cast %570 : i32 to index
    %c0_240 = arith.constant 0 : index
    %572 = vector.load %arg3[%571, %c0_240] : memref<1000x128xf32, #tpu.memory_space<vmem>>, vector<1x128xf32>
    %c72_i32_241 = arith.constant 72 : i32
    %573 = arith.addi %0, %c72_i32_241 : i32
    %c2_i32_242 = arith.constant 2 : i32
    %574 = arith.addi %573, %c2_i32_242 : i32
    %575 = arith.index_cast %arg1 : i32 to index
    %576 = arith.index_cast %574 : i32 to index
    %577 = memref.load %arg2[%575, %576] : memref<2x384xi32, #tpu.memory_space<smem>>
    %578 = arith.index_cast %577 : i32 to index
    %c0_243 = arith.constant 0 : index
    %579 = vector.load %arg3[%578, %c0_243] : memref<1000x128xf32, #tpu.memory_space<vmem>>, vector<1x128xf32>
    %c72_i32_244 = arith.constant 72 : i32
    %580 = arith.addi %0, %c72_i32_244 : i32
    %c3_i32_245 = arith.constant 3 : i32
    %581 = arith.addi %580, %c3_i32_245 : i32
    %582 = arith.index_cast %arg1 : i32 to index
    %583 = arith.index_cast %581 : i32 to index
    %584 = memref.load %arg2[%582, %583] : memref<2x384xi32, #tpu.memory_space<smem>>
    %585 = arith.index_cast %584 : i32 to index
    %c0_246 = arith.constant 0 : index
    %586 = vector.load %arg3[%585, %c0_246] : memref<1000x128xf32, #tpu.memory_space<vmem>>, vector<1x128xf32>
    %c72_i32_247 = arith.constant 72 : i32
    %587 = arith.addi %0, %c72_i32_247 : i32
    %c4_i32_248 = arith.constant 4 : i32
    %588 = arith.addi %587, %c4_i32_248 : i32
    %589 = arith.index_cast %arg1 : i32 to index
    %590 = arith.index_cast %588 : i32 to index
    %591 = memref.load %arg2[%589, %590] : memref<2x384xi32, #tpu.memory_space<smem>>
    %592 = arith.index_cast %591 : i32 to index
    %c0_249 = arith.constant 0 : index
    %593 = vector.load %arg3[%592, %c0_249] : memref<1000x128xf32, #tpu.memory_space<vmem>>, vector<1x128xf32>
    %c72_i32_250 = arith.constant 72 : i32
    %594 = arith.addi %0, %c72_i32_250 : i32
    %c5_i32_251 = arith.constant 5 : i32
    %595 = arith.addi %594, %c5_i32_251 : i32
    %596 = arith.index_cast %arg1 : i32 to index
    %597 = arith.index_cast %595 : i32 to index
    %598 = memref.load %arg2[%596, %597] : memref<2x384xi32, #tpu.memory_space<smem>>
    %599 = arith.index_cast %598 : i32 to index
    %c0_252 = arith.constant 0 : index
    %600 = vector.load %arg3[%599, %c0_252] : memref<1000x128xf32, #tpu.memory_space<vmem>>, vector<1x128xf32>
    %c72_i32_253 = arith.constant 72 : i32
    %601 = arith.addi %0, %c72_i32_253 : i32
    %c6_i32_254 = arith.constant 6 : i32
    %602 = arith.addi %601, %c6_i32_254 : i32
    %603 = arith.index_cast %arg1 : i32 to index
    %604 = arith.index_cast %602 : i32 to index
    %605 = memref.load %arg2[%603, %604] : memref<2x384xi32, #tpu.memory_space<smem>>
    %606 = arith.index_cast %605 : i32 to index
    %c0_255 = arith.constant 0 : index
    %607 = vector.load %arg3[%606, %c0_255] : memref<1000x128xf32, #tpu.memory_space<vmem>>, vector<1x128xf32>
    %c72_i32_256 = arith.constant 72 : i32
    %608 = arith.addi %0, %c72_i32_256 : i32
    %c7_i32_257 = arith.constant 7 : i32
    %609 = arith.addi %608, %c7_i32_257 : i32
    %610 = arith.index_cast %arg1 : i32 to index
    %611 = arith.index_cast %609 : i32 to index
    %612 = memref.load %arg2[%610, %611] : memref<2x384xi32, #tpu.memory_space<smem>>
    %613 = arith.index_cast %612 : i32 to index
    %c0_258 = arith.constant 0 : index
    %614 = vector.load %arg3[%613, %c0_258] : memref<1000x128xf32, #tpu.memory_space<vmem>>, vector<1x128xf32>
    %615 = tpu.concatenate %565, %572, %579, %586, %593, %600, %607, %614 in 0 : vector<1x128xf32>, vector<1x128xf32>, vector<1x128xf32>, vector<1x128xf32>, vector<1x128xf32>, vector<1x128xf32>, vector<1x128xf32>, vector<1x128xf32> -> vector<8x128xf32>
    %c72 = arith.constant 72 : index
    %c0_259 = arith.constant 0 : index
    %616 = vector.load %arg4[%c72, %c0_259] : memref<128x128xf32, #tpu.memory_space<vmem>>, vector<8x128xf32>
    %617 = arith.addf %615, %616 : vector<8x128xf32>
    %c0_260 = arith.constant 0 : index
    %c72_261 = arith.constant 72 : index
    %c0_262 = arith.constant 0 : index
    %618 = vector.load %arg5[%c0_260, %c72_261, %c0_262] : memref<1x128x128xf32, #tpu.memory_space<vmem>>, vector<1x8x128xf32>
    %619 = vector.shape_cast %618 : vector<1x8x128xf32> to vector<8x128xf32>
    %620 = vector.shape_cast %617 : vector<8x128xf32> to vector<1x8x128xf32>
    tpu.vector_store %arg5[%c0_260, %c72_261, %c0_262], %620 {strides = array<i32>} : memref<1x128x128xf32, #tpu.memory_space<vmem>>, vector<1x8x128xf32>,
    %c80_i32 = arith.constant 80 : i32
    %621 = arith.addi %0, %c80_i32 : i32
    %c0_i32_263 = arith.constant 0 : i32
    %622 = arith.addi %621, %c0_i32_263 : i32
    %623 = arith.index_cast %arg1 : i32 to index
    %624 = arith.index_cast %622 : i32 to index
    %625 = memref.load %arg2[%623, %624] : memref<2x384xi32, #tpu.memory_space<smem>>
    %626 = arith.index_cast %625 : i32 to index
    %c0_264 = arith.constant 0 : index
    %627 = vector.load %arg3[%626, %c0_264] : memref<1000x128xf32, #tpu.memory_space<vmem>>, vector<1x128xf32>
    %c80_i32_265 = arith.constant 80 : i32
    %628 = arith.addi %0, %c80_i32_265 : i32
    %c1_i32_266 = arith.constant 1 : i32
    %629 = arith.addi %628, %c1_i32_266 : i32
    %630 = arith.index_cast %arg1 : i32 to index
    %631 = arith.index_cast %629 : i32 to index
    %632 = memref.load %arg2[%630, %631] : memref<2x384xi32, #tpu.memory_space<smem>>
    %633 = arith.index_cast %632 : i32 to index
    %c0_267 = arith.constant 0 : index
    %634 = vector.load %arg3[%633, %c0_267] : memref<1000x128xf32, #tpu.memory_space<vmem>>, vector<1x128xf32>
    %c80_i32_268 = arith.constant 80 : i32
    %635 = arith.addi %0, %c80_i32_268 : i32
    %c2_i32_269 = arith.constant 2 : i32
    %636 = arith.addi %635, %c2_i32_269 : i32
    %637 = arith.index_cast %arg1 : i32 to index
    %638 = arith.index_cast %636 : i32 to index
    %639 = memref.load %arg2[%637, %638] : memref<2x384xi32, #tpu.memory_space<smem>>
    %640 = arith.index_cast %639 : i32 to index
    %c0_270 = arith.constant 0 : index
    %641 = vector.load %arg3[%640, %c0_270] : memref<1000x128xf32, #tpu.memory_space<vmem>>, vector<1x128xf32>
    %c80_i32_271 = arith.constant 80 : i32
    %642 = arith.addi %0, %c80_i32_271 : i32
    %c3_i32_272 = arith.constant 3 : i32
    %643 = arith.addi %642, %c3_i32_272 : i32
    %644 = arith.index_cast %arg1 : i32 to index
    %645 = arith.index_cast %643 : i32 to index
    %646 = memref.load %arg2[%644, %645] : memref<2x384xi32, #tpu.memory_space<smem>>
    %647 = arith.index_cast %646 : i32 to index
    %c0_273 = arith.constant 0 : index
    %648 = vector.load %arg3[%647, %c0_273] : memref<1000x128xf32, #tpu.memory_space<vmem>>, vector<1x128xf32>
    %c80_i32_274 = arith.constant 80 : i32
    %649 = arith.addi %0, %c80_i32_274 : i32
    %c4_i32_275 = arith.constant 4 : i32
    %650 = arith.addi %649, %c4_i32_275 : i32
    %651 = arith.index_cast %arg1 : i32 to index
    %652 = arith.index_cast %650 : i32 to index
    %653 = memref.load %arg2[%651, %652] : memref<2x384xi32, #tpu.memory_space<smem>>
    %654 = arith.index_cast %653 : i32 to index
    %c0_276 = arith.constant 0 : index
    %655 = vector.load %arg3[%654, %c0_276] : memref<1000x128xf32, #tpu.memory_space<vmem>>, vector<1x128xf32>
    %c80_i32_277 = arith.constant 80 : i32
    %656 = arith.addi %0, %c80_i32_277 : i32
    %c5_i32_278 = arith.constant 5 : i32
    %657 = arith.addi %656, %c5_i32_278 : i32
    %658 = arith.index_cast %arg1 : i32 to index
    %659 = arith.index_cast %657 : i32 to index
    %660 = memref.load %arg2[%658, %659] : memref<2x384xi32, #tpu.memory_space<smem>>
    %661 = arith.index_cast %660 : i32 to index
    %c0_279 = arith.constant 0 : index
    %662 = vector.load %arg3[%661, %c0_279] : memref<1000x128xf32, #tpu.memory_space<vmem>>, vector<1x128xf32>
    %c80_i32_280 = arith.constant 80 : i32
    %663 = arith.addi %0, %c80_i32_280 : i32
    %c6_i32_281 = arith.constant 6 : i32
    %664 = arith.addi %663, %c6_i32_281 : i32
    %665 = arith.index_cast %arg1 : i32 to index
    %666 = arith.index_cast %664 : i32 to index
    %667 = memref.load %arg2[%665, %666] : memref<2x384xi32, #tpu.memory_space<smem>>
    %668 = arith.index_cast %667 : i32 to index
    %c0_282 = arith.constant 0 : index
    %669 = vector.load %arg3[%668, %c0_282] : memref<1000x128xf32, #tpu.memory_space<vmem>>, vector<1x128xf32>
    %c80_i32_283 = arith.constant 80 : i32
    %670 = arith.addi %0, %c80_i32_283 : i32
    %c7_i32_284 = arith.constant 7 : i32
    %671 = arith.addi %670, %c7_i32_284 : i32
    %672 = arith.index_cast %arg1 : i32 to index
    %673 = arith.index_cast %671 : i32 to index
    %674 = memref.load %arg2[%672, %673] : memref<2x384xi32, #tpu.memory_space<smem>>
    %675 = arith.index_cast %674 : i32 to index
    %c0_285 = arith.constant 0 : index
    %676 = vector.load %arg3[%675, %c0_285] : memref<1000x128xf32, #tpu.memory_space<vmem>>, vector<1x128xf32>
    %677 = tpu.concatenate %627, %634, %641, %648, %655, %662, %669, %676 in 0 : vector<1x128xf32>, vector<1x128xf32>, vector<1x128xf32>, vector<1x128xf32>, vector<1x128xf32>, vector<1x128xf32>, vector<1x128xf32>, vector<1x128xf32> -> vector<8x128xf32>
    %c80 = arith.constant 80 : index
    %c0_286 = arith.constant 0 : index
    %678 = vector.load %arg4[%c80, %c0_286] : memref<128x128xf32, #tpu.memory_space<vmem>>, vector<8x128xf32>
    %679 = arith.addf %677, %678 : vector<8x128xf32>
    %c0_287 = arith.constant 0 : index
    %c80_288 = arith.constant 80 : index
    %c0_289 = arith.constant 0 : index
    %680 = vector.load %arg5[%c0_287, %c80_288, %c0_289] : memref<1x128x128xf32, #tpu.memory_space<vmem>>, vector<1x8x128xf32>
    %681 = vector.shape_cast %680 : vector<1x8x128xf32> to vector<8x128xf32>
    %682 = vector.shape_cast %679 : vector<8x128xf32> to vector<1x8x128xf32>
    tpu.vector_store %arg5[%c0_287, %c80_288, %c0_289], %682 {strides = array<i32>} : memref<1x128x128xf32, #tpu.memory_space<vmem>>, vector<1x8x128xf32>,
    %c88_i32 = arith.constant 88 : i32
    %683 = arith.addi %0, %c88_i32 : i32
    %c0_i32_290 = arith.constant 0 : i32
    %684 = arith.addi %683, %c0_i32_290 : i32
    %685 = arith.index_cast %arg1 : i32 to index
    %686 = arith.index_cast %684 : i32 to index
    %687 = memref.load %arg2[%685, %686] : memref<2x384xi32, #tpu.memory_space<smem>>
    %688 = arith.index_cast %687 : i32 to index
    %c0_291 = arith.constant 0 : index
    %689 = vector.load %arg3[%688, %c0_291] : memref<1000x128xf32, #tpu.memory_space<vmem>>, vector<1x128xf32>
    %c88_i32_292 = arith.constant 88 : i32
    %690 = arith.addi %0, %c88_i32_292 : i32
    %c1_i32_293 = arith.constant 1 : i32
    %691 = arith.addi %690, %c1_i32_293 : i32
    %692 = arith.index_cast %arg1 : i32 to index
    %693 = arith.index_cast %691 : i32 to index
    %694 = memref.load %arg2[%692, %693] : memref<2x384xi32, #tpu.memory_space<smem>>
    %695 = arith.index_cast %694 : i32 to index
    %c0_294 = arith.constant 0 : index
    %696 = vector.load %arg3[%695, %c0_294] : memref<1000x128xf32, #tpu.memory_space<vmem>>, vector<1x128xf32>
    %c88_i32_295 = arith.constant 88 : i32
    %697 = arith.addi %0, %c88_i32_295 : i32
    %c2_i32_296 = arith.constant 2 : i32
    %698 = arith.addi %697, %c2_i32_296 : i32
    %699 = arith.index_cast %arg1 : i32 to index
    %700 = arith.index_cast %698 : i32 to index
    %701 = memref.load %arg2[%699, %700] : memref<2x384xi32, #tpu.memory_space<smem>>
    %702 = arith.index_cast %701 : i32 to index
    %c0_297 = arith.constant 0 : index
    %703 = vector.load %arg3[%702, %c0_297] : memref<1000x128xf32, #tpu.memory_space<vmem>>, vector<1x128xf32>
    %c88_i32_298 = arith.constant 88 : i32
    %704 = arith.addi %0, %c88_i32_298 : i32
    %c3_i32_299 = arith.constant 3 : i32
    %705 = arith.addi %704, %c3_i32_299 : i32
    %706 = arith.index_cast %arg1 : i32 to index
    %707 = arith.index_cast %705 : i32 to index
    %708 = memref.load %arg2[%706, %707] : memref<2x384xi32, #tpu.memory_space<smem>>
    %709 = arith.index_cast %708 : i32 to index
    %c0_300 = arith.constant 0 : index
    %710 = vector.load %arg3[%709, %c0_300] : memref<1000x128xf32, #tpu.memory_space<vmem>>, vector<1x128xf32>
    %c88_i32_301 = arith.constant 88 : i32
    %711 = arith.addi %0, %c88_i32_301 : i32
    %c4_i32_302 = arith.constant 4 : i32
    %712 = arith.addi %711, %c4_i32_302 : i32
    %713 = arith.index_cast %arg1 : i32 to index
    %714 = arith.index_cast %712 : i32 to index
    %715 = memref.load %arg2[%713, %714] : memref<2x384xi32, #tpu.memory_space<smem>>
    %716 = arith.index_cast %715 : i32 to index
    %c0_303 = arith.constant 0 : index
    %717 = vector.load %arg3[%716, %c0_303] : memref<1000x128xf32, #tpu.memory_space<vmem>>, vector<1x128xf32>
    %c88_i32_304 = arith.constant 88 : i32
    %718 = arith.addi %0, %c88_i32_304 : i32
    %c5_i32_305 = arith.constant 5 : i32
    %719 = arith.addi %718, %c5_i32_305 : i32
    %720 = arith.index_cast %arg1 : i32 to index
    %721 = arith.index_cast %719 : i32 to index
    %722 = memref.load %arg2[%720, %721] : memref<2x384xi32, #tpu.memory_space<smem>>
    %723 = arith.index_cast %722 : i32 to index
    %c0_306 = arith.constant 0 : index
    %724 = vector.load %arg3[%723, %c0_306] : memref<1000x128xf32, #tpu.memory_space<vmem>>, vector<1x128xf32>
    %c88_i32_307 = arith.constant 88 : i32
    %725 = arith.addi %0, %c88_i32_307 : i32
    %c6_i32_308 = arith.constant 6 : i32
    %726 = arith.addi %725, %c6_i32_308 : i32
    %727 = arith.index_cast %arg1 : i32 to index
    %728 = arith.index_cast %726 : i32 to index
    %729 = memref.load %arg2[%727, %728] : memref<2x384xi32, #tpu.memory_space<smem>>
    %730 = arith.index_cast %729 : i32 to index
    %c0_309 = arith.constant 0 : index
    %731 = vector.load %arg3[%730, %c0_309] : memref<1000x128xf32, #tpu.memory_space<vmem>>, vector<1x128xf32>
    %c88_i32_310 = arith.constant 88 : i32
    %732 = arith.addi %0, %c88_i32_310 : i32
    %c7_i32_311 = arith.constant 7 : i32
    %733 = arith.addi %732, %c7_i32_311 : i32
    %734 = arith.index_cast %arg1 : i32 to index
    %735 = arith.index_cast %733 : i32 to index
    %736 = memref.load %arg2[%734, %735] : memref<2x384xi32, #tpu.memory_space<smem>>
    %737 = arith.index_cast %736 : i32 to index
    %c0_312 = arith.constant 0 : index
    %738 = vector.load %arg3[%737, %c0_312] : memref<1000x128xf32, #tpu.memory_space<vmem>>, vector<1x128xf32>
    %739 = tpu.concatenate %689, %696, %703, %710, %717, %724, %731, %738 in 0 : vector<1x128xf32>, vector<1x128xf32>, vector<1x128xf32>, vector<1x128xf32>, vector<1x128xf32>, vector<1x128xf32>, vector<1x128xf32>, vector<1x128xf32> -> vector<8x128xf32>
    %c88 = arith.constant 88 : index
    %c0_313 = arith.constant 0 : index
    %740 = vector.load %arg4[%c88, %c0_313] : memref<128x128xf32, #tpu.memory_space<vmem>>, vector<8x128xf32>
    %741 = arith.addf %739, %740 : vector<8x128xf32>
    %c0_314 = arith.constant 0 : index
    %c88_315 = arith.constant 88 : index
    %c0_316 = arith.constant 0 : index
    %742 = vector.load %arg5[%c0_314, %c88_315, %c0_316] : memref<1x128x128xf32, #tpu.memory_space<vmem>>, vector<1x8x128xf32>
    %743 = vector.shape_cast %742 : vector<1x8x128xf32> to vector<8x128xf32>
    %744 = vector.shape_cast %741 : vector<8x128xf32> to vector<1x8x128xf32>
    tpu.vector_store %arg5[%c0_314, %c88_315, %c0_316], %744 {strides = array<i32>} : memref<1x128x128xf32, #tpu.memory_space<vmem>>, vector<1x8x128xf32>,
    %c96_i32 = arith.constant 96 : i32
    %745 = arith.addi %0, %c96_i32 : i32
    %c0_i32_317 = arith.constant 0 : i32
    %746 = arith.addi %745, %c0_i32_317 : i32
    %747 = arith.index_cast %arg1 : i32 to index
    %748 = arith.index_cast %746 : i32 to index
    %749 = memref.load %arg2[%747, %748] : memref<2x384xi32, #tpu.memory_space<smem>>
    %750 = arith.index_cast %749 : i32 to index
    %c0_318 = arith.constant 0 : index
    %751 = vector.load %arg3[%750, %c0_318] : memref<1000x128xf32, #tpu.memory_space<vmem>>, vector<1x128xf32>
    %c96_i32_319 = arith.constant 96 : i32
    %752 = arith.addi %0, %c96_i32_319 : i32
    %c1_i32_320 = arith.constant 1 : i32
    %753 = arith.addi %752, %c1_i32_320 : i32
    %754 = arith.index_cast %arg1 : i32 to index
    %755 = arith.index_cast %753 : i32 to index
    %756 = memref.load %arg2[%754, %755] : memref<2x384xi32, #tpu.memory_space<smem>>
    %757 = arith.index_cast %756 : i32 to index
    %c0_321 = arith.constant 0 : index
    %758 = vector.load %arg3[%757, %c0_321] : memref<1000x128xf32, #tpu.memory_space<vmem>>, vector<1x128xf32>
    %c96_i32_322 = arith.constant 96 : i32
    %759 = arith.addi %0, %c96_i32_322 : i32
    %c2_i32_323 = arith.constant 2 : i32
    %760 = arith.addi %759, %c2_i32_323 : i32
    %761 = arith.index_cast %arg1 : i32 to index
    %762 = arith.index_cast %760 : i32 to index
    %763 = memref.load %arg2[%761, %762] : memref<2x384xi32, #tpu.memory_space<smem>>
    %764 = arith.index_cast %763 : i32 to index
    %c0_324 = arith.constant 0 : index
    %765 = vector.load %arg3[%764, %c0_324] : memref<1000x128xf32, #tpu.memory_space<vmem>>, vector<1x128xf32>
    %c96_i32_325 = arith.constant 96 : i32
    %766 = arith.addi %0, %c96_i32_325 : i32
    %c3_i32_326 = arith.constant 3 : i32
    %767 = arith.addi %766, %c3_i32_326 : i32
    %768 = arith.index_cast %arg1 : i32 to index
    %769 = arith.index_cast %767 : i32 to index
    %770 = memref.load %arg2[%768, %769] : memref<2x384xi32, #tpu.memory_space<smem>>
    %771 = arith.index_cast %770 : i32 to index
    %c0_327 = arith.constant 0 : index
    %772 = vector.load %arg3[%771, %c0_327] : memref<1000x128xf32, #tpu.memory_space<vmem>>, vector<1x128xf32>
    %c96_i32_328 = arith.constant 96 : i32
    %773 = arith.addi %0, %c96_i32_328 : i32
    %c4_i32_329 = arith.constant 4 : i32
    %774 = arith.addi %773, %c4_i32_329 : i32
    %775 = arith.index_cast %arg1 : i32 to index
    %776 = arith.index_cast %774 : i32 to index
    %777 = memref.load %arg2[%775, %776] : memref<2x384xi32, #tpu.memory_space<smem>>
    %778 = arith.index_cast %777 : i32 to index
    %c0_330 = arith.constant 0 : index
    %779 = vector.load %arg3[%778, %c0_330] : memref<1000x128xf32, #tpu.memory_space<vmem>>, vector<1x128xf32>
    %c96_i32_331 = arith.constant 96 : i32
    %780 = arith.addi %0, %c96_i32_331 : i32
    %c5_i32_332 = arith.constant 5 : i32
    %781 = arith.addi %780, %c5_i32_332 : i32
    %782 = arith.index_cast %arg1 : i32 to index
    %783 = arith.index_cast %781 : i32 to index
    %784 = memref.load %arg2[%782, %783] : memref<2x384xi32, #tpu.memory_space<smem>>
    %785 = arith.index_cast %784 : i32 to index
    %c0_333 = arith.constant 0 : index
    %786 = vector.load %arg3[%785, %c0_333] : memref<1000x128xf32, #tpu.memory_space<vmem>>, vector<1x128xf32>
    %c96_i32_334 = arith.constant 96 : i32
    %787 = arith.addi %0, %c96_i32_334 : i32
    %c6_i32_335 = arith.constant 6 : i32
    %788 = arith.addi %787, %c6_i32_335 : i32
    %789 = arith.index_cast %arg1 : i32 to index
    %790 = arith.index_cast %788 : i32 to index
    %791 = memref.load %arg2[%789, %790] : memref<2x384xi32, #tpu.memory_space<smem>>
    %792 = arith.index_cast %791 : i32 to index
    %c0_336 = arith.constant 0 : index
    %793 = vector.load %arg3[%792, %c0_336] : memref<1000x128xf32, #tpu.memory_space<vmem>>, vector<1x128xf32>
    %c96_i32_337 = arith.constant 96 : i32
    %794 = arith.addi %0, %c96_i32_337 : i32
    %c7_i32_338 = arith.constant 7 : i32
    %795 = arith.addi %794, %c7_i32_338 : i32
    %796 = arith.index_cast %arg1 : i32 to index
    %797 = arith.index_cast %795 : i32 to index
    %798 = memref.load %arg2[%796, %797] : memref<2x384xi32, #tpu.memory_space<smem>>
    %799 = arith.index_cast %798 : i32 to index
    %c0_339 = arith.constant 0 : index
    %800 = vector.load %arg3[%799, %c0_339] : memref<1000x128xf32, #tpu.memory_space<vmem>>, vector<1x128xf32>
    %801 = tpu.concatenate %751, %758, %765, %772, %779, %786, %793, %800 in 0 : vector<1x128xf32>, vector<1x128xf32>, vector<1x128xf32>, vector<1x128xf32>, vector<1x128xf32>, vector<1x128xf32>, vector<1x128xf32>, vector<1x128xf32> -> vector<8x128xf32>
    %c96 = arith.constant 96 : index
    %c0_340 = arith.constant 0 : index
    %802 = vector.load %arg4[%c96, %c0_340] : memref<128x128xf32, #tpu.memory_space<vmem>>, vector<8x128xf32>
    %803 = arith.addf %801, %802 : vector<8x128xf32>
    %c0_341 = arith.constant 0 : index
    %c96_342 = arith.constant 96 : index
    %c0_343 = arith.constant 0 : index
    %804 = vector.load %arg5[%c0_341, %c96_342, %c0_343] : memref<1x128x128xf32, #tpu.memory_space<vmem>>, vector<1x8x128xf32>
    %805 = vector.shape_cast %804 : vector<1x8x128xf32> to vector<8x128xf32>
    %806 = vector.shape_cast %803 : vector<8x128xf32> to vector<1x8x128xf32>
    tpu.vector_store %arg5[%c0_341, %c96_342, %c0_343], %806 {strides = array<i32>} : memref<1x128x128xf32, #tpu.memory_space<vmem>>, vector<1x8x128xf32>,
    %c104_i32 = arith.constant 104 : i32
    %807 = arith.addi %0, %c104_i32 : i32
    %c0_i32_344 = arith.constant 0 : i32
    %808 = arith.addi %807, %c0_i32_344 : i32
    %809 = arith.index_cast %arg1 : i32 to index
    %810 = arith.index_cast %808 : i32 to index
    %811 = memref.load %arg2[%809, %810] : memref<2x384xi32, #tpu.memory_space<smem>>
    %812 = arith.index_cast %811 : i32 to index
    %c0_345 = arith.constant 0 : index
    %813 = vector.load %arg3[%812, %c0_345] : memref<1000x128xf32, #tpu.memory_space<vmem>>, vector<1x128xf32>
    %c104_i32_346 = arith.constant 104 : i32
    %814 = arith.addi %0, %c104_i32_346 : i32
    %c1_i32_347 = arith.constant 1 : i32
    %815 = arith.addi %814, %c1_i32_347 : i32
    %816 = arith.index_cast %arg1 : i32 to index
    %817 = arith.index_cast %815 : i32 to index
    %818 = memref.load %arg2[%816, %817] : memref<2x384xi32, #tpu.memory_space<smem>>
    %819 = arith.index_cast %818 : i32 to index
    %c0_348 = arith.constant 0 : index
    %820 = vector.load %arg3[%819, %c0_348] : memref<1000x128xf32, #tpu.memory_space<vmem>>, vector<1x128xf32>
    %c104_i32_349 = arith.constant 104 : i32
    %821 = arith.addi %0, %c104_i32_349 : i32
    %c2_i32_350 = arith.constant 2 : i32
    %822 = arith.addi %821, %c2_i32_350 : i32
    %823 = arith.index_cast %arg1 : i32 to index
    %824 = arith.index_cast %822 : i32 to index
    %825 = memref.load %arg2[%823, %824] : memref<2x384xi32, #tpu.memory_space<smem>>
    %826 = arith.index_cast %825 : i32 to index
    %c0_351 = arith.constant 0 : index
    %827 = vector.load %arg3[%826, %c0_351] : memref<1000x128xf32, #tpu.memory_space<vmem>>, vector<1x128xf32>
    %c104_i32_352 = arith.constant 104 : i32
    %828 = arith.addi %0, %c104_i32_352 : i32
    %c3_i32_353 = arith.constant 3 : i32
    %829 = arith.addi %828, %c3_i32_353 : i32
    %830 = arith.index_cast %arg1 : i32 to index
    %831 = arith.index_cast %829 : i32 to index
    %832 = memref.load %arg2[%830, %831] : memref<2x384xi32, #tpu.memory_space<smem>>
    %833 = arith.index_cast %832 : i32 to index
    %c0_354 = arith.constant 0 : index
    %834 = vector.load %arg3[%833, %c0_354] : memref<1000x128xf32, #tpu.memory_space<vmem>>, vector<1x128xf32>
    %c104_i32_355 = arith.constant 104 : i32
    %835 = arith.addi %0, %c104_i32_355 : i32
    %c4_i32_356 = arith.constant 4 : i32
    %836 = arith.addi %835, %c4_i32_356 : i32
    %837 = arith.index_cast %arg1 : i32 to index
    %838 = arith.index_cast %836 : i32 to index
    %839 = memref.load %arg2[%837, %838] : memref<2x384xi32, #tpu.memory_space<smem>>
    %840 = arith.index_cast %839 : i32 to index
    %c0_357 = arith.constant 0 : index
    %841 = vector.load %arg3[%840, %c0_357] : memref<1000x128xf32, #tpu.memory_space<vmem>>, vector<1x128xf32>
    %c104_i32_358 = arith.constant 104 : i32
    %842 = arith.addi %0, %c104_i32_358 : i32
    %c5_i32_359 = arith.constant 5 : i32
    %843 = arith.addi %842, %c5_i32_359 : i32
    %844 = arith.index_cast %arg1 : i32 to index
    %845 = arith.index_cast %843 : i32 to index
    %846 = memref.load %arg2[%844, %845] : memref<2x384xi32, #tpu.memory_space<smem>>
    %847 = arith.index_cast %846 : i32 to index
    %c0_360 = arith.constant 0 : index
    %848 = vector.load %arg3[%847, %c0_360] : memref<1000x128xf32, #tpu.memory_space<vmem>>, vector<1x128xf32>
    %c104_i32_361 = arith.constant 104 : i32
    %849 = arith.addi %0, %c104_i32_361 : i32
    %c6_i32_362 = arith.constant 6 : i32
    %850 = arith.addi %849, %c6_i32_362 : i32
    %851 = arith.index_cast %arg1 : i32 to index
    %852 = arith.index_cast %850 : i32 to index
    %853 = memref.load %arg2[%851, %852] : memref<2x384xi32, #tpu.memory_space<smem>>
    %854 = arith.index_cast %853 : i32 to index
    %c0_363 = arith.constant 0 : index
    %855 = vector.load %arg3[%854, %c0_363] : memref<1000x128xf32, #tpu.memory_space<vmem>>, vector<1x128xf32>
    %c104_i32_364 = arith.constant 104 : i32
    %856 = arith.addi %0, %c104_i32_364 : i32
    %c7_i32_365 = arith.constant 7 : i32
    %857 = arith.addi %856, %c7_i32_365 : i32
    %858 = arith.index_cast %arg1 : i32 to index
    %859 = arith.index_cast %857 : i32 to index
    %860 = memref.load %arg2[%858, %859] : memref<2x384xi32, #tpu.memory_space<smem>>
    %861 = arith.index_cast %860 : i32 to index
    %c0_366 = arith.constant 0 : index
    %862 = vector.load %arg3[%861, %c0_366] : memref<1000x128xf32, #tpu.memory_space<vmem>>, vector<1x128xf32>
    %863 = tpu.concatenate %813, %820, %827, %834, %841, %848, %855, %862 in 0 : vector<1x128xf32>, vector<1x128xf32>, vector<1x128xf32>, vector<1x128xf32>, vector<1x128xf32>, vector<1x128xf32>, vector<1x128xf32>, vector<1x128xf32> -> vector<8x128xf32>
    %c104 = arith.constant 104 : index
    %c0_367 = arith.constant 0 : index
    %864 = vector.load %arg4[%c104, %c0_367] : memref<128x128xf32, #tpu.memory_space<vmem>>, vector<8x128xf32>
    %865 = arith.addf %863, %864 : vector<8x128xf32>
    %c0_368 = arith.constant 0 : index
    %c104_369 = arith.constant 104 : index
    %c0_370 = arith.constant 0 : index
    %866 = vector.load %arg5[%c0_368, %c104_369, %c0_370] : memref<1x128x128xf32, #tpu.memory_space<vmem>>, vector<1x8x128xf32>
    %867 = vector.shape_cast %866 : vector<1x8x128xf32> to vector<8x128xf32>
    %868 = vector.shape_cast %865 : vector<8x128xf32> to vector<1x8x128xf32>
    tpu.vector_store %arg5[%c0_368, %c104_369, %c0_370], %868 {strides = array<i32>} : memref<1x128x128xf32, #tpu.memory_space<vmem>>, vector<1x8x128xf32>,
    %c112_i32 = arith.constant 112 : i32
    %869 = arith.addi %0, %c112_i32 : i32
    %c0_i32_371 = arith.constant 0 : i32
    %870 = arith.addi %869, %c0_i32_371 : i32
    %871 = arith.index_cast %arg1 : i32 to index
    %872 = arith.index_cast %870 : i32 to index
    %873 = memref.load %arg2[%871, %872] : memref<2x384xi32, #tpu.memory_space<smem>>
    %874 = arith.index_cast %873 : i32 to index
    %c0_372 = arith.constant 0 : index
    %875 = vector.load %arg3[%874, %c0_372] : memref<1000x128xf32, #tpu.memory_space<vmem>>, vector<1x128xf32>
    %c112_i32_373 = arith.constant 112 : i32
    %876 = arith.addi %0, %c112_i32_373 : i32
    %c1_i32_374 = arith.constant 1 : i32
    %877 = arith.addi %876, %c1_i32_374 : i32
    %878 = arith.index_cast %arg1 : i32 to index
    %879 = arith.index_cast %877 : i32 to index
    %880 = memref.load %arg2[%878, %879] : memref<2x384xi32, #tpu.memory_space<smem>>
    %881 = arith.index_cast %880 : i32 to index
    %c0_375 = arith.constant 0 : index
    %882 = vector.load %arg3[%881, %c0_375] : memref<1000x128xf32, #tpu.memory_space<vmem>>, vector<1x128xf32>
    %c112_i32_376 = arith.constant 112 : i32
    %883 = arith.addi %0, %c112_i32_376 : i32
    %c2_i32_377 = arith.constant 2 : i32
    %884 = arith.addi %883, %c2_i32_377 : i32
    %885 = arith.index_cast %arg1 : i32 to index
    %886 = arith.index_cast %884 : i32 to index
    %887 = memref.load %arg2[%885, %886] : memref<2x384xi32, #tpu.memory_space<smem>>
    %888 = arith.index_cast %887 : i32 to index
    %c0_378 = arith.constant 0 : index
    %889 = vector.load %arg3[%888, %c0_378] : memref<1000x128xf32, #tpu.memory_space<vmem>>, vector<1x128xf32>
    %c112_i32_379 = arith.constant 112 : i32
    %890 = arith.addi %0, %c112_i32_379 : i32
    %c3_i32_380 = arith.constant 3 : i32
    %891 = arith.addi %890, %c3_i32_380 : i32
    %892 = arith.index_cast %arg1 : i32 to index
    %893 = arith.index_cast %891 : i32 to index
    %894 = memref.load %arg2[%892, %893] : memref<2x384xi32, #tpu.memory_space<smem>>
    %895 = arith.index_cast %894 : i32 to index
    %c0_381 = arith.constant 0 : index
    %896 = vector.load %arg3[%895, %c0_381] : memref<1000x128xf32, #tpu.memory_space<vmem>>, vector<1x128xf32>
    %c112_i32_382 = arith.constant 112 : i32
    %897 = arith.addi %0, %c112_i32_382 : i32
    %c4_i32_383 = arith.constant 4 : i32
    %898 = arith.addi %897, %c4_i32_383 : i32
    %899 = arith.index_cast %arg1 : i32 to index
    %900 = arith.index_cast %898 : i32 to index
    %901 = memref.load %arg2[%899, %900] : memref<2x384xi32, #tpu.memory_space<smem>>
    %902 = arith.index_cast %901 : i32 to index
    %c0_384 = arith.constant 0 : index
    %903 = vector.load %arg3[%902, %c0_384] : memref<1000x128xf32, #tpu.memory_space<vmem>>, vector<1x128xf32>
    %c112_i32_385 = arith.constant 112 : i32
    %904 = arith.addi %0, %c112_i32_385 : i32
    %c5_i32_386 = arith.constant 5 : i32
    %905 = arith.addi %904, %c5_i32_386 : i32
    %906 = arith.index_cast %arg1 : i32 to index
    %907 = arith.index_cast %905 : i32 to index
    %908 = memref.load %arg2[%906, %907] : memref<2x384xi32, #tpu.memory_space<smem>>
    %909 = arith.index_cast %908 : i32 to index
    %c0_387 = arith.constant 0 : index
    %910 = vector.load %arg3[%909, %c0_387] : memref<1000x128xf32, #tpu.memory_space<vmem>>, vector<1x128xf32>
    %c112_i32_388 = arith.constant 112 : i32
    %911 = arith.addi %0, %c112_i32_388 : i32
    %c6_i32_389 = arith.constant 6 : i32
    %912 = arith.addi %911, %c6_i32_389 : i32
    %913 = arith.index_cast %arg1 : i32 to index
    %914 = arith.index_cast %912 : i32 to index
    %915 = memref.load %arg2[%913, %914] : memref<2x384xi32, #tpu.memory_space<smem>>
    %916 = arith.index_cast %915 : i32 to index
    %c0_390 = arith.constant 0 : index
    %917 = vector.load %arg3[%916, %c0_390] : memref<1000x128xf32, #tpu.memory_space<vmem>>, vector<1x128xf32>
    %c112_i32_391 = arith.constant 112 : i32
    %918 = arith.addi %0, %c112_i32_391 : i32
    %c7_i32_392 = arith.constant 7 : i32
    %919 = arith.addi %918, %c7_i32_392 : i32
    %920 = arith.index_cast %arg1 : i32 to index
    %921 = arith.index_cast %919 : i32 to index
    %922 = memref.load %arg2[%920, %921] : memref<2x384xi32, #tpu.memory_space<smem>>
    %923 = arith.index_cast %922 : i32 to index
    %c0_393 = arith.constant 0 : index
    %924 = vector.load %arg3[%923, %c0_393] : memref<1000x128xf32, #tpu.memory_space<vmem>>, vector<1x128xf32>
    %925 = tpu.concatenate %875, %882, %889, %896, %903, %910, %917, %924 in 0 : vector<1x128xf32>, vector<1x128xf32>, vector<1x128xf32>, vector<1x128xf32>, vector<1x128xf32>, vector<1x128xf32>, vector<1x128xf32>, vector<1x128xf32> -> vector<8x128xf32>
    %c112 = arith.constant 112 : index
    %c0_394 = arith.constant 0 : index
    %926 = vector.load %arg4[%c112, %c0_394] : memref<128x128xf32, #tpu.memory_space<vmem>>, vector<8x128xf32>
    %927 = arith.addf %925, %926 : vector<8x128xf32>
    %c0_395 = arith.constant 0 : index
    %c112_396 = arith.constant 112 : index
    %c0_397 = arith.constant 0 : index
    %928 = vector.load %arg5[%c0_395, %c112_396, %c0_397] : memref<1x128x128xf32, #tpu.memory_space<vmem>>, vector<1x8x128xf32>
    %929 = vector.shape_cast %928 : vector<1x8x128xf32> to vector<8x128xf32>
    %930 = vector.shape_cast %927 : vector<8x128xf32> to vector<1x8x128xf32>
    tpu.vector_store %arg5[%c0_395, %c112_396, %c0_397], %930 {strides = array<i32>} : memref<1x128x128xf32, #tpu.memory_space<vmem>>, vector<1x8x128xf32>,
    %c120_i32 = arith.constant 120 : i32
    %931 = arith.addi %0, %c120_i32 : i32
    %c0_i32_398 = arith.constant 0 : i32
    %932 = arith.addi %931, %c0_i32_398 : i32
    %933 = arith.index_cast %arg1 : i32 to index
    %934 = arith.index_cast %932 : i32 to index
    %935 = memref.load %arg2[%933, %934] : memref<2x384xi32, #tpu.memory_space<smem>>
    %936 = arith.index_cast %935 : i32 to index
    %c0_399 = arith.constant 0 : index
    %937 = vector.load %arg3[%936, %c0_399] : memref<1000x128xf32, #tpu.memory_space<vmem>>, vector<1x128xf32>
    %c120_i32_400 = arith.constant 120 : i32
    %938 = arith.addi %0, %c120_i32_400 : i32
    %c1_i32_401 = arith.constant 1 : i32
    %939 = arith.addi %938, %c1_i32_401 : i32
    %940 = arith.index_cast %arg1 : i32 to index
    %941 = arith.index_cast %939 : i32 to index
    %942 = memref.load %arg2[%940, %941] : memref<2x384xi32, #tpu.memory_space<smem>>
    %943 = arith.index_cast %942 : i32 to index
    %c0_402 = arith.constant 0 : index
    %944 = vector.load %arg3[%943, %c0_402] : memref<1000x128xf32, #tpu.memory_space<vmem>>, vector<1x128xf32>
    %c120_i32_403 = arith.constant 120 : i32
    %945 = arith.addi %0, %c120_i32_403 : i32
    %c2_i32_404 = arith.constant 2 : i32
    %946 = arith.addi %945, %c2_i32_404 : i32
    %947 = arith.index_cast %arg1 : i32 to index
    %948 = arith.index_cast %946 : i32 to index
    %949 = memref.load %arg2[%947, %948] : memref<2x384xi32, #tpu.memory_space<smem>>
    %950 = arith.index_cast %949 : i32 to index
    %c0_405 = arith.constant 0 : index
    %951 = vector.load %arg3[%950, %c0_405] : memref<1000x128xf32, #tpu.memory_space<vmem>>, vector<1x128xf32>
    %c120_i32_406 = arith.constant 120 : i32
    %952 = arith.addi %0, %c120_i32_406 : i32
    %c3_i32_407 = arith.constant 3 : i32
    %953 = arith.addi %952, %c3_i32_407 : i32
    %954 = arith.index_cast %arg1 : i32 to index
    %955 = arith.index_cast %953 : i32 to index
    %956 = memref.load %arg2[%954, %955] : memref<2x384xi32, #tpu.memory_space<smem>>
    %957 = arith.index_cast %956 : i32 to index
    %c0_408 = arith.constant 0 : index
    %958 = vector.load %arg3[%957, %c0_408] : memref<1000x128xf32, #tpu.memory_space<vmem>>, vector<1x128xf32>
    %c120_i32_409 = arith.constant 120 : i32
    %959 = arith.addi %0, %c120_i32_409 : i32
    %c4_i32_410 = arith.constant 4 : i32
    %960 = arith.addi %959, %c4_i32_410 : i32
    %961 = arith.index_cast %arg1 : i32 to index
    %962 = arith.index_cast %960 : i32 to index
    %963 = memref.load %arg2[%961, %962] : memref<2x384xi32, #tpu.memory_space<smem>>
    %964 = arith.index_cast %963 : i32 to index
    %c0_411 = arith.constant 0 : index
    %965 = vector.load %arg3[%964, %c0_411] : memref<1000x128xf32, #tpu.memory_space<vmem>>, vector<1x128xf32>
    %c120_i32_412 = arith.constant 120 : i32
    %966 = arith.addi %0, %c120_i32_412 : i32
    %c5_i32_413 = arith.constant 5 : i32
    %967 = arith.addi %966, %c5_i32_413 : i32
    %968 = arith.index_cast %arg1 : i32 to index
    %969 = arith.index_cast %967 : i32 to index
    %970 = memref.load %arg2[%968, %969] : memref<2x384xi32, #tpu.memory_space<smem>>
    %971 = arith.index_cast %970 : i32 to index
    %c0_414 = arith.constant 0 : index
    %972 = vector.load %arg3[%971, %c0_414] : memref<1000x128xf32, #tpu.memory_space<vmem>>, vector<1x128xf32>
    %c120_i32_415 = arith.constant 120 : i32
    %973 = arith.addi %0, %c120_i32_415 : i32
    %c6_i32_416 = arith.constant 6 : i32
    %974 = arith.addi %973, %c6_i32_416 : i32
    %975 = arith.index_cast %arg1 : i32 to index
    %976 = arith.index_cast %974 : i32 to index
    %977 = memref.load %arg2[%975, %976] : memref<2x384xi32, #tpu.memory_space<smem>>
    %978 = arith.index_cast %977 : i32 to index
    %c0_417 = arith.constant 0 : index
    %979 = vector.load %arg3[%978, %c0_417] : memref<1000x128xf32, #tpu.memory_space<vmem>>, vector<1x128xf32>
    %c120_i32_418 = arith.constant 120 : i32
    %980 = arith.addi %0, %c120_i32_418 : i32
    %c7_i32_419 = arith.constant 7 : i32
    %981 = arith.addi %980, %c7_i32_419 : i32
    %982 = arith.index_cast %arg1 : i32 to index
    %983 = arith.index_cast %981 : i32 to index
    %984 = memref.load %arg2[%982, %983] : memref<2x384xi32, #tpu.memory_space<smem>>
    %985 = arith.index_cast %984 : i32 to index
    %c0_420 = arith.constant 0 : index
    %986 = vector.load %arg3[%985, %c0_420] : memref<1000x128xf32, #tpu.memory_space<vmem>>, vector<1x128xf32>
    %987 = tpu.concatenate %937, %944, %951, %958, %965, %972, %979, %986 in 0 : vector<1x128xf32>, vector<1x128xf32>, vector<1x128xf32>, vector<1x128xf32>, vector<1x128xf32>, vector<1x128xf32>, vector<1x128xf32>, vector<1x128xf32> -> vector<8x128xf32>
    %c120 = arith.constant 120 : index
    %c0_421 = arith.constant 0 : index
    %988 = vector.load %arg4[%c120, %c0_421] : memref<128x128xf32, #tpu.memory_space<vmem>>, vector<8x128xf32>
    %989 = arith.addf %987, %988 : vector<8x128xf32>
    %c0_422 = arith.constant 0 : index
    %c120_423 = arith.constant 120 : index
    %c0_424 = arith.constant 0 : index
    %990 = vector.load %arg5[%c0_422, %c120_423, %c0_424] : memref<1x128x128xf32, #tpu.memory_space<vmem>>, vector<1x8x128xf32>
    %991 = vector.shape_cast %990 : vector<1x8x128xf32> to vector<8x128xf32>
    %992 = vector.shape_cast %989 : vector<8x128xf32> to vector<1x8x128xf32>
    tpu.vector_store %arg5[%c0_422, %c120_423, %c0_424], %992 {strides = array<i32>} : memref<1x128x128xf32, #tpu.memory_space<vmem>>, vector<1x8x128xf32>,
    return
  }
  func.func @transform_0(%arg0: i32, %arg1: i32, %arg2: memref<2x384xi32, #tpu.memory_space<smem>>) -> (i32, i32) {
    %c0_i32 = arith.constant 0 : i32
    %c0_i32_0 = arith.constant 0 : i32
    %c0_i32_1 = arith.constant 0 : i32
    return %c0_i32, %c0_i32_0 : i32, i32
  }
  func.func @transform_1(%arg0: i32, %arg1: i32, %arg2: memref<2x384xi32, #tpu.memory_space<smem>>) -> (i32, i32) {
    %c0_i32 = arith.constant 0 : i32
    %c0_i32_0 = arith.constant 0 : i32
    return %arg0, %c0_i32 : i32, i32
  }
  func.func @transform_2(%arg0: i32, %arg1: i32, %arg2: memref<2x384xi32, #tpu.memory_space<smem>>) -> (i32, i32, i32) {
    %c0_i32 = arith.constant 0 : i32
    %c0_i32_0 = arith.constant 0 : i32
    return %arg1, %arg0, %c0_i32 : i32, i32, i32
  }
}

</mosaic_0001>

<bundles_post_ra>
// kernel: tpu_custom_call.1
= control target key start
LH: loop header
LB: loop body
LE: loop exit
PB: predicated region body
PF: predicated region fallthrough
CT: control target
= control target key end

     0   :  { %s3859_s0 = inlined_call_operand.hbm [shape: s32[2,384], index: 0, kind: input, shape index: {}]   ;;  %s3860_s1 = inlined_call_operand.hbm [shape: f32[1000,128], index: 1, kind: input, shape index: {}]   ;;  %s3861_s2 = inlined_call_operand.hbm [shape: f32[384,128], index: 2, kind: input, shape index: {}]   ;;  %s3862_s3 = inlined_call_operand.hbm [shape: f32[2,384,128], index: 3, kind: output, shape index: {}]  }
   0x1   :  { %3882 = sst [smem:[#allocation26_spill]] %s3860_s1  ;;  %s2753_s14 = scalar_lea.hbm %s3859_s0, 96 }
   0x2   :  { %3883 = sst [smem:[#allocation27_spill]] %s3861_s2  ;;  %p2754_p0 = scmp.ne.s32.totalorder %s3859_s0, %s2753_s14 }
   0x3   :  { %p2757_p1 = scmp.lt.u32.totalorder %s2753_s14, %s3859_s0 }
   0x5   :  { %p2759_p2 = pnand %p2757_p1, %p2754_p0 }
   0x7   :  { %2762 = shalt.err (!%p2759_p2)  }
   0x8   :  { %s2951_s19 = smov [#allocation3]  }
   0x9   :  { %9 = dma.hbm_to_smem %s3859_s0, 96, %s2951_s19, [#allocation2] }
   0xa   :  { %2893 = dma.done.wait [#allocation2], 96 }
   0xb   :  { %2894 = vsyncadd [#allocation2], 4294967200 }
   0xc   :  { %11 = sfence }
   0xd   :  { %12 = vsyncpa [#allocation5], 0 }
   0xe   :  { %13 = vsyncpa [#allocation8], 0 }
   0xf   :  { %15 = vsyncpa [#allocation8 + $0x1], 0 }
  0x10   :  { %16 = vsyncpa [#allocation6], 0 }
  0x11   :  { %18 = vsyncpa [#allocation6 + $0x1], 0  ;;  %s2991_s22 = smov 0   ;;  %s2993_s23 = smov 0  }
  0x12   :  { %s2995_s24 = smov 0   ;;  %s2997_s25 = smov 0  }
  0x13   :  { %s2999_s26 = smov 0   ;;  %s3001_s27 = smov 0  }
  0x14   :  { %s3003_s0 = smov 0   ;;  %s3005_s28 = smov 0  }
  0x15   :  { %s3007_s29 = smov 0   ;;  %s3009_s30 = smov 0  }
  0x16   :  { %s3011_s4 = smov 0  }
  0x17 LB: > { %3884 = sst [smem:[#allocation14_spill]] %s2909_s22  ;;  %s2486_s5 = sadd.s32 4294967295, %s2949_s4   ;;  %s2949_s4 = sphi %s3011_s4, %s24_s4   ;;  %s2945_s30 = sphi %s3009_s30, %s3925_s30   ;;  %s2941_s29 = sphi %s3007_s29, %s3928_s29   ;;  %s2937_s28 = sphi %s3005_s28, %s3923_s28   ;;  %s2933_s0 = sphi %s3003_s0, %s3922_s0   ;;  %s2929_s27 = sphi %s3001_s27, %s3921_s27   ;;  %s2925_s26 = sphi %s2999_s26, %s3920_s26   ;;  %s2921_s25 = sphi %s2997_s25, %s3919_s25   ;;  %s2917_s24 = sphi %s2995_s24, %s3918_s24   ;;  %s2913_s23 = sphi %s2993_s23, %s3927_s23   ;;  %s2909_s22 = sphi %s2991_s22, %s3926_s22  }
  0x18   : > { %3885 = sst [smem:[#allocation15_spill]] %s2917_s24  ;;  %s2487_s6 = sadd.s32 4294967294, %s2949_s4  }
  0x19   : > { %3886 = sst [smem:[#allocation16_spill]] %s2925_s26  ;;  %p77_p3 = scmp.ne.s32.totalorder %s2925_s26, %s2921_s25 }
  0x1a   : > { %3887 = sst [smem:[#allocation17_spill]] %s2929_s27  ;;  %p3047_p4 = scmp.eq.s32.totalorder %s2486_s5, 0 }
  0x1b   : > { %3888 = sst [smem:[#allocation18_spill]] %s2941_s29  ;;  %s92_s8 = sadd.s32 1, %s2917_s24 }
  0x1c   : > { %3889 = sst [smem:[#allocation19_spill]] %s2945_s30  ;;  %p102_p5 = scmp.ne.s32.totalorder %s2917_s24, %s2913_s23 }
  0x1d   : > { %3890 = sst [smem:[#allocation20_spill]] %s2949_s4  ;;  %p3056_p6 = por %p3047_p4, %p77_p3 }
  0x1e   : > { %s3891_s7 = scalar_select %p3047_p4, 1, 0 }
  0x1f   : > { %s3892_s9 = scalar_select %p3056_p6, 1, 0 }
  0x20   : > { %p103_p7 = scmp.eq.s32.totalorder %s2486_s5, 5  ;;  %p108_p8 = scmp.ne.s32.totalorder %s2913_s23, %s2909_s22 }
  0x21   : > { %p109_p9 = scmp.eq.s32.totalorder %s2487_s6, 5  ;;  %p2488_p11 = scmp.ge.s32.totalorder %s2949_s4, 1 }
  0x22   : > { %p3062_p10 = por %p103_p7, %p102_p5  ;;  %p116_p13 = scmp.lt.s32.totalorder %s2949_s4, 7 }
  0x23   : > { %p3067_p12 = por %p109_p9, %p108_p8  ;;  %s2952_s13 = smov [#allocation4]  }
  0x24   : > { %s3893_s10 = scalar_select %p3062_p10, 1, 0 }
  0x25   : > { %s3894_s11 = scalar_select %p3067_p12, 1, 0 }
  0x26   : > { %p3072_p0 = pnand %p2488_p11, %p116_p13  ;;  %s128_s14 = sshll.u32 %s2952_s13, 4  ;;  %s129_s14 = int_to_ptr.vmem [resolvable:$true] %s128_s14 }
  0x27   : > { %3895 = sst [smem:[#allocation21_spill]] %s3894_s11  ;;  %s3898_s1 = sld [smem:[#allocation26_spill]] }
  0x28   : > { %s3896_s12 = scalar_select %p3072_p0, 1, 0 }
  0x29   : > { %p2643_p1 = pneg %p3072_p0 }
  0x2b   : > { %p3080_p2 = pnand %p2643_p1, %p3047_p4 }
  0x2d   : > { %s2763_s18 = scalar_lea.hbm %s3898_s1, 16000  ;;  %p2765_p5 = pneg %p3080_p2 }
  0x2e   : > { %p2764_p3 = scmp.ne.s32.totalorder %s3898_s1, %s2763_s18  ;;  %p2770_p9 = scmp.lt.u32.totalorder %s2763_s18, %s3898_s1 }
  0x30   : > { %p2766_p7 = pnand %p2765_p5, %p2764_p3 }
  0x32   : > { %p2767_p8 = pneg %p2766_p7 }
  0x34   : > { %p2772_p11 = pnand %p2770_p9, %p2767_p8 }
  0x36   : > { %2775 = shalt.err (!%p2772_p11)
}
  0x37   : > { %s2776_s5 = scalar_lea.vmem %s129_s14, 16000  ;;  %p2784_p10 = scmp.lt.s32.totalorder %s129_s14, %s129_s14 }
  0x38   : > { %p2777_p13 = scmp.ne.s32.totalorder %s129_s14, %s2776_s5  ;;  %p2785_p6 = scmp.lt.s32.totalorder %s2776_s5, %s2776_s5 }
  0x3a   : > { %p2779_p1 = pnand %p2777_p13, %p2765_p5  ;;  %p2786_p4 = por %p2785_p6, %p2784_p10 }
  0x3c   : > { %p2780_p12 = pneg %p2779_p1 }
  0x3e   : > { %p2787_p0 = pnand %p2786_p4, %p2780_p12 }
  0x40   : > { %2790 = shalt.err (!%p2787_p0)
}
  0x41   : > { %s3868_s6 = smov 128   ;;  %s3869_s13 = smov 8  }
  0x42   : > { %2646 = dma.hbm_to_vmem [thread:$0]  (!%p3080_p2), %s3898_s1, 16000, %s129_s14, [#allocation5], %s3868_s6, %s3868_s6, %s3869_s13  }
  0x43   : > { %s33_s18 = sadd.s32 1, %s2941_s29  ;;  %s36_s19 = sadd.s32 1, %s2945_s30 }
  0x44   : > { %p34_p4 = scmp.ge.s32.totalorder %s33_s18, 2  ;;  %s64_s20 = sadd.s32 1, %s2929_s27 }
  0x45   : > { %p71_p6 = scmp.ne.s32.totalorder %s2929_s27, %s2925_s26  ;;  %p72_p10 = scmp.eq.s32.totalorder %s2949_s4, 0 }
  0x46   : > { %s3930_s18 = smov (%p34_p4, %s33_s18), 0  ;;  %s3932_s19 = smov (!%p34_p4, %s36_s19), %s2945_s30 }
  0x47   : > { %3899 = sst [smem:[#allocation22_spill]] %s3930_s18  ;;  %s87_s15 = ssub.s32 %s2941_s29, %s3930_s18 }
  0x48   : > { %p38_p12 = scmp.ge.s32.totalorder %s3932_s19, 3  ;;  %p2656_p0 = scmp.lt.s32.totalorder %s2949_s4, 6 }
  0x49   : > { %p3115_p2 = por %p72_p10, %p71_p6  ;;  %s142_s21 = sand.u32 1, %s2929_s27  }
  0x4a   : > { %s3934_s19 = smov (%p38_p12, %s3932_s19), 0  ;;  %s2491_s25 = sshll.u32 %s142_s21, 7 }
  0x4b   : > { %3901 = sst [smem:[#allocation23_spill]] %s3934_s19  ;;  %s61_s5 = ssub.s32 %s2945_s30, %s3934_s19 }
  0x4c   : > { %p62_p3 = scmp.eq.s32.totalorder %s61_s5, 0  ;;  %s89_s16 = sor.u32 %s87_s15, %s61_s5 }
  0x4d   : > { %p90_p5 = scmp.eq.s32.totalorder %s89_s16, 0  ;;  %s2633_s17 = sshll.u32 %s2945_s30, 11 }
  0x4e   : > { %s3126_s6 = scalar_select %p62_p3, %s2929_s27, %s64_s20  }
  0x4f   : > { %s3131_s13 = scalar_select %p90_p5, %s2917_s24, %s92_s8  }
  0x50   : > { %3902 = sst [smem:[#allocation24_spill]] %s3126_s6  ;;  %s146_s11 = scalar_lea.vmem [#allocation7], %s2491_s25 }
  0x51   : > { %3903 = sst [smem:[#allocation25_spill]] %s3131_s13  ;;  %s3904_s2 = sld [smem:[#allocation27_spill]] }
  0x52   : > { %s153_s19 = sshll.u32 %s146_s11, 4  ;;  %p3144_p7 = pnand %p2656_p0, %p3115_p2  ;;  %s3138_s19 = int_to_ptr.vmem [resolvable:$true] %s153_s19 }
  0x53   : > { %s3148_s8 = scalar_lea.sflag [#allocation8], %s142_s21 }
  0x54   : > { %p2793_p9 = pneg %p3144_p7 }
  0x57   : > { %s3136_s29 = scalar_lea.hbm %s3904_s2, %s2633_s17  ;;  %s2796_s15 = scalar_lea.hbm %s3904_s2, 6144 }
  0x58   : > { %s2791_s1 = scalar_lea.hbm %s3136_s29, 2048  ;;  %p2797_p1 = scmp.lt.u32.totalorder %s3136_s29, %s3904_s2 }
  0x59   : > { %p2792_p8 = scmp.ne.s32.totalorder %s3136_s29, %s2791_s1  ;;  %p2798_p4 = scmp.lt.u32.totalorder %s2796_s15, %s2791_s1 }
  0x5a   : > { %p2800_p10 = scmp.lt.u32.totalorder %s2791_s1, %s3136_s29 }
  0x5b   : > { %p2794_p11 = pnand %p2793_p9, %p2792_p8  ;;  %p2799_p6 = por %p2798_p4, %p2797_p1 }
  0x5d   : > { %p2795_p13 = pneg %p2794_p11  ;;  %p2801_p12 = por %p2800_p10, %p2799_p6 }
  0x5f   : > { %p2802_p0 = pnand %p2801_p12, %p2795_p13 }
  0x61   : > { %2805 = shalt.err (!%p2802_p0)
}
  0x62   : > { %s2806_s21 = scalar_lea.vmem %s3138_s19, 2048  ;;  %s2955_s5 = smov [#allocation7]  }
  0x63   : > { %p2807_p2 = scmp.ne.s32.totalorder %s3138_s19, %s2806_s21  ;;  %s2811_s16 = sshll.u32 %s2955_s5, 4  ;;  %s2812_s16 = int_to_ptr.vmem [resolvable:$false] %s2811_s16 }
  0x64   : > { %s2813_s17 = scalar_lea.vmem %s2812_s16, 4096  ;;  %p2814_p8 = scmp.lt.s32.totalorder %s3138_s19, %s2812_s16 }
  0x65   : > { %p2809_p3 = pnand %p2807_p2, %p2793_p9  ;;  %p2815_p11 = scmp.lt.s32.totalorder %s2813_s17, %s2806_s21 }
  0x67   : > { %p2810_p5 = pneg %p2809_p3  ;;  %p2816_p1 = por %p2815_p11, %p2814_p8 }
  0x69   : > { %p2817_p4 = pnand %p2816_p1, %p2810_p5 }
  0x6b   : > { %2820 = shalt.err (!%p2817_p4)
}
  0x6c   : > { %s3906_s1 = smov 8   ;;  %s3907_s11 = smov 128  }
  0x6d   : > { %2650 = dma.hbm_to_vmem [thread:$0]  (!%p3144_p7), %s3136_s29, 2048, %s3138_s19, %s3148_s8, %s3907_s11, %s3907_s11, %s3906_s1  }
  0x6e   : > { %p3908_p9 = scmp.ne.s32.totalorder %s3896_s12, 0 }
  0x6f   : > { %p3909_p13 = scmp.ne.s32.totalorder (!%p3908_p9), %s3891_s7, 0 }
  0x70   : > { %165 = sbr.rel (%p3908_p9) target bundleno = 731 (0x2db), region = 28 }
  0x77   : > { %2896 = dma.done.wait (%p3909_p13), [#allocation5], 16000  }
  0x78   : > { %2898 = vsyncadd (%p3909_p13), [#allocation5], 4294951296  ;;  %s171_s18 = sand.u32 1, %s2925_s26   ;;  %p3910_p6 = scmp.ne.s32.totalorder %s3892_s9, 0 }
  0x79   : > { %s2496_s20 = sshll.u32 %s171_s18, 7  ;;  %s172_s15 = scalar_lea.sflag [#allocation8], %s171_s18 }
  0x7a   : > { %s3186_s14 = scalar_lea.vmem [#allocation7], %s2496_s20 }
  0x7b   : > { %2900 = dma.done.wait (%p3910_p6), %s172_s15, 2048  }
  0x7c   : > { %2902 = vsyncadd (%p3910_p6), %s172_s15, 4294965248  ;;  %s3874_s29 = sand.u32 1, %s2913_s23   ;;  %s3194_s7 = sshll.u32 %s2937_s28, 7  ;;  %vm321_vm0 = vcmask 1040384   ;;  %vm323_vm1 = vcmask 1041408   ;;  %vm325_vm2 = vcmask 1042432  }
  0x7d   : > { %s3198_s12 = sshll.u32 %s3874_s29, 7  ;;  %s199_s19 = sshra.s32 %s3194_s7, 7  ;;  %vm327_vm3 = vcmask 1043456   ;;  %vm329_vm4 = vcmask 1044480   ;;  %vm331_vm5 = vcmask 1045504   ;;  %vm333_vm6 = vcmask 1046528  }
  0x7e   : > { %s201_s8 = sshra.s32 %s2933_s0, 1  ;;  %s207_s9 = sand.u32 1, %s2933_s0  ;;  %v335_v21 = vld [vmem:[%s3186_s14] sm:$0xff]  ;;  %v462_v45 = vld [vmem:[%s3186_s14 + $0x8] sm:$0xff] }
  0x7f   : > { %s3202_s25 = smul.u32 3, %s201_s8  ;;  %s209_s21 = sand.u32 127, %s3194_s7 }
  0x80   : > { %s3206_s5 = sshll.u32 %s207_s9, 7  ;;  %s216_s11 = sadd.s32 1, %s3194_s7 }
  0x81   : > { %s204_s16 = sadd.s32 %s3202_s25, %s199_s19  ;;  %s211_s17 = sadd.s32 %s3206_s5, %s209_s21 }
  0x82   : > { %s2499_s1 = sshll.u32 %s204_s16, 8  ;;  %s217_s20 = sshra.s32 %s216_s11, 7 }
  0x83   : > { %s212_s18 = sadd.s32 %s2499_s1, %s211_s17  ;;  %s219_s8 = sadd.s32 %s217_s20, %s3202_s25 }
  0x84   : > { %s3211_s15 = sld [smem:[#allocation3 + %s212_s18]]  ;;  %s2501_s29 = sshll.u32 %s219_s8, 8 }
  0x85   : > { %s222_s2 = sand.u32 127, %s216_s11  ;;  %s228_s9 = sadd.s32 2, %s3194_s7 }
  0x86   : > { %s223_s30 = sadd.s32 %s3206_s5, %s222_s2  ;;  %s229_s27 = sshra.s32 %s228_s9, 7 }
  0x87   : > { %s224_s6 = sadd.s32 %s2501_s29, %s223_s30  ;;  %s231_s21 = sadd.s32 %s229_s27, %s3202_s25 }
  0x88   : > { %s225_s19 = sld [smem:[#allocation3 + %s224_s6]]  ;;  %s2502_s16 = sshll.u32 %s231_s21, 8 }
  0x89   : > { %s234_s26 = sand.u32 127, %s228_s9  ;;  %s240_s18 = sadd.s32 3, %s3194_s7 }
  0x8a   : > { %s235_s17 = sadd.s32 %s3206_s5, %s234_s26  ;;  %s241_s20 = sshra.s32 %s240_s18, 7 }
  0x8b   : > { %s236_s1 = sadd.s32 %s2502_s16, %s235_s17  ;;  %s243_s8 = sadd.s32 %s241_s20, %s3202_s25 }
  0x8c   : > { %s237_s13 = sld [smem:[#allocation3 + %s236_s1]]  ;;  %s246_s11 = sand.u32 127, %s240_s18 }
  0x8d   : > { %s2503_s2 = sshll.u32 %s243_s8, 8  ;;  %s247_s24 = sadd.s32 %s3206_s5, %s246_s11 }
  0x8e   : > { %s252_s22 = sadd.s32 4, %s3194_s7  ;;  %s248_s30 = sadd.s32 %s2503_s2, %s247_s24 }
  0x8f   : > { %s253_s29 = sshra.s32 %s252_s22, 7  ;;  %s249_s6 = sld [smem:[#allocation3 + %s248_s30]] }
  0x90   : > { %s255_s27 = sadd.s32 %s253_s29, %s3202_s25  ;;  %s258_s9 = sand.u32 127, %s252_s22 }
  0x91   : > { %s2504_s21 = sshll.u32 %s255_s27, 8  ;;  %s264_s26 = sadd.s32 5, %s3194_s7 }
  0x92   : > { %s226_s16 = scalar_lea.vmem [#allocation4], %s225_s19  ;;  %s259_s17 = sadd.s32 %s3206_s5, %s258_s9 }
  0x93   : > { %v227_v0 = vld [vmem:[%s226_s16] sm:$0x1]  ;;  %s265_s1 = sshra.s32 %s264_s26, 7  ;;  %s260_s20 = sadd.s32 %s2504_s21, %s259_s17 }
  0x94   : > { %s267_s18 = sadd.s32 %s265_s1, %s3202_s25  ;;  %s261_s4 = sld [smem:[#allocation3 + %s260_s20]]  ;;  %v301_v2 = vrot.slane %v227_v0, 7 }
  0x95   : > { %s2505_s8 = sshll.u32 %s267_s18, 8  ;;  %s238_s11 = scalar_lea.vmem [#allocation4], %s237_s13 }
  0x96   : > { %v239_v1 = vld [vmem:[%s238_s11] sm:$0x1]  ;;  %s270_s24 = sand.u32 127, %s264_s26  ;;  %s214_s2 = scalar_lea.vmem [#allocation4], %s3211_s15 }
  0x97   : > { %v215_v3 = vld [vmem:[%s214_s2] sm:$0x1]  ;;  %s271_s22 = sadd.s32 %s3206_s5, %s270_s24  ;;  %s276_s30 = sadd.s32 6, %s3194_s7  ;;  %v304_v5 = vrot.slane %v239_v1, 6 }
  0x98   : > { %s272_s19 = sadd.s32 %s2505_s8, %s271_s22  ;;  %s277_s29 = sshra.s32 %s276_s30, 7  ;;  %v322_v6 = vsel %vm321_vm0, %v215_v3, %v301_v2 }
  0x99   : > { %s250_s27 = scalar_lea.vmem [#allocation4], %s249_s6  ;;  %s273_s21 = sld [smem:[#allocation3 + %s272_s19]]  ;;  %v324_v9 = vsel %vm323_vm1, %v322_v6, %v304_v5  ;;  %v589_v5 = vld [vmem:[%s3186_s14 + $0x10] sm:$0xff] }
  0x9a   : > { %v251_v4 = vld [vmem:[%s250_s27] sm:$0x1]  ;;  %s279_s9 = sadd.s32 %s277_s29, %s3202_s25  ;;  %s282_s13 = sand.u32 127, %s276_s30 }
  0x9b   : > { %s2506_s16 = sshll.u32 %s279_s9, 8  ;;  %s283_s15 = sadd.s32 %s3206_s5, %s282_s13  ;;  %v307_v8 = vrot.slane %v251_v4, 5 }
  0x9c   : > { %s262_s26 = scalar_lea.vmem [#allocation4], %s261_s4  ;;  %s284_s17 = sadd.s32 %s2506_s16, %s283_s15 }
  0x9d   : > { %v263_v7 = vld [vmem:[%s262_s26] sm:$0x1]  ;;  %s288_s1 = sadd.s32 7, %s3194_s7  ;;  %s285_s20 = sld [smem:[#allocation3 + %s284_s17]]  ;;  %v326_v12 = vsel %vm325_vm2, %v324_v9, %v307_v8 }
  0x9e   : > { %s289_s6 = sshra.s32 %s288_s1, 7  ;;  %s294_s8 = sand.u32 127, %s288_s1  ;;  %v310_v10 = vrot.slane %v263_v7, 4 }
  0x9f   : > { %s291_s18 = sadd.s32 %s289_s6, %s3202_s25  ;;  %s274_s24 = scalar_lea.vmem [#allocation4], %s273_s21 }
  0xa0   : > { %s2507_s11 = sshll.u32 %s291_s18, 8  ;;  %v275_v11 = vld [vmem:[%s274_s24] sm:$0x1]  ;;  %s295_s2 = sadd.s32 %s3206_s5, %s294_s8  ;;  %v328_v14 = vsel %vm327_vm3, %v326_v12, %v310_v10 }
  0xa1   : > { %s338_s4 = sadd.s32 8, %s3194_s7  ;;  %s296_s22 = sadd.s32 %s2507_s11, %s295_s2  ;;  %v313_v13 = vrot.slane %v275_v11, 3 }
  0xa2   : > { %s339_s30 = sshra.s32 %s338_s4, 7  ;;  %s297_s19 = sld [smem:[#allocation3 + %s296_s22]] }
  0xa3   : > { %s341_s29 = sadd.s32 %s339_s30, %s3202_s25  ;;  %s286_s9 = scalar_lea.vmem [#allocation4], %s285_s20  ;;  %v330_v17 = vsel %vm329_vm4, %v328_v14, %v313_v13 }
  0xa4   : > { %s2508_s27 = sshll.u32 %s341_s29, 8  ;;  %v287_v15 = vld [vmem:[%s286_s9] sm:$0x1]  ;;  %s344_s21 = sand.u32 127, %s338_s4 }
  0xa5   : > { %s350_s16 = sadd.s32 9, %s3194_s7  ;;  %v316_v16 = vrot.slane %v287_v15, 2  ;;  %s345_s13 = sadd.s32 %s3206_s5, %s344_s21 }
  0xa6   : > { %s351_s15 = sshra.s32 %s350_s16, 7  ;;  %s346_s26 = sadd.s32 %s2508_s27, %s345_s13 }
  0xa7   : > { %s353_s17 = sadd.s32 %s351_s15, %s3202_s25  ;;  %s3244_s1 = sld [smem:[#allocation3 + %s346_s26]]  ;;  %v332_v19 = vsel %vm331_vm5, %v330_v17, %v316_v16 }
  0xa8   : > { %s2509_s6 = sshll.u32 %s353_s17, 8  ;;  %s356_s18 = sand.u32 127, %s350_s16 }
  0xa9   : > { %s298_s20 = scalar_lea.vmem [#allocation4], %s297_s19  ;;  %s357_s8 = sadd.s32 %s3206_s5, %s356_s18 }
  0xaa   : > { %v299_v18 = vld [vmem:[%s298_s20] sm:$0x1]  ;;  %s362_s11 = sadd.s32 10, %s3194_s7  ;;  %s358_s24 = sadd.s32 %s2509_s6, %s357_s8 }
  0xab   : > { %v319_v20 = vrot.slane %v299_v18, 1  ;;  %s363_s2 = sshra.s32 %s362_s11, 7  ;;  %s359_s4 = sld [smem:[#allocation3 + %s358_s24]] }
  0xac   : > { %s365_s22 = sadd.s32 %s363_s2, %s3202_s25  ;;  %s368_s19 = sand.u32 127, %s362_s11 }
  0xad   : > { %v334_v22 = vsel %vm333_vm6, %v332_v19, %v319_v20  ;;  %s2510_s30 = sshll.u32 %s365_s22, 8  ;;  %s369_s29 = sadd.s32 %s3206_s5, %s368_s19 }
  0xae   : > { %v336_v23 = vadd.f32 %v335_v21, %v334_v22  ;;  %s370_s27 = sadd.s32 %s2510_s30, %s369_s29  ;;  %s374_s9 = sadd.s32 11, %s3194_s7 }
  0xaf   : > { %s3255_s21 = scalar_lea.vmem [#allocation9], %s3198_s12  ;;  %s371_s16 = sld [smem:[#allocation3 + %s370_s27]] }
  0xb0   : > { %337 = vst [vmem:[%s3255_s21] sm:$0xff] %v336_v23  ;;  %s375_s13 = sshra.s32 %s374_s9, 7  ;;  %s380_s26 = sand.u32 127, %s374_s9 }
  0xb1   : > { %s377_s15 = sadd.s32 %s375_s13, %s3202_s25  ;;  %s381_s6 = sadd.s32 %s3206_s5, %s380_s26 }
  0xb2   : > { %s2511_s17 = sshll.u32 %s377_s15, 8  ;;  %s386_s18 = sadd.s32 12, %s3194_s7 }
  0xb3   : > { %s382_s20 = sadd.s32 %s2511_s17, %s381_s6  ;;  %s387_s8 = sshra.s32 %s386_s18, 7 }
  0xb4   : > { %s383_s11 = sld [smem:[#allocation3 + %s382_s20]]  ;;  %s389_s24 = sadd.s32 %s387_s8, %s3202_s25 }
  0xb5   : > { %s2512_s2 = sshll.u32 %s389_s24, 8  ;;  %s392_s22 = sand.u32 127, %s386_s18 }
  0xb6   : > { %s398_s12 = sadd.s32 13, %s3194_s7  ;;  %s360_s30 = scalar_lea.vmem [#allocation4], %s359_s4 }
  0xb7   : > { %v361_v24 = vld [vmem:[%s360_s30] sm:$0x1]  ;;  %s393_s19 = sadd.s32 %s3206_s5, %s392_s22  ;;  %s399_s29 = sshra.s32 %s398_s12, 7 }
  0xb8   : > { %s394_s27 = sadd.s32 %s2512_s2, %s393_s19  ;;  %s401_s9 = sadd.s32 %s399_s29, %s3202_s25  ;;  %v435_v26 = vrot.slane %v361_v24, 7 }
  0xb9   : > { %s395_s13 = sld [smem:[#allocation3 + %s394_s27]]  ;;  %s2513_s15 = sshll.u32 %s401_s9, 8 }
  0xba   : > { %s372_s26 = scalar_lea.vmem [#allocation4], %s371_s16  ;;  %s404_s17 = sand.u32 127, %s398_s12 }
  0xbb   : > { %v373_v25 = vld [vmem:[%s372_s26] sm:$0x1]  ;;  %s348_s6 = scalar_lea.vmem [#allocation4], %s3244_s1  ;;  %s405_s18 = sadd.s32 %s3206_s5, %s404_s17 }
  0xbc   : > { %v349_v27 = vld [vmem:[%s348_s6] sm:$0x1]  ;;  %s410_s20 = sadd.s32 14, %s3194_s7  ;;  %s406_s8 = sadd.s32 %s2513_s15, %s405_s18  ;;  %v438_v29 = vrot.slane %v373_v25, 6 }
  0xbd   : > { %s411_s4 = sshra.s32 %s410_s20, 7  ;;  %s384_s24 = scalar_lea.vmem [#allocation4], %s383_s11  ;;  %v455_v30 = vsel %vm321_vm0, %v349_v27, %v435_v26 }
  0xbe   : > { %v385_v28 = vld [vmem:[%s384_s24] sm:$0x1]  ;;  %s407_s2 = sld [smem:[#allocation3 + %s406_s8]]  ;;  %s413_s22 = sadd.s32 %s411_s4, %s3202_s25  ;;  %v456_v33 = vsel %vm323_vm1, %v455_v30, %v438_v29 }
  0xbf   : > { %s2514_s30 = sshll.u32 %s413_s22, 8  ;;  %s416_s19 = sand.u32 127, %s410_s20  ;;  %v441_v32 = vrot.slane %v385_v28, 5  ;;  %v716_v29 = vld [vmem:[%s3186_s14 + $0x18] sm:$0xff] }
  0xc0   : > { %s417_s16 = sadd.s32 %s3206_s5, %s416_s19  ;;  %s396_s12 = scalar_lea.vmem [#allocation4], %s395_s13 }
  0xc1   : > { %v397_v31 = vld [vmem:[%s396_s12] sm:$0x1]  ;;  %s418_s1 = sadd.s32 %s2514_s30, %s417_s16  ;;  %s422_s29 = sadd.s32 15, %s3194_s7  ;;  %v457_v36 = vsel %vm325_vm2, %v456_v33, %v441_v32 }
  0xc2   : > { %s419_s27 = sld [smem:[#allocation3 + %s418_s1]]  ;;  %s423_s11 = sshra.s32 %s422_s29, 7  ;;  %v444_v34 = vrot.slane %v397_v31, 4 }
  0xc3   : > { %s425_s9 = sadd.s32 %s423_s11, %s3202_s25  ;;  %s428_s15 = sand.u32 127, %s422_s29 }
  0xc4   : > { %s2515_s26 = sshll.u32 %s425_s9, 8  ;;  %s408_s17 = scalar_lea.vmem [#allocation4], %s407_s2  ;;  %v458_v38 = vsel %vm327_vm3, %v457_v36, %v444_v34 }
  0xc5   : > { %v409_v35 = vld [vmem:[%s408_s17] sm:$0x1]  ;;  %s429_s6 = sadd.s32 %s3206_s5, %s428_s15  ;;  %s465_s13 = sadd.s32 16, %s3194_s7 }
  0xc6   : > { %s430_s18 = sadd.s32 %s2515_s26, %s429_s6  ;;  %s466_s20 = sshra.s32 %s465_s13, 7  ;;  %v447_v37 = vrot.slane %v409_v35, 3 }
  0xc7   : > { %s431_s8 = sld [smem:[#allocation3 + %s430_s18]]  ;;  %s468_s4 = sadd.s32 %s466_s20, %s3202_s25 }
  0xc8   : > { %s2516_s24 = sshll.u32 %s468_s4, 8  ;;  %s420_s22 = scalar_lea.vmem [#allocation4], %s419_s27  ;;  %v459_v41 = vsel %vm329_vm4, %v458_v38, %v447_v37 }
  0xc9   : > { %v421_v39 = vld [vmem:[%s420_s22] sm:$0x1]  ;;  %s471_s2 = sand.u32 127, %s465_s13  ;;  %s477_s30 = sadd.s32 17, %s3194_s7 }
  0xca   : > { %v450_v40 = vrot.slane %v421_v39, 2  ;;  %s472_s19 = sadd.s32 %s3206_s5, %s471_s2  ;;  %s478_s16 = sshra.s32 %s477_s30, 7 }
  0xcb   : > { %s473_s12 = sadd.s32 %s2516_s24, %s472_s19  ;;  %s480_s1 = sadd.s32 %s478_s16, %s3202_s25 }
  0xcc   : > { %s3283_s29 = sld [smem:[#allocation3 + %s473_s12]]  ;;  %s2517_s11 = sshll.u32 %s480_s1, 8  ;;  %v460_v43 = vsel %vm331_vm5, %v459_v41, %v450_v40 }
  0xcd   : > { %s483_s9 = sand.u32 127, %s477_s30  ;;  %s432_s27 = scalar_lea.vmem [#allocation4], %s431_s8 }
  0xce   : > { %v433_v42 = vld [vmem:[%s432_s27] sm:$0x1]  ;;  %s484_s15 = sadd.s32 %s3206_s5, %s483_s9  ;;  %s489_s26 = sadd.s32 18, %s3194_s7 }
  0xcf   : > { %v453_v44 = vrot.slane %v433_v42, 1  ;;  %s485_s17 = sadd.s32 %s2517_s11, %s484_s15  ;;  %s490_s6 = sshra.s32 %s489_s26, 7 }
  0xd0   : > { %s486_s13 = sld [smem:[#allocation3 + %s485_s17]]  ;;  %s492_s18 = sadd.s32 %s490_s6, %s3202_s25 }
  0xd1   : > { %v461_v46 = vsel %vm333_vm6, %v460_v43, %v453_v44  ;;  %s2518_s20 = sshll.u32 %s492_s18, 8  ;;  %s495_s8 = sand.u32 127, %s489_s26 }
  0xd2   : > { %v463_v47 = vadd.f32 %v462_v45, %v461_v46  ;;  %s496_s4 = sadd.s32 %s3206_s5, %s495_s8  ;;  %s501_s22 = sadd.s32 19, %s3194_s7 }
  0xd3   : > { %s497_s24 = sadd.s32 %s2518_s20, %s496_s4  ;;  %s502_s30 = sshra.s32 %s501_s22, 7 }
  0xd4   : > { %464 = vst [vmem:[%s3255_s21 + $0x8] sm:$0xff] %v463_v47  ;;  %s498_s2 = sld [smem:[#allocation3 + %s497_s24]]  ;;  %s504_s19 = sadd.s32 %s502_s30, %s3202_s25 }
  0xd5   : > { %s507_s16 = sand.u32 127, %s501_s22  ;;  %s2519_s12 = sshll.u32 %s504_s19, 8 }
  0xd6   : > { %s508_s1 = sadd.s32 %s3206_s5, %s507_s16  ;;  %s513_s11 = sadd.s32 20, %s3194_s7 }
  0xd7   : > { %s509_s9 = sadd.s32 %s2519_s12, %s508_s1  ;;  %s514_s27 = sshra.s32 %s513_s11, 7 }
  0xd8   : > { %s510_s15 = sld [smem:[#allocation3 + %s509_s9]]  ;;  %s516_s26 = sadd.s32 %s514_s27, %s3202_s25 }
  0xd9   : > { %s2520_s17 = sshll.u32 %s516_s26, 8  ;;  %s519_s6 = sand.u32 127, %s513_s11 }
  0xda   : > { %s525_s18 = sadd.s32 21, %s3194_s7  ;;  %s487_s20 = scalar_lea.vmem [#allocation4], %s486_s13 }
  0xdb   : > { %v488_v48 = vld [vmem:[%s487_s20] sm:$0x1]  ;;  %s520_s8 = sadd.s32 %s3206_s5, %s519_s6  ;;  %s526_s4 = sshra.s32 %s525_s18, 7 }
  0xdc   : > { %s521_s24 = sadd.s32 %s2520_s17, %s520_s8  ;;  %s528_s22 = sadd.s32 %s526_s4, %s3202_s25  ;;  %v562_v50 = vrot.slane %v488_v48, 7 }
  0xdd   : > { %s522_s30 = sld [smem:[#allocation3 + %s521_s24]]  ;;  %s2521_s19 = sshll.u32 %s528_s22, 8 }
  0xde   : > { %s499_s16 = scalar_lea.vmem [#allocation4], %s498_s2  ;;  %s531_s12 = sand.u32 127, %s525_s18 }
  0xdf   : > { %v500_v49 = vld [vmem:[%s499_s16] sm:$0x1]  ;;  %s475_s1 = scalar_lea.vmem [#allocation4], %s3283_s29  ;;  %s532_s11 = sadd.s32 %s3206_s5, %s531_s12 }
  0xe0   : > { %v476_v51 = vld [vmem:[%s475_s1] sm:$0x1]  ;;  %s537_s9 = sadd.s32 22, %s3194_s7  ;;  %s533_s27 = sadd.s32 %s2521_s19, %s532_s11  ;;  %v565_v53 = vrot.slane %v500_v49, 6 }
  0xe1   : > { %s538_s13 = sshra.s32 %s537_s9, 7  ;;  %s511_s26 = scalar_lea.vmem [#allocation4], %s510_s15  ;;  %v582_v54 = vsel %vm321_vm0, %v476_v51, %v562_v50 }
  0xe2   : > { %v512_v52 = vld [vmem:[%s511_s26] sm:$0x1]  ;;  %s534_s17 = sld [smem:[#allocation3 + %s533_s27]]  ;;  %s540_s6 = sadd.s32 %s538_s13, %s3202_s25  ;;  %v583_v57 = vsel %vm323_vm1, %v582_v54, %v565_v53  ;;  %v843_v53 = vld [vmem:[%s3186_s14 + $0x20] sm:$0xff] }
  0xe3   : > { %s2522_s20 = sshll.u32 %s540_s6, 8  ;;  %s543_s8 = sand.u32 127, %s537_s9  ;;  %v568_v56 = vrot.slane %v512_v52, 5 }
  0xe4   : > { %s544_s2 = sadd.s32 %s3206_s5, %s543_s8  ;;  %s523_s18 = scalar_lea.vmem [#allocation4], %s522_s30 }
  0xe5   : > { %v524_v55 = vld [vmem:[%s523_s18] sm:$0x1]  ;;  %s545_s29 = sadd.s32 %s2522_s20, %s544_s2  ;;  %s549_s4 = sadd.s32 23, %s3194_s7  ;;  %v584_v60 = vsel %vm325_vm2, %v583_v57, %v568_v56 }
  0xe6   : > { %s546_s24 = sld [smem:[#allocation3 + %s545_s29]]  ;;  %s550_s15 = sshra.s32 %s549_s4, 7  ;;  %v571_v58 = vrot.slane %v524_v55, 4 }
  0xe7   : > { %s552_s22 = sadd.s32 %s550_s15, %s3202_s25  ;;  %s555_s19 = sand.u32 127, %s549_s4 }
  0xe8   : > { %s2523_s16 = sshll.u32 %s552_s22, 8  ;;  %s535_s12 = scalar_lea.vmem [#allocation4], %s534_s17  ;;  %v585_v62 = vsel %vm327_vm3, %v584_v60, %v571_v58 }
  0xe9   : > { %v536_v59 = vld [vmem:[%s535_s12] sm:$0x1]  ;;  %s556_s1 = sadd.s32 %s3206_s5, %s555_s19  ;;  %s592_s30 = sadd.s32 24, %s3194_s7 }
  0xea   : > { %s557_s11 = sadd.s32 %s2523_s16, %s556_s1  ;;  %s593_s9 = sshra.s32 %s592_s30, 7  ;;  %v574_v61 = vrot.slane %v536_v59, 3 }
  0xeb   : > { %s558_s27 = sld [smem:[#allocation3 + %s557_s11]]  ;;  %s595_s13 = sadd.s32 %s593_s9, %s3202_s25 }
  0xec   : > { %s2524_s26 = sshll.u32 %s595_s13, 8  ;;  %s547_s6 = scalar_lea.vmem [#allocation4], %s546_s24  ;;  %v586_v1 = vsel %vm329_vm4, %v585_v62, %v574_v61 }
  0xed   : > { %v548_v63 = vld [vmem:[%s547_s6] sm:$0x1]  ;;  %s598_s17 = sand.u32 127, %s592_s30  ;;  %s604_s20 = sadd.s32 25, %s3194_s7 }
  0xee   : > { %v577_v0 = vrot.slane %v548_v63, 2  ;;  %s599_s8 = sadd.s32 %s3206_s5, %s598_s17  ;;  %s605_s2 = sshra.s32 %s604_s20, 7 }
  0xef   : > { %s600_s18 = sadd.s32 %s2524_s26, %s599_s8  ;;  %s607_s29 = sadd.s32 %s605_s2, %s3202_s25 }
  0xf0   : > { %s3319_s4 = sld [smem:[#allocation3 + %s600_s18]]  ;;  %s2525_s15 = sshll.u32 %s607_s29, 8  ;;  %v587_v3 = vsel %vm331_vm5, %v586_v1, %v577_v0 }
  0xf1   : > { %s610_s22 = sand.u32 127, %s604_s20  ;;  %s559_s24 = scalar_lea.vmem [#allocation4], %s558_s27 }
  0xf2   : > { %v560_v2 = vld [vmem:[%s559_s24] sm:$0x1]  ;;  %s611_s19 = sadd.s32 %s3206_s5, %s610_s22  ;;  %s616_s16 = sadd.s32 26, %s3194_s7 }
  0xf3   : > { %v580_v4 = vrot.slane %v560_v2, 1  ;;  %s612_s12 = sadd.s32 %s2525_s15, %s611_s19  ;;  %s617_s1 = sshra.s32 %s616_s16, 7 }
  0xf4   : > { %s613_s30 = sld [smem:[#allocation3 + %s612_s12]]  ;;  %s619_s11 = sadd.s32 %s617_s1, %s3202_s25 }
  0xf5   : > { %v588_v6 = vsel %vm333_vm6, %v587_v3, %v580_v4  ;;  %s2526_s9 = sshll.u32 %s619_s11, 8  ;;  %s622_s27 = sand.u32 127, %s616_s16 }
  0xf6   : > { %v590_v7 = vadd.f32 %v589_v5, %v588_v6  ;;  %s623_s13 = sadd.s32 %s3206_s5, %s622_s27  ;;  %s628_s6 = sadd.s32 27, %s3194_s7 }
  0xf7   : > { %s624_s26 = sadd.s32 %s2526_s9, %s623_s13  ;;  %s629_s20 = sshra.s32 %s628_s6, 7 }
  0xf8   : > { %591 = vst [vmem:[%s3255_s21 + $0x10] sm:$0xff] %v590_v7  ;;  %s625_s17 = sld [smem:[#allocation3 + %s624_s26]]  ;;  %s631_s8 = sadd.s32 %s629_s20, %s3202_s25 }
  0xf9   : > { %s634_s2 = sand.u32 127, %s628_s6  ;;  %s2527_s18 = sshll.u32 %s631_s8, 8 }
  0xfa   : > { %s635_s29 = sadd.s32 %s3206_s5, %s634_s2  ;;  %s640_s15 = sadd.s32 28, %s3194_s7 }
  0xfb   : > { %s636_s22 = sadd.s32 %s2527_s18, %s635_s29  ;;  %s641_s24 = sshra.s32 %s640_s15, 7 }
  0xfc   : > { %s637_s19 = sld [smem:[#allocation3 + %s636_s22]]  ;;  %s643_s16 = sadd.s32 %s641_s24, %s3202_s25 }
  0xfd   : > { %s2528_s12 = sshll.u32 %s643_s16, 8  ;;  %s646_s1 = sand.u32 127, %s640_s15 }
  0xfe   : > { %s652_s11 = sadd.s32 29, %s3194_s7  ;;  %s614_s9 = scalar_lea.vmem [#allocation4], %s613_s30 }
  0xff   : > { %v615_v8 = vld [vmem:[%s614_s9] sm:$0x1]  ;;  %s647_s27 = sadd.s32 %s3206_s5, %s646_s1  ;;  %s653_s13 = sshra.s32 %s652_s11, 7 }
 0x100   : > { %s648_s26 = sadd.s32 %s2528_s12, %s647_s27  ;;  %s655_s6 = sadd.s32 %s653_s13, %s3202_s25  ;;  %v689_v10 = vrot.slane %v615_v8, 7 }
 0x101   : > { %s649_s20 = sld [smem:[#allocation3 + %s648_s26]]  ;;  %s2529_s8 = sshll.u32 %s655_s6, 8 }
 0x102   : > { %s626_s2 = scalar_lea.vmem [#allocation4], %s625_s17  ;;  %s658_s18 = sand.u32 127, %s652_s11 }
 0x103   : > { %v627_v9 = vld [vmem:[%s626_s2] sm:$0x1]  ;;  %s602_s29 = scalar_lea.vmem [#allocation4], %s3319_s4  ;;  %s659_s15 = sadd.s32 %s3206_s5, %s658_s18 }
 0x104   : > { %v603_v11 = vld [vmem:[%s602_s29] sm:$0x1]  ;;  %s664_s22 = sadd.s32 30, %s3194_s7  ;;  %s660_s24 = sadd.s32 %s2529_s8, %s659_s15  ;;  %v692_v13 = vrot.slane %v627_v9, 6 }
 0x105   : > { %s665_s30 = sshra.s32 %s664_s22, 7  ;;  %s638_s16 = scalar_lea.vmem [#allocation4], %s637_s19  ;;  %v709_v14 = vsel %vm321_vm0, %v603_v11, %v689_v10 }
 0x106   : > { %v639_v12 = vld [vmem:[%s638_s16] sm:$0x1]  ;;  %s661_s12 = sld [smem:[#allocation3 + %s660_s24]]  ;;  %s667_s1 = sadd.s32 %s665_s30, %s3202_s25  ;;  %v710_v17 = vsel %vm323_vm1, %v709_v14, %v692_v13  ;;  %v970_v13 = vld [vmem:[%s3186_s14 + $0x28] sm:$0xff] }
 0x107   : > { %s2530_s9 = sshll.u32 %s667_s1, 8  ;;  %s670_s27 = sand.u32 127, %s664_s22  ;;  %v695_v16 = vrot.slane %v639_v12, 5 }
 0x108   : > { %s671_s17 = sadd.s32 %s3206_s5, %s670_s27  ;;  %s650_s11 = scalar_lea.vmem [#allocation4], %s649_s20 }
 0x109   : > { %v651_v15 = vld [vmem:[%s650_s11] sm:$0x1]  ;;  %s672_s4 = sadd.s32 %s2530_s9, %s671_s17  ;;  %s676_s13 = sadd.s32 31, %s3194_s7  ;;  %v711_v20 = vsel %vm325_vm2, %v710_v17, %v695_v16 }
 0x10a   : > { %s673_s26 = sld [smem:[#allocation3 + %s672_s4]]  ;;  %s677_s19 = sshra.s32 %s676_s13, 7  ;;  %v698_v18 = vrot.slane %v651_v15, 4 }
 0x10b   : > { %s679_s6 = sadd.s32 %s677_s19, %s3202_s25  ;;  %s682_s8 = sand.u32 127, %s676_s13 }
 0x10c   : > { %s2531_s2 = sshll.u32 %s679_s6, 8  ;;  %s662_s18 = scalar_lea.vmem [#allocation4], %s661_s12  ;;  %v712_v22 = vsel %vm327_vm3, %v711_v20, %v698_v18 }
 0x10d   : > { %v663_v19 = vld [vmem:[%s662_s18] sm:$0x1]  ;;  %s683_s29 = sadd.s32 %s3206_s5, %s682_s8  ;;  %s719_s20 = sadd.s32 32, %s3194_s7 }
 0x10e   : > { %s684_s15 = sadd.s32 %s2531_s2, %s683_s29  ;;  %s720_s22 = sshra.s32 %s719_s20, 7  ;;  %v701_v21 = vrot.slane %v663_v19, 3 }
 0x10f   : > { %s685_s24 = sld [smem:[#allocation3 + %s684_s15]]  ;;  %s722_s30 = sadd.s32 %s720_s22, %s3202_s25 }
 0x110   : > { %s2532_s16 = sshll.u32 %s722_s30, 8  ;;  %s674_s1 = scalar_lea.vmem [#allocation4], %s673_s26  ;;  %v713_v25 = vsel %vm329_vm4, %v712_v22, %v701_v21 }
 0x111   : > { %v675_v23 = vld [vmem:[%s674_s1] sm:$0x1]  ;;  %s725_s12 = sand.u32 127, %s719_s20  ;;  %s731_s9 = sadd.s32 33, %s3194_s7 }
 0x112   : > { %v704_v24 = vrot.slane %v675_v23, 2  ;;  %s726_s27 = sadd.s32 %s3206_s5, %s725_s12  ;;  %s732_s17 = sshra.s32 %s731_s9, 7 }
 0x113   : > { %s727_s11 = sadd.s32 %s2532_s16, %s726_s27  ;;  %s734_s4 = sadd.s32 %s732_s17, %s3202_s25 }
 0x114   : > { %s3355_s13 = sld [smem:[#allocation3 + %s727_s11]]  ;;  %s2533_s19 = sshll.u32 %s734_s4, 8  ;;  %v714_v27 = vsel %vm331_vm5, %v713_v25, %v704_v24 }
 0x115   : > { %s737_s6 = sand.u32 127, %s731_s9  ;;  %s686_s26 = scalar_lea.vmem [#allocation4], %s685_s24 }
 0x116   : > { %v687_v26 = vld [vmem:[%s686_s26] sm:$0x1]  ;;  %s738_s8 = sadd.s32 %s3206_s5, %s737_s6  ;;  %s743_s2 = sadd.s32 34, %s3194_s7 }
 0x117   : > { %v707_v28 = vrot.slane %v687_v26, 1  ;;  %s739_s18 = sadd.s32 %s2533_s19, %s738_s8  ;;  %s744_s29 = sshra.s32 %s743_s2, 7 }
 0x118   : > { %s740_s20 = sld [smem:[#allocation3 + %s739_s18]]  ;;  %s746_s15 = sadd.s32 %s744_s29, %s3202_s25 }
 0x119   : > { %v715_v30 = vsel %vm333_vm6, %v714_v27, %v707_v28  ;;  %s2534_s22 = sshll.u32 %s746_s15, 8  ;;  %s749_s24 = sand.u32 127, %s743_s2 }
 0x11a   : > { %v717_v31 = vadd.f32 %v716_v29, %v715_v30  ;;  %s750_s30 = sadd.s32 %s3206_s5, %s749_s24  ;;  %s755_s1 = sadd.s32 35, %s3194_s7 }
 0x11b   : > { %s751_s16 = sadd.s32 %s2534_s22, %s750_s30  ;;  %s756_s9 = sshra.s32 %s755_s1, 7 }
 0x11c   : > { %718 = vst [vmem:[%s3255_s21 + $0x18] sm:$0xff] %v717_v31  ;;  %s752_s12 = sld [smem:[#allocation3 + %s751_s16]]  ;;  %s758_s27 = sadd.s32 %s756_s9, %s3202_s25 }
 0x11d   : > { %s761_s17 = sand.u32 127, %s755_s1  ;;  %s2535_s11 = sshll.u32 %s758_s27, 8 }
 0x11e   : > { %s762_s4 = sadd.s32 %s3206_s5, %s761_s17  ;;  %s767_s19 = sadd.s32 36, %s3194_s7 }
 0x11f   : > { %s763_s6 = sadd.s32 %s2535_s11, %s762_s4  ;;  %s768_s26 = sshra.s32 %s767_s19, 7 }
 0x120   : > { %s764_s8 = sld [smem:[#allocation3 + %s763_s6]]  ;;  %s770_s2 = sadd.s32 %s768_s26, %s3202_s25 }
 0x121   : > { %s2536_s18 = sshll.u32 %s770_s2, 8  ;;  %s773_s29 = sand.u32 127, %s767_s19 }
 0x122   : > { %s779_s15 = sadd.s32 37, %s3194_s7  ;;  %s741_s22 = scalar_lea.vmem [#allocation4], %s740_s20 }
 0x123   : > { %v742_v32 = vld [vmem:[%s741_s22] sm:$0x1]  ;;  %s774_s24 = sadd.s32 %s3206_s5, %s773_s29  ;;  %s780_s30 = sshra.s32 %s779_s15, 7 }
 0x124   : > { %s775_s16 = sadd.s32 %s2536_s18, %s774_s24  ;;  %s782_s1 = sadd.s32 %s780_s30, %s3202_s25  ;;  %v816_v34 = vrot.slane %v742_v32, 7 }
 0x125   : > { %s776_s9 = sld [smem:[#allocation3 + %s775_s16]]  ;;  %s2537_s27 = sshll.u32 %s782_s1, 8 }
 0x126   : > { %s753_s17 = scalar_lea.vmem [#allocation4], %s752_s12  ;;  %s785_s11 = sand.u32 127, %s779_s15 }
 0x127   : > { %v754_v33 = vld [vmem:[%s753_s17] sm:$0x1]  ;;  %s729_s4 = scalar_lea.vmem [#allocation4], %s3355_s13  ;;  %s786_s19 = sadd.s32 %s3206_s5, %s785_s11 }
 0x128   : > { %v730_v35 = vld [vmem:[%s729_s4] sm:$0x1]  ;;  %s791_s6 = sadd.s32 38, %s3194_s7  ;;  %s787_s26 = sadd.s32 %s2537_s27, %s786_s19  ;;  %v819_v37 = vrot.slane %v754_v33, 6 }
 0x129   : > { %s792_s20 = sshra.s32 %s791_s6, 7  ;;  %s765_s2 = scalar_lea.vmem [#allocation4], %s764_s8  ;;  %v836_v38 = vsel %vm321_vm0, %v730_v35, %v816_v34 }
 0x12a   : > { %v766_v36 = vld [vmem:[%s765_s2] sm:$0x1]  ;;  %s788_s18 = sld [smem:[#allocation3 + %s787_s26]]  ;;  %s794_s29 = sadd.s32 %s792_s20, %s3202_s25  ;;  %v837_v41 = vsel %vm323_vm1, %v836_v38, %v819_v37  ;;  %v1097_v37 = vld [vmem:[%s3186_s14 + $0x30] sm:$0xff] }
 0x12b   : > { %s2538_s22 = sshll.u32 %s794_s29, 8  ;;  %s797_s24 = sand.u32 127, %s791_s6  ;;  %v822_v40 = vrot.slane %v766_v36, 5 }
 0x12c   : > { %s798_s12 = sadd.s32 %s3206_s5, %s797_s24  ;;  %s777_s15 = scalar_lea.vmem [#allocation4], %s776_s9 }
 0x12d   : > { %v778_v39 = vld [vmem:[%s777_s15] sm:$0x1]  ;;  %s799_s13 = sadd.s32 %s2538_s22, %s798_s12  ;;  %s803_s30 = sadd.s32 39, %s3194_s7  ;;  %v838_v44 = vsel %vm325_vm2, %v837_v41, %v822_v40 }
 0x12e   : > { %s800_s16 = sld [smem:[#allocation3 + %s799_s13]]  ;;  %s804_s8 = sshra.s32 %s803_s30, 7  ;;  %v825_v42 = vrot.slane %v778_v39, 4 }
 0x12f   : > { %s806_s1 = sadd.s32 %s804_s8, %s3202_s25  ;;  %s809_s27 = sand.u32 127, %s803_s30 }
 0x130   : > { %s2539_s17 = sshll.u32 %s806_s1, 8  ;;  %s789_s11 = scalar_lea.vmem [#allocation4], %s788_s18  ;;  %v839_v46 = vsel %vm327_vm3, %v838_v44, %v825_v42 }
 0x131   : > { %v790_v43 = vld [vmem:[%s789_s11] sm:$0x1]  ;;  %s810_s4 = sadd.s32 %s3206_s5, %s809_s27  ;;  %s846_s9 = sadd.s32 40, %s3194_s7 }
 0x132   : > { %s811_s19 = sadd.s32 %s2539_s17, %s810_s4  ;;  %s847_s6 = sshra.s32 %s846_s9, 7  ;;  %v828_v45 = vrot.slane %v790_v43, 3 }
 0x133   : > { %s812_s26 = sld [smem:[#allocation3 + %s811_s19]]  ;;  %s849_s20 = sadd.s32 %s847_s6, %s3202_s25 }
 0x134   : > { %s2540_s2 = sshll.u32 %s849_s20, 8  ;;  %s801_s29 = scalar_lea.vmem [#allocation4], %s800_s16  ;;  %v840_v49 = vsel %vm329_vm4, %v839_v46, %v828_v45 }
 0x135   : > { %v802_v47 = vld [vmem:[%s801_s29] sm:$0x1]  ;;  %s852_s18 = sand.u32 127, %s846_s9  ;;  %s858_s22 = sadd.s32 41, %s3194_s7 }
 0x136   : > { %v831_v48 = vrot.slane %v802_v47, 2  ;;  %s853_s24 = sadd.s32 %s3206_s5, %s852_s18  ;;  %s859_s12 = sshra.s32 %s858_s22, 7 }
 0x137   : > { %s854_s15 = sadd.s32 %s2540_s2, %s853_s24  ;;  %s861_s13 = sadd.s32 %s859_s12, %s3202_s25 }
 0x138   : > { %s3391_s30 = sld [smem:[#allocation3 + %s854_s15]]  ;;  %s2541_s8 = sshll.u32 %s861_s13, 8  ;;  %v841_v51 = vsel %vm331_vm5, %v840_v49, %v831_v48 }
 0x139   : > { %s864_s1 = sand.u32 127, %s858_s22  ;;  %s813_s16 = scalar_lea.vmem [#allocation4], %s812_s26 }
 0x13a   : > { %v814_v50 = vld [vmem:[%s813_s16] sm:$0x1]  ;;  %s865_s27 = sadd.s32 %s3206_s5, %s864_s1  ;;  %s870_s17 = sadd.s32 42, %s3194_s7 }
 0x13b   : > { %v834_v52 = vrot.slane %v814_v50, 1  ;;  %s866_s11 = sadd.s32 %s2541_s8, %s865_s27  ;;  %s871_s4 = sshra.s32 %s870_s17, 7 }
 0x13c   : > { %s867_s9 = sld [smem:[#allocation3 + %s866_s11]]  ;;  %s873_s19 = sadd.s32 %s871_s4, %s3202_s25 }
 0x13d   : > { %v842_v54 = vsel %vm333_vm6, %v841_v51, %v834_v52  ;;  %s2542_s6 = sshll.u32 %s873_s19, 8  ;;  %s876_s26 = sand.u32 127, %s870_s17 }
 0x13e   : > { %v844_v55 = vadd.f32 %v843_v53, %v842_v54  ;;  %s877_s20 = sadd.s32 %s3206_s5, %s876_s26  ;;  %s882_s29 = sadd.s32 43, %s3194_s7 }
 0x13f   : > { %s878_s2 = sadd.s32 %s2542_s6, %s877_s20  ;;  %s883_s22 = sshra.s32 %s882_s29, 7 }
 0x140   : > { %845 = vst [vmem:[%s3255_s21 + $0x20] sm:$0xff] %v844_v55  ;;  %s879_s18 = sld [smem:[#allocation3 + %s878_s2]]  ;;  %s885_s24 = sadd.s32 %s883_s22, %s3202_s25 }
 0x141   : > { %s888_s12 = sand.u32 127, %s882_s29  ;;  %s2543_s15 = sshll.u32 %s885_s24, 8 }
 0x142   : > { %s889_s13 = sadd.s32 %s3206_s5, %s888_s12  ;;  %s894_s8 = sadd.s32 44, %s3194_s7 }
 0x143   : > { %s890_s1 = sadd.s32 %s2543_s15, %s889_s13  ;;  %s895_s16 = sshra.s32 %s894_s8, 7 }
 0x144   : > { %s891_s27 = sld [smem:[#allocation3 + %s890_s1]]  ;;  %s897_s17 = sadd.s32 %s895_s16, %s3202_s25 }
 0x145   : > { %s2544_s11 = sshll.u32 %s897_s17, 8  ;;  %s900_s4 = sand.u32 127, %s894_s8 }
 0x146   : > { %s906_s19 = sadd.s32 45, %s3194_s7  ;;  %s868_s6 = scalar_lea.vmem [#allocation4], %s867_s9 }
 0x147   : > { %v869_v56 = vld [vmem:[%s868_s6] sm:$0x1]  ;;  %s901_s26 = sadd.s32 %s3206_s5, %s900_s4  ;;  %s907_s20 = sshra.s32 %s906_s19, 7 }
 0x148   : > { %s902_s2 = sadd.s32 %s2544_s11, %s901_s26  ;;  %s909_s29 = sadd.s32 %s907_s20, %s3202_s25  ;;  %v943_v58 = vrot.slane %v869_v56, 7 }
 0x149   : > { %s903_s22 = sld [smem:[#allocation3 + %s902_s2]]  ;;  %s2545_s24 = sshll.u32 %s909_s29, 8 }
 0x14a   : > { %s880_s12 = scalar_lea.vmem [#allocation4], %s879_s18  ;;  %s912_s15 = sand.u32 127, %s906_s19 }
 0x14b   : > { %v881_v57 = vld [vmem:[%s880_s12] sm:$0x1]  ;;  %s856_s13 = scalar_lea.vmem [#allocation4], %s3391_s30  ;;  %s913_s8 = sadd.s32 %s3206_s5, %s912_s15 }
 0x14c   : > { %v857_v59 = vld [vmem:[%s856_s13] sm:$0x1]  ;;  %s918_s1 = sadd.s32 46, %s3194_s7  ;;  %s914_s16 = sadd.s32 %s2545_s24, %s913_s8  ;;  %v946_v61 = vrot.slane %v881_v57, 6 }
 0x14d   : > { %s919_s9 = sshra.s32 %s918_s1, 7  ;;  %s892_s17 = scalar_lea.vmem [#allocation4], %s891_s27  ;;  %v963_v62 = vsel %vm321_vm0, %v857_v59, %v943_v58 }
 0x14e   : > { %v893_v60 = vld [vmem:[%s892_s17] sm:$0x1]  ;;  %s915_s11 = sld [smem:[#allocation3 + %s914_s16]]  ;;  %s921_s4 = sadd.s32 %s919_s9, %s3202_s25  ;;  %v964_v1 = vsel %vm323_vm1, %v963_v62, %v946_v61 }
 0x14f   : > { %s2546_s6 = sshll.u32 %s921_s4, 8  ;;  %s924_s26 = sand.u32 127, %s918_s1  ;;  %v949_v0 = vrot.slane %v893_v60, 5  ;;  %v1224_v61 = vld [vmem:[%s3186_s14 + $0x38] sm:$0xff] }
 0x150   : > { %s925_s18 = sadd.s32 %s3206_s5, %s924_s26  ;;  %s904_s19 = scalar_lea.vmem [#allocation4], %s903_s22 }
 0x151   : > { %v905_v63 = vld [vmem:[%s904_s19] sm:$0x1]  ;;  %s926_s30 = sadd.s32 %s2546_s6, %s925_s18  ;;  %s930_s20 = sadd.s32 47, %s3194_s7  ;;  %v965_v4 = vsel %vm325_vm2, %v964_v1, %v949_v0 }
 0x152   : > { %s927_s2 = sld [smem:[#allocation3 + %s926_s30]]  ;;  %s931_s27 = sshra.s32 %s930_s20, 7  ;;  %v952_v2 = vrot.slane %v905_v63, 4 }
 0x153   : > { %s933_s29 = sadd.s32 %s931_s27, %s3202_s25  ;;  %s936_s24 = sand.u32 127, %s930_s20 }
 0x154   : > { %s2547_s12 = sshll.u32 %s933_s29, 8  ;;  %s916_s15 = scalar_lea.vmem [#allocation4], %s915_s11  ;;  %v966_v6 = vsel %vm327_vm3, %v965_v4, %v952_v2 }
 0x155   : > { %v917_v3 = vld [vmem:[%s916_s15] sm:$0x1]  ;;  %s937_s13 = sadd.s32 %s3206_s5, %s936_s24  ;;  %s973_s22 = sadd.s32 48, %s3194_s7 }
 0x156   : > { %s938_s8 = sadd.s32 %s2547_s12, %s937_s13  ;;  %s974_s1 = sshra.s32 %s973_s22, 7  ;;  %v955_v5 = vrot.slane %v917_v3, 3 }
 0x157   : > { %s939_s16 = sld [smem:[#allocation3 + %s938_s8]]  ;;  %s976_s9 = sadd.s32 %s974_s1, %s3202_s25 }
 0x158   : > { %s2548_s17 = sshll.u32 %s976_s9, 8  ;;  %s928_s4 = scalar_lea.vmem [#allocation4], %s927_s2  ;;  %v967_v9 = vsel %vm329_vm4, %v966_v6, %v955_v5 }
 0x159   : > { %v929_v7 = vld [vmem:[%s928_s4] sm:$0x1]  ;;  %s979_s11 = sand.u32 127, %s973_s22  ;;  %s985_s6 = sadd.s32 49, %s3194_s7 }
 0x15a   : > { %v958_v8 = vrot.slane %v929_v7, 2  ;;  %s980_s26 = sadd.s32 %s3206_s5, %s979_s11  ;;  %s986_s18 = sshra.s32 %s985_s6, 7 }
 0x15b   : > { %s981_s19 = sadd.s32 %s2548_s17, %s980_s26  ;;  %s988_s30 = sadd.s32 %s986_s18, %s3202_s25 }
 0x15c   : > { %s3427_s20 = sld [smem:[#allocation3 + %s981_s19]]  ;;  %s2549_s27 = sshll.u32 %s988_s30, 8  ;;  %v968_v11 = vsel %vm331_vm5, %v967_v9, %v958_v8 }
 0x15d   : > { %s991_s29 = sand.u32 127, %s985_s6  ;;  %s940_s2 = scalar_lea.vmem [#allocation4], %s939_s16 }
 0x15e   : > { %v941_v10 = vld [vmem:[%s940_s2] sm:$0x1]  ;;  %s992_s24 = sadd.s32 %s3206_s5, %s991_s29  ;;  %s997_s12 = sadd.s32 50, %s3194_s7 }
 0x15f   : > { %v961_v12 = vrot.slane %v941_v10, 1  ;;  %s993_s15 = sadd.s32 %s2549_s27, %s992_s24  ;;  %s998_s13 = sshra.s32 %s997_s12, 7 }
 0x160   : > { %s994_s22 = sld [smem:[#allocation3 + %s993_s15]]  ;;  %s1000_s8 = sadd.s32 %s998_s13, %s3202_s25 }
 0x161   : > { %v969_v14 = vsel %vm333_vm6, %v968_v11, %v961_v12  ;;  %s2550_s1 = sshll.u32 %s1000_s8, 8  ;;  %s1003_s16 = sand.u32 127, %s997_s12 }
 0x162   : > { %v971_v15 = vadd.f32 %v970_v13, %v969_v14  ;;  %s1004_s9 = sadd.s32 %s3206_s5, %s1003_s16  ;;  %s1009_s4 = sadd.s32 51, %s3194_s7 }
 0x163   : > { %s1005_s17 = sadd.s32 %s2550_s1, %s1004_s9  ;;  %s1010_s6 = sshra.s32 %s1009_s4, 7 }
 0x164   : > { %972 = vst [vmem:[%s3255_s21 + $0x28] sm:$0xff] %v971_v15  ;;  %s1006_s11 = sld [smem:[#allocation3 + %s1005_s17]]  ;;  %s1012_s26 = sadd.s32 %s1010_s6, %s3202_s25 }
 0x165   : > { %s1015_s18 = sand.u32 127, %s1009_s4  ;;  %s2551_s19 = sshll.u32 %s1012_s26, 8 }
 0x166   : > { %s1016_s30 = sadd.s32 %s3206_s5, %s1015_s18  ;;  %s1021_s27 = sadd.s32 52, %s3194_s7 }
 0x167   : > { %s1017_s29 = sadd.s32 %s2551_s19, %s1016_s30  ;;  %s1022_s2 = sshra.s32 %s1021_s27, 7 }
 0x168   : > { %s1018_s24 = sld [smem:[#allocation3 + %s1017_s29]]  ;;  %s1024_s12 = sadd.s32 %s1022_s2, %s3202_s25 }
 0x169   : > { %s2552_s15 = sshll.u32 %s1024_s12, 8  ;;  %s1027_s13 = sand.u32 127, %s1021_s27 }
 0x16a   : > { %s1033_s8 = sadd.s32 53, %s3194_s7  ;;  %s995_s1 = scalar_lea.vmem [#allocation4], %s994_s22 }
 0x16b   : > { %v996_v16 = vld [vmem:[%s995_s1] sm:$0x1]  ;;  %s1028_s16 = sadd.s32 %s3206_s5, %s1027_s13  ;;  %s1034_s9 = sshra.s32 %s1033_s8, 7 }
 0x16c   : > { %s1029_s17 = sadd.s32 %s2552_s15, %s1028_s16  ;;  %s1036_s4 = sadd.s32 %s1034_s9, %s3202_s25  ;;  %v1070_v18 = vrot.slane %v996_v16, 7 }
 0x16d   : > { %s1030_s6 = sld [smem:[#allocation3 + %s1029_s17]]  ;;  %s2553_s26 = sshll.u32 %s1036_s4, 8 }
 0x16e   : > { %s1007_s18 = scalar_lea.vmem [#allocation4], %s1006_s11  ;;  %s1039_s19 = sand.u32 127, %s1033_s8 }
 0x16f   : > { %v1008_v17 = vld [vmem:[%s1007_s18] sm:$0x1]  ;;  %s983_s30 = scalar_lea.vmem [#allocation4], %s3427_s20  ;;  %s1040_s27 = sadd.s32 %s3206_s5, %s1039_s19 }
 0x170   : > { %v984_v19 = vld [vmem:[%s983_s30] sm:$0x1]  ;;  %s1045_s29 = sadd.s32 54, %s3194_s7  ;;  %s1041_s2 = sadd.s32 %s2553_s26, %s1040_s27  ;;  %v1073_v21 = vrot.slane %v1008_v17, 6 }
 0x171   : > { %s1046_s22 = sshra.s32 %s1045_s29, 7  ;;  %s1019_s12 = scalar_lea.vmem [#allocation4], %s1018_s24  ;;  %v1090_v22 = vsel %vm321_vm0, %v984_v19, %v1070_v18 }
 0x172   : > { %v1020_v20 = vld [vmem:[%s1019_s12] sm:$0x1]  ;;  %s1042_s15 = sld [smem:[#allocation3 + %s1041_s2]]  ;;  %s1048_s13 = sadd.s32 %s1046_s22, %s3202_s25  ;;  %v1091_v25 = vsel %vm323_vm1, %v1090_v22, %v1073_v21  ;;  %v1351_v21 = vld [vmem:[%s3186_s14 + $0x40] sm:$0xff] }
 0x173   : > { %s2554_s1 = sshll.u32 %s1048_s13, 8  ;;  %s1051_s16 = sand.u32 127, %s1045_s29  ;;  %v1076_v24 = vrot.slane %v1020_v20, 5 }
 0x174   : > { %s1052_s11 = sadd.s32 %s3206_s5, %s1051_s16  ;;  %s1031_s8 = scalar_lea.vmem [#allocation4], %s1030_s6 }
 0x175   : > { %v1032_v23 = vld [vmem:[%s1031_s8] sm:$0x1]  ;;  %s1053_s20 = sadd.s32 %s2554_s1, %s1052_s11  ;;  %s1057_s9 = sadd.s32 55, %s3194_s7  ;;  %v1092_v28 = vsel %vm325_vm2, %v1091_v25, %v1076_v24 }
 0x176   : > { %s1054_s17 = sld [smem:[#allocation3 + %s1053_s20]]  ;;  %s1058_s24 = sshra.s32 %s1057_s9, 7  ;;  %v1079_v26 = vrot.slane %v1032_v23, 4 }
 0x177   : > { %s1060_s4 = sadd.s32 %s1058_s24, %s3202_s25  ;;  %s1063_s26 = sand.u32 127, %s1057_s9 }
 0x178   : > { %s2555_s18 = sshll.u32 %s1060_s4, 8  ;;  %s1043_s19 = scalar_lea.vmem [#allocation4], %s1042_s15  ;;  %v1093_v30 = vsel %vm327_vm3, %v1092_v28, %v1079_v26 }
 0x179   : > { %v1044_v27 = vld [vmem:[%s1043_s19] sm:$0x1]  ;;  %s1064_s30 = sadd.s32 %s3206_s5, %s1063_s26  ;;  %s1100_s6 = sadd.s32 56, %s3194_s7 }
 0x17a   : > { %s1065_s27 = sadd.s32 %s2555_s18, %s1064_s30  ;;  %s1101_s29 = sshra.s32 %s1100_s6, 7  ;;  %v1082_v29 = vrot.slane %v1044_v27, 3 }
 0x17b   : > { %s1066_s2 = sld [smem:[#allocation3 + %s1065_s27]]  ;;  %s1103_s22 = sadd.s32 %s1101_s29, %s3202_s25 }
 0x17c   : > { %s2556_s12 = sshll.u32 %s1103_s22, 8  ;;  %s1055_s13 = scalar_lea.vmem [#allocation4], %s1054_s17  ;;  %v1094_v33 = vsel %vm329_vm4, %v1093_v30, %v1082_v29 }
 0x17d   : > { %v1056_v31 = vld [vmem:[%s1055_s13] sm:$0x1]  ;;  %s1106_s15 = sand.u32 127, %s1100_s6  ;;  %s1112_s1 = sadd.s32 57, %s3194_s7 }
 0x17e   : > { %v1085_v32 = vrot.slane %v1056_v31, 2  ;;  %s1107_s16 = sadd.s32 %s3206_s5, %s1106_s15  ;;  %s1113_s11 = sshra.s32 %s1112_s1, 7 }
 0x17f   : > { %s1108_s8 = sadd.s32 %s2556_s12, %s1107_s16  ;;  %s1115_s20 = sadd.s32 %s1113_s11, %s3202_s25 }
 0x180   : > { %s3463_s9 = sld [smem:[#allocation3 + %s1108_s8]]  ;;  %s2557_s24 = sshll.u32 %s1115_s20, 8  ;;  %v1095_v35 = vsel %vm331_vm5, %v1094_v33, %v1085_v32 }
 0x181   : > { %s1118_s4 = sand.u32 127, %s1112_s1  ;;  %s1067_s17 = scalar_lea.vmem [#allocation4], %s1066_s2 }
 0x182   : > { %v1068_v34 = vld [vmem:[%s1067_s17] sm:$0x1]  ;;  %s1119_s26 = sadd.s32 %s3206_s5, %s1118_s4  ;;  %s1124_s18 = sadd.s32 58, %s3194_s7 }
 0x183   : > { %v1088_v36 = vrot.slane %v1068_v34, 1  ;;  %s1120_s19 = sadd.s32 %s2557_s24, %s1119_s26  ;;  %s1125_s30 = sshra.s32 %s1124_s18, 7 }
 0x184   : > { %s1121_s6 = sld [smem:[#allocation3 + %s1120_s19]]  ;;  %s1127_s27 = sadd.s32 %s1125_s30, %s3202_s25 }
 0x185   : > { %v1096_v38 = vsel %vm333_vm6, %v1095_v35, %v1088_v36  ;;  %s2558_s29 = sshll.u32 %s1127_s27, 8  ;;  %s1130_s2 = sand.u32 127, %s1124_s18 }
 0x186   : > { %v1098_v39 = vadd.f32 %v1097_v37, %v1096_v38  ;;  %s1131_s22 = sadd.s32 %s3206_s5, %s1130_s2  ;;  %s1136_s13 = sadd.s32 59, %s3194_s7 }
 0x187   : > { %s1132_s12 = sadd.s32 %s2558_s29, %s1131_s22  ;;  %s1137_s1 = sshra.s32 %s1136_s13, 7 }
 0x188   : > { %1099 = vst [vmem:[%s3255_s21 + $0x30] sm:$0xff] %v1098_v39  ;;  %s1133_s15 = sld [smem:[#allocation3 + %s1132_s12]]  ;;  %s1139_s16 = sadd.s32 %s1137_s1, %s3202_s25 }
 0x189   : > { %s1142_s11 = sand.u32 127, %s1136_s13  ;;  %s2559_s8 = sshll.u32 %s1139_s16, 8 }
 0x18a   : > { %s1143_s20 = sadd.s32 %s3206_s5, %s1142_s11  ;;  %s1148_s24 = sadd.s32 60, %s3194_s7 }
 0x18b   : > { %s1144_s4 = sadd.s32 %s2559_s8, %s1143_s20  ;;  %s1149_s17 = sshra.s32 %s1148_s24, 7 }
 0x18c   : > { %s1145_s26 = sld [smem:[#allocation3 + %s1144_s4]]  ;;  %s1151_s18 = sadd.s32 %s1149_s17, %s3202_s25 }
 0x18d   : > { %s2560_s19 = sshll.u32 %s1151_s18, 8  ;;  %s1154_s30 = sand.u32 127, %s1148_s24 }
 0x18e   : > { %s1160_s27 = sadd.s32 61, %s3194_s7  ;;  %s1122_s29 = scalar_lea.vmem [#allocation4], %s1121_s6 }
 0x18f   : > { %v1123_v40 = vld [vmem:[%s1122_s29] sm:$0x1]  ;;  %s1155_s2 = sadd.s32 %s3206_s5, %s1154_s30  ;;  %s1161_s22 = sshra.s32 %s1160_s27, 7 }
 0x190   : > { %s1156_s12 = sadd.s32 %s2560_s19, %s1155_s2  ;;  %s1163_s13 = sadd.s32 %s1161_s22, %s3202_s25  ;;  %v1197_v42 = vrot.slane %v1123_v40, 7 }
 0x191   : > { %s1157_s1 = sld [smem:[#allocation3 + %s1156_s12]]  ;;  %s2561_s16 = sshll.u32 %s1163_s13, 8 }
 0x192   : > { %s1134_s11 = scalar_lea.vmem [#allocation4], %s1133_s15  ;;  %s1166_s8 = sand.u32 127, %s1160_s27 }
 0x193   : > { %v1135_v41 = vld [vmem:[%s1134_s11] sm:$0x1]  ;;  %s1110_s20 = scalar_lea.vmem [#allocation4], %s3463_s9  ;;  %s1167_s24 = sadd.s32 %s3206_s5, %s1166_s8 }
 0x194   : > { %v1111_v43 = vld [vmem:[%s1110_s20] sm:$0x1]  ;;  %s1172_s4 = sadd.s32 62, %s3194_s7  ;;  %s1168_s17 = sadd.s32 %s2561_s16, %s1167_s24  ;;  %v1200_v45 = vrot.slane %v1135_v41, 6 }
 0x195   : > { %s1173_s6 = sshra.s32 %s1172_s4, 7  ;;  %s1146_s18 = scalar_lea.vmem [#allocation4], %s1145_s26  ;;  %v1217_v46 = vsel %vm321_vm0, %v1111_v43, %v1197_v42 }
 0x196   : > { %v1147_v44 = vld [vmem:[%s1146_s18] sm:$0x1]  ;;  %s1169_s19 = sld [smem:[#allocation3 + %s1168_s17]]  ;;  %s1175_s30 = sadd.s32 %s1173_s6, %s3202_s25  ;;  %v1218_v49 = vsel %vm323_vm1, %v1217_v46, %v1200_v45  ;;  %v1478_v45 = vld [vmem:[%s3186_s14 + $0x48] sm:$0xff] }
 0x197   : > { %s2562_s29 = sshll.u32 %s1175_s30, 8  ;;  %s1178_s2 = sand.u32 127, %s1172_s4  ;;  %v1203_v48 = vrot.slane %v1147_v44, 5 }
 0x198   : > { %s1179_s15 = sadd.s32 %s3206_s5, %s1178_s2  ;;  %s1158_s27 = scalar_lea.vmem [#allocation4], %s1157_s1 }
 0x199   : > { %v1159_v47 = vld [vmem:[%s1158_s27] sm:$0x1]  ;;  %s1180_s9 = sadd.s32 %s2562_s29, %s1179_s15  ;;  %s1184_s22 = sadd.s32 63, %s3194_s7  ;;  %v1219_v52 = vsel %vm325_vm2, %v1218_v49, %v1203_v48 }
 0x19a   : > { %s1181_s12 = sld [smem:[#allocation3 + %s1180_s9]]  ;;  %s1185_s26 = sshra.s32 %s1184_s22, 7  ;;  %v1206_v50 = vrot.slane %v1159_v47, 4 }
 0x19b   : > { %s1187_s13 = sadd.s32 %s1185_s26, %s3202_s25  ;;  %s1190_s16 = sand.u32 127, %s1184_s22 }
 0x19c   : > { %s2563_s11 = sshll.u32 %s1187_s13, 8  ;;  %s1170_s8 = scalar_lea.vmem [#allocation4], %s1169_s19  ;;  %v1220_v54 = vsel %vm327_vm3, %v1219_v52, %v1206_v50 }
 0x19d   : > { %v1171_v51 = vld [vmem:[%s1170_s8] sm:$0x1]  ;;  %s1191_s20 = sadd.s32 %s3206_s5, %s1190_s16  ;;  %s1227_s1 = sadd.s32 64, %s3194_s7 }
 0x19e   : > { %s1192_s24 = sadd.s32 %s2563_s11, %s1191_s20  ;;  %s1228_s4 = sshra.s32 %s1227_s1, 7  ;;  %v1209_v53 = vrot.slane %v1171_v51, 3 }
 0x19f   : > { %s1193_s17 = sld [smem:[#allocation3 + %s1192_s24]]  ;;  %s1230_s6 = sadd.s32 %s1228_s4, %s3202_s25 }
 0x1a0   : > { %s2564_s18 = sshll.u32 %s1230_s6, 8  ;;  %s1182_s30 = scalar_lea.vmem [#allocation4], %s1181_s12  ;;  %v1221_v57 = vsel %vm329_vm4, %v1220_v54, %v1209_v53 }
 0x1a1   : > { %v1183_v55 = vld [vmem:[%s1182_s30] sm:$0x1]  ;;  %s1233_s19 = sand.u32 127, %s1227_s1  ;;  %s1239_s29 = sadd.s32 65, %s3194_s7 }
 0x1a2   : > { %v1212_v56 = vrot.slane %v1183_v55, 2  ;;  %s1234_s2 = sadd.s32 %s3206_s5, %s1233_s19  ;;  %s1240_s15 = sshra.s32 %s1239_s29, 7 }
 0x1a3   : > { %s1235_s27 = sadd.s32 %s2564_s18, %s1234_s2  ;;  %s1242_s9 = sadd.s32 %s1240_s15, %s3202_s25 }
 0x1a4   : > { %s3499_s22 = sld [smem:[#allocation3 + %s1235_s27]]  ;;  %s2565_s26 = sshll.u32 %s1242_s9, 8  ;;  %v1222_v59 = vsel %vm331_vm5, %v1221_v57, %v1212_v56 }
 0x1a5   : > { %s1245_s13 = sand.u32 127, %s1239_s29  ;;  %s1194_s12 = scalar_lea.vmem [#allocation4], %s1193_s17 }
 0x1a6   : > { %v1195_v58 = vld [vmem:[%s1194_s12] sm:$0x1]  ;;  %s1246_s16 = sadd.s32 %s3206_s5, %s1245_s13  ;;  %s1251_s11 = sadd.s32 66, %s3194_s7 }
 0x1a7   : > { %v1215_v60 = vrot.slane %v1195_v58, 1  ;;  %s1247_s8 = sadd.s32 %s2565_s26, %s1246_s16  ;;  %s1252_s20 = sshra.s32 %s1251_s11, 7 }
 0x1a8   : > { %s1248_s1 = sld [smem:[#allocation3 + %s1247_s8]]  ;;  %s1254_s24 = sadd.s32 %s1252_s20, %s3202_s25 }
 0x1a9   : > { %v1223_v62 = vsel %vm333_vm6, %v1222_v59, %v1215_v60  ;;  %s2566_s4 = sshll.u32 %s1254_s24, 8  ;;  %s1257_s17 = sand.u32 127, %s1251_s11 }
 0x1aa   : > { %v1225_v63 = vadd.f32 %v1224_v61, %v1223_v62  ;;  %s1258_s6 = sadd.s32 %s3206_s5, %s1257_s17  ;;  %s1263_s30 = sadd.s32 67, %s3194_s7 }
 0x1ab   : > { %s1259_s18 = sadd.s32 %s2566_s4, %s1258_s6  ;;  %s1264_s29 = sshra.s32 %s1263_s30, 7 }
 0x1ac   : > { %1226 = vst [vmem:[%s3255_s21 + $0x38] sm:$0xff] %v1225_v63  ;;  %s1260_s19 = sld [smem:[#allocation3 + %s1259_s18]]  ;;  %s1266_s2 = sadd.s32 %s1264_s29, %s3202_s25 }
 0x1ad   : > { %s1269_s15 = sand.u32 127, %s1263_s30  ;;  %s2567_s27 = sshll.u32 %s1266_s2, 8 }
 0x1ae   : > { %s1270_s9 = sadd.s32 %s3206_s5, %s1269_s15  ;;  %s1275_s26 = sadd.s32 68, %s3194_s7 }
 0x1af   : > { %s1271_s13 = sadd.s32 %s2567_s27, %s1270_s9  ;;  %s1276_s12 = sshra.s32 %s1275_s26, 7 }
 0x1b0   : > { %s1272_s16 = sld [smem:[#allocation3 + %s1271_s13]]  ;;  %s1278_s11 = sadd.s32 %s1276_s12, %s3202_s25 }
 0x1b1   : > { %s2568_s8 = sshll.u32 %s1278_s11, 8  ;;  %s1281_s20 = sand.u32 127, %s1275_s26 }
 0x1b2   : > { %s1287_s24 = sadd.s32 69, %s3194_s7  ;;  %s1249_s4 = scalar_lea.vmem [#allocation4], %s1248_s1 }
 0x1b3   : > { %v1250_v0 = vld [vmem:[%s1249_s4] sm:$0x1]  ;;  %s1282_s17 = sadd.s32 %s3206_s5, %s1281_s20  ;;  %s1288_s6 = sshra.s32 %s1287_s24, 7 }
 0x1b4   : > { %s1283_s18 = sadd.s32 %s2568_s8, %s1282_s17  ;;  %s1290_s30 = sadd.s32 %s1288_s6, %s3202_s25  ;;  %v1324_v2 = vrot.slane %v1250_v0, 7 }
 0x1b5   : > { %s1284_s29 = sld [smem:[#allocation3 + %s1283_s18]]  ;;  %s2569_s2 = sshll.u32 %s1290_s30, 8 }
 0x1b6   : > { %s1261_s15 = scalar_lea.vmem [#allocation4], %s1260_s19  ;;  %s1293_s27 = sand.u32 127, %s1287_s24 }
 0x1b7   : > { %v1262_v1 = vld [vmem:[%s1261_s15] sm:$0x1]  ;;  %s1237_s9 = scalar_lea.vmem [#allocation4], %s3499_s22  ;;  %s1294_s26 = sadd.s32 %s3206_s5, %s1293_s27 }
 0x1b8   : > { %v1238_v3 = vld [vmem:[%s1237_s9] sm:$0x1]  ;;  %s1299_s13 = sadd.s32 70, %s3194_s7  ;;  %s1295_s12 = sadd.s32 %s2569_s2, %s1294_s26  ;;  %v1327_v5 = vrot.slane %v1262_v1, 6 }
 0x1b9   : > { %s1300_s1 = sshra.s32 %s1299_s13, 7  ;;  %s1273_s11 = scalar_lea.vmem [#allocation4], %s1272_s16  ;;  %v1344_v6 = vsel %vm321_vm0, %v1238_v3, %v1324_v2 }
 0x1ba   : > { %v1274_v4 = vld [vmem:[%s1273_s11] sm:$0x1]  ;;  %s1296_s8 = sld [smem:[#allocation3 + %s1295_s12]]  ;;  %s1302_s20 = sadd.s32 %s1300_s1, %s3202_s25  ;;  %v1345_v9 = vsel %vm323_vm1, %v1344_v6, %v1327_v5  ;;  %v1605_v5 = vld [vmem:[%s3186_s14 + $0x50] sm:$0xff] }
 0x1bb   : > { %s2570_s4 = sshll.u32 %s1302_s20, 8  ;;  %s1305_s17 = sand.u32 127, %s1299_s13  ;;  %v1330_v8 = vrot.slane %v1274_v4, 5 }
 0x1bc   : > { %s1306_s19 = sadd.s32 %s3206_s5, %s1305_s17  ;;  %s1285_s24 = scalar_lea.vmem [#allocation4], %s1284_s29 }
 0x1bd   : > { %v1286_v7 = vld [vmem:[%s1285_s24] sm:$0x1]  ;;  %s1307_s22 = sadd.s32 %s2570_s4, %s1306_s19  ;;  %s1311_s6 = sadd.s32 71, %s3194_s7  ;;  %v1346_v12 = vsel %vm325_vm2, %v1345_v9, %v1330_v8 }
 0x1be   : > { %s1308_s18 = sld [smem:[#allocation3 + %s1307_s22]]  ;;  %s1312_s16 = sshra.s32 %s1311_s6, 7  ;;  %v1333_v10 = vrot.slane %v1286_v7, 4 }
 0x1bf   : > { %s1314_s30 = sadd.s32 %s1312_s16, %s3202_s25  ;;  %s1317_s2 = sand.u32 127, %s1311_s6 }
 0x1c0   : > { %s2571_s15 = sshll.u32 %s1314_s30, 8  ;;  %s1297_s27 = scalar_lea.vmem [#allocation4], %s1296_s8  ;;  %v1347_v14 = vsel %vm327_vm3, %v1346_v12, %v1333_v10 }
 0x1c1   : > { %v1298_v11 = vld [vmem:[%s1297_s27] sm:$0x1]  ;;  %s1318_s9 = sadd.s32 %s3206_s5, %s1317_s2  ;;  %s1354_s29 = sadd.s32 72, %s3194_s7 }
 0x1c2   : > { %s1319_s26 = sadd.s32 %s2571_s15, %s1318_s9  ;;  %s1355_s13 = sshra.s32 %s1354_s29, 7  ;;  %v1336_v13 = vrot.slane %v1298_v11, 3 }
 0x1c3   : > { %s1320_s12 = sld [smem:[#allocation3 + %s1319_s26]]  ;;  %s1357_s1 = sadd.s32 %s1355_s13, %s3202_s25 }
 0x1c4   : > { %s2572_s11 = sshll.u32 %s1357_s1, 8  ;;  %s1309_s20 = scalar_lea.vmem [#allocation4], %s1308_s18  ;;  %v1348_v17 = vsel %vm329_vm4, %v1347_v14, %v1336_v13 }
 0x1c5   : > { %v1310_v15 = vld [vmem:[%s1309_s20] sm:$0x1]  ;;  %s1360_s8 = sand.u32 127, %s1354_s29  ;;  %s1366_s4 = sadd.s32 73, %s3194_s7 }
 0x1c6   : > { %v1339_v16 = vrot.slane %v1310_v15, 2  ;;  %s1361_s17 = sadd.s32 %s3206_s5, %s1360_s8  ;;  %s1367_s19 = sshra.s32 %s1366_s4, 7 }
 0x1c7   : > { %s1362_s24 = sadd.s32 %s2572_s11, %s1361_s17  ;;  %s1369_s22 = sadd.s32 %s1367_s19, %s3202_s25 }
 0x1c8   : > { %s3535_s6 = sld [smem:[#allocation3 + %s1362_s24]]  ;;  %s2573_s16 = sshll.u32 %s1369_s22, 8  ;;  %v1349_v19 = vsel %vm331_vm5, %v1348_v17, %v1339_v16 }
 0x1c9   : > { %s1372_s30 = sand.u32 127, %s1366_s4  ;;  %s1321_s18 = scalar_lea.vmem [#allocation4], %s1320_s12 }
 0x1ca   : > { %v1322_v18 = vld [vmem:[%s1321_s18] sm:$0x1]  ;;  %s1373_s2 = sadd.s32 %s3206_s5, %s1372_s30  ;;  %s1378_s15 = sadd.s32 74, %s3194_s7 }
 0x1cb   : > { %v1342_v20 = vrot.slane %v1322_v18, 1  ;;  %s1374_s27 = sadd.s32 %s2573_s16, %s1373_s2  ;;  %s1379_s9 = sshra.s32 %s1378_s15, 7 }
 0x1cc   : > { %s1375_s29 = sld [smem:[#allocation3 + %s1374_s27]]  ;;  %s1381_s26 = sadd.s32 %s1379_s9, %s3202_s25 }
 0x1cd   : > { %v1350_v22 = vsel %vm333_vm6, %v1349_v19, %v1342_v20  ;;  %s2574_s13 = sshll.u32 %s1381_s26, 8  ;;  %s1384_s12 = sand.u32 127, %s1378_s15 }
 0x1ce   : > { %v1352_v23 = vadd.f32 %v1351_v21, %v1350_v22  ;;  %s1385_s1 = sadd.s32 %s3206_s5, %s1384_s12  ;;  %s1390_s20 = sadd.s32 75, %s3194_s7 }
 0x1cf   : > { %s1386_s11 = sadd.s32 %s2574_s13, %s1385_s1  ;;  %s1391_s4 = sshra.s32 %s1390_s20, 7 }
 0x1d0   : > { %1353 = vst [vmem:[%s3255_s21 + $0x40] sm:$0xff] %v1352_v23  ;;  %s1387_s8 = sld [smem:[#allocation3 + %s1386_s11]]  ;;  %s1393_s17 = sadd.s32 %s1391_s4, %s3202_s25 }
 0x1d1   : > { %s1396_s19 = sand.u32 127, %s1390_s20  ;;  %s2575_s24 = sshll.u32 %s1393_s17, 8 }
 0x1d2   : > { %s1397_s22 = sadd.s32 %s3206_s5, %s1396_s19  ;;  %s1402_s16 = sadd.s32 76, %s3194_s7 }
 0x1d3   : > { %s1398_s30 = sadd.s32 %s2575_s24, %s1397_s22  ;;  %s1403_s18 = sshra.s32 %s1402_s16, 7 }
 0x1d4   : > { %s1399_s2 = sld [smem:[#allocation3 + %s1398_s30]]  ;;  %s1405_s15 = sadd.s32 %s1403_s18, %s3202_s25 }
 0x1d5   : > { %s2576_s27 = sshll.u32 %s1405_s15, 8  ;;  %s1408_s9 = sand.u32 127, %s1402_s16 }
 0x1d6   : > { %s1414_s26 = sadd.s32 77, %s3194_s7  ;;  %s1376_s13 = scalar_lea.vmem [#allocation4], %s1375_s29 }
 0x1d7   : > { %v1377_v24 = vld [vmem:[%s1376_s13] sm:$0x1]  ;;  %s1409_s12 = sadd.s32 %s3206_s5, %s1408_s9  ;;  %s1415_s1 = sshra.s32 %s1414_s26, 7 }
 0x1d8   : > { %s1410_s11 = sadd.s32 %s2576_s27, %s1409_s12  ;;  %s1417_s20 = sadd.s32 %s1415_s1, %s3202_s25  ;;  %v1451_v26 = vrot.slane %v1377_v24, 7 }
 0x1d9   : > { %s1411_s4 = sld [smem:[#allocation3 + %s1410_s11]]  ;;  %s2577_s17 = sshll.u32 %s1417_s20, 8 }
 0x1da   : > { %s1388_s19 = scalar_lea.vmem [#allocation4], %s1387_s8  ;;  %s1420_s24 = sand.u32 127, %s1414_s26 }
 0x1db   : > { %v1389_v25 = vld [vmem:[%s1388_s19] sm:$0x1]  ;;  %s1364_s22 = scalar_lea.vmem [#allocation4], %s3535_s6  ;;  %s1421_s16 = sadd.s32 %s3206_s5, %s1420_s24 }
 0x1dc   : > { %v1365_v27 = vld [vmem:[%s1364_s22] sm:$0x1]  ;;  %s1426_s30 = sadd.s32 78, %s3194_s7  ;;  %s1422_s18 = sadd.s32 %s2577_s17, %s1421_s16  ;;  %v1454_v29 = vrot.slane %v1389_v25, 6 }
 0x1dd   : > { %s1427_s29 = sshra.s32 %s1426_s30, 7  ;;  %s1400_s15 = scalar_lea.vmem [#allocation4], %s1399_s2  ;;  %v1471_v30 = vsel %vm321_vm0, %v1365_v27, %v1451_v26 }
 0x1de   : > { %v1401_v28 = vld [vmem:[%s1400_s15] sm:$0x1]  ;;  %s1423_s27 = sld [smem:[#allocation3 + %s1422_s18]]  ;;  %s1429_s9 = sadd.s32 %s1427_s29, %s3202_s25  ;;  %v1472_v33 = vsel %vm323_vm1, %v1471_v30, %v1454_v29 }
 0x1df   : > { %s2578_s13 = sshll.u32 %s1429_s9, 8  ;;  %s1432_s12 = sand.u32 127, %s1426_s30  ;;  %v1457_v32 = vrot.slane %v1401_v28, 5  ;;  %v1732_v29 = vld [vmem:[%s3186_s14 + $0x58] sm:$0xff] }
 0x1e0   : > { %s1433_s8 = sadd.s32 %s3206_s5, %s1432_s12  ;;  %s1412_s26 = scalar_lea.vmem [#allocation4], %s1411_s4 }
 0x1e1   : > { %v1413_v31 = vld [vmem:[%s1412_s26] sm:$0x1]  ;;  %s1434_s6 = sadd.s32 %s2578_s13, %s1433_s8  ;;  %s1438_s1 = sadd.s32 79, %s3194_s7  ;;  %v1473_v36 = vsel %vm325_vm2, %v1472_v33, %v1457_v32 }
 0x1e2   : > { %s1435_s11 = sld [smem:[#allocation3 + %s1434_s6]]  ;;  %s1439_s2 = sshra.s32 %s1438_s1, 7  ;;  %v1460_v34 = vrot.slane %v1413_v31, 4 }
 0x1e3   : > { %s1441_s20 = sadd.s32 %s1439_s2, %s3202_s25  ;;  %s1444_s17 = sand.u32 127, %s1438_s1 }
 0x1e4   : > { %s2579_s19 = sshll.u32 %s1441_s20, 8  ;;  %s1424_s24 = scalar_lea.vmem [#allocation4], %s1423_s27  ;;  %v1474_v38 = vsel %vm327_vm3, %v1473_v36, %v1460_v34 }
 0x1e5   : > { %v1425_v35 = vld [vmem:[%s1424_s24] sm:$0x1]  ;;  %s1445_s22 = sadd.s32 %s3206_s5, %s1444_s17  ;;  %s1481_s4 = sadd.s32 80, %s3194_s7 }
 0x1e6   : > { %s1446_s16 = sadd.s32 %s2579_s19, %s1445_s22  ;;  %s1482_s30 = sshra.s32 %s1481_s4, 7  ;;  %v1463_v37 = vrot.slane %v1425_v35, 3 }
 0x1e7   : > { %s1447_s18 = sld [smem:[#allocation3 + %s1446_s16]]  ;;  %s1484_s29 = sadd.s32 %s1482_s30, %s3202_s25 }
 0x1e8   : > { %s2580_s15 = sshll.u32 %s1484_s29, 8  ;;  %s1436_s9 = scalar_lea.vmem [#allocation4], %s1435_s11  ;;  %v1475_v41 = vsel %vm329_vm4, %v1474_v38, %v1463_v37 }
 0x1e9   : > { %v1437_v39 = vld [vmem:[%s1436_s9] sm:$0x1]  ;;  %s1487_s27 = sand.u32 127, %s1481_s4  ;;  %s1493_s13 = sadd.s32 81, %s3194_s7 }
 0x1ea   : > { %v1466_v40 = vrot.slane %v1437_v39, 2  ;;  %s1488_s12 = sadd.s32 %s3206_s5, %s1487_s27  ;;  %s1494_s8 = sshra.s32 %s1493_s13, 7 }
 0x1eb   : > { %s1489_s26 = sadd.s32 %s2580_s15, %s1488_s12  ;;  %s1496_s6 = sadd.s32 %s1494_s8, %s3202_s25 }
 0x1ec   : > { %s3571_s1 = sld [smem:[#allocation3 + %s1489_s26]]  ;;  %s2581_s2 = sshll.u32 %s1496_s6, 8  ;;  %v1476_v43 = vsel %vm331_vm5, %v1475_v41, %v1466_v40 }
 0x1ed   : > { %s1499_s20 = sand.u32 127, %s1493_s13  ;;  %s1448_s11 = scalar_lea.vmem [#allocation4], %s1447_s18 }
 0x1ee   : > { %v1449_v42 = vld [vmem:[%s1448_s11] sm:$0x1]  ;;  %s1500_s17 = sadd.s32 %s3206_s5, %s1499_s20  ;;  %s1505_s19 = sadd.s32 82, %s3194_s7 }
 0x1ef   : > { %v1469_v44 = vrot.slane %v1449_v42, 1  ;;  %s1501_s24 = sadd.s32 %s2581_s2, %s1500_s17  ;;  %s1506_s22 = sshra.s32 %s1505_s19, 7 }
 0x1f0   : > { %s1502_s4 = sld [smem:[#allocation3 + %s1501_s24]]  ;;  %s1508_s16 = sadd.s32 %s1506_s22, %s3202_s25 }
 0x1f1   : > { %v1477_v46 = vsel %vm333_vm6, %v1476_v43, %v1469_v44  ;;  %s2582_s30 = sshll.u32 %s1508_s16, 8  ;;  %s1511_s18 = sand.u32 127, %s1505_s19 }
 0x1f2   : > { %v1479_v47 = vadd.f32 %v1478_v45, %v1477_v46  ;;  %s1512_s29 = sadd.s32 %s3206_s5, %s1511_s18  ;;  %s1517_s9 = sadd.s32 83, %s3194_s7 }
 0x1f3   : > { %s1513_s15 = sadd.s32 %s2582_s30, %s1512_s29  ;;  %s1518_s13 = sshra.s32 %s1517_s9, 7 }
 0x1f4   : > { %1480 = vst [vmem:[%s3255_s21 + $0x48] sm:$0xff] %v1479_v47  ;;  %s1514_s27 = sld [smem:[#allocation3 + %s1513_s15]]  ;;  %s1520_s12 = sadd.s32 %s1518_s13, %s3202_s25 }
 0x1f5   : > { %s1523_s8 = sand.u32 127, %s1517_s9  ;;  %s2583_s26 = sshll.u32 %s1520_s12, 8 }
 0x1f6   : > { %s1524_s6 = sadd.s32 %s3206_s5, %s1523_s8  ;;  %s1529_s2 = sadd.s32 84, %s3194_s7 }
 0x1f7   : > { %s1525_s20 = sadd.s32 %s2583_s26, %s1524_s6  ;;  %s1530_s11 = sshra.s32 %s1529_s2, 7 }
 0x1f8   : > { %s1526_s17 = sld [smem:[#allocation3 + %s1525_s20]]  ;;  %s1532_s19 = sadd.s32 %s1530_s11, %s3202_s25 }
 0x1f9   : > { %s2584_s24 = sshll.u32 %s1532_s19, 8  ;;  %s1535_s22 = sand.u32 127, %s1529_s2 }
 0x1fa   : > { %s1541_s16 = sadd.s32 85, %s3194_s7  ;;  %s1503_s30 = scalar_lea.vmem [#allocation4], %s1502_s4 }
 0x1fb   : > { %v1504_v48 = vld [vmem:[%s1503_s30] sm:$0x1]  ;;  %s1536_s18 = sadd.s32 %s3206_s5, %s1535_s22  ;;  %s1542_s29 = sshra.s32 %s1541_s16, 7 }
 0x1fc   : > { %s1537_s15 = sadd.s32 %s2584_s24, %s1536_s18  ;;  %s1544_s9 = sadd.s32 %s1542_s29, %s3202_s25  ;;  %v1578_v50 = vrot.slane %v1504_v48, 7 }
 0x1fd   : > { %s1538_s13 = sld [smem:[#allocation3 + %s1537_s15]]  ;;  %s2585_s12 = sshll.u32 %s1544_s9, 8 }
 0x1fe   : > { %s1515_s8 = scalar_lea.vmem [#allocation4], %s1514_s27  ;;  %s1547_s26 = sand.u32 127, %s1541_s16 }
 0x1ff   : > { %v1516_v49 = vld [vmem:[%s1515_s8] sm:$0x1]  ;;  %s1491_s6 = scalar_lea.vmem [#allocation4], %s3571_s1  ;;  %s1548_s2 = sadd.s32 %s3206_s5, %s1547_s26 }
 0x200   : > { %v1492_v51 = vld [vmem:[%s1491_s6] sm:$0x1]  ;;  %s1553_s20 = sadd.s32 86, %s3194_s7  ;;  %s1549_s11 = sadd.s32 %s2585_s12, %s1548_s2  ;;  %v1581_v53 = vrot.slane %v1516_v49, 6 }
 0x201   : > { %s1554_s4 = sshra.s32 %s1553_s20, 7  ;;  %s1527_s19 = scalar_lea.vmem [#allocation4], %s1526_s17  ;;  %v1598_v54 = vsel %vm321_vm0, %v1492_v51, %v1578_v50 }
 0x202   : > { %v1528_v52 = vld [vmem:[%s1527_s19] sm:$0x1]  ;;  %s1550_s24 = sld [smem:[#allocation3 + %s1549_s11]]  ;;  %s1556_s22 = sadd.s32 %s1554_s4, %s3202_s25  ;;  %v1599_v57 = vsel %vm323_vm1, %v1598_v54, %v1581_v53  ;;  %v1859_v53 = vld [vmem:[%s3186_s14 + $0x60] sm:$0xff] }
 0x203   : > { %s2586_s30 = sshll.u32 %s1556_s22, 8  ;;  %s1559_s18 = sand.u32 127, %s1553_s20  ;;  %v1584_v56 = vrot.slane %v1528_v52, 5 }
 0x204   : > { %s1560_s27 = sadd.s32 %s3206_s5, %s1559_s18  ;;  %s1539_s16 = scalar_lea.vmem [#allocation4], %s1538_s13 }
 0x205   : > { %v1540_v55 = vld [vmem:[%s1539_s16] sm:$0x1]  ;;  %s1561_s1 = sadd.s32 %s2586_s30, %s1560_s27  ;;  %s1565_s29 = sadd.s32 87, %s3194_s7  ;;  %v1600_v60 = vsel %vm325_vm2, %v1599_v57, %v1584_v56 }
 0x206   : > { %s1562_s15 = sld [smem:[#allocation3 + %s1561_s1]]  ;;  %s1566_s17 = sshra.s32 %s1565_s29, 7  ;;  %v1587_v58 = vrot.slane %v1540_v55, 4 }
 0x207   : > { %s1568_s9 = sadd.s32 %s1566_s17, %s3202_s25  ;;  %s1571_s12 = sand.u32 127, %s1565_s29 }
 0x208   : > { %s2587_s8 = sshll.u32 %s1568_s9, 8  ;;  %s1551_s26 = scalar_lea.vmem [#allocation4], %s1550_s24  ;;  %v1601_v62 = vsel %vm327_vm3, %v1600_v60, %v1587_v58 }
 0x209   : > { %v1552_v59 = vld [vmem:[%s1551_s26] sm:$0x1]  ;;  %s1572_s6 = sadd.s32 %s3206_s5, %s1571_s12  ;;  %s1608_s13 = sadd.s32 88, %s3194_s7 }
 0x20a   : > { %s1573_s2 = sadd.s32 %s2587_s8, %s1572_s6  ;;  %s1609_s20 = sshra.s32 %s1608_s13, 7  ;;  %v1590_v61 = vrot.slane %v1552_v59, 3 }
 0x20b   : > { %s1574_s11 = sld [smem:[#allocation3 + %s1573_s2]]  ;;  %s1611_s4 = sadd.s32 %s1609_s20, %s3202_s25 }
 0x20c   : > { %s2588_s19 = sshll.u32 %s1611_s4, 8  ;;  %s1563_s22 = scalar_lea.vmem [#allocation4], %s1562_s15  ;;  %v1602_v1 = vsel %vm329_vm4, %v1601_v62, %v1590_v61 }
 0x20d   : > { %v1564_v63 = vld [vmem:[%s1563_s22] sm:$0x1]  ;;  %s1614_s24 = sand.u32 127, %s1608_s13  ;;  %s1620_s30 = sadd.s32 89, %s3194_s7 }
 0x20e   : > { %v1593_v0 = vrot.slane %v1564_v63, 2  ;;  %s1615_s18 = sadd.s32 %s3206_s5, %s1614_s24  ;;  %s1621_s27 = sshra.s32 %s1620_s30, 7 }
 0x20f   : > { %s1616_s16 = sadd.s32 %s2588_s19, %s1615_s18  ;;  %s1623_s1 = sadd.s32 %s1621_s27, %s3202_s25 }
 0x210   : > { %s3607_s29 = sld [smem:[#allocation3 + %s1616_s16]]  ;;  %s2589_s17 = sshll.u32 %s1623_s1, 8  ;;  %v1603_v3 = vsel %vm331_vm5, %v1602_v1, %v1593_v0 }
 0x211   : > { %s1626_s9 = sand.u32 127, %s1620_s30  ;;  %s1575_s15 = scalar_lea.vmem [#allocation4], %s1574_s11 }
 0x212   : > { %v1576_v2 = vld [vmem:[%s1575_s15] sm:$0x1]  ;;  %s1627_s12 = sadd.s32 %s3206_s5, %s1626_s9  ;;  %s1632_s8 = sadd.s32 90, %s3194_s7 }
 0x213   : > { %v1596_v4 = vrot.slane %v1576_v2, 1  ;;  %s1628_s26 = sadd.s32 %s2589_s17, %s1627_s12  ;;  %s1633_s6 = sshra.s32 %s1632_s8, 7 }
 0x214   : > { %s1629_s13 = sld [smem:[#allocation3 + %s1628_s26]]  ;;  %s1635_s2 = sadd.s32 %s1633_s6, %s3202_s25 }
 0x215   : > { %v1604_v6 = vsel %vm333_vm6, %v1603_v3, %v1596_v4  ;;  %s2590_s20 = sshll.u32 %s1635_s2, 8  ;;  %s1638_s11 = sand.u32 127, %s1632_s8 }
 0x216   : > { %v1606_v7 = vadd.f32 %v1605_v5, %v1604_v6  ;;  %s1639_s4 = sadd.s32 %s3206_s5, %s1638_s11  ;;  %s1644_s22 = sadd.s32 91, %s3194_s7 }
 0x217   : > { %s1640_s19 = sadd.s32 %s2590_s20, %s1639_s4  ;;  %s1645_s30 = sshra.s32 %s1644_s22, 7 }
 0x218   : > { %1607 = vst [vmem:[%s3255_s21 + $0x50] sm:$0xff] %v1606_v7  ;;  %s1641_s24 = sld [smem:[#allocation3 + %s1640_s19]]  ;;  %s1647_s18 = sadd.s32 %s1645_s30, %s3202_s25 }
 0x219   : > { %s1650_s27 = sand.u32 127, %s1644_s22  ;;  %s2591_s16 = sshll.u32 %s1647_s18, 8 }
 0x21a   : > { %s1651_s1 = sadd.s32 %s3206_s5, %s1650_s27  ;;  %s1656_s17 = sadd.s32 92, %s3194_s7 }
 0x21b   : > { %s1652_s9 = sadd.s32 %s2591_s16, %s1651_s1  ;;  %s1657_s15 = sshra.s32 %s1656_s17, 7 }
 0x21c   : > { %s1653_s12 = sld [smem:[#allocation3 + %s1652_s9]]  ;;  %s1659_s8 = sadd.s32 %s1657_s15, %s3202_s25 }
 0x21d   : > { %s2592_s26 = sshll.u32 %s1659_s8, 8  ;;  %s1662_s6 = sand.u32 127, %s1656_s17 }
 0x21e   : > { %s1668_s2 = sadd.s32 93, %s3194_s7  ;;  %s1630_s20 = scalar_lea.vmem [#allocation4], %s1629_s13 }
 0x21f   : > { %v1631_v8 = vld [vmem:[%s1630_s20] sm:$0x1]  ;;  %s1663_s11 = sadd.s32 %s3206_s5, %s1662_s6  ;;  %s1669_s4 = sshra.s32 %s1668_s2, 7 }
 0x220   : > { %s1664_s19 = sadd.s32 %s2592_s26, %s1663_s11  ;;  %s1671_s22 = sadd.s32 %s1669_s4, %s3202_s25  ;;  %v1705_v10 = vrot.slane %v1631_v8, 7 }
 0x221   : > { %s1665_s30 = sld [smem:[#allocation3 + %s1664_s19]]  ;;  %s2593_s18 = sshll.u32 %s1671_s22, 8 }
 0x222   : > { %s1642_s27 = scalar_lea.vmem [#allocation4], %s1641_s24  ;;  %s1674_s16 = sand.u32 127, %s1668_s2 }
 0x223   : > { %v1643_v9 = vld [vmem:[%s1642_s27] sm:$0x1]  ;;  %s1618_s1 = scalar_lea.vmem [#allocation4], %s3607_s29  ;;  %s1675_s17 = sadd.s32 %s3206_s5, %s1674_s16 }
 0x224   : > { %v1619_v11 = vld [vmem:[%s1618_s1] sm:$0x1]  ;;  %s1680_s9 = sadd.s32 94, %s3194_s7  ;;  %s1676_s15 = sadd.s32 %s2593_s18, %s1675_s17  ;;  %v1708_v13 = vrot.slane %v1643_v9, 6 }
 0x225   : > { %s1681_s13 = sshra.s32 %s1680_s9, 7  ;;  %s1654_s8 = scalar_lea.vmem [#allocation4], %s1653_s12  ;;  %v1725_v14 = vsel %vm321_vm0, %v1619_v11, %v1705_v10 }
 0x226   : > { %v1655_v12 = vld [vmem:[%s1654_s8] sm:$0x1]  ;;  %s1677_s26 = sld [smem:[#allocation3 + %s1676_s15]]  ;;  %s1683_s6 = sadd.s32 %s1681_s13, %s3202_s25  ;;  %v1726_v17 = vsel %vm323_vm1, %v1725_v14, %v1708_v13  ;;  %v1986_v13 = vld [vmem:[%s3186_s14 + $0x68] sm:$0xff] }
 0x227   : > { %s2594_s20 = sshll.u32 %s1683_s6, 8  ;;  %s1686_s11 = sand.u32 127, %s1680_s9  ;;  %v1711_v16 = vrot.slane %v1655_v12, 5 }
 0x228   : > { %s1687_s24 = sadd.s32 %s3206_s5, %s1686_s11  ;;  %s1666_s2 = scalar_lea.vmem [#allocation4], %s1665_s30 }
 0x229   : > { %v1667_v15 = vld [vmem:[%s1666_s2] sm:$0x1]  ;;  %s1688_s29 = sadd.s32 %s2594_s20, %s1687_s24  ;;  %s1692_s4 = sadd.s32 95, %s3194_s7  ;;  %v1727_v20 = vsel %vm325_vm2, %v1726_v17, %v1711_v16 }
 0x22a   : > { %s1689_s19 = sld [smem:[#allocation3 + %s1688_s29]]  ;;  %s1693_s12 = sshra.s32 %s1692_s4, 7  ;;  %v1714_v18 = vrot.slane %v1667_v15, 4 }
 0x22b   : > { %s1695_s22 = sadd.s32 %s1693_s12, %s3202_s25  ;;  %s1698_s18 = sand.u32 127, %s1692_s4 }
 0x22c   : > { %s2595_s27 = sshll.u32 %s1695_s22, 8  ;;  %s1678_s16 = scalar_lea.vmem [#allocation4], %s1677_s26  ;;  %v1728_v22 = vsel %vm327_vm3, %v1727_v20, %v1714_v18 }
 0x22d   : > { %v1679_v19 = vld [vmem:[%s1678_s16] sm:$0x1]  ;;  %s1699_s1 = sadd.s32 %s3206_s5, %s1698_s18  ;;  %s1735_s30 = sadd.s32 96, %s3194_s7 }
 0x22e   : > { %s1700_s17 = sadd.s32 %s2595_s27, %s1699_s1  ;;  %s1736_s9 = sshra.s32 %s1735_s30, 7  ;;  %v1717_v21 = vrot.slane %v1679_v19, 3 }
 0x22f   : > { %s1701_s15 = sld [smem:[#allocation3 + %s1700_s17]]  ;;  %s1738_s13 = sadd.s32 %s1736_s9, %s3202_s25 }
 0x230   : > { %s2596_s8 = sshll.u32 %s1738_s13, 8  ;;  %s1690_s6 = scalar_lea.vmem [#allocation4], %s1689_s19  ;;  %v1729_v25 = vsel %vm329_vm4, %v1728_v22, %v1717_v21 }
 0x231   : > { %v1691_v23 = vld [vmem:[%s1690_s6] sm:$0x1]  ;;  %s1741_s26 = sand.u32 127, %s1735_s30  ;;  %s1747_s20 = sadd.s32 97, %s3194_s7 }
 0x232   : > { %v1720_v24 = vrot.slane %v1691_v23, 2  ;;  %s1742_s11 = sadd.s32 %s3206_s5, %s1741_s26  ;;  %s1748_s24 = sshra.s32 %s1747_s20, 7 }
 0x233   : > { %s1743_s2 = sadd.s32 %s2596_s8, %s1742_s11  ;;  %s1750_s29 = sadd.s32 %s1748_s24, %s3202_s25 }
 0x234   : > { %s3643_s4 = sld [smem:[#allocation3 + %s1743_s2]]  ;;  %s2597_s12 = sshll.u32 %s1750_s29, 8  ;;  %v1730_v27 = vsel %vm331_vm5, %v1729_v25, %v1720_v24 }
 0x235   : > { %s1753_s22 = sand.u32 127, %s1747_s20  ;;  %s1702_s19 = scalar_lea.vmem [#allocation4], %s1701_s15 }
 0x236   : > { %v1703_v26 = vld [vmem:[%s1702_s19] sm:$0x1]  ;;  %s1754_s18 = sadd.s32 %s3206_s5, %s1753_s22  ;;  %s1759_s27 = sadd.s32 98, %s3194_s7 }
 0x237   : > { %v1723_v28 = vrot.slane %v1703_v26, 1  ;;  %s1755_s16 = sadd.s32 %s2597_s12, %s1754_s18  ;;  %s1760_s1 = sshra.s32 %s1759_s27, 7 }
 0x238   : > { %s1756_s30 = sld [smem:[#allocation3 + %s1755_s16]]  ;;  %s1762_s17 = sadd.s32 %s1760_s1, %s3202_s25 }
 0x239   : > { %v1731_v30 = vsel %vm333_vm6, %v1730_v27, %v1723_v28  ;;  %s2598_s9 = sshll.u32 %s1762_s17, 8  ;;  %s1765_s15 = sand.u32 127, %s1759_s27 }
 0x23a   : > { %v1733_v31 = vadd.f32 %v1732_v29, %v1731_v30  ;;  %s1766_s13 = sadd.s32 %s3206_s5, %s1765_s15  ;;  %s1771_s6 = sadd.s32 99, %s3194_s7 }
 0x23b   : > { %s1767_s8 = sadd.s32 %s2598_s9, %s1766_s13  ;;  %s1772_s20 = sshra.s32 %s1771_s6, 7 }
 0x23c   : > { %1734 = vst [vmem:[%s3255_s21 + $0x58] sm:$0xff] %v1733_v31  ;;  %s1768_s26 = sld [smem:[#allocation3 + %s1767_s8]]  ;;  %s1774_s11 = sadd.s32 %s1772_s20, %s3202_s25 }
 0x23d   : > { %s1777_s24 = sand.u32 127, %s1771_s6  ;;  %s2599_s2 = sshll.u32 %s1774_s11, 8 }
 0x23e   : > { %s1778_s29 = sadd.s32 %s3206_s5, %s1777_s24  ;;  %s1783_s12 = sadd.s32 100, %s3194_s7 }
 0x23f   : > { %s1779_s22 = sadd.s32 %s2599_s2, %s1778_s29  ;;  %s1784_s19 = sshra.s32 %s1783_s12, 7 }
 0x240   : > { %s1780_s18 = sld [smem:[#allocation3 + %s1779_s22]]  ;;  %s1786_s27 = sadd.s32 %s1784_s19, %s3202_s25 }
 0x241   : > { %s2600_s16 = sshll.u32 %s1786_s27, 8  ;;  %s1789_s1 = sand.u32 127, %s1783_s12 }
 0x242   : > { %s1795_s17 = sadd.s32 101, %s3194_s7  ;;  %s1757_s9 = scalar_lea.vmem [#allocation4], %s1756_s30 }
 0x243   : > { %v1758_v32 = vld [vmem:[%s1757_s9] sm:$0x1]  ;;  %s1790_s15 = sadd.s32 %s3206_s5, %s1789_s1  ;;  %s1796_s13 = sshra.s32 %s1795_s17, 7 }
 0x244   : > { %s1791_s8 = sadd.s32 %s2600_s16, %s1790_s15  ;;  %s1798_s6 = sadd.s32 %s1796_s13, %s3202_s25  ;;  %v1832_v34 = vrot.slane %v1758_v32, 7 }
 0x245   : > { %s1792_s20 = sld [smem:[#allocation3 + %s1791_s8]]  ;;  %s2601_s11 = sshll.u32 %s1798_s6, 8 }
 0x246   : > { %s1769_s24 = scalar_lea.vmem [#allocation4], %s1768_s26  ;;  %s1801_s2 = sand.u32 127, %s1795_s17 }
 0x247   : > { %v1770_v33 = vld [vmem:[%s1769_s24] sm:$0x1]  ;;  %s1745_s29 = scalar_lea.vmem [#allocation4], %s3643_s4  ;;  %s1802_s12 = sadd.s32 %s3206_s5, %s1801_s2 }
 0x248   : > { %v1746_v35 = vld [vmem:[%s1745_s29] sm:$0x1]  ;;  %s1807_s22 = sadd.s32 102, %s3194_s7  ;;  %s1803_s19 = sadd.s32 %s2601_s11, %s1802_s12  ;;  %v1835_v37 = vrot.slane %v1770_v33, 6 }
 0x249   : > { %s1808_s30 = sshra.s32 %s1807_s22, 7  ;;  %s1781_s27 = scalar_lea.vmem [#allocation4], %s1780_s18  ;;  %v1852_v38 = vsel %vm321_vm0, %v1746_v35, %v1832_v34 }
 0x24a   : > { %v1782_v36 = vld [vmem:[%s1781_s27] sm:$0x1]  ;;  %s1804_s16 = sld [smem:[#allocation3 + %s1803_s19]]  ;;  %s1810_s1 = sadd.s32 %s1808_s30, %s3202_s25  ;;  %v1853_v41 = vsel %vm323_vm1, %v1852_v38, %v1835_v37  ;;  %v2113_v37 = vld [vmem:[%s3186_s14 + $0x70] sm:$0xff] }
 0x24b   : > { %s2602_s9 = sshll.u32 %s1810_s1, 8  ;;  %s1813_s15 = sand.u32 127, %s1807_s22  ;;  %v1838_v40 = vrot.slane %v1782_v36, 5 }
 0x24c   : > { %s1814_s26 = sadd.s32 %s3206_s5, %s1813_s15  ;;  %s1793_s17 = scalar_lea.vmem [#allocation4], %s1792_s20 }
 0x24d   : > { %v1794_v39 = vld [vmem:[%s1793_s17] sm:$0x1]  ;;  %s1815_s4 = sadd.s32 %s2602_s9, %s1814_s26  ;;  %s1819_s13 = sadd.s32 103, %s3194_s7  ;;  %v1854_v44 = vsel %vm325_vm2, %v1853_v41, %v1838_v40 }
 0x24e   : > { %s1816_s8 = sld [smem:[#allocation3 + %s1815_s4]]  ;;  %s1820_s18 = sshra.s32 %s1819_s13, 7  ;;  %v1841_v42 = vrot.slane %v1794_v39, 4 }
 0x24f   : > { %s1822_s6 = sadd.s32 %s1820_s18, %s3202_s25  ;;  %s1825_s11 = sand.u32 127, %s1819_s13 }
 0x250   : > { %s2603_s24 = sshll.u32 %s1822_s6, 8  ;;  %s1805_s2 = scalar_lea.vmem [#allocation4], %s1804_s16  ;;  %v1855_v46 = vsel %vm327_vm3, %v1854_v44, %v1841_v42 }
 0x251   : > { %v1806_v43 = vld [vmem:[%s1805_s2] sm:$0x1]  ;;  %s1826_s29 = sadd.s32 %s3206_s5, %s1825_s11  ;;  %s1862_s20 = sadd.s32 104, %s3194_s7 }
 0x252   : > { %s1827_s12 = sadd.s32 %s2603_s24, %s1826_s29  ;;  %s1863_s22 = sshra.s32 %s1862_s20, 7  ;;  %v1844_v45 = vrot.slane %v1806_v43, 3 }
 0x253   : > { %s1828_s19 = sld [smem:[#allocation3 + %s1827_s12]]  ;;  %s1865_s30 = sadd.s32 %s1863_s22, %s3202_s25 }
 0x254   : > { %s2604_s27 = sshll.u32 %s1865_s30, 8  ;;  %s1817_s1 = scalar_lea.vmem [#allocation4], %s1816_s8  ;;  %v1856_v49 = vsel %vm329_vm4, %v1855_v46, %v1844_v45 }
 0x255   : > { %v1818_v47 = vld [vmem:[%s1817_s1] sm:$0x1]  ;;  %s1868_s16 = sand.u32 127, %s1862_s20  ;;  %s1874_s9 = sadd.s32 105, %s3194_s7 }
 0x256   : > { %v1847_v48 = vrot.slane %v1818_v47, 2  ;;  %s1869_s15 = sadd.s32 %s3206_s5, %s1868_s16  ;;  %s1875_s26 = sshra.s32 %s1874_s9, 7 }
 0x257   : > { %s1870_s17 = sadd.s32 %s2604_s27, %s1869_s15  ;;  %s1877_s4 = sadd.s32 %s1875_s26, %s3202_s25 }
 0x258   : > { %s3679_s13 = sld [smem:[#allocation3 + %s1870_s17]]  ;;  %s2605_s18 = sshll.u32 %s1877_s4, 8  ;;  %v1857_v51 = vsel %vm331_vm5, %v1856_v49, %v1847_v48 }
 0x259   : > { %s1880_s6 = sand.u32 127, %s1874_s9  ;;  %s1829_s8 = scalar_lea.vmem [#allocation4], %s1828_s19 }
 0x25a   : > { %v1830_v50 = vld [vmem:[%s1829_s8] sm:$0x1]  ;;  %s1881_s11 = sadd.s32 %s3206_s5, %s1880_s6  ;;  %s1886_s24 = sadd.s32 106, %s3194_s7 }
 0x25b   : > { %v1850_v52 = vrot.slane %v1830_v50, 1  ;;  %s1882_s2 = sadd.s32 %s2605_s18, %s1881_s11  ;;  %s1887_s29 = sshra.s32 %s1886_s24, 7 }
 0x25c   : > { %s1883_s20 = sld [smem:[#allocation3 + %s1882_s2]]  ;;  %s1889_s12 = sadd.s32 %s1887_s29, %s3202_s25 }
 0x25d   : > { %v1858_v54 = vsel %vm333_vm6, %v1857_v51, %v1850_v52  ;;  %s2606_s22 = sshll.u32 %s1889_s12, 8  ;;  %s1892_s19 = sand.u32 127, %s1886_s24 }
 0x25e   : > { %v1860_v55 = vadd.f32 %v1859_v53, %v1858_v54  ;;  %s1893_s30 = sadd.s32 %s3206_s5, %s1892_s19  ;;  %s1898_s1 = sadd.s32 107, %s3194_s7 }
 0x25f   : > { %s1894_s27 = sadd.s32 %s2606_s22, %s1893_s30  ;;  %s1899_s9 = sshra.s32 %s1898_s1, 7 }
 0x260   : > { %1861 = vst [vmem:[%s3255_s21 + $0x60] sm:$0xff] %v1860_v55  ;;  %s1895_s16 = sld [smem:[#allocation3 + %s1894_s27]]  ;;  %s1901_s15 = sadd.s32 %s1899_s9, %s3202_s25 }
 0x261   : > { %s1904_s26 = sand.u32 127, %s1898_s1  ;;  %s2607_s17 = sshll.u32 %s1901_s15, 8 }
 0x262   : > { %s1905_s4 = sadd.s32 %s3206_s5, %s1904_s26  ;;  %s1910_s18 = sadd.s32 108, %s3194_s7 }
 0x263   : > { %s1906_s6 = sadd.s32 %s2607_s17, %s1905_s4  ;;  %s1911_s8 = sshra.s32 %s1910_s18, 7 }
 0x264   : > { %s1907_s11 = sld [smem:[#allocation3 + %s1906_s6]]  ;;  %s1913_s24 = sadd.s32 %s1911_s8, %s3202_s25 }
 0x265   : > { %s2608_s2 = sshll.u32 %s1913_s24, 8  ;;  %s1916_s29 = sand.u32 127, %s1910_s18 }
 0x266   : > { %s1922_s12 = sadd.s32 109, %s3194_s7  ;;  %s1884_s22 = scalar_lea.vmem [#allocation4], %s1883_s20 }
 0x267   : > { %v1885_v56 = vld [vmem:[%s1884_s22] sm:$0x1]  ;;  %s1917_s19 = sadd.s32 %s3206_s5, %s1916_s29  ;;  %s1923_s30 = sshra.s32 %s1922_s12, 7 }
 0x268   : > { %s1918_s27 = sadd.s32 %s2608_s2, %s1917_s19  ;;  %s1925_s1 = sadd.s32 %s1923_s30, %s3202_s25  ;;  %v1959_v58 = vrot.slane %v1885_v56, 7 }
 0x269   : > { %s1919_s9 = sld [smem:[#allocation3 + %s1918_s27]]  ;;  %s2609_s15 = sshll.u32 %s1925_s1, 8 }
 0x26a   : > { %s1896_s26 = scalar_lea.vmem [#allocation4], %s1895_s16  ;;  %s1928_s17 = sand.u32 127, %s1922_s12 }
 0x26b   : > { %v1897_v57 = vld [vmem:[%s1896_s26] sm:$0x1]  ;;  %s1872_s4 = scalar_lea.vmem [#allocation4], %s3679_s13  ;;  %s1929_s18 = sadd.s32 %s3206_s5, %s1928_s17 }
 0x26c   : > { %v1873_v59 = vld [vmem:[%s1872_s4] sm:$0x1]  ;;  %s1934_s6 = sadd.s32 110, %s3194_s7  ;;  %s1930_s8 = sadd.s32 %s2609_s15, %s1929_s18  ;;  %v1962_v61 = vrot.slane %v1897_v57, 6 }
 0x26d   : > { %s1935_s20 = sshra.s32 %s1934_s6, 7  ;;  %s1908_s24 = scalar_lea.vmem [#allocation4], %s1907_s11  ;;  %v1979_v62 = vsel %vm321_vm0, %v1873_v59, %v1959_v58 }
 0x26e   : > { %v1909_v60 = vld [vmem:[%s1908_s24] sm:$0x1]  ;;  %s1931_s2 = sld [smem:[#allocation3 + %s1930_s8]]  ;;  %s1937_s29 = sadd.s32 %s1935_s20, %s3202_s25  ;;  %v1980_v1 = vsel %vm323_vm1, %v1979_v62, %v1962_v61 }
 0x26f   : > { %s2610_s22 = sshll.u32 %s1937_s29, 8  ;;  %s1940_s19 = sand.u32 127, %s1934_s6  ;;  %v1965_v0 = vrot.slane %v1909_v60, 5  ;;  %v2240_v61 = vld [vmem:[%s3186_s14 + $0x78] sm:$0xff] }
 0x270   : > { %s1941_s16 = sadd.s32 %s3206_s5, %s1940_s19  ;;  %s1920_s12 = scalar_lea.vmem [#allocation4], %s1919_s9 }
 0x271   : > { %v1921_v63 = vld [vmem:[%s1920_s12] sm:$0x1]  ;;  %s1942_s13 = sadd.s32 %s2610_s22, %s1941_s16  ;;  %s1946_s30 = sadd.s32 111, %s3194_s7  ;;  %v1981_v4 = vsel %vm325_vm2, %v1980_v1, %v1965_v0 }
 0x272   : > { %s1943_s27 = sld [smem:[#allocation3 + %s1942_s13]]  ;;  %s1947_s11 = sshra.s32 %s1946_s30, 7  ;;  %v1968_v2 = vrot.slane %v1921_v63, 4 }
 0x273   : > { %s1949_s1 = sadd.s32 %s1947_s11, %s3202_s25  ;;  %s1952_s15 = sand.u32 127, %s1946_s30 }
 0x274   : > { %s2611_s26 = sshll.u32 %s1949_s1, 8  ;;  %s1932_s17 = scalar_lea.vmem [#allocation4], %s1931_s2  ;;  %v1982_v6 = vsel %vm327_vm3, %v1981_v4, %v1968_v2 }
 0x275   : > { %v1933_v3 = vld [vmem:[%s1932_s17] sm:$0x1]  ;;  %s1953_s4 = sadd.s32 %s3206_s5, %s1952_s15  ;;  %s1989_s9 = sadd.s32 112, %s3194_s7 }
 0x276   : > { %s1954_s18 = sadd.s32 %s2611_s26, %s1953_s4  ;;  %s1990_s6 = sshra.s32 %s1989_s9, 7  ;;  %v1971_v5 = vrot.slane %v1933_v3, 3 }
 0x277   : > { %s1955_s8 = sld [smem:[#allocation3 + %s1954_s18]]  ;;  %s1992_s20 = sadd.s32 %s1990_s6, %s3202_s25 }
 0x278   : > { %s2612_s24 = sshll.u32 %s1992_s20, 8  ;;  %s1944_s29 = scalar_lea.vmem [#allocation4], %s1943_s27  ;;  %v1983_v9 = vsel %vm329_vm4, %v1982_v6, %v1971_v5 }
 0x279   : > { %v1945_v7 = vld [vmem:[%s1944_s29] sm:$0x1]  ;;  %s1995_s2 = sand.u32 127, %s1989_s9  ;;  %s2001_s22 = sadd.s32 113, %s3194_s7 }
 0x27a   : > { %v1974_v8 = vrot.slane %v1945_v7, 2  ;;  %s1996_s19 = sadd.s32 %s3206_s5, %s1995_s2  ;;  %s2002_s16 = sshra.s32 %s2001_s22, 7 }
 0x27b   : > { %s1997_s12 = sadd.s32 %s2612_s24, %s1996_s19  ;;  %s2004_s13 = sadd.s32 %s2002_s16, %s3202_s25 }
 0x27c   : > { %s3715_s30 = sld [smem:[#allocation3 + %s1997_s12]]  ;;  %s2613_s11 = sshll.u32 %s2004_s13, 8  ;;  %v1984_v11 = vsel %vm331_vm5, %v1983_v9, %v1974_v8 }
 0x27d   : > { %s2007_s1 = sand.u32 127, %s2001_s22  ;;  %s1956_s27 = scalar_lea.vmem [#allocation4], %s1955_s8 }
 0x27e   : > { %v1957_v10 = vld [vmem:[%s1956_s27] sm:$0x1]  ;;  %s2008_s15 = sadd.s32 %s3206_s5, %s2007_s1  ;;  %s2013_s26 = sadd.s32 114, %s3194_s7 }
 0x27f   : > { %v1977_v12 = vrot.slane %v1957_v10, 1  ;;  %s2009_s17 = sadd.s32 %s2613_s11, %s2008_s15  ;;  %s2014_s4 = sshra.s32 %s2013_s26, 7 }
 0x280   : > { %s2010_s9 = sld [smem:[#allocation3 + %s2009_s17]]  ;;  %s2016_s18 = sadd.s32 %s2014_s4, %s3202_s25 }
 0x281   : > { %v1985_v14 = vsel %vm333_vm6, %v1984_v11, %v1977_v12  ;;  %s2614_s6 = sshll.u32 %s2016_s18, 8  ;;  %s2019_s8 = sand.u32 127, %s2013_s26 }
 0x282   : > { %v1987_v15 = vadd.f32 %v1986_v13, %v1985_v14  ;;  %s2020_s20 = sadd.s32 %s3206_s5, %s2019_s8  ;;  %s2025_s29 = sadd.s32 115, %s3194_s7 }
 0x283   : > { %s2021_s24 = sadd.s32 %s2614_s6, %s2020_s20  ;;  %s2026_s22 = sshra.s32 %s2025_s29, 7 }
 0x284   : > { %1988 = vst [vmem:[%s3255_s21 + $0x68] sm:$0xff] %v1987_v15  ;;  %s2022_s2 = sld [smem:[#allocation3 + %s2021_s24]]  ;;  %s2028_s19 = sadd.s32 %s2026_s22, %s3202_s25 }
 0x285   : > { %s2031_s16 = sand.u32 127, %s2025_s29  ;;  %s2615_s12 = sshll.u32 %s2028_s19, 8 }
 0x286   : > { %s2032_s13 = sadd.s32 %s3206_s5, %s2031_s16  ;;  %s2037_s11 = sadd.s32 116, %s3194_s7 }
 0x287   : > { %s2033_s1 = sadd.s32 %s2615_s12, %s2032_s13  ;;  %s2038_s27 = sshra.s32 %s2037_s11, 7 }
 0x288   : > { %s2034_s15 = sld [smem:[#allocation3 + %s2033_s1]]  ;;  %s2040_s26 = sadd.s32 %s2038_s27, %s3202_s25 }
 0x289   : > { %s2616_s17 = sshll.u32 %s2040_s26, 8  ;;  %s2043_s4 = sand.u32 127, %s2037_s11 }
 0x28a   : > { %s2049_s18 = sadd.s32 117, %s3194_s7  ;;  %s2011_s6 = scalar_lea.vmem [#allocation4], %s2010_s9 }
 0x28b   : > { %v2012_v16 = vld [vmem:[%s2011_s6] sm:$0x1]  ;;  %s2044_s8 = sadd.s32 %s3206_s5, %s2043_s4  ;;  %s2050_s20 = sshra.s32 %s2049_s18, 7 }
 0x28c   : > { %s2045_s24 = sadd.s32 %s2616_s17, %s2044_s8  ;;  %s2052_s29 = sadd.s32 %s2050_s20, %s3202_s25  ;;  %v2086_v18 = vrot.slane %v2012_v16, 7 }
 0x28d   : > { %s2046_s22 = sld [smem:[#allocation3 + %s2045_s24]]  ;;  %s2617_s19 = sshll.u32 %s2052_s29, 8 }
 0x28e   : > { %s2023_s16 = scalar_lea.vmem [#allocation4], %s2022_s2  ;;  %s2055_s12 = sand.u32 127, %s2049_s18 }
 0x28f   : > { %v2024_v17 = vld [vmem:[%s2023_s16] sm:$0x1]  ;;  %s1999_s13 = scalar_lea.vmem [#allocation4], %s3715_s30  ;;  %s2056_s11 = sadd.s32 %s3206_s5, %s2055_s12 }
 0x290   : > { %v2000_v19 = vld [vmem:[%s1999_s13] sm:$0x1]  ;;  %s2061_s1 = sadd.s32 118, %s3194_s7  ;;  %s2057_s27 = sadd.s32 %s2617_s19, %s2056_s11  ;;  %v2089_v21 = vrot.slane %v2024_v17, 6 }
 0x291   : > { %s2062_s9 = sshra.s32 %s2061_s1, 7  ;;  %s2035_s26 = scalar_lea.vmem [#allocation4], %s2034_s15  ;;  %v2106_v22 = vsel %vm321_vm0, %v2000_v19, %v2086_v18 }
 0x292   : > { %v2036_v20 = vld [vmem:[%s2035_s26] sm:$0x1]  ;;  %s2058_s17 = sld [smem:[#allocation3 + %s2057_s27]]  ;;  %s2064_s4 = sadd.s32 %s2062_s9, %s3202_s25  ;;  %v2107_v25 = vsel %vm323_vm1, %v2106_v22, %v2089_v21 }
 0x293   : > { %s2618_s6 = sshll.u32 %s2064_s4, 8  ;;  %s2067_s8 = sand.u32 127, %s2061_s1  ;;  %v2092_v24 = vrot.slane %v2036_v20, 5 }
 0x294   : > { %s2068_s2 = sadd.s32 %s3206_s5, %s2067_s8  ;;  %s2047_s18 = scalar_lea.vmem [#allocation4], %s2046_s22 }
 0x295   : > { %v2048_v23 = vld [vmem:[%s2047_s18] sm:$0x1]  ;;  %s2069_s30 = sadd.s32 %s2618_s6, %s2068_s2  ;;  %s2073_s20 = sadd.s32 119, %s3194_s7  ;;  %v2108_v28 = vsel %vm325_vm2, %v2107_v25, %v2092_v24 }
 0x296   : > { %s2070_s24 = sld [smem:[#allocation3 + %s2069_s30]]  ;;  %s2074_s15 = sshra.s32 %s2073_s20, 7  ;;  %v2095_v26 = vrot.slane %v2048_v23, 4 }
 0x297   : > { %s2076_s29 = sadd.s32 %s2074_s15, %s3202_s25  ;;  %s2079_s19 = sand.u32 127, %s2073_s20 }
 0x298   : > { %s2619_s16 = sshll.u32 %s2076_s29, 8  ;;  %s2059_s12 = scalar_lea.vmem [#allocation4], %s2058_s17  ;;  %v2109_v30 = vsel %vm327_vm3, %v2108_v28, %v2095_v26 }
 0x299   : > { %v2060_v27 = vld [vmem:[%s2059_s12] sm:$0x1]  ;;  %s2080_s13 = sadd.s32 %s3206_s5, %s2079_s19  ;;  %s2116_s22 = sadd.s32 120, %s3194_s7 }
 0x29a   : > { %s2081_s11 = sadd.s32 %s2619_s16, %s2080_s13  ;;  %s2117_s1 = sshra.s32 %s2116_s22, 7  ;;  %v2098_v29 = vrot.slane %v2060_v27, 3 }
 0x29b   : > { %s2082_s27 = sld [smem:[#allocation3 + %s2081_s11]]  ;;  %s2119_s9 = sadd.s32 %s2117_s1, %s3202_s25 }
 0x29c   : > { %s2620_s26 = sshll.u32 %s2119_s9, 8  ;;  %s2071_s4 = scalar_lea.vmem [#allocation4], %s2070_s24  ;;  %v2110_v33 = vsel %vm329_vm4, %v2109_v30, %v2098_v29 }
 0x29d   : > { %v2072_v31 = vld [vmem:[%s2071_s4] sm:$0x1]  ;;  %s2122_s17 = sand.u32 127, %s2116_s22  ;;  %s2128_s6 = sadd.s32 121, %s3194_s7 }
 0x29e   : > { %v2101_v32 = vrot.slane %v2072_v31, 2  ;;  %s2123_s8 = sadd.s32 %s3206_s5, %s2122_s17  ;;  %s2129_s2 = sshra.s32 %s2128_s6, 7 }
 0x29f   : > { %s2124_s18 = sadd.s32 %s2620_s26, %s2123_s8  ;;  %s2131_s30 = sadd.s32 %s2129_s2, %s3202_s25 }
 0x2a0   : > { %s3751_s20 = sld [smem:[#allocation3 + %s2124_s18]]  ;;  %s2621_s15 = sshll.u32 %s2131_s30, 8  ;;  %v2111_v35 = vsel %vm331_vm5, %v2110_v33, %v2101_v32 }
 0x2a1   : > { %s2134_s29 = sand.u32 127, %s2128_s6  ;;  %s2083_s24 = scalar_lea.vmem [#allocation4], %s2082_s27 }
 0x2a2   : > { %v2084_v34 = vld [vmem:[%s2083_s24] sm:$0x1]  ;;  %s2135_s19 = sadd.s32 %s3206_s5, %s2134_s29  ;;  %s2140_s16 = sadd.s32 122, %s3194_s7 }
 0x2a3   : > { %v2104_v36 = vrot.slane %v2084_v34, 1  ;;  %s2136_s12 = sadd.s32 %s2621_s15, %s2135_s19  ;;  %s2141_s13 = sshra.s32 %s2140_s16, 7 }
 0x2a4   : > { %s2137_s22 = sld [smem:[#allocation3 + %s2136_s12]]  ;;  %s2143_s11 = sadd.s32 %s2141_s13, %s3202_s25 }
 0x2a5   : > { %v2112_v38 = vsel %vm333_vm6, %v2111_v35, %v2104_v36  ;;  %s2622_s1 = sshll.u32 %s2143_s11, 8  ;;  %s2146_s27 = sand.u32 127, %s2140_s16 }
 0x2a6   : > { %v2114_v39 = vadd.f32 %v2113_v37, %v2112_v38  ;;  %s2147_s9 = sadd.s32 %s3206_s5, %s2146_s27  ;;  %s2152_s4 = sadd.s32 123, %s3194_s7 }
 0x2a7   : > { %s2148_s26 = sadd.s32 %s2622_s1, %s2147_s9  ;;  %s2153_s6 = sshra.s32 %s2152_s4, 7 }
 0x2a8   : > { %2115 = vst [vmem:[%s3255_s21 + $0x70] sm:$0xff] %v2114_v39  ;;  %s2149_s17 = sld [smem:[#allocation3 + %s2148_s26]]  ;;  %s2155_s8 = sadd.s32 %s2153_s6, %s3202_s25 }
 0x2a9   : > { %s2158_s2 = sand.u32 127, %s2152_s4  ;;  %s2623_s18 = sshll.u32 %s2155_s8, 8 }
 0x2aa   : > { %s2159_s30 = sadd.s32 %s3206_s5, %s2158_s2  ;;  %s2164_s15 = sadd.s32 124, %s3194_s7 }
 0x2ab   : > { %s2160_s29 = sadd.s32 %s2623_s18, %s2159_s30  ;;  %s2165_s24 = sshra.s32 %s2164_s15, 7 }
 0x2ac   : > { %s2161_s19 = sld [smem:[#allocation3 + %s2160_s29]]  ;;  %s2167_s16 = sadd.s32 %s2165_s24, %s3202_s25 }
 0x2ad   : > { %s2624_s12 = sshll.u32 %s2167_s16, 8  ;;  %s2170_s13 = sand.u32 127, %s2164_s15 }
 0x2ae   : > { %s2176_s11 = sadd.s32 125, %s3194_s7  ;;  %s2138_s1 = scalar_lea.vmem [#allocation4], %s2137_s22 }
 0x2af   : > { %v2139_v40 = vld [vmem:[%s2138_s1] sm:$0x1]  ;;  %s2171_s27 = sadd.s32 %s3206_s5, %s2170_s13  ;;  %s2177_s9 = sshra.s32 %s2176_s11, 7 }
 0x2b0   : > { %s2172_s26 = sadd.s32 %s2624_s12, %s2171_s27  ;;  %s2179_s4 = sadd.s32 %s2177_s9, %s3202_s25  ;;  %v2213_v42 = vrot.slane %v2139_v40, 7 }
 0x2b1   : > { %s2173_s6 = sld [smem:[#allocation3 + %s2172_s26]]  ;;  %s2625_s8 = sshll.u32 %s2179_s4, 8 }
 0x2b2   : > { %s2150_s2 = scalar_lea.vmem [#allocation4], %s2149_s17  ;;  %s2182_s18 = sand.u32 127, %s2176_s11 }
 0x2b3   : > { %v2151_v41 = vld [vmem:[%s2150_s2] sm:$0x1]  ;;  %s2126_s30 = scalar_lea.vmem [#allocation4], %s3751_s20  ;;  %s2183_s15 = sadd.s32 %s3206_s5, %s2182_s18 }
 0x2b4   : > { %v2127_v43 = vld [vmem:[%s2126_s30] sm:$0x1]  ;;  %s2188_s29 = sadd.s32 126, %s3194_s7  ;;  %s2184_s24 = sadd.s32 %s2625_s8, %s2183_s15  ;;  %v2216_v45 = vrot.slane %v2151_v41, 6 }
 0x2b5   : > { %s2189_s22 = sshra.s32 %s2188_s29, 7  ;;  %s2162_s16 = scalar_lea.vmem [#allocation4], %s2161_s19  ;;  %v2233_v46 = vsel %vm321_vm0, %v2127_v43, %v2213_v42 }
 0x2b6   : > { %v2163_v44 = vld [vmem:[%s2162_s16] sm:$0x1]  ;;  %s2185_s12 = sld [smem:[#allocation3 + %s2184_s24]]  ;;  %s2191_s13 = sadd.s32 %s2189_s22, %s3202_s25  ;;  %v2234_v49 = vsel %vm323_vm1, %v2233_v46, %v2216_v45 }
 0x2b7   : > { %s2626_s1 = sshll.u32 %s2191_s13, 8  ;;  %s2194_s27 = sand.u32 127, %s2188_s29  ;;  %v2219_v48 = vrot.slane %v2163_v44, 5 }
 0x2b8   : > { %s2195_s17 = sadd.s32 %s3206_s5, %s2194_s27  ;;  %s2174_s11 = scalar_lea.vmem [#allocation4], %s2173_s6 }
 0x2b9   : > { %v2175_v47 = vld [vmem:[%s2174_s11] sm:$0x1]  ;;  %s2196_s20 = sadd.s32 %s2626_s1, %s2195_s17  ;;  %s2200_s9 = sadd.s32 127, %s3194_s7  ;;  %v2235_v52 = vsel %vm325_vm2, %v2234_v49, %v2219_v48 }
 0x2ba   : > { %s2197_s26 = sld [smem:[#allocation3 + %s2196_s20]]  ;;  %s2201_s4 = sshra.s32 %s2200_s9, 7  ;;  %v2222_v50 = vrot.slane %v2175_v47, 4 }
 0x2bb   : > { %s2203_s19 = sadd.s32 %s2201_s4, %s3202_s25  ;;  %s2206_s8 = sand.u32 127, %s2200_s9 }
 0x2bc   : > { %s2627_s2 = sshll.u32 %s2203_s19, 8  ;;  %s2186_s18 = scalar_lea.vmem [#allocation4], %s2185_s12  ;;  %v2236_v54 = vsel %vm327_vm3, %v2235_v52, %v2222_v50 }
 0x2bd   : > { %v2187_v51 = vld [vmem:[%s2186_s18] sm:$0x1]  ;;  %s2207_s30 = sadd.s32 %s3206_s5, %s2206_s8  ;;  %s2634_s15 = smul.u32 48, %s2933_s0 }
 0x2be   : > { %s2208_s6 = sadd.s32 %s2627_s2, %s2207_s30  ;;  %v2225_v53 = vrot.slane %v2187_v51, 3  ;;  %s2629_s25 = sshll.u32 %s2937_s28, 4 }
 0x2bf   : > { %s2209_s7 = sld [smem:[#allocation3 + %s2208_s6]]  ;;  %s2256_s24 = sadd.s32 %s2634_s15, %s2629_s25 }
 0x2c0   : > { %s2198_s29 = scalar_lea.vmem [#allocation4], %s2197_s26  ;;  %v2237_v57 = vsel %vm329_vm4, %v2236_v54, %v2225_v53  ;;  %s2259_s22 = sshll.u32 %s3255_s21, 4  ;;  %s3788_s22 = int_to_ptr.vmem [resolvable:$true] %s2259_s22 }
 0x2c1   : > { %v2199_v55 = vld [vmem:[%s2198_s29] sm:$0x1]  ;;  %s2630_s16 = sshll.u32 %s2256_s24, 7  ;;  %s3911_s13 = sand.u32 1, %s2913_s23  }
 0x2c2   : > { %v2228_v56 = vrot.slane %v2199_v55, 2  ;;  %s3793_s12 = scalar_lea.hbm %s3862_s3, %s2630_s16  ;;  %s3798_s1 = scalar_lea.sflag [#allocation6], %s3911_s13 }
 0x2c3   : > { %s2821_s27 = scalar_lea.vmem %s3788_s22, 2048  ;;  %p3912_p10 = scmp.ne.s32.totalorder %s3893_s10, 0 }
 0x2c4   : > { %v2238_v59 = vsel %vm331_vm5, %v2237_v57, %v2228_v56  ;;  %p2822_p7 = scmp.ne.s32.totalorder %s3788_s22, %s2821_s27  ;;  %s2956_s14 = smov [#allocation9]  }
 0x2c5   : > { %s2210_s5 = scalar_lea.vmem [#allocation4], %s2209_s7  ;;  %s2825_s17 = sshll.u32 %s2956_s14, 4  ;;  %s2826_s17 = int_to_ptr.vmem [resolvable:$false] %s2825_s17 }
 0x2c6   : > { %v2211_v58 = vld [vmem:[%s2210_s5] sm:$0x1]  ;;  %p2823_p12 = pnand %p2822_p7, %p3912_p10  ;;  %s2827_s11 = scalar_lea.vmem %s2826_s17, 4096 }
 0x2c7   : > { %v2231_v60 = vrot.slane %v2211_v58, 1  ;;  %p2828_p2 = scmp.lt.s32.totalorder %s3788_s22, %s2826_s17  ;;  %p2829_p3 = scmp.lt.s32.totalorder %s2827_s11, %s2821_s27 }
 0x2c8   : > { %p2824_p0 = pneg %p2823_p12 }
 0x2c9   : > { %v2239_v62 = vsel %vm333_vm6, %v2238_v59, %v2231_v60  ;;  %p2830_p5 = por %p2829_p3, %p2828_p2 }
 0x2ca   : > { %v2241_v63 = vadd.f32 %v2240_v61, %v2239_v62 }
 0x2cb   : > { %p2831_p8 = pnand %p2830_p5, %p2824_p0 }
 0x2cc   : > { %2242 = vst [vmem:[%s3255_s21 + $0x78] sm:$0xff] %v2241_v63 }
 0x2cd   : > { %2834 = shalt.err (!%p2831_p8)
}
 0x2ce   : > { %s2835_s21 = scalar_lea.hbm %s3793_s12, 2048  ;;  %s2839_s26 = scalar_lea.hbm %s3862_s3, 12288 }
 0x2cf   : > { %p2836_p11 = scmp.ne.s32.totalorder %s3793_s12, %s2835_s21  ;;  %p2840_p9 = scmp.lt.u32.totalorder %s3793_s12, %s3862_s3 }
 0x2d0   : > { %p2841_p13 = scmp.lt.u32.totalorder %s2839_s26, %s2835_s21  ;;  %p2843_p7 = scmp.lt.u32.totalorder %s2835_s21, %s3793_s12 }
 0x2d1   : > { %p2837_p1 = pnand %p2836_p11, %p3912_p10 }
 0x2d2   : > { %p2842_p6 = por %p2841_p13, %p2840_p9 }
 0x2d3   : > { %p2838_p4 = pneg %p2837_p1 }
 0x2d4   : > { %p2844_p12 = por %p2843_p7, %p2842_p6 }
 0x2d6   : > { %p2845_p0 = pnand %p2844_p12, %p2838_p4 }
 0x2d8   : > { %2848 = shalt.err (!%p2845_p0)
}
 0x2d9   : > { %s2957_s8 = smov 128   ;;  %s2958_s2 = smov 8  }
 0x2da   : > { %2641 = dma.vmem_to_hbm [thread:$0]  (%p3912_p10), %s3788_s22, 2048, %s3793_s12, %s3798_s1, %s2957_s8, %s2957_s8, %s2958_s2  }
 0x2db PF: > { %s3913_s18 = sld [smem:[#allocation20_spill]]  ;;  %s3914_s30 = sld [smem:[#allocation14_spill]] }
 0x2dc   : > { %s3915_s6 = sld [smem:[#allocation21_spill]] }
 0x2e1   : > { %p2658_p2 = scmp.ge.s32.totalorder %s3913_s18, 2  ;;  %s2274_s7 = sand.u32 1, %s3914_s30  }
 0x2e2   : > { %p3916_p3 = scmp.ne.s32.totalorder %s3915_s6, 0  ;;  %s2275_s15 = scalar_lea.sflag [#allocation6], %s2274_s7 }
 0x2e4   : > { %p2652_p5 = pnand %p2658_p2, %p3916_p3 }
 0x2e6   : > { %2904 = dma.done.wait (!%p2652_p5), %s2275_s15, 2048  }
 0x2e7   : > { %2906 = vsyncadd (!%p2652_p5), %s2275_s15, 4294965248  ;;  %s24_s4 = sadd.s32 1, %s3913_s18   ;;  %s3917_s29 = sld [smem:[#allocation15_spill]] }
 0x2e8   : > { %p21_p8 = scmp.ge.s32.totalorder %s24_s4, 8   ;;  %s3918_s24 = sld [smem:[#allocation25_spill]] }
 0x2e9   : > { %s3919_s25 = sld [smem:[#allocation16_spill]]  ;;  %s3920_s26 = sld [smem:[#allocation17_spill]] }
 0x2ea   : > { %s3921_s27 = sld [smem:[#allocation24_spill]]  ;;  %s3922_s0 = sld [smem:[#allocation18_spill]] }
 0x2eb   : > { %s3923_s28 = sld [smem:[#allocation19_spill]]  ;;  %s3924_s10 = sld [smem:[#allocation22_spill]] }
 0x2ec   : > { %s3925_s30 = sld [smem:[#allocation23_spill]]  ;;  %s3926_s22 = smov %s2913_s23 }
 0x2ed   : > { %s3927_s23 = smov %s3917_s29  ;;  %23 = sbr.rel (!%p21_p8) target bundleno = 23 (0x17), region = 206 }
 0x2f1   : > { %s3928_s29 = smov %s3924_s10 }
 0x2f4   :  { %2280 = vsyncpa [#allocation5], 1 }
 0x2f5   :  { %2282 = vsyncpa [#allocation5 + $0x1], 1 }
 0x2f6   :  { %2283 = vsyncpa [#allocation8], 1 }
 0x2f7   :  { %2285 = vsyncpa [#allocation8 + $0x1], 1 }
 0x2f8   :  { %2286 = vsyncpa [#allocation6], 1 }
 0x2f9   :  { %2288 = vsyncpa [#allocation6 + $0x1], 1 }

// kernel: tpu_custom_call.1
= control target key start
LH: loop header
LB: loop body
LE: loop exit
PB: predicated region body
PF: predicated region fallthrough
CT: control target
= control target key end

     0   :  { %s3859_s0 = inlined_call_operand.hbm [shape: s32[2,384], index: 0, kind: input, shape index: {}]   ;;  %s3860_s1 = inlined_call_operand.hbm [shape: f32[1000,128], index: 1, kind: input, shape index: {}]   ;;  %s3861_s2 = inlined_call_operand.hbm [shape: f32[384,128], index: 2, kind: input, shape index: {}]   ;;  %s3862_s3 = inlined_call_operand.hbm [shape: f32[2,384,128], index: 3, kind: output, shape index: {}]  }
   0x1   :  { %3882 = sst [smem:[#allocation26_spill]] %s3860_s1  ;;  %s2753_s14 = scalar_lea.hbm %s3859_s0, 96 }
   0x2   :  { %3883 = sst [smem:[#allocation27_spill]] %s3861_s2  ;;  %p2754_p0 = scmp.ne.s32.totalorder %s3859_s0, %s2753_s14 }
   0x3   :  { %p2757_p1 = scmp.lt.u32.totalorder %s2753_s14, %s3859_s0 }
   0x5   :  { %p2759_p2 = pnand %p2757_p1, %p2754_p0 }
   0x7   :  { %2762 = shalt.err (!%p2759_p2)  }
   0x8   :  { %s2951_s19 = smov [#allocation3]  }
   0x9   :  { %9 = dma.hbm_to_smem %s3859_s0, 96, %s2951_s19, [#allocation2] }
   0xa   :  { %2893 = dma.done.wait [#allocation2], 96 }
   0xb   :  { %2894 = vsyncadd [#allocation2], 4294967200 }
   0xc   :  { %11 = sfence }
   0xd   :  { %12 = vsyncpa [#allocation5], 0 }
   0xe   :  { %13 = vsyncpa [#allocation8], 0 }
   0xf   :  { %15 = vsyncpa [#allocation8 + $0x1], 0 }
  0x10   :  { %16 = vsyncpa [#allocation6], 0 }
  0x11   :  { %18 = vsyncpa [#allocation6 + $0x1], 0  ;;  %s2991_s22 = smov 0   ;;  %s2993_s23 = smov 0  }
  0x12   :  { %s2995_s24 = smov 0   ;;  %s2997_s25 = smov 0  }
  0x13   :  { %s2999_s26 = smov 0   ;;  %s3001_s27 = smov 0  }
  0x14   :  { %s3003_s0 = smov 0   ;;  %s3005_s28 = smov 0  }
  0x15   :  { %s3007_s29 = smov 0   ;;  %s3009_s30 = smov 0  }
  0x16   :  { %s3011_s4 = smov 0  }
  0x17 LB: > { %3884 = sst [smem:[#allocation14_spill]] %s2909_s22  ;;  %s2486_s5 = sadd.s32 4294967295, %s2949_s4   ;;  %s2949_s4 = sphi %s3011_s4, %s24_s4   ;;  %s2945_s30 = sphi %s3009_s30, %s3925_s30   ;;  %s2941_s29 = sphi %s3007_s29, %s3928_s29   ;;  %s2937_s28 = sphi %s3005_s28, %s3923_s28   ;;  %s2933_s0 = sphi %s3003_s0, %s3922_s0   ;;  %s2929_s27 = sphi %s3001_s27, %s3921_s27   ;;  %s2925_s26 = sphi %s2999_s26, %s3920_s26   ;;  %s2921_s25 = sphi %s2997_s25, %s3919_s25   ;;  %s2917_s24 = sphi %s2995_s24, %s3918_s24   ;;  %s2913_s23 = sphi %s2993_s23, %s3927_s23   ;;  %s2909_s22 = sphi %s2991_s22, %s3926_s22  }
  0x18   : > { %3885 = sst [smem:[#allocation15_spill]] %s2917_s24  ;;  %s2487_s6 = sadd.s32 4294967294, %s2949_s4  }
  0x19   : > { %3886 = sst [smem:[#allocation16_spill]] %s2925_s26  ;;  %p77_p3 = scmp.ne.s32.totalorder %s2925_s26, %s2921_s25 }
  0x1a   : > { %3887 = sst [smem:[#allocation17_spill]] %s2929_s27  ;;  %p3047_p4 = scmp.eq.s32.totalorder %s2486_s5, 0 }
  0x1b   : > { %3888 = sst [smem:[#allocation18_spill]] %s2941_s29  ;;  %s92_s8 = sadd.s32 1, %s2917_s24 }
  0x1c   : > { %3889 = sst [smem:[#allocation19_spill]] %s2945_s30  ;;  %p102_p5 = scmp.ne.s32.totalorder %s2917_s24, %s2913_s23 }
  0x1d   : > { %3890 = sst [smem:[#allocation20_spill]] %s2949_s4  ;;  %p3056_p6 = por %p3047_p4, %p77_p3 }
  0x1e   : > { %s3891_s7 = scalar_select %p3047_p4, 1, 0 }
  0x1f   : > { %s3892_s9 = scalar_select %p3056_p6, 1, 0 }
  0x20   : > { %p103_p7 = scmp.eq.s32.totalorder %s2486_s5, 5  ;;  %p108_p8 = scmp.ne.s32.totalorder %s2913_s23, %s2909_s22 }
  0x21   : > { %p109_p9 = scmp.eq.s32.totalorder %s2487_s6, 5  ;;  %p2488_p11 = scmp.ge.s32.totalorder %s2949_s4, 1 }
  0x22   : > { %p3062_p10 = por %p103_p7, %p102_p5  ;;  %p116_p13 = scmp.lt.s32.totalorder %s2949_s4, 7 }
  0x23   : > { %p3067_p12 = por %p109_p9, %p108_p8  ;;  %s2952_s13 = smov [#allocation4]  }
  0x24   : > { %s3893_s10 = scalar_select %p3062_p10, 1, 0 }
  0x25   : > { %s3894_s11 = scalar_select %p3067_p12, 1, 0 }
  0x26   : > { %p3072_p0 = pnand %p2488_p11, %p116_p13  ;;  %s128_s14 = sshll.u32 %s2952_s13, 4  ;;  %s129_s14 = int_to_ptr.vmem [resolvable:$true] %s128_s14 }
  0x27   : > { %3895 = sst [smem:[#allocation21_spill]] %s3894_s11  ;;  %s3898_s1 = sld [smem:[#allocation26_spill]] }
  0x28   : > { %s3896_s12 = scalar_select %p3072_p0, 1, 0 }
  0x29   : > { %p2643_p1 = pneg %p3072_p0 }
  0x2b   : > { %p3080_p2 = pnand %p2643_p1, %p3047_p4 }
  0x2d   : > { %s2763_s18 = scalar_lea.hbm %s3898_s1, 16000  ;;  %p2765_p5 = pneg %p3080_p2 }
  0x2e   : > { %p2764_p3 = scmp.ne.s32.totalorder %s3898_s1, %s2763_s18  ;;  %p2770_p9 = scmp.lt.u32.totalorder %s2763_s18, %s3898_s1 }
  0x30   : > { %p2766_p7 = pnand %p2765_p5, %p2764_p3 }
  0x32   : > { %p2767_p8 = pneg %p2766_p7 }
  0x34   : > { %p2772_p11 = pnand %p2770_p9, %p2767_p8 }
  0x36   : > { %2775 = shalt.err (!%p2772_p11)
}
  0x37   : > { %s2776_s5 = scalar_lea.vmem %s129_s14, 16000  ;;  %p2784_p10 = scmp.lt.s32.totalorder %s129_s14, %s129_s14 }
  0x38   : > { %p2777_p13 = scmp.ne.s32.totalorder %s129_s14, %s2776_s5  ;;  %p2785_p6 = scmp.lt.s32.totalorder %s2776_s5, %s2776_s5 }
  0x3a   : > { %p2779_p1 = pnand %p2777_p13, %p2765_p5  ;;  %p2786_p4 = por %p2785_p6, %p2784_p10 }
  0x3c   : > { %p2780_p12 = pneg %p2779_p1 }
  0x3e   : > { %p2787_p0 = pnand %p2786_p4, %p2780_p12 }
  0x40   : > { %2790 = shalt.err (!%p2787_p0)
}
  0x41   : > { %s3868_s6 = smov 128   ;;  %s3869_s13 = smov 8  }
  0x42   : > { %2646 = dma.hbm_to_vmem [thread:$0]  (!%p3080_p2), %s3898_s1, 16000, %s129_s14, [#allocation5], %s3868_s6, %s3868_s6, %s3869_s13  }
  0x43   : > { %s33_s18 = sadd.s32 1, %s2941_s29  ;;  %s36_s19 = sadd.s32 1, %s2945_s30 }
  0x44   : > { %p34_p4 = scmp.ge.s32.totalorder %s33_s18, 2  ;;  %s64_s20 = sadd.s32 1, %s2929_s27 }
  0x45   : > { %p71_p6 = scmp.ne.s32.totalorder %s2929_s27, %s2925_s26  ;;  %p72_p10 = scmp.eq.s32.totalorder %s2949_s4, 0 }
  0x46   : > { %s3930_s18 = smov (%p34_p4, %s33_s18), 0  ;;  %s3932_s19 = smov (!%p34_p4, %s36_s19), %s2945_s30 }
  0x47   : > { %3899 = sst [smem:[#allocation22_spill]] %s3930_s18  ;;  %s87_s15 = ssub.s32 %s2941_s29, %s3930_s18 }
  0x48   : > { %p38_p12 = scmp.ge.s32.totalorder %s3932_s19, 3  ;;  %p2656_p0 = scmp.lt.s32.totalorder %s2949_s4, 6 }
  0x49   : > { %p3115_p2 = por %p72_p10, %p71_p6  ;;  %s142_s21 = sand.u32 1, %s2929_s27  }
  0x4a   : > { %s3934_s19 = smov (%p38_p12, %s3932_s19), 0  ;;  %s2491_s25 = sshll.u32 %s142_s21, 7 }
  0x4b   : > { %3901 = sst [smem:[#allocation23_spill]] %s3934_s19  ;;  %s61_s5 = ssub.s32 %s2945_s30, %s3934_s19 }
  0x4c   : > { %p62_p3 = scmp.eq.s32.totalorder %s61_s5, 0  ;;  %s89_s16 = sor.u32 %s87_s15, %s61_s5 }
  0x4d   : > { %p90_p5 = scmp.eq.s32.totalorder %s89_s16, 0  ;;  %s2633_s17 = sshll.u32 %s2945_s30, 11 }
  0x4e   : > { %s3126_s6 = scalar_select %p62_p3, %s2929_s27, %s64_s20  }
  0x4f   : > { %s3131_s13 = scalar_select %p90_p5, %s2917_s24, %s92_s8  }
  0x50   : > { %3902 = sst [smem:[#allocation24_spill]] %s3126_s6  ;;  %s146_s11 = scalar_lea.vmem [#allocation7], %s2491_s25 }
  0x51   : > { %3903 = sst [smem:[#allocation25_spill]] %s3131_s13  ;;  %s3904_s2 = sld [smem:[#allocation27_spill]] }
  0x52   : > { %s153_s19 = sshll.u32 %s146_s11, 4  ;;  %p3144_p7 = pnand %p2656_p0, %p3115_p2  ;;  %s3138_s19 = int_to_ptr.vmem [resolvable:$true] %s153_s19 }
  0x53   : > { %s3148_s8 = scalar_lea.sflag [#allocation8], %s142_s21 }
  0x54   : > { %p2793_p9 = pneg %p3144_p7 }
  0x57   : > { %s3136_s29 = scalar_lea.hbm %s3904_s2, %s2633_s17  ;;  %s2796_s15 = scalar_lea.hbm %s3904_s2, 6144 }
  0x58   : > { %s2791_s1 = scalar_lea.hbm %s3136_s29, 2048  ;;  %p2797_p1 = scmp.lt.u32.totalorder %s3136_s29, %s3904_s2 }
  0x59   : > { %p2792_p8 = scmp.ne.s32.totalorder %s3136_s29, %s2791_s1  ;;  %p2798_p4 = scmp.lt.u32.totalorder %s2796_s15, %s2791_s1 }
  0x5a   : > { %p2800_p10 = scmp.lt.u32.totalorder %s2791_s1, %s3136_s29 }
  0x5b   : > { %p2794_p11 = pnand %p2793_p9, %p2792_p8  ;;  %p2799_p6 = por %p2798_p4, %p2797_p1 }
  0x5d   : > { %p2795_p13 = pneg %p2794_p11  ;;  %p2801_p12 = por %p2800_p10, %p2799_p6 }
  0x5f   : > { %p2802_p0 = pnand %p2801_p12, %p2795_p13 }
  0x61   : > { %2805 = shalt.err (!%p2802_p0)
}
  0x62   : > { %s2806_s21 = scalar_lea.vmem %s3138_s19, 2048  ;;  %s2955_s5 = smov [#allocation7]  }
  0x63   : > { %p2807_p2 = scmp.ne.s32.totalorder %s3138_s19, %s2806_s21  ;;  %s2811_s16 = sshll.u32 %s2955_s5, 4  ;;  %s2812_s16 = int_to_ptr.vmem [resolvable:$false] %s2811_s16 }
  0x64   : > { %s2813_s17 = scalar_lea.vmem %s2812_s16, 4096  ;;  %p2814_p8 = scmp.lt.s32.totalorder %s3138_s19, %s2812_s16 }
  0x65   : > { %p2809_p3 = pnand %p2807_p2, %p2793_p9  ;;  %p2815_p11 = scmp.lt.s32.totalorder %s2813_s17, %s2806_s21 }
  0x67   : > { %p2810_p5 = pneg %p2809_p3  ;;  %p2816_p1 = por %p2815_p11, %p2814_p8 }
  0x69   : > { %p2817_p4 = pnand %p2816_p1, %p2810_p5 }
  0x6b   : > { %2820 = shalt.err (!%p2817_p4)
}
  0x6c   : > { %s3906_s1 = smov 8   ;;  %s3907_s11 = smov 128  }
  0x6d   : > { %2650 = dma.hbm_to_vmem [thread:$0]  (!%p3144_p7), %s3136_s29, 2048, %s3138_s19, %s3148_s8, %s3907_s11, %s3907_s11, %s3906_s1  }
  0x6e   : > { %p3908_p9 = scmp.ne.s32.totalorder %s3896_s12, 0 }
  0x6f   : > { %p3909_p13 = scmp.ne.s32.totalorder (!%p3908_p9), %s3891_s7, 0 }
  0x70   : > { %165 = sbr.rel (%p3908_p9) target bundleno = 731 (0x2db), region = 28 }
  0x77   : > { %2896 = dma.done.wait (%p3909_p13), [#allocation5], 16000  }
  0x78   : > { %2898 = vsyncadd (%p3909_p13), [#allocation5], 4294951296  ;;  %s171_s18 = sand.u32 1, %s2925_s26   ;;  %p3910_p6 = scmp.ne.s32.totalorder %s3892_s9, 0 }
  0x79   : > { %s2496_s20 = sshll.u32 %s171_s18, 7  ;;  %s172_s15 = scalar_lea.sflag [#allocation8], %s171_s18 }
  0x7a   : > { %s3186_s14 = scalar_lea.vmem [#allocation7], %s2496_s20 }
  0x7b   : > { %2900 = dma.done.wait (%p3910_p6), %s172_s15, 2048  }
  0x7c   : > { %2902 = vsyncadd (%p3910_p6), %s172_s15, 4294965248  ;;  %s3874_s29 = sand.u32 1, %s2913_s23   ;;  %s3194_s7 = sshll.u32 %s2937_s28, 7  ;;  %vm321_vm0 = vcmask 1040384   ;;  %vm323_vm1 = vcmask 1041408   ;;  %vm325_vm2 = vcmask 1042432  }
  0x7d   : > { %s3198_s12 = sshll.u32 %s3874_s29, 7  ;;  %s199_s19 = sshra.s32 %s3194_s7, 7  ;;  %vm327_vm3 = vcmask 1043456   ;;  %vm329_vm4 = vcmask 1044480   ;;  %vm331_vm5 = vcmask 1045504   ;;  %vm333_vm6 = vcmask 1046528  }
  0x7e   : > { %s201_s8 = sshra.s32 %s2933_s0, 1  ;;  %s207_s9 = sand.u32 1, %s2933_s0  ;;  %v335_v21 = vld [vmem:[%s3186_s14] sm:$0xff]  ;;  %v462_v45 = vld [vmem:[%s3186_s14 + $0x8] sm:$0xff] }
  0x7f   : > { %s3202_s25 = smul.u32 3, %s201_s8  ;;  %s209_s21 = sand.u32 127, %s3194_s7 }
  0x80   : > { %s3206_s5 = sshll.u32 %s207_s9, 7  ;;  %s216_s11 = sadd.s32 1, %s3194_s7 }
  0x81   : > { %s204_s16 = sadd.s32 %s3202_s25, %s199_s19  ;;  %s211_s17 = sadd.s32 %s3206_s5, %s209_s21 }
  0x82   : > { %s2499_s1 = sshll.u32 %s204_s16, 8  ;;  %s217_s20 = sshra.s32 %s216_s11, 7 }
  0x83   : > { %s212_s18 = sadd.s32 %s2499_s1, %s211_s17  ;;  %s219_s8 = sadd.s32 %s217_s20, %s3202_s25 }
  0x84   : > { %s3211_s15 = sld [smem:[#allocation3 + %s212_s18]]  ;;  %s2501_s29 = sshll.u32 %s219_s8, 8 }
  0x85   : > { %s222_s2 = sand.u32 127, %s216_s11  ;;  %s228_s9 = sadd.s32 2, %s3194_s7 }
  0x86   : > { %s223_s30 = sadd.s32 %s3206_s5, %s222_s2  ;;  %s229_s27 = sshra.s32 %s228_s9, 7 }
  0x87   : > { %s224_s6 = sadd.s32 %s2501_s29, %s223_s30  ;;  %s231_s21 = sadd.s32 %s229_s27, %s3202_s25 }
  0x88   : > { %s225_s19 = sld [smem:[#allocation3 + %s224_s6]]  ;;  %s2502_s16 = sshll.u32 %s231_s21, 8 }
  0x89   : > { %s234_s26 = sand.u32 127, %s228_s9  ;;  %s240_s18 = sadd.s32 3, %s3194_s7 }
  0x8a   : > { %s235_s17 = sadd.s32 %s3206_s5, %s234_s26  ;;  %s241_s20 = sshra.s32 %s240_s18, 7 }
  0x8b   : > { %s236_s1 = sadd.s32 %s2502_s16, %s235_s17  ;;  %s243_s8 = sadd.s32 %s241_s20, %s3202_s25 }
  0x8c   : > { %s237_s13 = sld [smem:[#allocation3 + %s236_s1]]  ;;  %s246_s11 = sand.u32 127, %s240_s18 }
  0x8d   : > { %s2503_s2 = sshll.u32 %s243_s8, 8  ;;  %s247_s24 = sadd.s32 %s3206_s5, %s246_s11 }
  0x8e   : > { %s252_s22 = sadd.s32 4, %s3194_s7  ;;  %s248_s30 = sadd.s32 %s2503_s2, %s247_s24 }
  0x8f   : > { %s253_s29 = sshra.s32 %s252_s22, 7  ;;  %s249_s6 = sld [smem:[#allocation3 + %s248_s30]] }
  0x90   : > { %s255_s27 = sadd.s32 %s253_s29, %s3202_s25  ;;  %s258_s9 = sand.u32 127, %s252_s22 }
  0x91   : > { %s2504_s21 = sshll.u32 %s255_s27, 8  ;;  %s264_s26 = sadd.s32 5, %s3194_s7 }
  0x92   : > { %s226_s16 = scalar_lea.vmem [#allocation4], %s225_s19  ;;  %s259_s17 = sadd.s32 %s3206_s5, %s258_s9 }
  0x93   : > { %v227_v0 = vld [vmem:[%s226_s16] sm:$0x1]  ;;  %s265_s1 = sshra.s32 %s264_s26, 7  ;;  %s260_s20 = sadd.s32 %s2504_s21, %s259_s17 }
  0x94   : > { %s267_s18 = sadd.s32 %s265_s1, %s3202_s25  ;;  %s261_s4 = sld [smem:[#allocation3 + %s260_s20]]  ;;  %v301_v2 = vrot.slane %v227_v0, 7 }
  0x95   : > { %s2505_s8 = sshll.u32 %s267_s18, 8  ;;  %s238_s11 = scalar_lea.vmem [#allocation4], %s237_s13 }
  0x96   : > { %v239_v1 = vld [vmem:[%s238_s11] sm:$0x1]  ;;  %s270_s24 = sand.u32 127, %s264_s26  ;;  %s214_s2 = scalar_lea.vmem [#allocation4], %s3211_s15 }
  0x97   : > { %v215_v3 = vld [vmem:[%s214_s2] sm:$0x1]  ;;  %s271_s22 = sadd.s32 %s3206_s5, %s270_s24  ;;  %s276_s30 = sadd.s32 6, %s3194_s7  ;;  %v304_v5 = vrot.slane %v239_v1, 6 }
  0x98   : > { %s272_s19 = sadd.s32 %s2505_s8, %s271_s22  ;;  %s277_s29 = sshra.s32 %s276_s30, 7  ;;  %v322_v6 = vsel %vm321_vm0, %v215_v3, %v301_v2 }
  0x99   : > { %s250_s27 = scalar_lea.vmem [#allocation4], %s249_s6  ;;  %s273_s21 = sld [smem:[#allocation3 + %s272_s19]]  ;;  %v324_v9 = vsel %vm323_vm1, %v322_v6, %v304_v5  ;;  %v589_v5 = vld [vmem:[%s3186_s14 + $0x10] sm:$0xff] }
  0x9a   : > { %v251_v4 = vld [vmem:[%s250_s27] sm:$0x1]  ;;  %s279_s9 = sadd.s32 %s277_s29, %s3202_s25  ;;  %s282_s13 = sand.u32 127, %s276_s30 }
  0x9b   : > { %s2506_s16 = sshll.u32 %s279_s9, 8  ;;  %s283_s15 = sadd.s32 %s3206_s5, %s282_s13  ;;  %v307_v8 = vrot.slane %v251_v4, 5 }
  0x9c   : > { %s262_s26 = scalar_lea.vmem [#allocation4], %s261_s4  ;;  %s284_s17 = sadd.s32 %s2506_s16, %s283_s15 }
  0x9d   : > { %v263_v7 = vld [vmem:[%s262_s26] sm:$0x1]  ;;  %s288_s1 = sadd.s32 7, %s3194_s7  ;;  %s285_s20 = sld [smem:[#allocation3 + %s284_s17]]  ;;  %v326_v12 = vsel %vm325_vm2, %v324_v9, %v307_v8 }
  0x9e   : > { %s289_s6 = sshra.s32 %s288_s1, 7  ;;  %s294_s8 = sand.u32 127, %s288_s1  ;;  %v310_v10 = vrot.slane %v263_v7, 4 }
  0x9f   : > { %s291_s18 = sadd.s32 %s289_s6, %s3202_s25  ;;  %s274_s24 = scalar_lea.vmem [#allocation4], %s273_s21 }
  0xa0   : > { %s2507_s11 = sshll.u32 %s291_s18, 8  ;;  %v275_v11 = vld [vmem:[%s274_s24] sm:$0x1]  ;;  %s295_s2 = sadd.s32 %s3206_s5, %s294_s8  ;;  %v328_v14 = vsel %vm327_vm3, %v326_v12, %v310_v10 }
  0xa1   : > { %s338_s4 = sadd.s32 8, %s3194_s7  ;;  %s296_s22 = sadd.s32 %s2507_s11, %s295_s2  ;;  %v313_v13 = vrot.slane %v275_v11, 3 }
  0xa2   : > { %s339_s30 = sshra.s32 %s338_s4, 7  ;;  %s297_s19 = sld [smem:[#allocation3 + %s296_s22]] }
  0xa3   : > { %s341_s29 = sadd.s32 %s339_s30, %s3202_s25  ;;  %s286_s9 = scalar_lea.vmem [#allocation4], %s285_s20  ;;  %v330_v17 = vsel %vm329_vm4, %v328_v14, %v313_v13 }
  0xa4   : > { %s2508_s27 = sshll.u32 %s341_s29, 8  ;;  %v287_v15 = vld [vmem:[%s286_s9] sm:$0x1]  ;;  %s344_s21 = sand.u32 127, %s338_s4 }
  0xa5   : > { %s350_s16 = sadd.s32 9, %s3194_s7  ;;  %v316_v16 = vrot.slane %v287_v15, 2  ;;  %s345_s13 = sadd.s32 %s3206_s5, %s344_s21 }
  0xa6   : > { %s351_s15 = sshra.s32 %s350_s16, 7  ;;  %s346_s26 = sadd.s32 %s2508_s27, %s345_s13 }
  0xa7   : > { %s353_s17 = sadd.s32 %s351_s15, %s3202_s25  ;;  %s3244_s1 = sld [smem:[#allocation3 + %s346_s26]]  ;;  %v332_v19 = vsel %vm331_vm5, %v330_v17, %v316_v16 }
  0xa8   : > { %s2509_s6 = sshll.u32 %s353_s17, 8  ;;  %s356_s18 = sand.u32 127, %s350_s16 }
  0xa9   : > { %s298_s20 = scalar_lea.vmem [#allocation4], %s297_s19  ;;  %s357_s8 = sadd.s32 %s3206_s5, %s356_s18 }
  0xaa   : > { %v299_v18 = vld [vmem:[%s298_s20] sm:$0x1]  ;;  %s362_s11 = sadd.s32 10, %s3194_s7  ;;  %s358_s24 = sadd.s32 %s2509_s6, %s357_s8 }
  0xab   : > { %v319_v20 = vrot.slane %v299_v18, 1  ;;  %s363_s2 = sshra.s32 %s362_s11, 7  ;;  %s359_s4 = sld [smem:[#allocation3 + %s358_s24]] }
  0xac   : > { %s365_s22 = sadd.s32 %s363_s2, %s3202_s25  ;;  %s368_s19 = sand.u32 127, %s362_s11 }
  0xad   : > { %v334_v22 = vsel %vm333_vm6, %v332_v19, %v319_v20  ;;  %s2510_s30 = sshll.u32 %s365_s22, 8  ;;  %s369_s29 = sadd.s32 %s3206_s5, %s368_s19 }
  0xae   : > { %v336_v23 = vadd.f32 %v335_v21, %v334_v22  ;;  %s370_s27 = sadd.s32 %s2510_s30, %s369_s29  ;;  %s374_s9 = sadd.s32 11, %s3194_s7 }
  0xaf   : > { %s3255_s21 = scalar_lea.vmem [#allocation9], %s3198_s12  ;;  %s371_s16 = sld [smem:[#allocation3 + %s370_s27]] }
  0xb0   : > { %337 = vst [vmem:[%s3255_s21] sm:$0xff] %v336_v23  ;;  %s375_s13 = sshra.s32 %s374_s9, 7  ;;  %s380_s26 = sand.u32 127, %s374_s9 }
  0xb1   : > { %s377_s15 = sadd.s32 %s375_s13, %s3202_s25  ;;  %s381_s6 = sadd.s32 %s3206_s5, %s380_s26 }
  0xb2   : > { %s2511_s17 = sshll.u32 %s377_s15, 8  ;;  %s386_s18 = sadd.s32 12, %s3194_s7 }
  0xb3   : > { %s382_s20 = sadd.s32 %s2511_s17, %s381_s6  ;;  %s387_s8 = sshra.s32 %s386_s18, 7 }
  0xb4   : > { %s383_s11 = sld [smem:[#allocation3 + %s382_s20]]  ;;  %s389_s24 = sadd.s32 %s387_s8, %s3202_s25 }
  0xb5   : > { %s2512_s2 = sshll.u32 %s389_s24, 8  ;;  %s392_s22 = sand.u32 127, %s386_s18 }
  0xb6   : > { %s398_s12 = sadd.s32 13, %s3194_s7  ;;  %s360_s30 = scalar_lea.vmem [#allocation4], %s359_s4 }
  0xb7   : > { %v361_v24 = vld [vmem:[%s360_s30] sm:$0x1]  ;;  %s393_s19 = sadd.s32 %s3206_s5, %s392_s22  ;;  %s399_s29 = sshra.s32 %s398_s12, 7 }
  0xb8   : > { %s394_s27 = sadd.s32 %s2512_s2, %s393_s19  ;;  %s401_s9 = sadd.s32 %s399_s29, %s3202_s25  ;;  %v435_v26 = vrot.slane %v361_v24, 7 }
  0xb9   : > { %s395_s13 = sld [smem:[#allocation3 + %s394_s27]]  ;;  %s2513_s15 = sshll.u32 %s401_s9, 8 }
  0xba   : > { %s372_s26 = scalar_lea.vmem [#allocation4], %s371_s16  ;;  %s404_s17 = sand.u32 127, %s398_s12 }
  0xbb   : > { %v373_v25 = vld [vmem:[%s372_s26] sm:$0x1]  ;;  %s348_s6 = scalar_lea.vmem [#allocation4], %s3244_s1  ;;  %s405_s18 = sadd.s32 %s3206_s5, %s404_s17 }
  0xbc   : > { %v349_v27 = vld [vmem:[%s348_s6] sm:$0x1]  ;;  %s410_s20 = sadd.s32 14, %s3194_s7  ;;  %s406_s8 = sadd.s32 %s2513_s15, %s405_s18  ;;  %v438_v29 = vrot.slane %v373_v25, 6 }
  0xbd   : > { %s411_s4 = sshra.s32 %s410_s20, 7  ;;  %s384_s24 = scalar_lea.vmem [#allocation4], %s383_s11  ;;  %v455_v30 = vsel %vm321_vm0, %v349_v27, %v435_v26 }
  0xbe   : > { %v385_v28 = vld [vmem:[%s384_s24] sm:$0x1]  ;;  %s407_s2 = sld [smem:[#allocation3 + %s406_s8]]  ;;  %s413_s22 = sadd.s32 %s411_s4, %s3202_s25  ;;  %v456_v33 = vsel %vm323_vm1, %v455_v30, %v438_v29 }
  0xbf   : > { %s2514_s30 = sshll.u32 %s413_s22, 8  ;;  %s416_s19 = sand.u32 127, %s410_s20  ;;  %v441_v32 = vrot.slane %v385_v28, 5  ;;  %v716_v29 = vld [vmem:[%s3186_s14 + $0x18] sm:$0xff] }
  0xc0   : > { %s417_s16 = sadd.s32 %s3206_s5, %s416_s19  ;;  %s396_s12 = scalar_lea.vmem [#allocation4], %s395_s13 }
  0xc1   : > { %v397_v31 = vld [vmem:[%s396_s12] sm:$0x1]  ;;  %s418_s1 = sadd.s32 %s2514_s30, %s417_s16  ;;  %s422_s29 = sadd.s32 15, %s3194_s7  ;;  %v457_v36 = vsel %vm325_vm2, %v456_v33, %v441_v32 }
  0xc2   : > { %s419_s27 = sld [smem:[#allocation3 + %s418_s1]]  ;;  %s423_s11 = sshra.s32 %s422_s29, 7  ;;  %v444_v34 = vrot.slane %v397_v31, 4 }
  0xc3   : > { %s425_s9 = sadd.s32 %s423_s11, %s3202_s25  ;;  %s428_s15 = sand.u32 127, %s422_s29 }
  0xc4   : > { %s2515_s26 = sshll.u32 %s425_s9, 8  ;;  %s408_s17 = scalar_lea.vmem [#allocation4], %s407_s2  ;;  %v458_v38 = vsel %vm327_vm3, %v457_v36, %v444_v34 }
  0xc5   : > { %v409_v35 = vld [vmem:[%s408_s17] sm:$0x1]  ;;  %s429_s6 = sadd.s32 %s3206_s5, %s428_s15  ;;  %s465_s13 = sadd.s32 16, %s3194_s7 }
  0xc6   : > { %s430_s18 = sadd.s32 %s2515_s26, %s429_s6  ;;  %s466_s20 = sshra.s32 %s465_s13, 7  ;;  %v447_v37 = vrot.slane %v409_v35, 3 }
  0xc7   : > { %s431_s8 = sld [smem:[#allocation3 + %s430_s18]]  ;;  %s468_s4 = sadd.s32 %s466_s20, %s3202_s25 }
  0xc8   : > { %s2516_s24 = sshll.u32 %s468_s4, 8  ;;  %s420_s22 = scalar_lea.vmem [#allocation4], %s419_s27  ;;  %v459_v41 = vsel %vm329_vm4, %v458_v38, %v447_v37 }
  0xc9   : > { %v421_v39 = vld [vmem:[%s420_s22] sm:$0x1]  ;;  %s471_s2 = sand.u32 127, %s465_s13  ;;  %s477_s30 = sadd.s32 17, %s3194_s7 }
  0xca   : > { %v450_v40 = vrot.slane %v421_v39, 2  ;;  %s472_s19 = sadd.s32 %s3206_s5, %s471_s2  ;;  %s478_s16 = sshra.s32 %s477_s30, 7 }
  0xcb   : > { %s473_s12 = sadd.s32 %s2516_s24, %s472_s19  ;;  %s480_s1 = sadd.s32 %s478_s16, %s3202_s25 }
  0xcc   : > { %s3283_s29 = sld [smem:[#allocation3 + %s473_s12]]  ;;  %s2517_s11 = sshll.u32 %s480_s1, 8  ;;  %v460_v43 = vsel %vm331_vm5, %v459_v41, %v450_v40 }
  0xcd   : > { %s483_s9 = sand.u32 127, %s477_s30  ;;  %s432_s27 = scalar_lea.vmem [#allocation4], %s431_s8 }
  0xce   : > { %v433_v42 = vld [vmem:[%s432_s27] sm:$0x1]  ;;  %s484_s15 = sadd.s32 %s3206_s5, %s483_s9  ;;  %s489_s26 = sadd.s32 18, %s3194_s7 }
  0xcf   : > { %v453_v44 = vrot.slane %v433_v42, 1  ;;  %s485_s17 = sadd.s32 %s2517_s11, %s484_s15  ;;  %s490_s6 = sshra.s32 %s489_s26, 7 }
  0xd0   : > { %s486_s13 = sld [smem:[#allocation3 + %s485_s17]]  ;;  %s492_s18 = sadd.s32 %s490_s6, %s3202_s25 }
  0xd1   : > { %v461_v46 = vsel %vm333_vm6, %v460_v43, %v453_v44  ;;  %s2518_s20 = sshll.u32 %s492_s18, 8  ;;  %s495_s8 = sand.u32 127, %s489_s26 }
  0xd2   : > { %v463_v47 = vadd.f32 %v462_v45, %v461_v46  ;;  %s496_s4 = sadd.s32 %s3206_s5, %s495_s8  ;;  %s501_s22 = sadd.s32 19, %s3194_s7 }
  0xd3   : > { %s497_s24 = sadd.s32 %s2518_s20, %s496_s4  ;;  %s502_s30 = sshra.s32 %s501_s22, 7 }
  0xd4   : > { %464 = vst [vmem:[%s3255_s21 + $0x8] sm:$0xff] %v463_v47  ;;  %s498_s2 = sld [smem:[#allocation3 + %s497_s24]]  ;;  %s504_s19 = sadd.s32 %s502_s30, %s3202_s25 }
  0xd5   : > { %s507_s16 = sand.u32 127, %s501_s22  ;;  %s2519_s12 = sshll.u32 %s504_s19, 8 }
  0xd6   : > { %s508_s1 = sadd.s32 %s3206_s5, %s507_s16  ;;  %s513_s11 = sadd.s32 20, %s3194_s7 }
  0xd7   : > { %s509_s9 = sadd.s32 %s2519_s12, %s508_s1  ;;  %s514_s27 = sshra.s32 %s513_s11, 7 }
  0xd8   : > { %s510_s15 = sld [smem:[#allocation3 + %s509_s9]]  ;;  %s516_s26 = sadd.s32 %s514_s27, %s3202_s25 }
  0xd9   : > { %s2520_s17 = sshll.u32 %s516_s26, 8  ;;  %s519_s6 = sand.u32 127, %s513_s11 }
  0xda   : > { %s525_s18 = sadd.s32 21, %s3194_s7  ;;  %s487_s20 = scalar_lea.vmem [#allocation4], %s486_s13 }
  0xdb   : > { %v488_v48 = vld [vmem:[%s487_s20] sm:$0x1]  ;;  %s520_s8 = sadd.s32 %s3206_s5, %s519_s6  ;;  %s526_s4 = sshra.s32 %s525_s18, 7 }
  0xdc   : > { %s521_s24 = sadd.s32 %s2520_s17, %s520_s8  ;;  %s528_s22 = sadd.s32 %s526_s4, %s3202_s25  ;;  %v562_v50 = vrot.slane %v488_v48, 7 }
  0xdd   : > { %s522_s30 = sld [smem:[#allocation3 + %s521_s24]]  ;;  %s2521_s19 = sshll.u32 %s528_s22, 8 }
  0xde   : > { %s499_s16 = scalar_lea.vmem [#allocation4], %s498_s2  ;;  %s531_s12 = sand.u32 127, %s525_s18 }
  0xdf   : > { %v500_v49 = vld [vmem:[%s499_s16] sm:$0x1]  ;;  %s475_s1 = scalar_lea.vmem [#allocation4], %s3283_s29  ;;  %s532_s11 = sadd.s32 %s3206_s5, %s531_s12 }
  0xe0   : > { %v476_v51 = vld [vmem:[%s475_s1] sm:$0x1]  ;;  %s537_s9 = sadd.s32 22, %s3194_s7  ;;  %s533_s27 = sadd.s32 %s2521_s19, %s532_s11  ;;  %v565_v53 = vrot.slane %v500_v49, 6 }
  0xe1   : > { %s538_s13 = sshra.s32 %s537_s9, 7  ;;  %s511_s26 = scalar_lea.vmem [#allocation4], %s510_s15  ;;  %v582_v54 = vsel %vm321_vm0, %v476_v51, %v562_v50 }
  0xe2   : > { %v512_v52 = vld [vmem:[%s511_s26] sm:$0x1]  ;;  %s534_s17 = sld [smem:[#allocation3 + %s533_s27]]  ;;  %s540_s6 = sadd.s32 %s538_s13, %s3202_s25  ;;  %v583_v57 = vsel %vm323_vm1, %v582_v54, %v565_v53  ;;  %v843_v53 = vld [vmem:[%s3186_s14 + $0x20] sm:$0xff] }
  0xe3   : > { %s2522_s20 = sshll.u32 %s540_s6, 8  ;;  %s543_s8 = sand.u32 127, %s537_s9  ;;  %v568_v56 = vrot.slane %v512_v52, 5 }
  0xe4   : > { %s544_s2 = sadd.s32 %s3206_s5, %s543_s8  ;;  %s523_s18 = scalar_lea.vmem [#allocation4], %s522_s30 }
  0xe5   : > { %v524_v55 = vld [vmem:[%s523_s18] sm:$0x1]  ;;  %s545_s29 = sadd.s32 %s2522_s20, %s544_s2  ;;  %s549_s4 = sadd.s32 23, %s3194_s7  ;;  %v584_v60 = vsel %vm325_vm2, %v583_v57, %v568_v56 }
  0xe6   : > { %s546_s24 = sld [smem:[#allocation3 + %s545_s29]]  ;;  %s550_s15 = sshra.s32 %s549_s4, 7  ;;  %v571_v58 = vrot.slane %v524_v55, 4 }
  0xe7   : > { %s552_s22 = sadd.s32 %s550_s15, %s3202_s25  ;;  %s555_s19 = sand.u32 127, %s549_s4 }
  0xe8   : > { %s2523_s16 = sshll.u32 %s552_s22, 8  ;;  %s535_s12 = scalar_lea.vmem [#allocation4], %s534_s17  ;;  %v585_v62 = vsel %vm327_vm3, %v584_v60, %v571_v58 }
  0xe9   : > { %v536_v59 = vld [vmem:[%s535_s12] sm:$0x1]  ;;  %s556_s1 = sadd.s32 %s3206_s5, %s555_s19  ;;  %s592_s30 = sadd.s32 24, %s3194_s7 }
  0xea   : > { %s557_s11 = sadd.s32 %s2523_s16, %s556_s1  ;;  %s593_s9 = sshra.s32 %s592_s30, 7  ;;  %v574_v61 = vrot.slane %v536_v59, 3 }
  0xeb   : > { %s558_s27 = sld [smem:[#allocation3 + %s557_s11]]  ;;  %s595_s13 = sadd.s32 %s593_s9, %s3202_s25 }
  0xec   : > { %s2524_s26 = sshll.u32 %s595_s13, 8  ;;  %s547_s6 = scalar_lea.vmem [#allocation4], %s546_s24  ;;  %v586_v1 = vsel %vm329_vm4, %v585_v62, %v574_v61 }
  0xed   : > { %v548_v63 = vld [vmem:[%s547_s6] sm:$0x1]  ;;  %s598_s17 = sand.u32 127, %s592_s30  ;;  %s604_s20 = sadd.s32 25, %s3194_s7 }
  0xee   : > { %v577_v0 = vrot.slane %v548_v63, 2  ;;  %s599_s8 = sadd.s32 %s3206_s5, %s598_s17  ;;  %s605_s2 = sshra.s32 %s604_s20, 7 }
  0xef   : > { %s600_s18 = sadd.s32 %s2524_s26, %s599_s8  ;;  %s607_s29 = sadd.s32 %s605_s2, %s3202_s25 }
  0xf0   : > { %s3319_s4 = sld [smem:[#allocation3 + %s600_s18]]  ;;  %s2525_s15 = sshll.u32 %s607_s29, 8  ;;  %v587_v3 = vsel %vm331_vm5, %v586_v1, %v577_v0 }
  0xf1   : > { %s610_s22 = sand.u32 127, %s604_s20  ;;  %s559_s24 = scalar_lea.vmem [#allocation4], %s558_s27 }
  0xf2   : > { %v560_v2 = vld [vmem:[%s559_s24] sm:$0x1]  ;;  %s611_s19 = sadd.s32 %s3206_s5, %s610_s22  ;;  %s616_s16 = sadd.s32 26, %s3194_s7 }
  0xf3   : > { %v580_v4 = vrot.slane %v560_v2, 1  ;;  %s612_s12 = sadd.s32 %s2525_s15, %s611_s19  ;;  %s617_s1 = sshra.s32 %s616_s16, 7 }
  0xf4   : > { %s613_s30 = sld [smem:[#allocation3 + %s612_s12]]  ;;  %s619_s11 = sadd.s32 %s617_s1, %s3202_s25 }
  0xf5   : > { %v588_v6 = vsel %vm333_vm6, %v587_v3, %v580_v4  ;;  %s2526_s9 = sshll.u32 %s619_s11, 8  ;;  %s622_s27 = sand.u32 127, %s616_s16 }
  0xf6   : > { %v590_v7 = vadd.f32 %v589_v5, %v588_v6  ;;  %s623_s13 = sadd.s32 %s3206_s5, %s622_s27  ;;  %s628_s6 = sadd.s32 27, %s3194_s7 }
  0xf7   : > { %s624_s26 = sadd.s32 %s2526_s9, %s623_s13  ;;  %s629_s20 = sshra.s32 %s628_s6, 7 }
  0xf8   : > { %591 = vst [vmem:[%s3255_s21 + $0x10] sm:$0xff] %v590_v7  ;;  %s625_s17 = sld [smem:[#allocation3 + %s624_s26]]  ;;  %s631_s8 = sadd.s32 %s629_s20, %s3202_s25 }
  0xf9   : > { %s634_s2 = sand.u32 127, %s628_s6  ;;  %s2527_s18 = sshll.u32 %s631_s8, 8 }
  0xfa   : > { %s635_s29 = sadd.s32 %s3206_s5, %s634_s2  ;;  %s640_s15 = sadd.s32 28, %s3194_s7 }
  0xfb   : > { %s636_s22 = sadd.s32 %s2527_s18, %s635_s29  ;;  %s641_s24 = sshra.s32 %s640_s15, 7 }
  0xfc   : > { %s637_s19 = sld [smem:[#allocation3 + %s636_s22]]  ;;  %s643_s16 = sadd.s32 %s641_s24, %s3202_s25 }
  0xfd   : > { %s2528_s12 = sshll.u32 %s643_s16, 8  ;;  %s646_s1 = sand.u32 127, %s640_s15 }
  0xfe   : > { %s652_s11 = sadd.s32 29, %s3194_s7  ;;  %s614_s9 = scalar_lea.vmem [#allocation4], %s613_s30 }
  0xff   : > { %v615_v8 = vld [vmem:[%s614_s9] sm:$0x1]  ;;  %s647_s27 = sadd.s32 %s3206_s5, %s646_s1  ;;  %s653_s13 = sshra.s32 %s652_s11, 7 }
 0x100   : > { %s648_s26 = sadd.s32 %s2528_s12, %s647_s27  ;;  %s655_s6 = sadd.s32 %s653_s13, %s3202_s25  ;;  %v689_v10 = vrot.slane %v615_v8, 7 }
 0x101   : > { %s649_s20 = sld [smem:[#allocation3 + %s648_s26]]  ;;  %s2529_s8 = sshll.u32 %s655_s6, 8 }
 0x102   : > { %s626_s2 = scalar_lea.vmem [#allocation4], %s625_s17  ;;  %s658_s18 = sand.u32 127, %s652_s11 }
 0x103   : > { %v627_v9 = vld [vmem:[%s626_s2] sm:$0x1]  ;;  %s602_s29 = scalar_lea.vmem [#allocation4], %s3319_s4  ;;  %s659_s15 = sadd.s32 %s3206_s5, %s658_s18 }
 0x104   : > { %v603_v11 = vld [vmem:[%s602_s29] sm:$0x1]  ;;  %s664_s22 = sadd.s32 30, %s3194_s7  ;;  %s660_s24 = sadd.s32 %s2529_s8, %s659_s15  ;;  %v692_v13 = vrot.slane %v627_v9, 6 }
 0x105   : > { %s665_s30 = sshra.s32 %s664_s22, 7  ;;  %s638_s16 = scalar_lea.vmem [#allocation4], %s637_s19  ;;  %v709_v14 = vsel %vm321_vm0, %v603_v11, %v689_v10 }
 0x106   : > { %v639_v12 = vld [vmem:[%s638_s16] sm:$0x1]  ;;  %s661_s12 = sld [smem:[#allocation3 + %s660_s24]]  ;;  %s667_s1 = sadd.s32 %s665_s30, %s3202_s25  ;;  %v710_v17 = vsel %vm323_vm1, %v709_v14, %v692_v13  ;;  %v970_v13 = vld [vmem:[%s3186_s14 + $0x28] sm:$0xff] }
 0x107   : > { %s2530_s9 = sshll.u32 %s667_s1, 8  ;;  %s670_s27 = sand.u32 127, %s664_s22  ;;  %v695_v16 = vrot.slane %v639_v12, 5 }
 0x108   : > { %s671_s17 = sadd.s32 %s3206_s5, %s670_s27  ;;  %s650_s11 = scalar_lea.vmem [#allocation4], %s649_s20 }
 0x109   : > { %v651_v15 = vld [vmem:[%s650_s11] sm:$0x1]  ;;  %s672_s4 = sadd.s32 %s2530_s9, %s671_s17  ;;  %s676_s13 = sadd.s32 31, %s3194_s7  ;;  %v711_v20 = vsel %vm325_vm2, %v710_v17, %v695_v16 }
 0x10a   : > { %s673_s26 = sld [smem:[#allocation3 + %s672_s4]]  ;;  %s677_s19 = sshra.s32 %s676_s13, 7  ;;  %v698_v18 = vrot.slane %v651_v15, 4 }
 0x10b   : > { %s679_s6 = sadd.s32 %s677_s19, %s3202_s25  ;;  %s682_s8 = sand.u32 127, %s676_s13 }
 0x10c   : > { %s2531_s2 = sshll.u32 %s679_s6, 8  ;;  %s662_s18 = scalar_lea.vmem [#allocation4], %s661_s12  ;;  %v712_v22 = vsel %vm327_vm3, %v711_v20, %v698_v18 }
 0x10d   : > { %v663_v19 = vld [vmem:[%s662_s18] sm:$0x1]  ;;  %s683_s29 = sadd.s32 %s3206_s5, %s682_s8  ;;  %s719_s20 = sadd.s32 32, %s3194_s7 }
 0x10e   : > { %s684_s15 = sadd.s32 %s2531_s2, %s683_s29  ;;  %s720_s22 = sshra.s32 %s719_s20, 7  ;;  %v701_v21 = vrot.slane %v663_v19, 3 }
 0x10f   : > { %s685_s24 = sld [smem:[#allocation3 + %s684_s15]]  ;;  %s722_s30 = sadd.s32 %s720_s22, %s3202_s25 }
 0x110   : > { %s2532_s16 = sshll.u32 %s722_s30, 8  ;;  %s674_s1 = scalar_lea.vmem [#allocation4], %s673_s26  ;;  %v713_v25 = vsel %vm329_vm4, %v712_v22, %v701_v21 }
 0x111   : > { %v675_v23 = vld [vmem:[%s674_s1] sm:$0x1]  ;;  %s725_s12 = sand.u32 127, %s719_s20  ;;  %s731_s9 = sadd.s32 33, %s3194_s7 }
 0x112   : > { %v704_v24 = vrot.slane %v675_v23, 2  ;;  %s726_s27 = sadd.s32 %s3206_s5, %s725_s12  ;;  %s732_s17 = sshra.s32 %s731_s9, 7 }
 0x113   : > { %s727_s11 = sadd.s32 %s2532_s16, %s726_s27  ;;  %s734_s4 = sadd.s32 %s732_s17, %s3202_s25 }
 0x114   : > { %s3355_s13 = sld [smem:[#allocation3 + %s727_s11]]  ;;  %s2533_s19 = sshll.u32 %s734_s4, 8  ;;  %v714_v27 = vsel %vm331_vm5, %v713_v25, %v704_v24 }
 0x115   : > { %s737_s6 = sand.u32 127, %s731_s9  ;;  %s686_s26 = scalar_lea.vmem [#allocation4], %s685_s24 }
 0x116   : > { %v687_v26 = vld [vmem:[%s686_s26] sm:$0x1]  ;;  %s738_s8 = sadd.s32 %s3206_s5, %s737_s6  ;;  %s743_s2 = sadd.s32 34, %s3194_s7 }
 0x117   : > { %v707_v28 = vrot.slane %v687_v26, 1  ;;  %s739_s18 = sadd.s32 %s2533_s19, %s738_s8  ;;  %s744_s29 = sshra.s32 %s743_s2, 7 }
 0x118   : > { %s740_s20 = sld [smem:[#allocation3 + %s739_s18]]  ;;  %s746_s15 = sadd.s32 %s744_s29, %s3202_s25 }
 0x119   : > { %v715_v30 = vsel %vm333_vm6, %v714_v27, %v707_v28  ;;  %s2534_s22 = sshll.u32 %s746_s15, 8  ;;  %s749_s24 = sand.u32 127, %s743_s2 }
 0x11a   : > { %v717_v31 = vadd.f32 %v716_v29, %v715_v30  ;;  %s750_s30 = sadd.s32 %s3206_s5, %s749_s24  ;;  %s755_s1 = sadd.s32 35, %s3194_s7 }
 0x11b   : > { %s751_s16 = sadd.s32 %s2534_s22, %s750_s30  ;;  %s756_s9 = sshra.s32 %s755_s1, 7 }
 0x11c   : > { %718 = vst [vmem:[%s3255_s21 + $0x18] sm:$0xff] %v717_v31  ;;  %s752_s12 = sld [smem:[#allocation3 + %s751_s16]]  ;;  %s758_s27 = sadd.s32 %s756_s9, %s3202_s25 }
 0x11d   : > { %s761_s17 = sand.u32 127, %s755_s1  ;;  %s2535_s11 = sshll.u32 %s758_s27, 8 }
 0x11e   : > { %s762_s4 = sadd.s32 %s3206_s5, %s761_s17  ;;  %s767_s19 = sadd.s32 36, %s3194_s7 }
 0x11f   : > { %s763_s6 = sadd.s32 %s2535_s11, %s762_s4  ;;  %s768_s26 = sshra.s32 %s767_s19, 7 }
 0x120   : > { %s764_s8 = sld [smem:[#allocation3 + %s763_s6]]  ;;  %s770_s2 = sadd.s32 %s768_s26, %s3202_s25 }
 0x121   : > { %s2536_s18 = sshll.u32 %s770_s2, 8  ;;  %s773_s29 = sand.u32 127, %s767_s19 }
 0x122   : > { %s779_s15 = sadd.s32 37, %s3194_s7  ;;  %s741_s22 = scalar_lea.vmem [#allocation4], %s740_s20 }
 0x123   : > { %v742_v32 = vld [vmem:[%s741_s22] sm:$0x1]  ;;  %s774_s24 = sadd.s32 %s3206_s5, %s773_s29  ;;  %s780_s30 = sshra.s32 %s779_s15, 7 }
 0x124   : > { %s775_s16 = sadd.s32 %s2536_s18, %s774_s24  ;;  %s782_s1 = sadd.s32 %s780_s30, %s3202_s25  ;;  %v816_v34 = vrot.slane %v742_v32, 7 }
 0x125   : > { %s776_s9 = sld [smem:[#allocation3 + %s775_s16]]  ;;  %s2537_s27 = sshll.u32 %s782_s1, 8 }
 0x126   : > { %s753_s17 = scalar_lea.vmem [#allocation4], %s752_s12  ;;  %s785_s11 = sand.u32 127, %s779_s15 }
 0x127   : > { %v754_v33 = vld [vmem:[%s753_s17] sm:$0x1]  ;;  %s729_s4 = scalar_lea.vmem [#allocation4], %s3355_s13  ;;  %s786_s19 = sadd.s32 %s3206_s5, %s785_s11 }
 0x128   : > { %v730_v35 = vld [vmem:[%s729_s4] sm:$0x1]  ;;  %s791_s6 = sadd.s32 38, %s3194_s7  ;;  %s787_s26 = sadd.s32 %s2537_s27, %s786_s19  ;;  %v819_v37 = vrot.slane %v754_v33, 6 }
 0x129   : > { %s792_s20 = sshra.s32 %s791_s6, 7  ;;  %s765_s2 = scalar_lea.vmem [#allocation4], %s764_s8  ;;  %v836_v38 = vsel %vm321_vm0, %v730_v35, %v816_v34 }
 0x12a   : > { %v766_v36 = vld [vmem:[%s765_s2] sm:$0x1]  ;;  %s788_s18 = sld [smem:[#allocation3 + %s787_s26]]  ;;  %s794_s29 = sadd.s32 %s792_s20, %s3202_s25  ;;  %v837_v41 = vsel %vm323_vm1, %v836_v38, %v819_v37  ;;  %v1097_v37 = vld [vmem:[%s3186_s14 + $0x30] sm:$0xff] }
 0x12b   : > { %s2538_s22 = sshll.u32 %s794_s29, 8  ;;  %s797_s24 = sand.u32 127, %s791_s6  ;;  %v822_v40 = vrot.slane %v766_v36, 5 }
 0x12c   : > { %s798_s12 = sadd.s32 %s3206_s5, %s797_s24  ;;  %s777_s15 = scalar_lea.vmem [#allocation4], %s776_s9 }
 0x12d   : > { %v778_v39 = vld [vmem:[%s777_s15] sm:$0x1]  ;;  %s799_s13 = sadd.s32 %s2538_s22, %s798_s12  ;;  %s803_s30 = sadd.s32 39, %s3194_s7  ;;  %v838_v44 = vsel %vm325_vm2, %v837_v41, %v822_v40 }
 0x12e   : > { %s800_s16 = sld [smem:[#allocation3 + %s799_s13]]  ;;  %s804_s8 = sshra.s32 %s803_s30, 7  ;;  %v825_v42 = vrot.slane %v778_v39, 4 }
 0x12f   : > { %s806_s1 = sadd.s32 %s804_s8, %s3202_s25  ;;  %s809_s27 = sand.u32 127, %s803_s30 }
 0x130   : > { %s2539_s17 = sshll.u32 %s806_s1, 8  ;;  %s789_s11 = scalar_lea.vmem [#allocation4], %s788_s18  ;;  %v839_v46 = vsel %vm327_vm3, %v838_v44, %v825_v42 }
 0x131   : > { %v790_v43 = vld [vmem:[%s789_s11] sm:$0x1]  ;;  %s810_s4 = sadd.s32 %s3206_s5, %s809_s27  ;;  %s846_s9 = sadd.s32 40, %s3194_s7 }
 0x132   : > { %s811_s19 = sadd.s32 %s2539_s17, %s810_s4  ;;  %s847_s6 = sshra.s32 %s846_s9, 7  ;;  %v828_v45 = vrot.slane %v790_v43, 3 }
 0x133   : > { %s812_s26 = sld [smem:[#allocation3 + %s811_s19]]  ;;  %s849_s20 = sadd.s32 %s847_s6, %s3202_s25 }
 0x134   : > { %s2540_s2 = sshll.u32 %s849_s20, 8  ;;  %s801_s29 = scalar_lea.vmem [#allocation4], %s800_s16  ;;  %v840_v49 = vsel %vm329_vm4, %v839_v46, %v828_v45 }
 0x135   : > { %v802_v47 = vld [vmem:[%s801_s29] sm:$0x1]  ;;  %s852_s18 = sand.u32 127, %s846_s9  ;;  %s858_s22 = sadd.s32 41, %s3194_s7 }
 0x136   : > { %v831_v48 = vrot.slane %v802_v47, 2  ;;  %s853_s24 = sadd.s32 %s3206_s5, %s852_s18  ;;  %s859_s12 = sshra.s32 %s858_s22, 7 }
 0x137   : > { %s854_s15 = sadd.s32 %s2540_s2, %s853_s24  ;;  %s861_s13 = sadd.s32 %s859_s12, %s3202_s25 }
 0x138   : > { %s3391_s30 = sld [smem:[#allocation3 + %s854_s15]]  ;;  %s2541_s8 = sshll.u32 %s861_s13, 8  ;;  %v841_v51 = vsel %vm331_vm5, %v840_v49, %v831_v48 }
 0x139   : > { %s864_s1 = sand.u32 127, %s858_s22  ;;  %s813_s16 = scalar_lea.vmem [#allocation4], %s812_s26 }
 0x13a   : > { %v814_v50 = vld [vmem:[%s813_s16] sm:$0x1]  ;;  %s865_s27 = sadd.s32 %s3206_s5, %s864_s1  ;;  %s870_s17 = sadd.s32 42, %s3194_s7 }
 0x13b   : > { %v834_v52 = vrot.slane %v814_v50, 1  ;;  %s866_s11 = sadd.s32 %s2541_s8, %s865_s27  ;;  %s871_s4 = sshra.s32 %s870_s17, 7 }
 0x13c   : > { %s867_s9 = sld [smem:[#allocation3 + %s866_s11]]  ;;  %s873_s19 = sadd.s32 %s871_s4, %s3202_s25 }
 0x13d   : > { %v842_v54 = vsel %vm333_vm6, %v841_v51, %v834_v52  ;;  %s2542_s6 = sshll.u32 %s873_s19, 8  ;;  %s876_s26 = sand.u32 127, %s870_s17 }
 0x13e   : > { %v844_v55 = vadd.f32 %v843_v53, %v842_v54  ;;  %s877_s20 = sadd.s32 %s3206_s5, %s876_s26  ;;  %s882_s29 = sadd.s32 43, %s3194_s7 }
 0x13f   : > { %s878_s2 = sadd.s32 %s2542_s6, %s877_s20  ;;  %s883_s22 = sshra.s32 %s882_s29, 7 }
 0x140   : > { %845 = vst [vmem:[%s3255_s21 + $0x20] sm:$0xff] %v844_v55  ;;  %s879_s18 = sld [smem:[#allocation3 + %s878_s2]]  ;;  %s885_s24 = sadd.s32 %s883_s22, %s3202_s25 }
 0x141   : > { %s888_s12 = sand.u32 127, %s882_s29  ;;  %s2543_s15 = sshll.u32 %s885_s24, 8 }
 0x142   : > { %s889_s13 = sadd.s32 %s3206_s5, %s888_s12  ;;  %s894_s8 = sadd.s32 44, %s3194_s7 }
 0x143   : > { %s890_s1 = sadd.s32 %s2543_s15, %s889_s13  ;;  %s895_s16 = sshra.s32 %s894_s8, 7 }
 0x144   : > { %s891_s27 = sld [smem:[#allocation3 + %s890_s1]]  ;;  %s897_s17 = sadd.s32 %s895_s16, %s3202_s25 }
 0x145   : > { %s2544_s11 = sshll.u32 %s897_s17, 8  ;;  %s900_s4 = sand.u32 127, %s894_s8 }
 0x146   : > { %s906_s19 = sadd.s32 45, %s3194_s7  ;;  %s868_s6 = scalar_lea.vmem [#allocation4], %s867_s9 }
 0x147   : > { %v869_v56 = vld [vmem:[%s868_s6] sm:$0x1]  ;;  %s901_s26 = sadd.s32 %s3206_s5, %s900_s4  ;;  %s907_s20 = sshra.s32 %s906_s19, 7 }
 0x148   : > { %s902_s2 = sadd.s32 %s2544_s11, %s901_s26  ;;  %s909_s29 = sadd.s32 %s907_s20, %s3202_s25  ;;  %v943_v58 = vrot.slane %v869_v56, 7 }
 0x149   : > { %s903_s22 = sld [smem:[#allocation3 + %s902_s2]]  ;;  %s2545_s24 = sshll.u32 %s909_s29, 8 }
 0x14a   : > { %s880_s12 = scalar_lea.vmem [#allocation4], %s879_s18  ;;  %s912_s15 = sand.u32 127, %s906_s19 }
 0x14b   : > { %v881_v57 = vld [vmem:[%s880_s12] sm:$0x1]  ;;  %s856_s13 = scalar_lea.vmem [#allocation4], %s3391_s30  ;;  %s913_s8 = sadd.s32 %s3206_s5, %s912_s15 }
 0x14c   : > { %v857_v59 = vld [vmem:[%s856_s13] sm:$0x1]  ;;  %s918_s1 = sadd.s32 46, %s3194_s7  ;;  %s914_s16 = sadd.s32 %s2545_s24, %s913_s8  ;;  %v946_v61 = vrot.slane %v881_v57, 6 }
 0x14d   : > { %s919_s9 = sshra.s32 %s918_s1, 7  ;;  %s892_s17 = scalar_lea.vmem [#allocation4], %s891_s27  ;;  %v963_v62 = vsel %vm321_vm0, %v857_v59, %v943_v58 }
 0x14e   : > { %v893_v60 = vld [vmem:[%s892_s17] sm:$0x1]  ;;  %s915_s11 = sld [smem:[#allocation3 + %s914_s16]]  ;;  %s921_s4 = sadd.s32 %s919_s9, %s3202_s25  ;;  %v964_v1 = vsel %vm323_vm1, %v963_v62, %v946_v61 }
 0x14f   : > { %s2546_s6 = sshll.u32 %s921_s4, 8  ;;  %s924_s26 = sand.u32 127, %s918_s1  ;;  %v949_v0 = vrot.slane %v893_v60, 5  ;;  %v1224_v61 = vld [vmem:[%s3186_s14 + $0x38] sm:$0xff] }
 0x150   : > { %s925_s18 = sadd.s32 %s3206_s5, %s924_s26  ;;  %s904_s19 = scalar_lea.vmem [#allocation4], %s903_s22 }
 0x151   : > { %v905_v63 = vld [vmem:[%s904_s19] sm:$0x1]  ;;  %s926_s30 = sadd.s32 %s2546_s6, %s925_s18  ;;  %s930_s20 = sadd.s32 47, %s3194_s7  ;;  %v965_v4 = vsel %vm325_vm2, %v964_v1, %v949_v0 }
 0x152   : > { %s927_s2 = sld [smem:[#allocation3 + %s926_s30]]  ;;  %s931_s27 = sshra.s32 %s930_s20, 7  ;;  %v952_v2 = vrot.slane %v905_v63, 4 }
 0x153   : > { %s933_s29 = sadd.s32 %s931_s27, %s3202_s25  ;;  %s936_s24 = sand.u32 127, %s930_s20 }
 0x154   : > { %s2547_s12 = sshll.u32 %s933_s29, 8  ;;  %s916_s15 = scalar_lea.vmem [#allocation4], %s915_s11  ;;  %v966_v6 = vsel %vm327_vm3, %v965_v4, %v952_v2 }
 0x155   : > { %v917_v3 = vld [vmem:[%s916_s15] sm:$0x1]  ;;  %s937_s13 = sadd.s32 %s3206_s5, %s936_s24  ;;  %s973_s22 = sadd.s32 48, %s3194_s7 }
 0x156   : > { %s938_s8 = sadd.s32 %s2547_s12, %s937_s13  ;;  %s974_s1 = sshra.s32 %s973_s22, 7  ;;  %v955_v5 = vrot.slane %v917_v3, 3 }
 0x157   : > { %s939_s16 = sld [smem:[#allocation3 + %s938_s8]]  ;;  %s976_s9 = sadd.s32 %s974_s1, %s3202_s25 }
 0x158   : > { %s2548_s17 = sshll.u32 %s976_s9, 8  ;;  %s928_s4 = scalar_lea.vmem [#allocation4], %s927_s2  ;;  %v967_v9 = vsel %vm329_vm4, %v966_v6, %v955_v5 }
 0x159   : > { %v929_v7 = vld [vmem:[%s928_s4] sm:$0x1]  ;;  %s979_s11 = sand.u32 127, %s973_s22  ;;  %s985_s6 = sadd.s32 49, %s3194_s7 }
 0x15a   : > { %v958_v8 = vrot.slane %v929_v7, 2  ;;  %s980_s26 = sadd.s32 %s3206_s5, %s979_s11  ;;  %s986_s18 = sshra.s32 %s985_s6, 7 }
 0x15b   : > { %s981_s19 = sadd.s32 %s2548_s17, %s980_s26  ;;  %s988_s30 = sadd.s32 %s986_s18, %s3202_s25 }
 0x15c   : > { %s3427_s20 = sld [smem:[#allocation3 + %s981_s19]]  ;;  %s2549_s27 = sshll.u32 %s988_s30, 8  ;;  %v968_v11 = vsel %vm331_vm5, %v967_v9, %v958_v8 }
 0x15d   : > { %s991_s29 = sand.u32 127, %s985_s6  ;;  %s940_s2 = scalar_lea.vmem [#allocation4], %s939_s16 }
 0x15e   : > { %v941_v10 = vld [vmem:[%s940_s2] sm:$0x1]  ;;  %s992_s24 = sadd.s32 %s3206_s5, %s991_s29  ;;  %s997_s12 = sadd.s32 50, %s3194_s7 }
 0x15f   : > { %v961_v12 = vrot.slane %v941_v10, 1  ;;  %s993_s15 = sadd.s32 %s2549_s27, %s992_s24  ;;  %s998_s13 = sshra.s32 %s997_s12, 7 }
 0x160   : > { %s994_s22 = sld [smem:[#allocation3 + %s993_s15]]  ;;  %s1000_s8 = sadd.s32 %s998_s13, %s3202_s25 }
 0x161   : > { %v969_v14 = vsel %vm333_vm6, %v968_v11, %v961_v12  ;;  %s2550_s1 = sshll.u32 %s1000_s8, 8  ;;  %s1003_s16 = sand.u32 127, %s997_s12 }
 0x162   : > { %v971_v15 = vadd.f32 %v970_v13, %v969_v14  ;;  %s1004_s9 = sadd.s32 %s3206_s5, %s1003_s16  ;;  %s1009_s4 = sadd.s32 51, %s3194_s7 }
 0x163   : > { %s1005_s17 = sadd.s32 %s2550_s1, %s1004_s9  ;;  %s1010_s6 = sshra.s32 %s1009_s4, 7 }
 0x164   : > { %972 = vst [vmem:[%s3255_s21 + $0x28] sm:$0xff] %v971_v15  ;;  %s1006_s11 = sld [smem:[#allocation3 + %s1005_s17]]  ;;  %s1012_s26 = sadd.s32 %s1010_s6, %s3202_s25 }
 0x165   : > { %s1015_s18 = sand.u32 127, %s1009_s4  ;;  %s2551_s19 = sshll.u32 %s1012_s26, 8 }
 0x166   : > { %s1016_s30 = sadd.s32 %s3206_s5, %s1015_s18  ;;  %s1021_s27 = sadd.s32 52, %s3194_s7 }
 0x167   : > { %s1017_s29 = sadd.s32 %s2551_s19, %s1016_s30  ;;  %s1022_s2 = sshra.s32 %s1021_s27, 7 }
 0x168   : > { %s1018_s24 = sld [smem:[#allocation3 + %s1017_s29]]  ;;  %s1024_s12 = sadd.s32 %s1022_s2, %s3202_s25 }
 0x169   : > { %s2552_s15 = sshll.u32 %s1024_s12, 8  ;;  %s1027_s13 = sand.u32 127, %s1021_s27 }
 0x16a   : > { %s1033_s8 = sadd.s32 53, %s3194_s7  ;;  %s995_s1 = scalar_lea.vmem [#allocation4], %s994_s22 }
 0x16b   : > { %v996_v16 = vld [vmem:[%s995_s1] sm:$0x1]  ;;  %s1028_s16 = sadd.s32 %s3206_s5, %s1027_s13  ;;  %s1034_s9 = sshra.s32 %s1033_s8, 7 }
 0x16c   : > { %s1029_s17 = sadd.s32 %s2552_s15, %s1028_s16  ;;  %s1036_s4 = sadd.s32 %s1034_s9, %s3202_s25  ;;  %v1070_v18 = vrot.slane %v996_v16, 7 }
 0x16d   : > { %s1030_s6 = sld [smem:[#allocation3 + %s1029_s17]]  ;;  %s2553_s26 = sshll.u32 %s1036_s4, 8 }
 0x16e   : > { %s1007_s18 = scalar_lea.vmem [#allocation4], %s1006_s11  ;;  %s1039_s19 = sand.u32 127, %s1033_s8 }
 0x16f   : > { %v1008_v17 = vld [vmem:[%s1007_s18] sm:$0x1]  ;;  %s983_s30 = scalar_lea.vmem [#allocation4], %s3427_s20  ;;  %s1040_s27 = sadd.s32 %s3206_s5, %s1039_s19 }
 0x170   : > { %v984_v19 = vld [vmem:[%s983_s30] sm:$0x1]  ;;  %s1045_s29 = sadd.s32 54, %s3194_s7  ;;  %s1041_s2 = sadd.s32 %s2553_s26, %s1040_s27  ;;  %v1073_v21 = vrot.slane %v1008_v17, 6 }
 0x171   : > { %s1046_s22 = sshra.s32 %s1045_s29, 7  ;;  %s1019_s12 = scalar_lea.vmem [#allocation4], %s1018_s24  ;;  %v1090_v22 = vsel %vm321_vm0, %v984_v19, %v1070_v18 }
 0x172   : > { %v1020_v20 = vld [vmem:[%s1019_s12] sm:$0x1]  ;;  %s1042_s15 = sld [smem:[#allocation3 + %s1041_s2]]  ;;  %s1048_s13 = sadd.s32 %s1046_s22, %s3202_s25  ;;  %v1091_v25 = vsel %vm323_vm1, %v1090_v22, %v1073_v21  ;;  %v1351_v21 = vld [vmem:[%s3186_s14 + $0x40] sm:$0xff] }
 0x173   : > { %s2554_s1 = sshll.u32 %s1048_s13, 8  ;;  %s1051_s16 = sand.u32 127, %s1045_s29  ;;  %v1076_v24 = vrot.slane %v1020_v20, 5 }
 0x174   : > { %s1052_s11 = sadd.s32 %s3206_s5, %s1051_s16  ;;  %s1031_s8 = scalar_lea.vmem [#allocation4], %s1030_s6 }
 0x175   : > { %v1032_v23 = vld [vmem:[%s1031_s8] sm:$0x1]  ;;  %s1053_s20 = sadd.s32 %s2554_s1, %s1052_s11  ;;  %s1057_s9 = sadd.s32 55, %s3194_s7  ;;  %v1092_v28 = vsel %vm325_vm2, %v1091_v25, %v1076_v24 }
 0x176   : > { %s1054_s17 = sld [smem:[#allocation3 + %s1053_s20]]  ;;  %s1058_s24 = sshra.s32 %s1057_s9, 7  ;;  %v1079_v26 = vrot.slane %v1032_v23, 4 }
 0x177   : > { %s1060_s4 = sadd.s32 %s1058_s24, %s3202_s25  ;;  %s1063_s26 = sand.u32 127, %s1057_s9 }
 0x178   : > { %s2555_s18 = sshll.u32 %s1060_s4, 8  ;;  %s1043_s19 = scalar_lea.vmem [#allocation4], %s1042_s15  ;;  %v1093_v30 = vsel %vm327_vm3, %v1092_v28, %v1079_v26 }
 0x179   : > { %v1044_v27 = vld [vmem:[%s1043_s19] sm:$0x1]  ;;  %s1064_s30 = sadd.s32 %s3206_s5, %s1063_s26  ;;  %s1100_s6 = sadd.s32 56, %s3194_s7 }
 0x17a   : > { %s1065_s27 = sadd.s32 %s2555_s18, %s1064_s30  ;;  %s1101_s29 = sshra.s32 %s1100_s6, 7  ;;  %v1082_v29 = vrot.slane %v1044_v27, 3 }
 0x17b   : > { %s1066_s2 = sld [smem:[#allocation3 + %s1065_s27]]  ;;  %s1103_s22 = sadd.s32 %s1101_s29, %s3202_s25 }
 0x17c   : > { %s2556_s12 = sshll.u32 %s1103_s22, 8  ;;  %s1055_s13 = scalar_lea.vmem [#allocation4], %s1054_s17  ;;  %v1094_v33 = vsel %vm329_vm4, %v1093_v30, %v1082_v29 }
 0x17d   : > { %v1056_v31 = vld [vmem:[%s1055_s13] sm:$0x1]  ;;  %s1106_s15 = sand.u32 127, %s1100_s6  ;;  %s1112_s1 = sadd.s32 57, %s3194_s7 }
 0x17e   : > { %v1085_v32 = vrot.slane %v1056_v31, 2  ;;  %s1107_s16 = sadd.s32 %s3206_s5, %s1106_s15  ;;  %s1113_s11 = sshra.s32 %s1112_s1, 7 }
 0x17f   : > { %s1108_s8 = sadd.s32 %s2556_s12, %s1107_s16  ;;  %s1115_s20 = sadd.s32 %s1113_s11, %s3202_s25 }
 0x180   : > { %s3463_s9 = sld [smem:[#allocation3 + %s1108_s8]]  ;;  %s2557_s24 = sshll.u32 %s1115_s20, 8  ;;  %v1095_v35 = vsel %vm331_vm5, %v1094_v33, %v1085_v32 }
 0x181   : > { %s1118_s4 = sand.u32 127, %s1112_s1  ;;  %s1067_s17 = scalar_lea.vmem [#allocation4], %s1066_s2 }
 0x182   : > { %v1068_v34 = vld [vmem:[%s1067_s17] sm:$0x1]  ;;  %s1119_s26 = sadd.s32 %s3206_s5, %s1118_s4  ;;  %s1124_s18 = sadd.s32 58, %s3194_s7 }
 0x183   : > { %v1088_v36 = vrot.slane %v1068_v34, 1  ;;  %s1120_s19 = sadd.s32 %s2557_s24, %s1119_s26  ;;  %s1125_s30 = sshra.s32 %s1124_s18, 7 }
 0x184   : > { %s1121_s6 = sld [smem:[#allocation3 + %s1120_s19]]  ;;  %s1127_s27 = sadd.s32 %s1125_s30, %s3202_s25 }
 0x185   : > { %v1096_v38 = vsel %vm333_vm6, %v1095_v35, %v1088_v36  ;;  %s2558_s29 = sshll.u32 %s1127_s27, 8  ;;  %s1130_s2 = sand.u32 127, %s1124_s18 }
 0x186   : > { %v1098_v39 = vadd.f32 %v1097_v37, %v1096_v38  ;;  %s1131_s22 = sadd.s32 %s3206_s5, %s1130_s2  ;;  %s1136_s13 = sadd.s32 59, %s3194_s7 }
 0x187   : > { %s1132_s12 = sadd.s32 %s2558_s29, %s1131_s22  ;;  %s1137_s1 = sshra.s32 %s1136_s13, 7 }
 0x188   : > { %1099 = vst [vmem:[%s3255_s21 + $0x30] sm:$0xff] %v1098_v39  ;;  %s1133_s15 = sld [smem:[#allocation3 + %s1132_s12]]  ;;  %s1139_s16 = sadd.s32 %s1137_s1, %s3202_s25 }
 0x189   : > { %s1142_s11 = sand.u32 127, %s1136_s13  ;;  %s2559_s8 = sshll.u32 %s1139_s16, 8 }
 0x18a   : > { %s1143_s20 = sadd.s32 %s3206_s5, %s1142_s11  ;;  %s1148_s24 = sadd.s32 60, %s3194_s7 }
 0x18b   : > { %s1144_s4 = sadd.s32 %s2559_s8, %s1143_s20  ;;  %s1149_s17 = sshra.s32 %s1148_s24, 7 }
 0x18c   : > { %s1145_s26 = sld [smem:[#allocation3 + %s1144_s4]]  ;;  %s1151_s18 = sadd.s32 %s1149_s17, %s3202_s25 }
 0x18d   : > { %s2560_s19 = sshll.u32 %s1151_s18, 8  ;;  %s1154_s30 = sand.u32 127, %s1148_s24 }
 0x18e   : > { %s1160_s27 = sadd.s32 61, %s3194_s7  ;;  %s1122_s29 = scalar_lea.vmem [#allocation4], %s1121_s6 }
 0x18f   : > { %v1123_v40 = vld [vmem:[%s1122_s29] sm:$0x1]  ;;  %s1155_s2 = sadd.s32 %s3206_s5, %s1154_s30  ;;  %s1161_s22 = sshra.s32 %s1160_s27, 7 }
 0x190   : > { %s1156_s12 = sadd.s32 %s2560_s19, %s1155_s2  ;;  %s1163_s13 = sadd.s32 %s1161_s22, %s3202_s25  ;;  %v1197_v42 = vrot.slane %v1123_v40, 7 }
 0x191   : > { %s1157_s1 = sld [smem:[#allocation3 + %s1156_s12]]  ;;  %s2561_s16 = sshll.u32 %s1163_s13, 8 }
 0x192   : > { %s1134_s11 = scalar_lea.vmem [#allocation4], %s1133_s15  ;;  %s1166_s8 = sand.u32 127, %s1160_s27 }
 0x193   : > { %v1135_v41 = vld [vmem:[%s1134_s11] sm:$0x1]  ;;  %s1110_s20 = scalar_lea.vmem [#allocation4], %s3463_s9  ;;  %s1167_s24 = sadd.s32 %s3206_s5, %s1166_s8 }
 0x194   : > { %v1111_v43 = vld [vmem:[%s1110_s20] sm:$0x1]  ;;  %s1172_s4 = sadd.s32 62, %s3194_s7  ;;  %s1168_s17 = sadd.s32 %s2561_s16, %s1167_s24  ;;  %v1200_v45 = vrot.slane %v1135_v41, 6 }
 0x195   : > { %s1173_s6 = sshra.s32 %s1172_s4, 7  ;;  %s1146_s18 = scalar_lea.vmem [#allocation4], %s1145_s26  ;;  %v1217_v46 = vsel %vm321_vm0, %v1111_v43, %v1197_v42 }
 0x196   : > { %v1147_v44 = vld [vmem:[%s1146_s18] sm:$0x1]  ;;  %s1169_s19 = sld [smem:[#allocation3 + %s1168_s17]]  ;;  %s1175_s30 = sadd.s32 %s1173_s6, %s3202_s25  ;;  %v1218_v49 = vsel %vm323_vm1, %v1217_v46, %v1200_v45  ;;  %v1478_v45 = vld [vmem:[%s3186_s14 + $0x48] sm:$0xff] }
 0x197   : > { %s2562_s29 = sshll.u32 %s1175_s30, 8  ;;  %s1178_s2 = sand.u32 127, %s1172_s4  ;;  %v1203_v48 = vrot.slane %v1147_v44, 5 }
 0x198   : > { %s1179_s15 = sadd.s32 %s3206_s5, %s1178_s2  ;;  %s1158_s27 = scalar_lea.vmem [#allocation4], %s1157_s1 }
 0x199   : > { %v1159_v47 = vld [vmem:[%s1158_s27] sm:$0x1]  ;;  %s1180_s9 = sadd.s32 %s2562_s29, %s1179_s15  ;;  %s1184_s22 = sadd.s32 63, %s3194_s7  ;;  %v1219_v52 = vsel %vm325_vm2, %v1218_v49, %v1203_v48 }
 0x19a   : > { %s1181_s12 = sld [smem:[#allocation3 + %s1180_s9]]  ;;  %s1185_s26 = sshra.s32 %s1184_s22, 7  ;;  %v1206_v50 = vrot.slane %v1159_v47, 4 }
 0x19b   : > { %s1187_s13 = sadd.s32 %s1185_s26, %s3202_s25  ;;  %s1190_s16 = sand.u32 127, %s1184_s22 }
 0x19c   : > { %s2563_s11 = sshll.u32 %s1187_s13, 8  ;;  %s1170_s8 = scalar_lea.vmem [#allocation4], %s1169_s19  ;;  %v1220_v54 = vsel %vm327_vm3, %v1219_v52, %v1206_v50 }
 0x19d   : > { %v1171_v51 = vld [vmem:[%s1170_s8] sm:$0x1]  ;;  %s1191_s20 = sadd.s32 %s3206_s5, %s1190_s16  ;;  %s1227_s1 = sadd.s32 64, %s3194_s7 }
 0x19e   : > { %s1192_s24 = sadd.s32 %s2563_s11, %s1191_s20  ;;  %s1228_s4 = sshra.s32 %s1227_s1, 7  ;;  %v1209_v53 = vrot.slane %v1171_v51, 3 }
 0x19f   : > { %s1193_s17 = sld [smem:[#allocation3 + %s1192_s24]]  ;;  %s1230_s6 = sadd.s32 %s1228_s4, %s3202_s25 }
 0x1a0   : > { %s2564_s18 = sshll.u32 %s1230_s6, 8  ;;  %s1182_s30 = scalar_lea.vmem [#allocation4], %s1181_s12  ;;  %v1221_v57 = vsel %vm329_vm4, %v1220_v54, %v1209_v53 }
 0x1a1   : > { %v1183_v55 = vld [vmem:[%s1182_s30] sm:$0x1]  ;;  %s1233_s19 = sand.u32 127, %s1227_s1  ;;  %s1239_s29 = sadd.s32 65, %s3194_s7 }
 0x1a2   : > { %v1212_v56 = vrot.slane %v1183_v55, 2  ;;  %s1234_s2 = sadd.s32 %s3206_s5, %s1233_s19  ;;  %s1240_s15 = sshra.s32 %s1239_s29, 7 }
 0x1a3   : > { %s1235_s27 = sadd.s32 %s2564_s18, %s1234_s2  ;;  %s1242_s9 = sadd.s32 %s1240_s15, %s3202_s25 }
 0x1a4   : > { %s3499_s22 = sld [smem:[#allocation3 + %s1235_s27]]  ;;  %s2565_s26 = sshll.u32 %s1242_s9, 8  ;;  %v1222_v59 = vsel %vm331_vm5, %v1221_v57, %v1212_v56 }
 0x1a5   : > { %s1245_s13 = sand.u32 127, %s1239_s29  ;;  %s1194_s12 = scalar_lea.vmem [#allocation4], %s1193_s17 }
 0x1a6   : > { %v1195_v58 = vld [vmem:[%s1194_s12] sm:$0x1]  ;;  %s1246_s16 = sadd.s32 %s3206_s5, %s1245_s13  ;;  %s1251_s11 = sadd.s32 66, %s3194_s7 }
 0x1a7   : > { %v1215_v60 = vrot.slane %v1195_v58, 1  ;;  %s1247_s8 = sadd.s32 %s2565_s26, %s1246_s16  ;;  %s1252_s20 = sshra.s32 %s1251_s11, 7 }
 0x1a8   : > { %s1248_s1 = sld [smem:[#allocation3 + %s1247_s8]]  ;;  %s1254_s24 = sadd.s32 %s1252_s20, %s3202_s25 }
 0x1a9   : > { %v1223_v62 = vsel %vm333_vm6, %v1222_v59, %v1215_v60  ;;  %s2566_s4 = sshll.u32 %s1254_s24, 8  ;;  %s1257_s17 = sand.u32 127, %s1251_s11 }
 0x1aa   : > { %v1225_v63 = vadd.f32 %v1224_v61, %v1223_v62  ;;  %s1258_s6 = sadd.s32 %s3206_s5, %s1257_s17  ;;  %s1263_s30 = sadd.s32 67, %s3194_s7 }
 0x1ab   : > { %s1259_s18 = sadd.s32 %s2566_s4, %s1258_s6  ;;  %s1264_s29 = sshra.s32 %s1263_s30, 7 }
 0x1ac   : > { %1226 = vst [vmem:[%s3255_s21 + $0x38] sm:$0xff] %v1225_v63  ;;  %s1260_s19 = sld [smem:[#allocation3 + %s1259_s18]]  ;;  %s1266_s2 = sadd.s32 %s1264_s29, %s3202_s25 }
 0x1ad   : > { %s1269_s15 = sand.u32 127, %s1263_s30  ;;  %s2567_s27 = sshll.u32 %s1266_s2, 8 }
 0x1ae   : > { %s1270_s9 = sadd.s32 %s3206_s5, %s1269_s15  ;;  %s1275_s26 = sadd.s32 68, %s3194_s7 }
 0x1af   : > { %s1271_s13 = sadd.s32 %s2567_s27, %s1270_s9  ;;  %s1276_s12 = sshra.s32 %s1275_s26, 7 }
 0x1b0   : > { %s1272_s16 = sld [smem:[#allocation3 + %s1271_s13]]  ;;  %s1278_s11 = sadd.s32 %s1276_s12, %s3202_s25 }
 0x1b1   : > { %s2568_s8 = sshll.u32 %s1278_s11, 8  ;;  %s1281_s20 = sand.u32 127, %s1275_s26 }
 0x1b2   : > { %s1287_s24 = sadd.s32 69, %s3194_s7  ;;  %s1249_s4 = scalar_lea.vmem [#allocation4], %s1248_s1 }
 0x1b3   : > { %v1250_v0 = vld [vmem:[%s1249_s4] sm:$0x1]  ;;  %s1282_s17 = sadd.s32 %s3206_s5, %s1281_s20  ;;  %s1288_s6 = sshra.s32 %s1287_s24, 7 }
 0x1b4   : > { %s1283_s18 = sadd.s32 %s2568_s8, %s1282_s17  ;;  %s1290_s30 = sadd.s32 %s1288_s6, %s3202_s25  ;;  %v1324_v2 = vrot.slane %v1250_v0, 7 }
 0x1b5   : > { %s1284_s29 = sld [smem:[#allocation3 + %s1283_s18]]  ;;  %s2569_s2 = sshll.u32 %s1290_s30, 8 }
 0x1b6   : > { %s1261_s15 = scalar_lea.vmem [#allocation4], %s1260_s19  ;;  %s1293_s27 = sand.u32 127, %s1287_s24 }
 0x1b7   : > { %v1262_v1 = vld [vmem:[%s1261_s15] sm:$0x1]  ;;  %s1237_s9 = scalar_lea.vmem [#allocation4], %s3499_s22  ;;  %s1294_s26 = sadd.s32 %s3206_s5, %s1293_s27 }
 0x1b8   : > { %v1238_v3 = vld [vmem:[%s1237_s9] sm:$0x1]  ;;  %s1299_s13 = sadd.s32 70, %s3194_s7  ;;  %s1295_s12 = sadd.s32 %s2569_s2, %s1294_s26  ;;  %v1327_v5 = vrot.slane %v1262_v1, 6 }
 0x1b9   : > { %s1300_s1 = sshra.s32 %s1299_s13, 7  ;;  %s1273_s11 = scalar_lea.vmem [#allocation4], %s1272_s16  ;;  %v1344_v6 = vsel %vm321_vm0, %v1238_v3, %v1324_v2 }
 0x1ba   : > { %v1274_v4 = vld [vmem:[%s1273_s11] sm:$0x1]  ;;  %s1296_s8 = sld [smem:[#allocation3 + %s1295_s12]]  ;;  %s1302_s20 = sadd.s32 %s1300_s1, %s3202_s25  ;;  %v1345_v9 = vsel %vm323_vm1, %v1344_v6, %v1327_v5  ;;  %v1605_v5 = vld [vmem:[%s3186_s14 + $0x50] sm:$0xff] }
 0x1bb   : > { %s2570_s4 = sshll.u32 %s1302_s20, 8  ;;  %s1305_s17 = sand.u32 127, %s1299_s13  ;;  %v1330_v8 = vrot.slane %v1274_v4, 5 }
 0x1bc   : > { %s1306_s19 = sadd.s32 %s3206_s5, %s1305_s17  ;;  %s1285_s24 = scalar_lea.vmem [#allocation4], %s1284_s29 }
 0x1bd   : > { %v1286_v7 = vld [vmem:[%s1285_s24] sm:$0x1]  ;;  %s1307_s22 = sadd.s32 %s2570_s4, %s1306_s19  ;;  %s1311_s6 = sadd.s32 71, %s3194_s7  ;;  %v1346_v12 = vsel %vm325_vm2, %v1345_v9, %v1330_v8 }
 0x1be   : > { %s1308_s18 = sld [smem:[#allocation3 + %s1307_s22]]  ;;  %s1312_s16 = sshra.s32 %s1311_s6, 7  ;;  %v1333_v10 = vrot.slane %v1286_v7, 4 }
 0x1bf   : > { %s1314_s30 = sadd.s32 %s1312_s16, %s3202_s25  ;;  %s1317_s2 = sand.u32 127, %s1311_s6 }
 0x1c0   : > { %s2571_s15 = sshll.u32 %s1314_s30, 8  ;;  %s1297_s27 = scalar_lea.vmem [#allocation4], %s1296_s8  ;;  %v1347_v14 = vsel %vm327_vm3, %v1346_v12, %v1333_v10 }
 0x1c1   : > { %v1298_v11 = vld [vmem:[%s1297_s27] sm:$0x1]  ;;  %s1318_s9 = sadd.s32 %s3206_s5, %s1317_s2  ;;  %s1354_s29 = sadd.s32 72, %s3194_s7 }
 0x1c2   : > { %s1319_s26 = sadd.s32 %s2571_s15, %s1318_s9  ;;  %s1355_s13 = sshra.s32 %s1354_s29, 7  ;;  %v1336_v13 = vrot.slane %v1298_v11, 3 }
 0x1c3   : > { %s1320_s12 = sld [smem:[#allocation3 + %s1319_s26]]  ;;  %s1357_s1 = sadd.s32 %s1355_s13, %s3202_s25 }
 0x1c4   : > { %s2572_s11 = sshll.u32 %s1357_s1, 8  ;;  %s1309_s20 = scalar_lea.vmem [#allocation4], %s1308_s18  ;;  %v1348_v17 = vsel %vm329_vm4, %v1347_v14, %v1336_v13 }
 0x1c5   : > { %v1310_v15 = vld [vmem:[%s1309_s20] sm:$0x1]  ;;  %s1360_s8 = sand.u32 127, %s1354_s29  ;;  %s1366_s4 = sadd.s32 73, %s3194_s7 }
 0x1c6   : > { %v1339_v16 = vrot.slane %v1310_v15, 2  ;;  %s1361_s17 = sadd.s32 %s3206_s5, %s1360_s8  ;;  %s1367_s19 = sshra.s32 %s1366_s4, 7 }
 0x1c7   : > { %s1362_s24 = sadd.s32 %s2572_s11, %s1361_s17  ;;  %s1369_s22 = sadd.s32 %s1367_s19, %s3202_s25 }
 0x1c8   : > { %s3535_s6 = sld [smem:[#allocation3 + %s1362_s24]]  ;;  %s2573_s16 = sshll.u32 %s1369_s22, 8  ;;  %v1349_v19 = vsel %vm331_vm5, %v1348_v17, %v1339_v16 }
 0x1c9   : > { %s1372_s30 = sand.u32 127, %s1366_s4  ;;  %s1321_s18 = scalar_lea.vmem [#allocation4], %s1320_s12 }
 0x1ca   : > { %v1322_v18 = vld [vmem:[%s1321_s18] sm:$0x1]  ;;  %s1373_s2 = sadd.s32 %s3206_s5, %s1372_s30  ;;  %s1378_s15 = sadd.s32 74, %s3194_s7 }
 0x1cb   : > { %v1342_v20 = vrot.slane %v1322_v18, 1  ;;  %s1374_s27 = sadd.s32 %s2573_s16, %s1373_s2  ;;  %s1379_s9 = sshra.s32 %s1378_s15, 7 }
 0x1cc   : > { %s1375_s29 = sld [smem:[#allocation3 + %s1374_s27]]  ;;  %s1381_s26 = sadd.s32 %s1379_s9, %s3202_s25 }
 0x1cd   : > { %v1350_v22 = vsel %vm333_vm6, %v1349_v19, %v1342_v20  ;;  %s2574_s13 = sshll.u32 %s1381_s26, 8  ;;  %s1384_s12 = sand.u32 127, %s1378_s15 }
 0x1ce   : > { %v1352_v23 = vadd.f32 %v1351_v21, %v1350_v22  ;;  %s1385_s1 = sadd.s32 %s3206_s5, %s1384_s12  ;;  %s1390_s20 = sadd.s32 75, %s3194_s7 }
 0x1cf   : > { %s1386_s11 = sadd.s32 %s2574_s13, %s1385_s1  ;;  %s1391_s4 = sshra.s32 %s1390_s20, 7 }
 0x1d0   : > { %1353 = vst [vmem:[%s3255_s21 + $0x40] sm:$0xff] %v1352_v23  ;;  %s1387_s8 = sld [smem:[#allocation3 + %s1386_s11]]  ;;  %s1393_s17 = sadd.s32 %s1391_s4, %s3202_s25 }
 0x1d1   : > { %s1396_s19 = sand.u32 127, %s1390_s20  ;;  %s2575_s24 = sshll.u32 %s1393_s17, 8 }
 0x1d2   : > { %s1397_s22 = sadd.s32 %s3206_s5, %s1396_s19  ;;  %s1402_s16 = sadd.s32 76, %s3194_s7 }
 0x1d3   : > { %s1398_s30 = sadd.s32 %s2575_s24, %s1397_s22  ;;  %s1403_s18 = sshra.s32 %s1402_s16, 7 }
 0x1d4   : > { %s1399_s2 = sld [smem:[#allocation3 + %s1398_s30]]  ;;  %s1405_s15 = sadd.s32 %s1403_s18, %s3202_s25 }
 0x1d5   : > { %s2576_s27 = sshll.u32 %s1405_s15, 8  ;;  %s1408_s9 = sand.u32 127, %s1402_s16 }
 0x1d6   : > { %s1414_s26 = sadd.s32 77, %s3194_s7  ;;  %s1376_s13 = scalar_lea.vmem [#allocation4], %s1375_s29 }
 0x1d7   : > { %v1377_v24 = vld [vmem:[%s1376_s13] sm:$0x1]  ;;  %s1409_s12 = sadd.s32 %s3206_s5, %s1408_s9  ;;  %s1415_s1 = sshra.s32 %s1414_s26, 7 }
 0x1d8   : > { %s1410_s11 = sadd.s32 %s2576_s27, %s1409_s12  ;;  %s1417_s20 = sadd.s32 %s1415_s1, %s3202_s25  ;;  %v1451_v26 = vrot.slane %v1377_v24, 7 }
 0x1d9   : > { %s1411_s4 = sld [smem:[#allocation3 + %s1410_s11]]  ;;  %s2577_s17 = sshll.u32 %s1417_s20, 8 }
 0x1da   : > { %s1388_s19 = scalar_lea.vmem [#allocation4], %s1387_s8  ;;  %s1420_s24 = sand.u32 127, %s1414_s26 }
 0x1db   : > { %v1389_v25 = vld [vmem:[%s1388_s19] sm:$0x1]  ;;  %s1364_s22 = scalar_lea.vmem [#allocation4], %s3535_s6  ;;  %s1421_s16 = sadd.s32 %s3206_s5, %s1420_s24 }
 0x1dc   : > { %v1365_v27 = vld [vmem:[%s1364_s22] sm:$0x1]  ;;  %s1426_s30 = sadd.s32 78, %s3194_s7  ;;  %s1422_s18 = sadd.s32 %s2577_s17, %s1421_s16  ;;  %v1454_v29 = vrot.slane %v1389_v25, 6 }
 0x1dd   : > { %s1427_s29 = sshra.s32 %s1426_s30, 7  ;;  %s1400_s15 = scalar_lea.vmem [#allocation4], %s1399_s2  ;;  %v1471_v30 = vsel %vm321_vm0, %v1365_v27, %v1451_v26 }
 0x1de   : > { %v1401_v28 = vld [vmem:[%s1400_s15] sm:$0x1]  ;;  %s1423_s27 = sld [smem:[#allocation3 + %s1422_s18]]  ;;  %s1429_s9 = sadd.s32 %s1427_s29, %s3202_s25  ;;  %v1472_v33 = vsel %vm323_vm1, %v1471_v30, %v1454_v29 }
 0x1df   : > { %s2578_s13 = sshll.u32 %s1429_s9, 8  ;;  %s1432_s12 = sand.u32 127, %s1426_s30  ;;  %v1457_v32 = vrot.slane %v1401_v28, 5  ;;  %v1732_v29 = vld [vmem:[%s3186_s14 + $0x58] sm:$0xff] }
 0x1e0   : > { %s1433_s8 = sadd.s32 %s3206_s5, %s1432_s12  ;;  %s1412_s26 = scalar_lea.vmem [#allocation4], %s1411_s4 }
 0x1e1   : > { %v1413_v31 = vld [vmem:[%s1412_s26] sm:$0x1]  ;;  %s1434_s6 = sadd.s32 %s2578_s13, %s1433_s8  ;;  %s1438_s1 = sadd.s32 79, %s3194_s7  ;;  %v1473_v36 = vsel %vm325_vm2, %v1472_v33, %v1457_v32 }
 0x1e2   : > { %s1435_s11 = sld [smem:[#allocation3 + %s1434_s6]]  ;;  %s1439_s2 = sshra.s32 %s1438_s1, 7  ;;  %v1460_v34 = vrot.slane %v1413_v31, 4 }
 0x1e3   : > { %s1441_s20 = sadd.s32 %s1439_s2, %s3202_s25  ;;  %s1444_s17 = sand.u32 127, %s1438_s1 }
 0x1e4   : > { %s2579_s19 = sshll.u32 %s1441_s20, 8  ;;  %s1424_s24 = scalar_lea.vmem [#allocation4], %s1423_s27  ;;  %v1474_v38 = vsel %vm327_vm3, %v1473_v36, %v1460_v34 }
 0x1e5   : > { %v1425_v35 = vld [vmem:[%s1424_s24] sm:$0x1]  ;;  %s1445_s22 = sadd.s32 %s3206_s5, %s1444_s17  ;;  %s1481_s4 = sadd.s32 80, %s3194_s7 }
 0x1e6   : > { %s1446_s16 = sadd.s32 %s2579_s19, %s1445_s22  ;;  %s1482_s30 = sshra.s32 %s1481_s4, 7  ;;  %v1463_v37 = vrot.slane %v1425_v35, 3 }
 0x1e7   : > { %s1447_s18 = sld [smem:[#allocation3 + %s1446_s16]]  ;;  %s1484_s29 = sadd.s32 %s1482_s30, %s3202_s25 }
 0x1e8   : > { %s2580_s15 = sshll.u32 %s1484_s29, 8  ;;  %s1436_s9 = scalar_lea.vmem [#allocation4], %s1435_s11  ;;  %v1475_v41 = vsel %vm329_vm4, %v1474_v38, %v1463_v37 }
 0x1e9   : > { %v1437_v39 = vld [vmem:[%s1436_s9] sm:$0x1]  ;;  %s1487_s27 = sand.u32 127, %s1481_s4  ;;  %s1493_s13 = sadd.s32 81, %s3194_s7 }
 0x1ea   : > { %v1466_v40 = vrot.slane %v1437_v39, 2  ;;  %s1488_s12 = sadd.s32 %s3206_s5, %s1487_s27  ;;  %s1494_s8 = sshra.s32 %s1493_s13, 7 }
 0x1eb   : > { %s1489_s26 = sadd.s32 %s2580_s15, %s1488_s12  ;;  %s1496_s6 = sadd.s32 %s1494_s8, %s3202_s25 }
 0x1ec   : > { %s3571_s1 = sld [smem:[#allocation3 + %s1489_s26]]  ;;  %s2581_s2 = sshll.u32 %s1496_s6, 8  ;;  %v1476_v43 = vsel %vm331_vm5, %v1475_v41, %v1466_v40 }
 0x1ed   : > { %s1499_s20 = sand.u32 127, %s1493_s13  ;;  %s1448_s11 = scalar_lea.vmem [#allocation4], %s1447_s18 }
 0x1ee   : > { %v1449_v42 = vld [vmem:[%s1448_s11] sm:$0x1]  ;;  %s1500_s17 = sadd.s32 %s3206_s5, %s1499_s20  ;;  %s1505_s19 = sadd.s32 82, %s3194_s7 }
 0x1ef   : > { %v1469_v44 = vrot.slane %v1449_v42, 1  ;;  %s1501_s24 = sadd.s32 %s2581_s2, %s1500_s17  ;;  %s1506_s22 = sshra.s32 %s1505_s19, 7 }
 0x1f0   : > { %s1502_s4 = sld [smem:[#allocation3 + %s1501_s24]]  ;;  %s1508_s16 = sadd.s32 %s1506_s22, %s3202_s25 }
 0x1f1   : > { %v1477_v46 = vsel %vm333_vm6, %v1476_v43, %v1469_v44  ;;  %s2582_s30 = sshll.u32 %s1508_s16, 8  ;;  %s1511_s18 = sand.u32 127, %s1505_s19 }
 0x1f2   : > { %v1479_v47 = vadd.f32 %v1478_v45, %v1477_v46  ;;  %s1512_s29 = sadd.s32 %s3206_s5, %s1511_s18  ;;  %s1517_s9 = sadd.s32 83, %s3194_s7 }
 0x1f3   : > { %s1513_s15 = sadd.s32 %s2582_s30, %s1512_s29  ;;  %s1518_s13 = sshra.s32 %s1517_s9, 7 }
 0x1f4   : > { %1480 = vst [vmem:[%s3255_s21 + $0x48] sm:$0xff] %v1479_v47  ;;  %s1514_s27 = sld [smem:[#allocation3 + %s1513_s15]]  ;;  %s1520_s12 = sadd.s32 %s1518_s13, %s3202_s25 }
 0x1f5   : > { %s1523_s8 = sand.u32 127, %s1517_s9  ;;  %s2583_s26 = sshll.u32 %s1520_s12, 8 }
 0x1f6   : > { %s1524_s6 = sadd.s32 %s3206_s5, %s1523_s8  ;;  %s1529_s2 = sadd.s32 84, %s3194_s7 }
 0x1f7   : > { %s1525_s20 = sadd.s32 %s2583_s26, %s1524_s6  ;;  %s1530_s11 = sshra.s32 %s1529_s2, 7 }
 0x1f8   : > { %s1526_s17 = sld [smem:[#allocation3 + %s1525_s20]]  ;;  %s1532_s19 = sadd.s32 %s1530_s11, %s3202_s25 }
 0x1f9   : > { %s2584_s24 = sshll.u32 %s1532_s19, 8  ;;  %s1535_s22 = sand.u32 127, %s1529_s2 }
 0x1fa   : > { %s1541_s16 = sadd.s32 85, %s3194_s7  ;;  %s1503_s30 = scalar_lea.vmem [#allocation4], %s1502_s4 }
 0x1fb   : > { %v1504_v48 = vld [vmem:[%s1503_s30] sm:$0x1]  ;;  %s1536_s18 = sadd.s32 %s3206_s5, %s1535_s22  ;;  %s1542_s29 = sshra.s32 %s1541_s16, 7 }
 0x1fc   : > { %s1537_s15 = sadd.s32 %s2584_s24, %s1536_s18  ;;  %s1544_s9 = sadd.s32 %s1542_s29, %s3202_s25  ;;  %v1578_v50 = vrot.slane %v1504_v48, 7 }
 0x1fd   : > { %s1538_s13 = sld [smem:[#allocation3 + %s1537_s15]]  ;;  %s2585_s12 = sshll.u32 %s1544_s9, 8 }
 0x1fe   : > { %s1515_s8 = scalar_lea.vmem [#allocation4], %s1514_s27  ;;  %s1547_s26 = sand.u32 127, %s1541_s16 }
 0x1ff   : > { %v1516_v49 = vld [vmem:[%s1515_s8] sm:$0x1]  ;;  %s1491_s6 = scalar_lea.vmem [#allocation4], %s3571_s1  ;;  %s1548_s2 = sadd.s32 %s3206_s5, %s1547_s26 }
 0x200   : > { %v1492_v51 = vld [vmem:[%s1491_s6] sm:$0x1]  ;;  %s1553_s20 = sadd.s32 86, %s3194_s7  ;;  %s1549_s11 = sadd.s32 %s2585_s12, %s1548_s2  ;;  %v1581_v53 = vrot.slane %v1516_v49, 6 }
 0x201   : > { %s1554_s4 = sshra.s32 %s1553_s20, 7  ;;  %s1527_s19 = scalar_lea.vmem [#allocation4], %s1526_s17  ;;  %v1598_v54 = vsel %vm321_vm0, %v1492_v51, %v1578_v50 }
 0x202   : > { %v1528_v52 = vld [vmem:[%s1527_s19] sm:$0x1]  ;;  %s1550_s24 = sld [smem:[#allocation3 + %s1549_s11]]  ;;  %s1556_s22 = sadd.s32 %s1554_s4, %s3202_s25  ;;  %v1599_v57 = vsel %vm323_vm1, %v1598_v54, %v1581_v53  ;;  %v1859_v53 = vld [vmem:[%s3186_s14 + $0x60] sm:$0xff] }
 0x203   : > { %s2586_s30 = sshll.u32 %s1556_s22, 8  ;;  %s1559_s18 = sand.u32 127, %s1553_s20  ;;  %v1584_v56 = vrot.slane %v1528_v52, 5 }
 0x204   : > { %s1560_s27 = sadd.s32 %s3206_s5, %s1559_s18  ;;  %s1539_s16 = scalar_lea.vmem [#allocation4], %s1538_s13 }
 0x205   : > { %v1540_v55 = vld [vmem:[%s1539_s16] sm:$0x1]  ;;  %s1561_s1 = sadd.s32 %s2586_s30, %s1560_s27  ;;  %s1565_s29 = sadd.s32 87, %s3194_s7  ;;  %v1600_v60 = vsel %vm325_vm2, %v1599_v57, %v1584_v56 }
 0x206   : > { %s1562_s15 = sld [smem:[#allocation3 + %s1561_s1]]  ;;  %s1566_s17 = sshra.s32 %s1565_s29, 7  ;;  %v1587_v58 = vrot.slane %v1540_v55, 4 }
 0x207   : > { %s1568_s9 = sadd.s32 %s1566_s17, %s3202_s25  ;;  %s1571_s12 = sand.u32 127, %s1565_s29 }
 0x208   : > { %s2587_s8 = sshll.u32 %s1568_s9, 8  ;;  %s1551_s26 = scalar_lea.vmem [#allocation4], %s1550_s24  ;;  %v1601_v62 = vsel %vm327_vm3, %v1600_v60, %v1587_v58 }
 0x209   : > { %v1552_v59 = vld [vmem:[%s1551_s26] sm:$0x1]  ;;  %s1572_s6 = sadd.s32 %s3206_s5, %s1571_s12  ;;  %s1608_s13 = sadd.s32 88, %s3194_s7 }
 0x20a   : > { %s1573_s2 = sadd.s32 %s2587_s8, %s1572_s6  ;;  %s1609_s20 = sshra.s32 %s1608_s13, 7  ;;  %v1590_v61 = vrot.slane %v1552_v59, 3 }
 0x20b   : > { %s1574_s11 = sld [smem:[#allocation3 + %s1573_s2]]  ;;  %s1611_s4 = sadd.s32 %s1609_s20, %s3202_s25 }
 0x20c   : > { %s2588_s19 = sshll.u32 %s1611_s4, 8  ;;  %s1563_s22 = scalar_lea.vmem [#allocation4], %s1562_s15  ;;  %v1602_v1 = vsel %vm329_vm4, %v1601_v62, %v1590_v61 }
 0x20d   : > { %v1564_v63 = vld [vmem:[%s1563_s22] sm:$0x1]  ;;  %s1614_s24 = sand.u32 127, %s1608_s13  ;;  %s1620_s30 = sadd.s32 89, %s3194_s7 }
 0x20e   : > { %v1593_v0 = vrot.slane %v1564_v63, 2  ;;  %s1615_s18 = sadd.s32 %s3206_s5, %s1614_s24  ;;  %s1621_s27 = sshra.s32 %s1620_s30, 7 }
 0x20f   : > { %s1616_s16 = sadd.s32 %s2588_s19, %s1615_s18  ;;  %s1623_s1 = sadd.s32 %s1621_s27, %s3202_s25 }
 0x210   : > { %s3607_s29 = sld [smem:[#allocation3 + %s1616_s16]]  ;;  %s2589_s17 = sshll.u32 %s1623_s1, 8  ;;  %v1603_v3 = vsel %vm331_vm5, %v1602_v1, %v1593_v0 }
 0x211   : > { %s1626_s9 = sand.u32 127, %s1620_s30  ;;  %s1575_s15 = scalar_lea.vmem [#allocation4], %s1574_s11 }
 0x212   : > { %v1576_v2 = vld [vmem:[%s1575_s15] sm:$0x1]  ;;  %s1627_s12 = sadd.s32 %s3206_s5, %s1626_s9  ;;  %s1632_s8 = sadd.s32 90, %s3194_s7 }
 0x213   : > { %v1596_v4 = vrot.slane %v1576_v2, 1  ;;  %s1628_s26 = sadd.s32 %s2589_s17, %s1627_s12  ;;  %s1633_s6 = sshra.s32 %s1632_s8, 7 }
 0x214   : > { %s1629_s13 = sld [smem:[#allocation3 + %s1628_s26]]  ;;  %s1635_s2 = sadd.s32 %s1633_s6, %s3202_s25 }
 0x215   : > { %v1604_v6 = vsel %vm333_vm6, %v1603_v3, %v1596_v4  ;;  %s2590_s20 = sshll.u32 %s1635_s2, 8  ;;  %s1638_s11 = sand.u32 127, %s1632_s8 }
 0x216   : > { %v1606_v7 = vadd.f32 %v1605_v5, %v1604_v6  ;;  %s1639_s4 = sadd.s32 %s3206_s5, %s1638_s11  ;;  %s1644_s22 = sadd.s32 91, %s3194_s7 }
 0x217   : > { %s1640_s19 = sadd.s32 %s2590_s20, %s1639_s4  ;;  %s1645_s30 = sshra.s32 %s1644_s22, 7 }
 0x218   : > { %1607 = vst [vmem:[%s3255_s21 + $0x50] sm:$0xff] %v1606_v7  ;;  %s1641_s24 = sld [smem:[#allocation3 + %s1640_s19]]  ;;  %s1647_s18 = sadd.s32 %s1645_s30, %s3202_s25 }
 0x219   : > { %s1650_s27 = sand.u32 127, %s1644_s22  ;;  %s2591_s16 = sshll.u32 %s1647_s18, 8 }
 0x21a   : > { %s1651_s1 = sadd.s32 %s3206_s5, %s1650_s27  ;;  %s1656_s17 = sadd.s32 92, %s3194_s7 }
 0x21b   : > { %s1652_s9 = sadd.s32 %s2591_s16, %s1651_s1  ;;  %s1657_s15 = sshra.s32 %s1656_s17, 7 }
 0x21c   : > { %s1653_s12 = sld [smem:[#allocation3 + %s1652_s9]]  ;;  %s1659_s8 = sadd.s32 %s1657_s15, %s3202_s25 }
 0x21d   : > { %s2592_s26 = sshll.u32 %s1659_s8, 8  ;;  %s1662_s6 = sand.u32 127, %s1656_s17 }
 0x21e   : > { %s1668_s2 = sadd.s32 93, %s3194_s7  ;;  %s1630_s20 = scalar_lea.vmem [#allocation4], %s1629_s13 }
 0x21f   : > { %v1631_v8 = vld [vmem:[%s1630_s20] sm:$0x1]  ;;  %s1663_s11 = sadd.s32 %s3206_s5, %s1662_s6  ;;  %s1669_s4 = sshra.s32 %s1668_s2, 7 }
 0x220   : > { %s1664_s19 = sadd.s32 %s2592_s26, %s1663_s11  ;;  %s1671_s22 = sadd.s32 %s1669_s4, %s3202_s25  ;;  %v1705_v10 = vrot.slane %v1631_v8, 7 }
 0x221   : > { %s1665_s30 = sld [smem:[#allocation3 + %s1664_s19]]  ;;  %s2593_s18 = sshll.u32 %s1671_s22, 8 }
 0x222   : > { %s1642_s27 = scalar_lea.vmem [#allocation4], %s1641_s24  ;;  %s1674_s16 = sand.u32 127, %s1668_s2 }
 0x223   : > { %v1643_v9 = vld [vmem:[%s1642_s27] sm:$0x1]  ;;  %s1618_s1 = scalar_lea.vmem [#allocation4], %s3607_s29  ;;  %s1675_s17 = sadd.s32 %s3206_s5, %s1674_s16 }
 0x224   : > { %v1619_v11 = vld [vmem:[%s1618_s1] sm:$0x1]  ;;  %s1680_s9 = sadd.s32 94, %s3194_s7  ;;  %s1676_s15 = sadd.s32 %s2593_s18, %s1675_s17  ;;  %v1708_v13 = vrot.slane %v1643_v9, 6 }
 0x225   : > { %s1681_s13 = sshra.s32 %s1680_s9, 7  ;;  %s1654_s8 = scalar_lea.vmem [#allocation4], %s1653_s12  ;;  %v1725_v14 = vsel %vm321_vm0, %v1619_v11, %v1705_v10 }
 0x226   : > { %v1655_v12 = vld [vmem:[%s1654_s8] sm:$0x1]  ;;  %s1677_s26 = sld [smem:[#allocation3 + %s1676_s15]]  ;;  %s1683_s6 = sadd.s32 %s1681_s13, %s3202_s25  ;;  %v1726_v17 = vsel %vm323_vm1, %v1725_v14, %v1708_v13  ;;  %v1986_v13 = vld [vmem:[%s3186_s14 + $0x68] sm:$0xff] }
 0x227   : > { %s2594_s20 = sshll.u32 %s1683_s6, 8  ;;  %s1686_s11 = sand.u32 127, %s1680_s9  ;;  %v1711_v16 = vrot.slane %v1655_v12, 5 }
 0x228   : > { %s1687_s24 = sadd.s32 %s3206_s5, %s1686_s11  ;;  %s1666_s2 = scalar_lea.vmem [#allocation4], %s1665_s30 }
 0x229   : > { %v1667_v15 = vld [vmem:[%s1666_s2] sm:$0x1]  ;;  %s1688_s29 = sadd.s32 %s2594_s20, %s1687_s24  ;;  %s1692_s4 = sadd.s32 95, %s3194_s7  ;;  %v1727_v20 = vsel %vm325_vm2, %v1726_v17, %v1711_v16 }
 0x22a   : > { %s1689_s19 = sld [smem:[#allocation3 + %s1688_s29]]  ;;  %s1693_s12 = sshra.s32 %s1692_s4, 7  ;;  %v1714_v18 = vrot.slane %v1667_v15, 4 }
 0x22b   : > { %s1695_s22 = sadd.s32 %s1693_s12, %s3202_s25  ;;  %s1698_s18 = sand.u32 127, %s1692_s4 }
 0x22c   : > { %s2595_s27 = sshll.u32 %s1695_s22, 8  ;;  %s1678_s16 = scalar_lea.vmem [#allocation4], %s1677_s26  ;;  %v1728_v22 = vsel %vm327_vm3, %v1727_v20, %v1714_v18 }
 0x22d   : > { %v1679_v19 = vld [vmem:[%s1678_s16] sm:$0x1]  ;;  %s1699_s1 = sadd.s32 %s3206_s5, %s1698_s18  ;;  %s1735_s30 = sadd.s32 96, %s3194_s7 }
 0x22e   : > { %s1700_s17 = sadd.s32 %s2595_s27, %s1699_s1  ;;  %s1736_s9 = sshra.s32 %s1735_s30, 7  ;;  %v1717_v21 = vrot.slane %v1679_v19, 3 }
 0x22f   : > { %s1701_s15 = sld [smem:[#allocation3 + %s1700_s17]]  ;;  %s1738_s13 = sadd.s32 %s1736_s9, %s3202_s25 }
 0x230   : > { %s2596_s8 = sshll.u32 %s1738_s13, 8  ;;  %s1690_s6 = scalar_lea.vmem [#allocation4], %s1689_s19  ;;  %v1729_v25 = vsel %vm329_vm4, %v1728_v22, %v1717_v21 }
 0x231   : > { %v1691_v23 = vld [vmem:[%s1690_s6] sm:$0x1]  ;;  %s1741_s26 = sand.u32 127, %s1735_s30  ;;  %s1747_s20 = sadd.s32 97, %s3194_s7 }
 0x232   : > { %v1720_v24 = vrot.slane %v1691_v23, 2  ;;  %s1742_s11 = sadd.s32 %s3206_s5, %s1741_s26  ;;  %s1748_s24 = sshra.s32 %s1747_s20, 7 }
 0x233   : > { %s1743_s2 = sadd.s32 %s2596_s8, %s1742_s11  ;;  %s1750_s29 = sadd.s32 %s1748_s24, %s3202_s25 }
 0x234   : > { %s3643_s4 = sld [smem:[#allocation3 + %s1743_s2]]  ;;  %s2597_s12 = sshll.u32 %s1750_s29, 8  ;;  %v1730_v27 = vsel %vm331_vm5, %v1729_v25, %v1720_v24 }
 0x235   : > { %s1753_s22 = sand.u32 127, %s1747_s20  ;;  %s1702_s19 = scalar_lea.vmem [#allocation4], %s1701_s15 }
 0x236   : > { %v1703_v26 = vld [vmem:[%s1702_s19] sm:$0x1]  ;;  %s1754_s18 = sadd.s32 %s3206_s5, %s1753_s22  ;;  %s1759_s27 = sadd.s32 98, %s3194_s7 }
 0x237   : > { %v1723_v28 = vrot.slane %v1703_v26, 1  ;;  %s1755_s16 = sadd.s32 %s2597_s12, %s1754_s18  ;;  %s1760_s1 = sshra.s32 %s1759_s27, 7 }
 0x238   : > { %s1756_s30 = sld [smem:[#allocation3 + %s1755_s16]]  ;;  %s1762_s17 = sadd.s32 %s1760_s1, %s3202_s25 }
 0x239   : > { %v1731_v30 = vsel %vm333_vm6, %v1730_v27, %v1723_v28  ;;  %s2598_s9 = sshll.u32 %s1762_s17, 8  ;;  %s1765_s15 = sand.u32 127, %s1759_s27 }
 0x23a   : > { %v1733_v31 = vadd.f32 %v1732_v29, %v1731_v30  ;;  %s1766_s13 = sadd.s32 %s3206_s5, %s1765_s15  ;;  %s1771_s6 = sadd.s32 99, %s3194_s7 }
 0x23b   : > { %s1767_s8 = sadd.s32 %s2598_s9, %s1766_s13  ;;  %s1772_s20 = sshra.s32 %s1771_s6, 7 }
 0x23c   : > { %1734 = vst [vmem:[%s3255_s21 + $0x58] sm:$0xff] %v1733_v31  ;;  %s1768_s26 = sld [smem:[#allocation3 + %s1767_s8]]  ;;  %s1774_s11 = sadd.s32 %s1772_s20, %s3202_s25 }
 0x23d   : > { %s1777_s24 = sand.u32 127, %s1771_s6  ;;  %s2599_s2 = sshll.u32 %s1774_s11, 8 }
 0x23e   : > { %s1778_s29 = sadd.s32 %s3206_s5, %s1777_s24  ;;  %s1783_s12 = sadd.s32 100, %s3194_s7 }
 0x23f   : > { %s1779_s22 = sadd.s32 %s2599_s2, %s1778_s29  ;;  %s1784_s19 = sshra.s32 %s1783_s12, 7 }
 0x240   : > { %s1780_s18 = sld [smem:[#allocation3 + %s1779_s22]]  ;;  %s1786_s27 = sadd.s32 %s1784_s19, %s3202_s25 }
 0x241   : > { %s2600_s16 = sshll.u32 %s1786_s27, 8  ;;  %s1789_s1 = sand.u32 127, %s1783_s12 }
 0x242   : > { %s1795_s17 = sadd.s32 101, %s3194_s7  ;;  %s1757_s9 = scalar_lea.vmem [#allocation4], %s1756_s30 }
 0x243   : > { %v1758_v32 = vld [vmem:[%s1757_s9] sm:$0x1]  ;;  %s1790_s15 = sadd.s32 %s3206_s5, %s1789_s1  ;;  %s1796_s13 = sshra.s32 %s1795_s17, 7 }
 0x244   : > { %s1791_s8 = sadd.s32 %s2600_s16, %s1790_s15  ;;  %s1798_s6 = sadd.s32 %s1796_s13, %s3202_s25  ;;  %v1832_v34 = vrot.slane %v1758_v32, 7 }
 0x245   : > { %s1792_s20 = sld [smem:[#allocation3 + %s1791_s8]]  ;;  %s2601_s11 = sshll.u32 %s1798_s6, 8 }
 0x246   : > { %s1769_s24 = scalar_lea.vmem [#allocation4], %s1768_s26  ;;  %s1801_s2 = sand.u32 127, %s1795_s17 }
 0x247   : > { %v1770_v33 = vld [vmem:[%s1769_s24] sm:$0x1]  ;;  %s1745_s29 = scalar_lea.vmem [#allocation4], %s3643_s4  ;;  %s1802_s12 = sadd.s32 %s3206_s5, %s1801_s2 }
 0x248   : > { %v1746_v35 = vld [vmem:[%s1745_s29] sm:$0x1]  ;;  %s1807_s22 = sadd.s32 102, %s3194_s7  ;;  %s1803_s19 = sadd.s32 %s2601_s11, %s1802_s12  ;;  %v1835_v37 = vrot.slane %v1770_v33, 6 }
 0x249   : > { %s1808_s30 = sshra.s32 %s1807_s22, 7  ;;  %s1781_s27 = scalar_lea.vmem [#allocation4], %s1780_s18  ;;  %v1852_v38 = vsel %vm321_vm0, %v1746_v35, %v1832_v34 }
 0x24a   : > { %v1782_v36 = vld [vmem:[%s1781_s27] sm:$0x1]  ;;  %s1804_s16 = sld [smem:[#allocation3 + %s1803_s19]]  ;;  %s1810_s1 = sadd.s32 %s1808_s30, %s3202_s25  ;;  %v1853_v41 = vsel %vm323_vm1, %v1852_v38, %v1835_v37  ;;  %v2113_v37 = vld [vmem:[%s3186_s14 + $0x70] sm:$0xff] }
 0x24b   : > { %s2602_s9 = sshll.u32 %s1810_s1, 8  ;;  %s1813_s15 = sand.u32 127, %s1807_s22  ;;  %v1838_v40 = vrot.slane %v1782_v36, 5 }
 0x24c   : > { %s1814_s26 = sadd.s32 %s3206_s5, %s1813_s15  ;;  %s1793_s17 = scalar_lea.vmem [#allocation4], %s1792_s20 }
 0x24d   : > { %v1794_v39 = vld [vmem:[%s1793_s17] sm:$0x1]  ;;  %s1815_s4 = sadd.s32 %s2602_s9, %s1814_s26  ;;  %s1819_s13 = sadd.s32 103, %s3194_s7  ;;  %v1854_v44 = vsel %vm325_vm2, %v1853_v41, %v1838_v40 }
 0x24e   : > { %s1816_s8 = sld [smem:[#allocation3 + %s1815_s4]]  ;;  %s1820_s18 = sshra.s32 %s1819_s13, 7  ;;  %v1841_v42 = vrot.slane %v1794_v39, 4 }
 0x24f   : > { %s1822_s6 = sadd.s32 %s1820_s18, %s3202_s25  ;;  %s1825_s11 = sand.u32 127, %s1819_s13 }
 0x250   : > { %s2603_s24 = sshll.u32 %s1822_s6, 8  ;;  %s1805_s2 = scalar_lea.vmem [#allocation4], %s1804_s16  ;;  %v1855_v46 = vsel %vm327_vm3, %v1854_v44, %v1841_v42 }
 0x251   : > { %v1806_v43 = vld [vmem:[%s1805_s2] sm:$0x1]  ;;  %s1826_s29 = sadd.s32 %s3206_s5, %s1825_s11  ;;  %s1862_s20 = sadd.s32 104, %s3194_s7 }
 0x252   : > { %s1827_s12 = sadd.s32 %s2603_s24, %s1826_s29  ;;  %s1863_s22 = sshra.s32 %s1862_s20, 7  ;;  %v1844_v45 = vrot.slane %v1806_v43, 3 }
 0x253   : > { %s1828_s19 = sld [smem:[#allocation3 + %s1827_s12]]  ;;  %s1865_s30 = sadd.s32 %s1863_s22, %s3202_s25 }
 0x254   : > { %s2604_s27 = sshll.u32 %s1865_s30, 8  ;;  %s1817_s1 = scalar_lea.vmem [#allocation4], %s1816_s8  ;;  %v1856_v49 = vsel %vm329_vm4, %v1855_v46, %v1844_v45 }
 0x255   : > { %v1818_v47 = vld [vmem:[%s1817_s1] sm:$0x1]  ;;  %s1868_s16 = sand.u32 127, %s1862_s20  ;;  %s1874_s9 = sadd.s32 105, %s3194_s7 }
 0x256   : > { %v1847_v48 = vrot.slane %v1818_v47, 2  ;;  %s1869_s15 = sadd.s32 %s3206_s5, %s1868_s16  ;;  %s1875_s26 = sshra.s32 %s1874_s9, 7 }
 0x257   : > { %s1870_s17 = sadd.s32 %s2604_s27, %s1869_s15  ;;  %s1877_s4 = sadd.s32 %s1875_s26, %s3202_s25 }
 0x258   : > { %s3679_s13 = sld [smem:[#allocation3 + %s1870_s17]]  ;;  %s2605_s18 = sshll.u32 %s1877_s4, 8  ;;  %v1857_v51 = vsel %vm331_vm5, %v1856_v49, %v1847_v48 }
 0x259   : > { %s1880_s6 = sand.u32 127, %s1874_s9  ;;  %s1829_s8 = scalar_lea.vmem [#allocation4], %s1828_s19 }
 0x25a   : > { %v1830_v50 = vld [vmem:[%s1829_s8] sm:$0x1]  ;;  %s1881_s11 = sadd.s32 %s3206_s5, %s1880_s6  ;;  %s1886_s24 = sadd.s32 106, %s3194_s7 }
 0x25b   : > { %v1850_v52 = vrot.slane %v1830_v50, 1  ;;  %s1882_s2 = sadd.s32 %s2605_s18, %s1881_s11  ;;  %s1887_s29 = sshra.s32 %s1886_s24, 7 }
 0x25c   : > { %s1883_s20 = sld [smem:[#allocation3 + %s1882_s2]]  ;;  %s1889_s12 = sadd.s32 %s1887_s29, %s3202_s25 }
 0x25d   : > { %v1858_v54 = vsel %vm333_vm6, %v1857_v51, %v1850_v52  ;;  %s2606_s22 = sshll.u32 %s1889_s12, 8  ;;  %s1892_s19 = sand.u32 127, %s1886_s24 }
 0x25e   : > { %v1860_v55 = vadd.f32 %v1859_v53, %v1858_v54  ;;  %s1893_s30 = sadd.s32 %s3206_s5, %s1892_s19  ;;  %s1898_s1 = sadd.s32 107, %s3194_s7 }
 0x25f   : > { %s1894_s27 = sadd.s32 %s2606_s22, %s1893_s30  ;;  %s1899_s9 = sshra.s32 %s1898_s1, 7 }
 0x260   : > { %1861 = vst [vmem:[%s3255_s21 + $0x60] sm:$0xff] %v1860_v55  ;;  %s1895_s16 = sld [smem:[#allocation3 + %s1894_s27]]  ;;  %s1901_s15 = sadd.s32 %s1899_s9, %s3202_s25 }
 0x261   : > { %s1904_s26 = sand.u32 127, %s1898_s1  ;;  %s2607_s17 = sshll.u32 %s1901_s15, 8 }
 0x262   : > { %s1905_s4 = sadd.s32 %s3206_s5, %s1904_s26  ;;  %s1910_s18 = sadd.s32 108, %s3194_s7 }
 0x263   : > { %s1906_s6 = sadd.s32 %s2607_s17, %s1905_s4  ;;  %s1911_s8 = sshra.s32 %s1910_s18, 7 }
 0x264   : > { %s1907_s11 = sld [smem:[#allocation3 + %s1906_s6]]  ;;  %s1913_s24 = sadd.s32 %s1911_s8, %s3202_s25 }
 0x265   : > { %s2608_s2 = sshll.u32 %s1913_s24, 8  ;;  %s1916_s29 = sand.u32 127, %s1910_s18 }
 0x266   : > { %s1922_s12 = sadd.s32 109, %s3194_s7  ;;  %s1884_s22 = scalar_lea.vmem [#allocation4], %s1883_s20 }
 0x267   : > { %v1885_v56 = vld [vmem:[%s1884_s22] sm:$0x1]  ;;  %s1917_s19 = sadd.s32 %s3206_s5, %s1916_s29  ;;  %s1923_s30 = sshra.s32 %s1922_s12, 7 }
 0x268   : > { %s1918_s27 = sadd.s32 %s2608_s2, %s1917_s19  ;;  %s1925_s1 = sadd.s32 %s1923_s30, %s3202_s25  ;;  %v1959_v58 = vrot.slane %v1885_v56, 7 }
 0x269   : > { %s1919_s9 = sld [smem:[#allocation3 + %s1918_s27]]  ;;  %s2609_s15 = sshll.u32 %s1925_s1, 8 }
 0x26a   : > { %s1896_s26 = scalar_lea.vmem [#allocation4], %s1895_s16  ;;  %s1928_s17 = sand.u32 127, %s1922_s12 }
 0x26b   : > { %v1897_v57 = vld [vmem:[%s1896_s26] sm:$0x1]  ;;  %s1872_s4 = scalar_lea.vmem [#allocation4], %s3679_s13  ;;  %s1929_s18 = sadd.s32 %s3206_s5, %s1928_s17 }
 0x26c   : > { %v1873_v59 = vld [vmem:[%s1872_s4] sm:$0x1]  ;;  %s1934_s6 = sadd.s32 110, %s3194_s7  ;;  %s1930_s8 = sadd.s32 %s2609_s15, %s1929_s18  ;;  %v1962_v61 = vrot.slane %v1897_v57, 6 }
 0x26d   : > { %s1935_s20 = sshra.s32 %s1934_s6, 7  ;;  %s1908_s24 = scalar_lea.vmem [#allocation4], %s1907_s11  ;;  %v1979_v62 = vsel %vm321_vm0, %v1873_v59, %v1959_v58 }
 0x26e   : > { %v1909_v60 = vld [vmem:[%s1908_s24] sm:$0x1]  ;;  %s1931_s2 = sld [smem:[#allocation3 + %s1930_s8]]  ;;  %s1937_s29 = sadd.s32 %s1935_s20, %s3202_s25  ;;  %v1980_v1 = vsel %vm323_vm1, %v1979_v62, %v1962_v61 }
 0x26f   : > { %s2610_s22 = sshll.u32 %s1937_s29, 8  ;;  %s1940_s19 = sand.u32 127, %s1934_s6  ;;  %v1965_v0 = vrot.slane %v1909_v60, 5  ;;  %v2240_v61 = vld [vmem:[%s3186_s14 + $0x78] sm:$0xff] }
 0x270   : > { %s1941_s16 = sadd.s32 %s3206_s5, %s1940_s19  ;;  %s1920_s12 = scalar_lea.vmem [#allocation4], %s1919_s9 }
 0x271   : > { %v1921_v63 = vld [vmem:[%s1920_s12] sm:$0x1]  ;;  %s1942_s13 = sadd.s32 %s2610_s22, %s1941_s16  ;;  %s1946_s30 = sadd.s32 111, %s3194_s7  ;;  %v1981_v4 = vsel %vm325_vm2, %v1980_v1, %v1965_v0 }
 0x272   : > { %s1943_s27 = sld [smem:[#allocation3 + %s1942_s13]]  ;;  %s1947_s11 = sshra.s32 %s1946_s30, 7  ;;  %v1968_v2 = vrot.slane %v1921_v63, 4 }
 0x273   : > { %s1949_s1 = sadd.s32 %s1947_s11, %s3202_s25  ;;  %s1952_s15 = sand.u32 127, %s1946_s30 }
 0x274   : > { %s2611_s26 = sshll.u32 %s1949_s1, 8  ;;  %s1932_s17 = scalar_lea.vmem [#allocation4], %s1931_s2  ;;  %v1982_v6 = vsel %vm327_vm3, %v1981_v4, %v1968_v2 }
 0x275   : > { %v1933_v3 = vld [vmem:[%s1932_s17] sm:$0x1]  ;;  %s1953_s4 = sadd.s32 %s3206_s5, %s1952_s15  ;;  %s1989_s9 = sadd.s32 112, %s3194_s7 }
 0x276   : > { %s1954_s18 = sadd.s32 %s2611_s26, %s1953_s4  ;;  %s1990_s6 = sshra.s32 %s1989_s9, 7  ;;  %v1971_v5 = vrot.slane %v1933_v3, 3 }
 0x277   : > { %s1955_s8 = sld [smem:[#allocation3 + %s1954_s18]]  ;;  %s1992_s20 = sadd.s32 %s1990_s6, %s3202_s25 }
 0x278   : > { %s2612_s24 = sshll.u32 %s1992_s20, 8  ;;  %s1944_s29 = scalar_lea.vmem [#allocation4], %s1943_s27  ;;  %v1983_v9 = vsel %vm329_vm4, %v1982_v6, %v1971_v5 }
 0x279   : > { %v1945_v7 = vld [vmem:[%s1944_s29] sm:$0x1]  ;;  %s1995_s2 = sand.u32 127, %s1989_s9  ;;  %s2001_s22 = sadd.s32 113, %s3194_s7 }
 0x27a   : > { %v1974_v8 = vrot.slane %v1945_v7, 2  ;;  %s1996_s19 = sadd.s32 %s3206_s5, %s1995_s2  ;;  %s2002_s16 = sshra.s32 %s2001_s22, 7 }
 0x27b   : > { %s1997_s12 = sadd.s32 %s2612_s24, %s1996_s19  ;;  %s2004_s13 = sadd.s32 %s2002_s16, %s3202_s25 }
 0x27c   : > { %s3715_s30 = sld [smem:[#allocation3 + %s1997_s12]]  ;;  %s2613_s11 = sshll.u32 %s2004_s13, 8  ;;  %v1984_v11 = vsel %vm331_vm5, %v1983_v9, %v1974_v8 }
 0x27d   : > { %s2007_s1 = sand.u32 127, %s2001_s22  ;;  %s1956_s27 = scalar_lea.vmem [#allocation4], %s1955_s8 }
 0x27e   : > { %v1957_v10 = vld [vmem:[%s1956_s27] sm:$0x1]  ;;  %s2008_s15 = sadd.s32 %s3206_s5, %s2007_s1  ;;  %s2013_s26 = sadd.s32 114, %s3194_s7 }
 0x27f   : > { %v1977_v12 = vrot.slane %v1957_v10, 1  ;;  %s2009_s17 = sadd.s32 %s2613_s11, %s2008_s15  ;;  %s2014_s4 = sshra.s32 %s2013_s26, 7 }
 0x280   : > { %s2010_s9 = sld [smem:[#allocation3 + %s2009_s17]]  ;;  %s2016_s18 = sadd.s32 %s2014_s4, %s3202_s25 }
 0x281   : > { %v1985_v14 = vsel %vm333_vm6, %v1984_v11, %v1977_v12  ;;  %s2614_s6 = sshll.u32 %s2016_s18, 8  ;;  %s2019_s8 = sand.u32 127, %s2013_s26 }
 0x282   : > { %v1987_v15 = vadd.f32 %v1986_v13, %v1985_v14  ;;  %s2020_s20 = sadd.s32 %s3206_s5, %s2019_s8  ;;  %s2025_s29 = sadd.s32 115, %s3194_s7 }
 0x283   : > { %s2021_s24 = sadd.s32 %s2614_s6, %s2020_s20  ;;  %s2026_s22 = sshra.s32 %s2025_s29, 7 }
 0x284   : > { %1988 = vst [vmem:[%s3255_s21 + $0x68] sm:$0xff] %v1987_v15  ;;  %s2022_s2 = sld [smem:[#allocation3 + %s2021_s24]]  ;;  %s2028_s19 = sadd.s32 %s2026_s22, %s3202_s25 }
 0x285   : > { %s2031_s16 = sand.u32 127, %s2025_s29  ;;  %s2615_s12 = sshll.u32 %s2028_s19, 8 }
 0x286   : > { %s2032_s13 = sadd.s32 %s3206_s5, %s2031_s16  ;;  %s2037_s11 = sadd.s32 116, %s3194_s7 }
 0x287   : > { %s2033_s1 = sadd.s32 %s2615_s12, %s2032_s13  ;;  %s2038_s27 = sshra.s32 %s2037_s11, 7 }
 0x288   : > { %s2034_s15 = sld [smem:[#allocation3 + %s2033_s1]]  ;;  %s2040_s26 = sadd.s32 %s2038_s27, %s3202_s25 }
 0x289   : > { %s2616_s17 = sshll.u32 %s2040_s26, 8  ;;  %s2043_s4 = sand.u32 127, %s2037_s11 }
 0x28a   : > { %s2049_s18 = sadd.s32 117, %s3194_s7  ;;  %s2011_s6 = scalar_lea.vmem [#allocation4], %s2010_s9 }
 0x28b   : > { %v2012_v16 = vld [vmem:[%s2011_s6] sm:$0x1]  ;;  %s2044_s8 = sadd.s32 %s3206_s5, %s2043_s4  ;;  %s2050_s20 = sshra.s32 %s2049_s18, 7 }
 0x28c   : > { %s2045_s24 = sadd.s32 %s2616_s17, %s2044_s8  ;;  %s2052_s29 = sadd.s32 %s2050_s20, %s3202_s25  ;;  %v2086_v18 = vrot.slane %v2012_v16, 7 }
 0x28d   : > { %s2046_s22 = sld [smem:[#allocation3 + %s2045_s24]]  ;;  %s2617_s19 = sshll.u32 %s2052_s29, 8 }
 0x28e   : > { %s2023_s16 = scalar_lea.vmem [#allocation4], %s2022_s2  ;;  %s2055_s12 = sand.u32 127, %s2049_s18 }
 0x28f   : > { %v2024_v17 = vld [vmem:[%s2023_s16] sm:$0x1]  ;;  %s1999_s13 = scalar_lea.vmem [#allocation4], %s3715_s30  ;;  %s2056_s11 = sadd.s32 %s3206_s5, %s2055_s12 }
 0x290   : > { %v2000_v19 = vld [vmem:[%s1999_s13] sm:$0x1]  ;;  %s2061_s1 = sadd.s32 118, %s3194_s7  ;;  %s2057_s27 = sadd.s32 %s2617_s19, %s2056_s11  ;;  %v2089_v21 = vrot.slane %v2024_v17, 6 }
 0x291   : > { %s2062_s9 = sshra.s32 %s2061_s1, 7  ;;  %s2035_s26 = scalar_lea.vmem [#allocation4], %s2034_s15  ;;  %v2106_v22 = vsel %vm321_vm0, %v2000_v19, %v2086_v18 }
 0x292   : > { %v2036_v20 = vld [vmem:[%s2035_s26] sm:$0x1]  ;;  %s2058_s17 = sld [smem:[#allocation3 + %s2057_s27]]  ;;  %s2064_s4 = sadd.s32 %s2062_s9, %s3202_s25  ;;  %v2107_v25 = vsel %vm323_vm1, %v2106_v22, %v2089_v21 }
 0x293   : > { %s2618_s6 = sshll.u32 %s2064_s4, 8  ;;  %s2067_s8 = sand.u32 127, %s2061_s1  ;;  %v2092_v24 = vrot.slane %v2036_v20, 5 }
 0x294   : > { %s2068_s2 = sadd.s32 %s3206_s5, %s2067_s8  ;;  %s2047_s18 = scalar_lea.vmem [#allocation4], %s2046_s22 }
 0x295   : > { %v2048_v23 = vld [vmem:[%s2047_s18] sm:$0x1]  ;;  %s2069_s30 = sadd.s32 %s2618_s6, %s2068_s2  ;;  %s2073_s20 = sadd.s32 119, %s3194_s7  ;;  %v2108_v28 = vsel %vm325_vm2, %v2107_v25, %v2092_v24 }
 0x296   : > { %s2070_s24 = sld [smem:[#allocation3 + %s2069_s30]]  ;;  %s2074_s15 = sshra.s32 %s2073_s20, 7  ;;  %v2095_v26 = vrot.slane %v2048_v23, 4 }
 0x297   : > { %s2076_s29 = sadd.s32 %s2074_s15, %s3202_s25  ;;  %s2079_s19 = sand.u32 127, %s2073_s20 }
 0x298   : > { %s2619_s16 = sshll.u32 %s2076_s29, 8  ;;  %s2059_s12 = scalar_lea.vmem [#allocation4], %s2058_s17  ;;  %v2109_v30 = vsel %vm327_vm3, %v2108_v28, %v2095_v26 }
 0x299   : > { %v2060_v27 = vld [vmem:[%s2059_s12] sm:$0x1]  ;;  %s2080_s13 = sadd.s32 %s3206_s5, %s2079_s19  ;;  %s2116_s22 = sadd.s32 120, %s3194_s7 }
 0x29a   : > { %s2081_s11 = sadd.s32 %s2619_s16, %s2080_s13  ;;  %s2117_s1 = sshra.s32 %s2116_s22, 7  ;;  %v2098_v29 = vrot.slane %v2060_v27, 3 }
 0x29b   : > { %s2082_s27 = sld [smem:[#allocation3 + %s2081_s11]]  ;;  %s2119_s9 = sadd.s32 %s2117_s1, %s3202_s25 }
 0x29c   : > { %s2620_s26 = sshll.u32 %s2119_s9, 8  ;;  %s2071_s4 = scalar_lea.vmem [#allocation4], %s2070_s24  ;;  %v2110_v33 = vsel %vm329_vm4, %v2109_v30, %v2098_v29 }
 0x29d   : > { %v2072_v31 = vld [vmem:[%s2071_s4] sm:$0x1]  ;;  %s2122_s17 = sand.u32 127, %s2116_s22  ;;  %s2128_s6 = sadd.s32 121, %s3194_s7 }
 0x29e   : > { %v2101_v32 = vrot.slane %v2072_v31, 2  ;;  %s2123_s8 = sadd.s32 %s3206_s5, %s2122_s17  ;;  %s2129_s2 = sshra.s32 %s2128_s6, 7 }
 0x29f   : > { %s2124_s18 = sadd.s32 %s2620_s26, %s2123_s8  ;;  %s2131_s30 = sadd.s32 %s2129_s2, %s3202_s25 }
 0x2a0   : > { %s3751_s20 = sld [smem:[#allocation3 + %s2124_s18]]  ;;  %s2621_s15 = sshll.u32 %s2131_s30, 8  ;;  %v2111_v35 = vsel %vm331_vm5, %v2110_v33, %v2101_v32 }
 0x2a1   : > { %s2134_s29 = sand.u32 127, %s2128_s6  ;;  %s2083_s24 = scalar_lea.vmem [#allocation4], %s2082_s27 }
 0x2a2   : > { %v2084_v34 = vld [vmem:[%s2083_s24] sm:$0x1]  ;;  %s2135_s19 = sadd.s32 %s3206_s5, %s2134_s29  ;;  %s2140_s16 = sadd.s32 122, %s3194_s7 }
 0x2a3   : > { %v2104_v36 = vrot.slane %v2084_v34, 1  ;;  %s2136_s12 = sadd.s32 %s2621_s15, %s2135_s19  ;;  %s2141_s13 = sshra.s32 %s2140_s16, 7 }
 0x2a4   : > { %s2137_s22 = sld [smem:[#allocation3 + %s2136_s12]]  ;;  %s2143_s11 = sadd.s32 %s2141_s13, %s3202_s25 }
 0x2a5   : > { %v2112_v38 = vsel %vm333_vm6, %v2111_v35, %v2104_v36  ;;  %s2622_s1 = sshll.u32 %s2143_s11, 8  ;;  %s2146_s27 = sand.u32 127, %s2140_s16 }
 0x2a6   : > { %v2114_v39 = vadd.f32 %v2113_v37, %v2112_v38  ;;  %s2147_s9 = sadd.s32 %s3206_s5, %s2146_s27  ;;  %s2152_s4 = sadd.s32 123, %s3194_s7 }
 0x2a7   : > { %s2148_s26 = sadd.s32 %s2622_s1, %s2147_s9  ;;  %s2153_s6 = sshra.s32 %s2152_s4, 7 }
 0x2a8   : > { %2115 = vst [vmem:[%s3255_s21 + $0x70] sm:$0xff] %v2114_v39  ;;  %s2149_s17 = sld [smem:[#allocation3 + %s2148_s26]]  ;;  %s2155_s8 = sadd.s32 %s2153_s6, %s3202_s25 }
 0x2a9   : > { %s2158_s2 = sand.u32 127, %s2152_s4  ;;  %s2623_s18 = sshll.u32 %s2155_s8, 8 }
 0x2aa   : > { %s2159_s30 = sadd.s32 %s3206_s5, %s2158_s2  ;;  %s2164_s15 = sadd.s32 124, %s3194_s7 }
 0x2ab   : > { %s2160_s29 = sadd.s32 %s2623_s18, %s2159_s30  ;;  %s2165_s24 = sshra.s32 %s2164_s15, 7 }
 0x2ac   : > { %s2161_s19 = sld [smem:[#allocation3 + %s2160_s29]]  ;;  %s2167_s16 = sadd.s32 %s2165_s24, %s3202_s25 }
 0x2ad   : > { %s2624_s12 = sshll.u32 %s2167_s16, 8  ;;  %s2170_s13 = sand.u32 127, %s2164_s15 }
 0x2ae   : > { %s2176_s11 = sadd.s32 125, %s3194_s7  ;;  %s2138_s1 = scalar_lea.vmem [#allocation4], %s2137_s22 }
 0x2af   : > { %v2139_v40 = vld [vmem:[%s2138_s1] sm:$0x1]  ;;  %s2171_s27 = sadd.s32 %s3206_s5, %s2170_s13  ;;  %s2177_s9 = sshra.s32 %s2176_s11, 7 }
 0x2b0   : > { %s2172_s26 = sadd.s32 %s2624_s12, %s2171_s27  ;;  %s2179_s4 = sadd.s32 %s2177_s9, %s3202_s25  ;;  %v2213_v42 = vrot.slane %v2139_v40, 7 }
 0x2b1   : > { %s2173_s6 = sld [smem:[#allocation3 + %s2172_s26]]  ;;  %s2625_s8 = sshll.u32 %s2179_s4, 8 }
 0x2b2   : > { %s2150_s2 = scalar_lea.vmem [#allocation4], %s2149_s17  ;;  %s2182_s18 = sand.u32 127, %s2176_s11 }
 0x2b3   : > { %v2151_v41 = vld [vmem:[%s2150_s2] sm:$0x1]  ;;  %s2126_s30 = scalar_lea.vmem [#allocation4], %s3751_s20  ;;  %s2183_s15 = sadd.s32 %s3206_s5, %s2182_s18 }
 0x2b4   : > { %v2127_v43 = vld [vmem:[%s2126_s30] sm:$0x1]  ;;  %s2188_s29 = sadd.s32 126, %s3194_s7  ;;  %s2184_s24 = sadd.s32 %s2625_s8, %s2183_s15  ;;  %v2216_v45 = vrot.slane %v2151_v41, 6 }
 0x2b5   : > { %s2189_s22 = sshra.s32 %s2188_s29, 7  ;;  %s2162_s16 = scalar_lea.vmem [#allocation4], %s2161_s19  ;;  %v2233_v46 = vsel %vm321_vm0, %v2127_v43, %v2213_v42 }
 0x2b6   : > { %v2163_v44 = vld [vmem:[%s2162_s16] sm:$0x1]  ;;  %s2185_s12 = sld [smem:[#allocation3 + %s2184_s24]]  ;;  %s2191_s13 = sadd.s32 %s2189_s22, %s3202_s25  ;;  %v2234_v49 = vsel %vm323_vm1, %v2233_v46, %v2216_v45 }
 0x2b7   : > { %s2626_s1 = sshll.u32 %s2191_s13, 8  ;;  %s2194_s27 = sand.u32 127, %s2188_s29  ;;  %v2219_v48 = vrot.slane %v2163_v44, 5 }
 0x2b8   : > { %s2195_s17 = sadd.s32 %s3206_s5, %s2194_s27  ;;  %s2174_s11 = scalar_lea.vmem [#allocation4], %s2173_s6 }
 0x2b9   : > { %v2175_v47 = vld [vmem:[%s2174_s11] sm:$0x1]  ;;  %s2196_s20 = sadd.s32 %s2626_s1, %s2195_s17  ;;  %s2200_s9 = sadd.s32 127, %s3194_s7  ;;  %v2235_v52 = vsel %vm325_vm2, %v2234_v49, %v2219_v48 }
 0x2ba   : > { %s2197_s26 = sld [smem:[#allocation3 + %s2196_s20]]  ;;  %s2201_s4 = sshra.s32 %s2200_s9, 7  ;;  %v2222_v50 = vrot.slane %v2175_v47, 4 }
 0x2bb   : > { %s2203_s19 = sadd.s32 %s2201_s4, %s3202_s25  ;;  %s2206_s8 = sand.u32 127, %s2200_s9 }
 0x2bc   : > { %s2627_s2 = sshll.u32 %s2203_s19, 8  ;;  %s2186_s18 = scalar_lea.vmem [#allocation4], %s2185_s12  ;;  %v2236_v54 = vsel %vm327_vm3, %v2235_v52, %v2222_v50 }
 0x2bd   : > { %v2187_v51 = vld [vmem:[%s2186_s18] sm:$0x1]  ;;  %s2207_s30 = sadd.s32 %s3206_s5, %s2206_s8  ;;  %s2634_s15 = smul.u32 48, %s2933_s0 }
 0x2be   : > { %s2208_s6 = sadd.s32 %s2627_s2, %s2207_s30  ;;  %v2225_v53 = vrot.slane %v2187_v51, 3  ;;  %s2629_s25 = sshll.u32 %s2937_s28, 4 }
 0x2bf   : > { %s2209_s7 = sld [smem:[#allocation3 + %s2208_s6]]  ;;  %s2256_s24 = sadd.s32 %s2634_s15, %s2629_s25 }
 0x2c0   : > { %s2198_s29 = scalar_lea.vmem [#allocation4], %s2197_s26  ;;  %v2237_v57 = vsel %vm329_vm4, %v2236_v54, %v2225_v53  ;;  %s2259_s22 = sshll.u32 %s3255_s21, 4  ;;  %s3788_s22 = int_to_ptr.vmem [resolvable:$true] %s2259_s22 }
 0x2c1   : > { %v2199_v55 = vld [vmem:[%s2198_s29] sm:$0x1]  ;;  %s2630_s16 = sshll.u32 %s2256_s24, 7  ;;  %s3911_s13 = sand.u32 1, %s2913_s23  }
 0x2c2   : > { %v2228_v56 = vrot.slane %v2199_v55, 2  ;;  %s3793_s12 = scalar_lea.hbm %s3862_s3, %s2630_s16  ;;  %s3798_s1 = scalar_lea.sflag [#allocation6], %s3911_s13 }
 0x2c3   : > { %s2821_s27 = scalar_lea.vmem %s3788_s22, 2048  ;;  %p3912_p10 = scmp.ne.s32.totalorder %s3893_s10, 0 }
 0x2c4   : > { %v2238_v59 = vsel %vm331_vm5, %v2237_v57, %v2228_v56  ;;  %p2822_p7 = scmp.ne.s32.totalorder %s3788_s22, %s2821_s27  ;;  %s2956_s14 = smov [#allocation9]  }
 0x2c5   : > { %s2210_s5 = scalar_lea.vmem [#allocation4], %s2209_s7  ;;  %s2825_s17 = sshll.u32 %s2956_s14, 4  ;;  %s2826_s17 = int_to_ptr.vmem [resolvable:$false] %s2825_s17 }
 0x2c6   : > { %v2211_v58 = vld [vmem:[%s2210_s5] sm:$0x1]  ;;  %p2823_p12 = pnand %p2822_p7, %p3912_p10  ;;  %s2827_s11 = scalar_lea.vmem %s2826_s17, 4096 }
 0x2c7   : > { %v2231_v60 = vrot.slane %v2211_v58, 1  ;;  %p2828_p2 = scmp.lt.s32.totalorder %s3788_s22, %s2826_s17  ;;  %p2829_p3 = scmp.lt.s32.totalorder %s2827_s11, %s2821_s27 }
 0x2c8   : > { %p2824_p0 = pneg %p2823_p12 }
 0x2c9   : > { %v2239_v62 = vsel %vm333_vm6, %v2238_v59, %v2231_v60  ;;  %p2830_p5 = por %p2829_p3, %p2828_p2 }
 0x2ca   : > { %v2241_v63 = vadd.f32 %v2240_v61, %v2239_v62 }
 0x2cb   : > { %p2831_p8 = pnand %p2830_p5, %p2824_p0 }
 0x2cc   : > { %2242 = vst [vmem:[%s3255_s21 + $0x78] sm:$0xff] %v2241_v63 }
 0x2cd   : > { %2834 = shalt.err (!%p2831_p8)
}
 0x2ce   : > { %s2835_s21 = scalar_lea.hbm %s3793_s12, 2048  ;;  %s2839_s26 = scalar_lea.hbm %s3862_s3, 12288 }
 0x2cf   : > { %p2836_p11 = scmp.ne.s32.totalorder %s3793_s12, %s2835_s21  ;;  %p2840_p9 = scmp.lt.u32.totalorder %s3793_s12, %s3862_s3 }
 0x2d0   : > { %p2841_p13 = scmp.lt.u32.totalorder %s2839_s26, %s2835_s21  ;;  %p2843_p7 = scmp.lt.u32.totalorder %s2835_s21, %s3793_s12 }
 0x2d1   : > { %p2837_p1 = pnand %p2836_p11, %p3912_p10 }
 0x2d2   : > { %p2842_p6 = por %p2841_p13, %p2840_p9 }
 0x2d3   : > { %p2838_p4 = pneg %p2837_p1 }
 0x2d4   : > { %p2844_p12 = por %p2843_p7, %p2842_p6 }
 0x2d6   : > { %p2845_p0 = pnand %p2844_p12, %p2838_p4 }
 0x2d8   : > { %2848 = shalt.err (!%p2845_p0)
}
 0x2d9   : > { %s2957_s8 = smov 128   ;;  %s2958_s2 = smov 8  }
 0x2da   : > { %2641 = dma.vmem_to_hbm [thread:$0]  (%p3912_p10), %s3788_s22, 2048, %s3793_s12, %s3798_s1, %s2957_s8, %s2957_s8, %s2958_s2  }
 0x2db PF: > { %s3913_s18 = sld [smem:[#allocation20_spill]]  ;;  %s3914_s30 = sld [smem:[#allocation14_spill]] }
 0x2dc   : > { %s3915_s6 = sld [smem:[#allocation21_spill]] }
 0x2e1   : > { %p2658_p2 = scmp.ge.s32.totalorder %s3913_s18, 2  ;;  %s2274_s7 = sand.u32 1, %s3914_s30  }
 0x2e2   : > { %p3916_p3 = scmp.ne.s32.totalorder %s3915_s6, 0  ;;  %s2275_s15 = scalar_lea.sflag [#allocation6], %s2274_s7 }
 0x2e4   : > { %p2652_p5 = pnand %p2658_p2, %p3916_p3 }
 0x2e6   : > { %2904 = dma.done.wait (!%p2652_p5), %s2275_s15, 2048  }
 0x2e7   : > { %2906 = vsyncadd (!%p2652_p5), %s2275_s15, 4294965248  ;;  %s24_s4 = sadd.s32 1, %s3913_s18   ;;  %s3917_s29 = sld [smem:[#allocation15_spill]] }
 0x2e8   : > { %p21_p8 = scmp.ge.s32.totalorder %s24_s4, 8   ;;  %s3918_s24 = sld [smem:[#allocation25_spill]] }
 0x2e9   : > { %s3919_s25 = sld [smem:[#allocation16_spill]]  ;;  %s3920_s26 = sld [smem:[#allocation17_spill]] }
 0x2ea   : > { %s3921_s27 = sld [smem:[#allocation24_spill]]  ;;  %s3922_s0 = sld [smem:[#allocation18_spill]] }
 0x2eb   : > { %s3923_s28 = sld [smem:[#allocation19_spill]]  ;;  %s3924_s10 = sld [smem:[#allocation22_spill]] }
 0x2ec   : > { %s3925_s30 = sld [smem:[#allocation23_spill]]  ;;  %s3926_s22 = smov %s2913_s23 }
 0x2ed   : > { %s3927_s23 = smov %s3917_s29  ;;  %23 = sbr.rel (!%p21_p8) target bundleno = 23 (0x17), region = 206 }
 0x2f1   : > { %s3928_s29 = smov %s3924_s10 }
 0x2f4   :  { %2280 = vsyncpa [#allocation5], 1 }
 0x2f5   :  { %2282 = vsyncpa [#allocation5 + $0x1], 1 }
 0x2f6   :  { %2283 = vsyncpa [#allocation8], 1 }
 0x2f7   :  { %2285 = vsyncpa [#allocation8 + $0x1], 1 }
 0x2f8   :  { %2286 = vsyncpa [#allocation6], 1 }
 0x2f9   :  { %2288 = vsyncpa [#allocation6 + $0x1], 1 }

</bundles_post_ra>
